<compile_context>
chip_gen: v7x
topology: tpu7x:2x2x1
jax: 0.10.0
libtpu: 0.0.40
codegen_flags: <defaults>
</compile_context>

<pallas_src>
import jax
import jax.numpy as jnp
from jax.experimental import pallas as pl
from jax.experimental.pallas import tpu as pltpu


# ----------------------------------------------------------------------------
# Fused DownScale kernel (one batch element per grid step, everything in VMEM)
# ----------------------------------------------------------------------------
def _downscale_kernel(alpha_ref, x_ref,
                      w1_ref, b1_ref, w2_ref, b2_ref,
                      w3_ref, b3_ref, w4_ref, b4_ref,
                      o_ref,
                      p1_ref, p2_ref, p3_ref, p4_ref, s1_ref, s2_ref):
    alpha = alpha_ref[...]                          # (1, 1, 1), broadcastable

    def prelu(v):
        # PReLU with a single shared parameter (PyTorch default).
        return jnp.maximum(v, 0.0) + alpha * jnp.minimum(v, 0.0)

    def fill_patches(dst_ref, act):
        # Pack the nine 3x3 taps of `act` (with the zero conv halo) along the
        # channel axis of `dst_ref`, so the conv is a single matmul with
        # contraction K = 9*Cin.
        H, W, cin = act.shape
        zrow = jnp.zeros((1, W, cin), jnp.float32)
        zcol = jnp.zeros((H, 1, cin), jnp.float32)
        for dy in range(3):
            for dx in range(3):
                lo = (dy * 3 + dx) * cin
                hi = lo + cin
                oy, ox = dy - 1, dx - 1
                nr, nc = H - abs(oy), W - abs(ox)
                r0, sr = max(0, -oy), max(0, oy)
                c0, sc = max(0, -ox), max(0, ox)
                dst_ref[r0:r0 + nr, c0:c0 + nc, lo:hi] = \
                    act[sr:sr + nr, sc:sc + nc, :]
                # Zero only the 1-wide halo strips of this tap slab.
                if oy == -1:
                    dst_ref[0:1, :, lo:hi] = zrow
                if oy == 1:
                    dst_ref[H - 1:H, :, lo:hi] = zrow
                if ox == -1:
                    dst_ref[:, 0:1, lo:hi] = zcol
                if ox == 1:
                    dst_ref[:, W - 1:W, lo:hi] = zcol

    def conv3x3(patch_ref, act, w_ref, b_ref):
        fill_patches(patch_ref, act)
        out = jnp.einsum('hwk,ko->hwo', patch_ref[...], w_ref[...],
                         preferred_element_type=jnp.float32)
        return out + b_ref[...]

    def maxpool2x2(act, s_ref):
        # act: (H, W, C) -> (H//2, W//2, C).
        # Row pairs: trivial outer-dim split.  Column pairs: re-pack through
        # `s_ref` of shape (H//2, 2, W//2, C) with static slab stores.
        H, W, C = act.shape
        rows = act.reshape(H // 2, 2, W, C)
        yh = jnp.maximum(rows[:, 0], rows[:, 1])          # (H//2, W, C)
        for j in range(W // 2):
            s_ref[:, :, j, :] = yh[:, 2 * j:2 * j + 2, :]
        return jnp.maximum(s_ref[:, 0, :, :], s_ref[:, 1, :, :])

    h = x_ref[0].astype(jnp.float32)                       # (H,   W,   1)
    h = prelu(conv3x3(p1_ref, h, w1_ref, b1_ref))          # (H,   W,   32)
    h = prelu(conv3x3(p2_ref, h, w2_ref, b2_ref))          # (H,   W,   64)
    h = maxpool2x2(h, s1_ref)                              # (H/2, W/2, 64)
    h = prelu(conv3x3(p3_ref, h, w3_ref, b3_ref))          # (H/2, W/2, 32)
    h = maxpool2x2(h, s2_ref)                              # (H/4, W/4, 32)
    h = conv3x3(p4_ref, h, w4_ref, b4_ref)                 # (H/4, W/4, 1)
    o_ref[0] = h.astype(o_ref.dtype)


def _downscale_pallas(x_nhwc, alpha, w1, b1, w2, b2, w3, b3, w4, b4):
    N, H, W, _ = x_nhwc.shape
    H2, W2, H4, W4 = H // 2, W // 2, H // 4, W // 4
    C1, C2, C3, C4 = w1.shape[1], w2.shape[1], w3.shape[1], w4.shape[1]

    def full(arr):
        shape = arr.shape
        return pl.BlockSpec(shape, lambda n: (0,) * len(shape))

    return pl.pallas_call(
        _downscale_kernel,
        out_shape=jax.ShapeDtypeStruct((N, H4, W4, C4), jnp.float32),
        grid=(N,),
        in_specs=[
            full(alpha),                                      # PReLU alpha
            pl.BlockSpec((1, H, W, 1), lambda n: (n, 0, 0, 0)),
            full(w1), full(b1), full(w2), full(b2),
            full(w3), full(b3), full(w4), full(b4),
        ],
        out_specs=pl.BlockSpec((1, H4, W4, C4), lambda n: (n, 0, 0, 0)),
        scratch_shapes=[
            pltpu.VMEM((H, W, 9 * 1), jnp.float32),      # conv1 patches
            pltpu.VMEM((H, W, 9 * C1), jnp.float32),     # conv2 patches
            pltpu.VMEM((H2, W2, 9 * C2), jnp.float32),   # conv3 patches
            pltpu.VMEM((H4, W4, 9 * C3), jnp.float32),   # conv4 patches
            pltpu.VMEM((H2, 2, W2, C2), jnp.float32),    # pool-1 column re-pack
            pltpu.VMEM((H4, 2, W4, C3), jnp.float32),    # pool-2 column re-pack
        ],
        compiler_params=pltpu.CompilerParams(
            dimension_semantics=("parallel",),
            vmem_limit_bytes=32 * 1024 * 1024,
        ),
    )(alpha, x_nhwc, w1, b1, w2, b2, w3, b3, w4, b4)


# ----------------------------------------------------------------------------
# Parameters / wrapper / pure-JAX reference
# ----------------------------------------------------------------------------
def make_downscale_params(key):
    def conv_param(kw, kb, cin, cout):
        # PyTorch-style Conv2d init (uniform, fan_in = 9*cin), bias=True.
        bound = 1.0 / jnp.sqrt(jnp.float32(9 * cin))
        w = jax.random.uniform(kw, (cout, cin, 3, 3), jnp.float32, -bound, bound)
        b = jax.random.uniform(kb, (cout,), jnp.float32, -bound, bound)
        # (Cout,Cin,kh,kw) -> (kh,kw,Cin,Cout) -> (9*Cin, Cout); row index
        # (kh*3 + kw)*Cin + cin matches the kernel's patch packing.
        w_mat = jnp.transpose(w, (2, 3, 1, 0)).reshape(9 * cin, cout)
        return w_mat, b.reshape(1, 1, cout)

    ks = jax.random.split(key, 8)
    w1, b1 = conv_param(ks[0], ks[1], 1, 32)
    w2, b2 = conv_param(ks[2], ks[3], 32, 64)
    w3, b3 = conv_param(ks[4], ks[5], 64, 32)
    w4, b4 = conv_param(ks[6], ks[7], 32, 1)
    alpha = jnp.full((1, 1, 1), 0.25, jnp.float32)      # PReLU default init
    return dict(alpha=alpha, w1=w1, b1=b1, w2=w2, b2=b2,
                w3=w3, b3=b3, w4=w4, b4=b4)


@jax.jit
def downscale_forward(x, params):
    """DownScale.forward with NCHW input/output (PyTorch convention)."""
    N, C, H, W = x.shape
    assert C == 1
    x_nhwc = x.reshape(N, H, W, 1).astype(jnp.float32)   # free: single channel
    out_nhwc = _downscale_pallas(
        x_nhwc, params["alpha"],
        params["w1"], params["b1"], params["w2"], params["b2"],
        params["w3"], params["b3"], params["w4"], params["b4"])
    return out_nhwc.reshape(N, 1, H // 4, W // 4)          # free: single channel


def downscale_reference(x, params):
    a = params["alpha"].reshape(())

    def prelu(v):
        return jnp.where(v >= 0, v, a * v)

    def conv(v, w_mat, b):
        cin = w_mat.shape[0] // 9
        cout = w_mat.shape[1]
        w_hwio = w_mat.reshape(3, 3, cin, cout)
        out = jax.lax.conv_general_dilated(
            v, w_hwio, window_strides=(1, 1), padding='SAME',
            dimension_numbers=('NHWC', 'HWIO', 'NHWC'),
            precision=jax.lax.Precision.HIGHEST)
        return out + b.reshape(1, 1, 1, cout)

    def pool(v):
        n, h, w, c = v.shape
        return v.reshape(n, h // 2, 2, w // 2, 2, c).max(axis=(2, 4))

    N, _, H, W = x.shape
    v = x.reshape(N, H, W, 1).astype(jnp.float32)
    v = prelu(conv(v, params["w1"], params["b1"]))
    v = prelu(conv(v, params["w2"], params["b2"]))
    v = pool(v)
    v = prelu(conv(v, params["w3"], params["b3"]))
    v = pool(v)
    v = conv(v, params["w4"], params["b4"])
    return v.reshape(N, 1, H // 4, W // 4)


if __name__ == "__main__":
    key = jax.random.PRNGKey(0)
    k_x, k_p = jax.random.split(key)

    N, H, W = 2, 16, 16
    x = jax.random.normal(k_x, (N, 1, H, W), jnp.float32)
    params = make_downscale_params(k_p)

    out = downscale_forward(x, params)
    jax.block_until_ready(out)
    assert out.shape == (N, 1, H // 4, W // 4), out.shape

    ref = downscale_reference(x, params)
    max_err = float(jnp.max(jnp.abs(out - ref)))
    assert jnp.allclose(out, ref, atol=5e-2, rtol=5e-2), max_err

    print("KERNEL_OK")
</pallas_src>

<mosaic_0001>
module attributes {stable_mosaic.version = 11 : i64} {
  func.func @_downscale_kernel(%arg0: i32, %arg1: memref<1x1x1xf32, #tpu.memory_space<vmem>>, %arg2: memref<1x16x16x1xf32, #tpu.memory_space<vmem>>, %arg3: memref<9x32xf32, #tpu.memory_space<vmem>>, %arg4: memref<1x1x32xf32, #tpu.memory_space<vmem>>, %arg5: memref<288x64xf32, #tpu.memory_space<vmem>>, %arg6: memref<1x1x64xf32, #tpu.memory_space<vmem>>, %arg7: memref<576x32xf32, #tpu.memory_space<vmem>>, %arg8: memref<1x1x32xf32, #tpu.memory_space<vmem>>, %arg9: memref<288x1xf32, #tpu.memory_space<vmem>>, %arg10: memref<1x1x1xf32, #tpu.memory_space<vmem>>, %arg11: memref<1x4x4x1xf32, #tpu.memory_space<vmem>>, %arg12: memref<16x16x9xf32, #tpu.memory_space<vmem>>, %arg13: memref<16x16x288xf32, #tpu.memory_space<vmem>>, %arg14: memref<8x8x576xf32, #tpu.memory_space<vmem>>, %arg15: memref<4x4x288xf32, #tpu.memory_space<vmem>>, %arg16: memref<8x2x8x64xf32, #tpu.memory_space<vmem>>, %arg17: memref<4x2x4x32xf32, #tpu.memory_space<vmem>>) attributes {dimension_semantics = [#tpu.dimension_semantics<parallel>], iteration_bounds = array<i64: 2>, scalar_prefetch = 0 : i64, scratch_operands = 6 : i64, tpu.core_type = #tpu.core_type<tc>, window_params = [{pipeline_mode = #tpu.pipeline_mode<synchronous>, transform_indices = @transform_0, window_bounds = array<i64: 1, 1, 1>}, {transform_indices = @transform_1, window_bounds = array<i64: 1, 16, 16, 1>}, {pipeline_mode = #tpu.pipeline_mode<synchronous>, transform_indices = @transform_2, window_bounds = array<i64: 9, 32>}, {pipeline_mode = #tpu.pipeline_mode<synchronous>, transform_indices = @transform_3, window_bounds = array<i64: 1, 1, 32>}, {pipeline_mode = #tpu.pipeline_mode<synchronous>, transform_indices = @transform_4, window_bounds = array<i64: 288, 64>}, {pipeline_mode = #tpu.pipeline_mode<synchronous>, transform_indices = @transform_5, window_bounds = array<i64: 1, 1, 64>}, {pipeline_mode = #tpu.pipeline_mode<synchronous>, transform_indices = @transform_6, window_bounds = array<i64: 576, 32>}, {pipeline_mode = #tpu.pipeline_mode<synchronous>, transform_indices = @transform_7, window_bounds = array<i64: 1, 1, 32>}, {pipeline_mode = #tpu.pipeline_mode<synchronous>, transform_indices = @transform_8, window_bounds = array<i64: 288, 1>}, {pipeline_mode = #tpu.pipeline_mode<synchronous>, transform_indices = @transform_9, window_bounds = array<i64: 1, 1, 1>}, {transform_indices = @transform_10, window_bounds = array<i64: 1, 4, 4, 1>}]} {
    %c0 = arith.constant 0 : index
    %c0_0 = arith.constant 0 : index
    %c0_1 = arith.constant 0 : index
    %0 = vector.load %arg1[%c0, %c0_0, %c0_1] : memref<1x1x1xf32, #tpu.memory_space<vmem>>, vector<1x1x1xf32>
    %c0_2 = arith.constant 0 : index
    %c0_3 = arith.constant 0 : index
    %c0_4 = arith.constant 0 : index
    %c0_5 = arith.constant 0 : index
    %1 = vector.load %arg2[%c0_2, %c0_3, %c0_4, %c0_5] : memref<1x16x16x1xf32, #tpu.memory_space<vmem>>, vector<1x16x16x1xf32>
    %2 = vector.shape_cast %1 : vector<1x16x16x1xf32> to vector<16x16x1xf32>
    %cst = arith.constant 0.000000e+00 : f32
    %3 = vector.broadcast %cst : f32 to vector<1x16x1xf32>
    %cst_6 = arith.constant 0.000000e+00 : f32
    %4 = vector.broadcast %cst_6 : f32 to vector<16x1x1xf32>
    %5 = vector.extract_strided_slice %2 {offsets = [0, 0, 0], sizes = [15, 15, 1], strides = [1, 1, 1]} : vector<16x16x1xf32> to vector<15x15x1xf32>
    %c1 = arith.constant 1 : index
    %c1_7 = arith.constant 1 : index
    %c0_8 = arith.constant 0 : index
    %6 = vector.load %arg12[%c1, %c1_7, %c0_8] : memref<16x16x9xf32, #tpu.memory_space<vmem>>, vector<15x15x1xf32>
    tpu.vector_store %arg12[%c1, %c1_7, %c0_8], %5 {strides = array<i32>} : memref<16x16x9xf32, #tpu.memory_space<vmem>>, vector<15x15x1xf32>,
    %c0_9 = arith.constant 0 : index
    %c0_10 = arith.constant 0 : index
    %c0_11 = arith.constant 0 : index
    %7 = vector.load %arg12[%c0_9, %c0_10, %c0_11] : memref<16x16x9xf32, #tpu.memory_space<vmem>>, vector<1x16x1xf32>
    tpu.vector_store %arg12[%c0_9, %c0_10, %c0_11], %3 {strides = array<i32>} : memref<16x16x9xf32, #tpu.memory_space<vmem>>, vector<1x16x1xf32>,
    %c0_12 = arith.constant 0 : index
    %c0_13 = arith.constant 0 : index
    %c0_14 = arith.constant 0 : index
    %8 = vector.load %arg12[%c0_12, %c0_13, %c0_14] : memref<16x16x9xf32, #tpu.memory_space<vmem>>, vector<16x1x1xf32>
    tpu.vector_store %arg12[%c0_12, %c0_13, %c0_14], %4 {strides = array<i32>} : memref<16x16x9xf32, #tpu.memory_space<vmem>>, vector<16x1x1xf32>,
    %9 = vector.extract_strided_slice %2 {offsets = [0, 0, 0], sizes = [15, 16, 1], strides = [1, 1, 1]} : vector<16x16x1xf32> to vector<15x16x1xf32>
    %c1_15 = arith.constant 1 : index
    %c0_16 = arith.constant 0 : index
    %c1_17 = arith.constant 1 : index
    %10 = vector.load %arg12[%c1_15, %c0_16, %c1_17] : memref<16x16x9xf32, #tpu.memory_space<vmem>>, vector<15x16x1xf32>
    tpu.vector_store %arg12[%c1_15, %c0_16, %c1_17], %9 {strides = array<i32>} : memref<16x16x9xf32, #tpu.memory_space<vmem>>, vector<15x16x1xf32>,
    %c0_18 = arith.constant 0 : index
    %c0_19 = arith.constant 0 : index
    %c1_20 = arith.constant 1 : index
    %11 = vector.load %arg12[%c0_18, %c0_19, %c1_20] : memref<16x16x9xf32, #tpu.memory_space<vmem>>, vector<1x16x1xf32>
    tpu.vector_store %arg12[%c0_18, %c0_19, %c1_20], %3 {strides = array<i32>} : memref<16x16x9xf32, #tpu.memory_space<vmem>>, vector<1x16x1xf32>,
    %12 = vector.extract_strided_slice %2 {offsets = [0, 1, 0], sizes = [15, 15, 1], strides = [1, 1, 1]} : vector<16x16x1xf32> to vector<15x15x1xf32>
    %c1_21 = arith.constant 1 : index
    %c0_22 = arith.constant 0 : index
    %c2 = arith.constant 2 : index
    %13 = vector.load %arg12[%c1_21, %c0_22, %c2] : memref<16x16x9xf32, #tpu.memory_space<vmem>>, vector<15x15x1xf32>
    tpu.vector_store %arg12[%c1_21, %c0_22, %c2], %12 {strides = array<i32>} : memref<16x16x9xf32, #tpu.memory_space<vmem>>, vector<15x15x1xf32>,
    %c0_23 = arith.constant 0 : index
    %c0_24 = arith.constant 0 : index
    %c2_25 = arith.constant 2 : index
    %14 = vector.load %arg12[%c0_23, %c0_24, %c2_25] : memref<16x16x9xf32, #tpu.memory_space<vmem>>, vector<1x16x1xf32>
    tpu.vector_store %arg12[%c0_23, %c0_24, %c2_25], %3 {strides = array<i32>} : memref<16x16x9xf32, #tpu.memory_space<vmem>>, vector<1x16x1xf32>,
    %c0_26 = arith.constant 0 : index
    %c15 = arith.constant 15 : index
    %c2_27 = arith.constant 2 : index
    %15 = vector.load %arg12[%c0_26, %c15, %c2_27] : memref<16x16x9xf32, #tpu.memory_space<vmem>>, vector<16x1x1xf32>
    tpu.vector_store %arg12[%c0_26, %c15, %c2_27], %4 {strides = array<i32>} : memref<16x16x9xf32, #tpu.memory_space<vmem>>, vector<16x1x1xf32>,
    %16 = vector.extract_strided_slice %2 {offsets = [0, 0, 0], sizes = [16, 15, 1], strides = [1, 1, 1]} : vector<16x16x1xf32> to vector<16x15x1xf32>
    %c0_28 = arith.constant 0 : index
    %c1_29 = arith.constant 1 : index
    %c3 = arith.constant 3 : index
    %17 = vector.load %arg12[%c0_28, %c1_29, %c3] : memref<16x16x9xf32, #tpu.memory_space<vmem>>, vector<16x15x1xf32>
    tpu.vector_store %arg12[%c0_28, %c1_29, %c3], %16 {strides = array<i32>} : memref<16x16x9xf32, #tpu.memory_space<vmem>>, vector<16x15x1xf32>,
    %c0_30 = arith.constant 0 : index
    %c0_31 = arith.constant 0 : index
    %c3_32 = arith.constant 3 : index
    %18 = vector.load %arg12[%c0_30, %c0_31, %c3_32] : memref<16x16x9xf32, #tpu.memory_space<vmem>>, vector<16x1x1xf32>
    tpu.vector_store %arg12[%c0_30, %c0_31, %c3_32], %4 {strides = array<i32>} : memref<16x16x9xf32, #tpu.memory_space<vmem>>, vector<16x1x1xf32>,
    %c0_33 = arith.constant 0 : index
    %c0_34 = arith.constant 0 : index
    %c4 = arith.constant 4 : index
    %19 = vector.load %arg12[%c0_33, %c0_34, %c4] : memref<16x16x9xf32, #tpu.memory_space<vmem>>, vector<16x16x1xf32>
    tpu.vector_store %arg12[%c0_33, %c0_34, %c4], %2 {strides = array<i32>} : memref<16x16x9xf32, #tpu.memory_space<vmem>>, vector<16x16x1xf32>,
    %20 = vector.extract_strided_slice %2 {offsets = [0, 1, 0], sizes = [16, 15, 1], strides = [1, 1, 1]} : vector<16x16x1xf32> to vector<16x15x1xf32>
    %c0_35 = arith.constant 0 : index
    %c0_36 = arith.constant 0 : index
    %c5 = arith.constant 5 : index
    %21 = vector.load %arg12[%c0_35, %c0_36, %c5] : memref<16x16x9xf32, #tpu.memory_space<vmem>>, vector<16x15x1xf32>
    tpu.vector_store %arg12[%c0_35, %c0_36, %c5], %20 {strides = array<i32>} : memref<16x16x9xf32, #tpu.memory_space<vmem>>, vector<16x15x1xf32>,
    %c0_37 = arith.constant 0 : index
    %c15_38 = arith.constant 15 : index
    %c5_39 = arith.constant 5 : index
    %22 = vector.load %arg12[%c0_37, %c15_38, %c5_39] : memref<16x16x9xf32, #tpu.memory_space<vmem>>, vector<16x1x1xf32>
    tpu.vector_store %arg12[%c0_37, %c15_38, %c5_39], %4 {strides = array<i32>} : memref<16x16x9xf32, #tpu.memory_space<vmem>>, vector<16x1x1xf32>,
    %23 = vector.extract_strided_slice %2 {offsets = [1, 0, 0], sizes = [15, 15, 1], strides = [1, 1, 1]} : vector<16x16x1xf32> to vector<15x15x1xf32>
    %c0_40 = arith.constant 0 : index
    %c1_41 = arith.constant 1 : index
    %c6 = arith.constant 6 : index
    %24 = vector.load %arg12[%c0_40, %c1_41, %c6] : memref<16x16x9xf32, #tpu.memory_space<vmem>>, vector<15x15x1xf32>
    tpu.vector_store %arg12[%c0_40, %c1_41, %c6], %23 {strides = array<i32>} : memref<16x16x9xf32, #tpu.memory_space<vmem>>, vector<15x15x1xf32>,
    %c15_42 = arith.constant 15 : index
    %c0_43 = arith.constant 0 : index
    %c6_44 = arith.constant 6 : index
    %25 = vector.load %arg12[%c15_42, %c0_43, %c6_44] : memref<16x16x9xf32, #tpu.memory_space<vmem>>, vector<1x16x1xf32>
    tpu.vector_store %arg12[%c15_42, %c0_43, %c6_44], %3 {strides = array<i32>} : memref<16x16x9xf32, #tpu.memory_space<vmem>>, vector<1x16x1xf32>,
    %c0_45 = arith.constant 0 : index
    %c0_46 = arith.constant 0 : index
    %c6_47 = arith.constant 6 : index
    %26 = vector.load %arg12[%c0_45, %c0_46, %c6_47] : memref<16x16x9xf32, #tpu.memory_space<vmem>>, vector<16x1x1xf32>
    tpu.vector_store %arg12[%c0_45, %c0_46, %c6_47], %4 {strides = array<i32>} : memref<16x16x9xf32, #tpu.memory_space<vmem>>, vector<16x1x1xf32>,
    %27 = vector.extract_strided_slice %2 {offsets = [1, 0, 0], sizes = [15, 16, 1], strides = [1, 1, 1]} : vector<16x16x1xf32> to vector<15x16x1xf32>
    %c0_48 = arith.constant 0 : index
    %c0_49 = arith.constant 0 : index
    %c7 = arith.constant 7 : index
    %28 = vector.load %arg12[%c0_48, %c0_49, %c7] : memref<16x16x9xf32, #tpu.memory_space<vmem>>, vector<15x16x1xf32>
    tpu.vector_store %arg12[%c0_48, %c0_49, %c7], %27 {strides = array<i32>} : memref<16x16x9xf32, #tpu.memory_space<vmem>>, vector<15x16x1xf32>,
    %c15_50 = arith.constant 15 : index
    %c0_51 = arith.constant 0 : index
    %c7_52 = arith.constant 7 : index
    %29 = vector.load %arg12[%c15_50, %c0_51, %c7_52] : memref<16x16x9xf32, #tpu.memory_space<vmem>>, vector<1x16x1xf32>
    tpu.vector_store %arg12[%c15_50, %c0_51, %c7_52], %3 {strides = array<i32>} : memref<16x16x9xf32, #tpu.memory_space<vmem>>, vector<1x16x1xf32>,
    %30 = vector.extract_strided_slice %2 {offsets = [1, 1, 0], sizes = [15, 15, 1], strides = [1, 1, 1]} : vector<16x16x1xf32> to vector<15x15x1xf32>
    %c0_53 = arith.constant 0 : index
    %c0_54 = arith.constant 0 : index
    %c8 = arith.constant 8 : index
    %31 = vector.load %arg12[%c0_53, %c0_54, %c8] : memref<16x16x9xf32, #tpu.memory_space<vmem>>, vector<15x15x1xf32>
    tpu.vector_store %arg12[%c0_53, %c0_54, %c8], %30 {strides = array<i32>} : memref<16x16x9xf32, #tpu.memory_space<vmem>>, vector<15x15x1xf32>,
    %c15_55 = arith.constant 15 : index
    %c0_56 = arith.constant 0 : index
    %c8_57 = arith.constant 8 : index
    %32 = vector.load %arg12[%c15_55, %c0_56, %c8_57] : memref<16x16x9xf32, #tpu.memory_space<vmem>>, vector<1x16x1xf32>
    tpu.vector_store %arg12[%c15_55, %c0_56, %c8_57], %3 {strides = array<i32>} : memref<16x16x9xf32, #tpu.memory_space<vmem>>, vector<1x16x1xf32>,
    %c0_58 = arith.constant 0 : index
    %c15_59 = arith.constant 15 : index
    %c8_60 = arith.constant 8 : index
    %33 = vector.load %arg12[%c0_58, %c15_59, %c8_60] : memref<16x16x9xf32, #tpu.memory_space<vmem>>, vector<16x1x1xf32>
    tpu.vector_store %arg12[%c0_58, %c15_59, %c8_60], %4 {strides = array<i32>} : memref<16x16x9xf32, #tpu.memory_space<vmem>>, vector<16x1x1xf32>,
    %c0_61 = arith.constant 0 : index
    %c0_62 = arith.constant 0 : index
    %c0_63 = arith.constant 0 : index
    %34 = vector.load %arg12[%c0_61, %c0_62, %c0_63] : memref<16x16x9xf32, #tpu.memory_space<vmem>>, vector<16x16x9xf32>
    %c0_64 = arith.constant 0 : index
    %c0_65 = arith.constant 0 : index
    %35 = vector.load %arg3[%c0_64, %c0_65] : memref<9x32xf32, #tpu.memory_space<vmem>>, vector<9x32xf32>
    "tpu.trace_start"() <{level = 10 : i32, message = "hwk,ko->hwo"}> : () -> ()
    %cst_66 = arith.constant dense<0.000000e+00> : vector<16x16x32xf32>
    %36 = tpu.matmul %34, %35, %cst_66 {dimension_numbers = #tpu.dot_dimension_numbers<[2], [0], [0, 1], [1], [0, 0, 0, 1, 1, 1], [], []>} : vector<16x16x9xf32>, vector<9x32xf32>, vector<16x16x32xf32> -> vector<16x16x32xf32>
    "tpu.trace_stop"() : () -> ()
    %c0_67 = arith.constant 0 : index
    %c0_68 = arith.constant 0 : index
    %c0_69 = arith.constant 0 : index
    %37 = vector.load %arg4[%c0_67, %c0_68, %c0_69] : memref<1x1x32xf32, #tpu.memory_space<vmem>>, vector<1x1x32xf32>
    %38 = vector.broadcast %37 : vector<1x1x32xf32> to vector<16x16x32xf32>
    %39 = arith.addf %36, %38 : vector<16x16x32xf32>
    %cst_70 = arith.constant 0.000000e+00 : f32
    %40 = vector.broadcast %cst_70 : f32 to vector<16x16x32xf32>
    %41 = arith.maximumf %39, %40 : vector<16x16x32xf32>
    %cst_71 = arith.constant 0.000000e+00 : f32
    %42 = vector.broadcast %cst_71 : f32 to vector<16x16x32xf32>
    %43 = arith.minimumf %39, %42 : vector<16x16x32xf32>
    %44 = vector.broadcast %0 : vector<1x1x1xf32> to vector<16x16x32xf32>
    %45 = arith.mulf %44, %43 : vector<16x16x32xf32>
    %46 = arith.addf %41, %45 : vector<16x16x32xf32>
    %cst_72 = arith.constant 0.000000e+00 : f32
    %47 = vector.broadcast %cst_72 : f32 to vector<1x16x32xf32>
    %cst_73 = arith.constant 0.000000e+00 : f32
    %48 = vector.broadcast %cst_73 : f32 to vector<16x1x32xf32>
    %49 = vector.extract_strided_slice %46 {offsets = [0, 0, 0], sizes = [15, 15, 32], strides = [1, 1, 1]} : vector<16x16x32xf32> to vector<15x15x32xf32>
    %c1_74 = arith.constant 1 : index
    %c1_75 = arith.constant 1 : index
    %c0_76 = arith.constant 0 : index
    %50 = vector.load %arg13[%c1_74, %c1_75, %c0_76] : memref<16x16x288xf32, #tpu.memory_space<vmem>>, vector<15x15x32xf32>
    tpu.vector_store %arg13[%c1_74, %c1_75, %c0_76], %49 {strides = array<i32>} : memref<16x16x288xf32, #tpu.memory_space<vmem>>, vector<15x15x32xf32>,
    %c0_77 = arith.constant 0 : index
    %c0_78 = arith.constant 0 : index
    %c0_79 = arith.constant 0 : index
    %51 = vector.load %arg13[%c0_77, %c0_78, %c0_79] : memref<16x16x288xf32, #tpu.memory_space<vmem>>, vector<1x16x32xf32>
    tpu.vector_store %arg13[%c0_77, %c0_78, %c0_79], %47 {strides = array<i32>} : memref<16x16x288xf32, #tpu.memory_space<vmem>>, vector<1x16x32xf32>,
    %c0_80 = arith.constant 0 : index
    %c0_81 = arith.constant 0 : index
    %c0_82 = arith.constant 0 : index
    %52 = vector.load %arg13[%c0_80, %c0_81, %c0_82] : memref<16x16x288xf32, #tpu.memory_space<vmem>>, vector<16x1x32xf32>
    tpu.vector_store %arg13[%c0_80, %c0_81, %c0_82], %48 {strides = array<i32>} : memref<16x16x288xf32, #tpu.memory_space<vmem>>, vector<16x1x32xf32>,
    %53 = vector.extract_strided_slice %46 {offsets = [0, 0, 0], sizes = [15, 16, 32], strides = [1, 1, 1]} : vector<16x16x32xf32> to vector<15x16x32xf32>
    %c1_83 = arith.constant 1 : index
    %c0_84 = arith.constant 0 : index
    %c32 = arith.constant 32 : index
    %54 = vector.load %arg13[%c1_83, %c0_84, %c32] : memref<16x16x288xf32, #tpu.memory_space<vmem>>, vector<15x16x32xf32>
    tpu.vector_store %arg13[%c1_83, %c0_84, %c32], %53 {strides = array<i32>} : memref<16x16x288xf32, #tpu.memory_space<vmem>>, vector<15x16x32xf32>,
    %c0_85 = arith.constant 0 : index
    %c0_86 = arith.constant 0 : index
    %c32_87 = arith.constant 32 : index
    %55 = vector.load %arg13[%c0_85, %c0_86, %c32_87] : memref<16x16x288xf32, #tpu.memory_space<vmem>>, vector<1x16x32xf32>
    tpu.vector_store %arg13[%c0_85, %c0_86, %c32_87], %47 {strides = array<i32>} : memref<16x16x288xf32, #tpu.memory_space<vmem>>, vector<1x16x32xf32>,
    %56 = vector.extract_strided_slice %46 {offsets = [0, 1, 0], sizes = [15, 15, 32], strides = [1, 1, 1]} : vector<16x16x32xf32> to vector<15x15x32xf32>
    %c1_88 = arith.constant 1 : index
    %c0_89 = arith.constant 0 : index
    %c64 = arith.constant 64 : index
    %57 = vector.load %arg13[%c1_88, %c0_89, %c64] : memref<16x16x288xf32, #tpu.memory_space<vmem>>, vector<15x15x32xf32>
    tpu.vector_store %arg13[%c1_88, %c0_89, %c64], %56 {strides = array<i32>} : memref<16x16x288xf32, #tpu.memory_space<vmem>>, vector<15x15x32xf32>,
    %c0_90 = arith.constant 0 : index
    %c0_91 = arith.constant 0 : index
    %c64_92 = arith.constant 64 : index
    %58 = vector.load %arg13[%c0_90, %c0_91, %c64_92] : memref<16x16x288xf32, #tpu.memory_space<vmem>>, vector<1x16x32xf32>
    tpu.vector_store %arg13[%c0_90, %c0_91, %c64_92], %47 {strides = array<i32>} : memref<16x16x288xf32, #tpu.memory_space<vmem>>, vector<1x16x32xf32>,
    %c0_93 = arith.constant 0 : index
    %c15_94 = arith.constant 15 : index
    %c64_95 = arith.constant 64 : index
    %59 = vector.load %arg13[%c0_93, %c15_94, %c64_95] : memref<16x16x288xf32, #tpu.memory_space<vmem>>, vector<16x1x32xf32>
    tpu.vector_store %arg13[%c0_93, %c15_94, %c64_95], %48 {strides = array<i32>} : memref<16x16x288xf32, #tpu.memory_space<vmem>>, vector<16x1x32xf32>,
    %60 = vector.extract_strided_slice %46 {offsets = [0, 0, 0], sizes = [16, 15, 32], strides = [1, 1, 1]} : vector<16x16x32xf32> to vector<16x15x32xf32>
    %c0_96 = arith.constant 0 : index
    %c1_97 = arith.constant 1 : index
    %c96 = arith.constant 96 : index
    %61 = vector.load %arg13[%c0_96, %c1_97, %c96] : memref<16x16x288xf32, #tpu.memory_space<vmem>>, vector<16x15x32xf32>
    tpu.vector_store %arg13[%c0_96, %c1_97, %c96], %60 {strides = array<i32>} : memref<16x16x288xf32, #tpu.memory_space<vmem>>, vector<16x15x32xf32>,
    %c0_98 = arith.constant 0 : index
    %c0_99 = arith.constant 0 : index
    %c96_100 = arith.constant 96 : index
    %62 = vector.load %arg13[%c0_98, %c0_99, %c96_100] : memref<16x16x288xf32, #tpu.memory_space<vmem>>, vector<16x1x32xf32>
    tpu.vector_store %arg13[%c0_98, %c0_99, %c96_100], %48 {strides = array<i32>} : memref<16x16x288xf32, #tpu.memory_space<vmem>>, vector<16x1x32xf32>,
    %c0_101 = arith.constant 0 : index
    %c0_102 = arith.constant 0 : index
    %c128 = arith.constant 128 : index
    %63 = vector.load %arg13[%c0_101, %c0_102, %c128] : memref<16x16x288xf32, #tpu.memory_space<vmem>>, vector<16x16x32xf32>
    tpu.vector_store %arg13[%c0_101, %c0_102, %c128], %46 {strides = array<i32>} : memref<16x16x288xf32, #tpu.memory_space<vmem>>, vector<16x16x32xf32>,
    %64 = vector.extract_strided_slice %46 {offsets = [0, 1, 0], sizes = [16, 15, 32], strides = [1, 1, 1]} : vector<16x16x32xf32> to vector<16x15x32xf32>
    %c0_103 = arith.constant 0 : index
    %c0_104 = arith.constant 0 : index
    %c160 = arith.constant 160 : index
    %65 = vector.load %arg13[%c0_103, %c0_104, %c160] : memref<16x16x288xf32, #tpu.memory_space<vmem>>, vector<16x15x32xf32>
    tpu.vector_store %arg13[%c0_103, %c0_104, %c160], %64 {strides = array<i32>} : memref<16x16x288xf32, #tpu.memory_space<vmem>>, vector<16x15x32xf32>,
    %c0_105 = arith.constant 0 : index
    %c15_106 = arith.constant 15 : index
    %c160_107 = arith.constant 160 : index
    %66 = vector.load %arg13[%c0_105, %c15_106, %c160_107] : memref<16x16x288xf32, #tpu.memory_space<vmem>>, vector<16x1x32xf32>
    tpu.vector_store %arg13[%c0_105, %c15_106, %c160_107], %48 {strides = array<i32>} : memref<16x16x288xf32, #tpu.memory_space<vmem>>, vector<16x1x32xf32>,
    %67 = vector.extract_strided_slice %46 {offsets = [1, 0, 0], sizes = [15, 15, 32], strides = [1, 1, 1]} : vector<16x16x32xf32> to vector<15x15x32xf32>
    %c0_108 = arith.constant 0 : index
    %c1_109 = arith.constant 1 : index
    %c192 = arith.constant 192 : index
    %68 = vector.load %arg13[%c0_108, %c1_109, %c192] : memref<16x16x288xf32, #tpu.memory_space<vmem>>, vector<15x15x32xf32>
    tpu.vector_store %arg13[%c0_108, %c1_109, %c192], %67 {strides = array<i32>} : memref<16x16x288xf32, #tpu.memory_space<vmem>>, vector<15x15x32xf32>,
    %c15_110 = arith.constant 15 : index
    %c0_111 = arith.constant 0 : index
    %c192_112 = arith.constant 192 : index
    %69 = vector.load %arg13[%c15_110, %c0_111, %c192_112] : memref<16x16x288xf32, #tpu.memory_space<vmem>>, vector<1x16x32xf32>
    tpu.vector_store %arg13[%c15_110, %c0_111, %c192_112], %47 {strides = array<i32>} : memref<16x16x288xf32, #tpu.memory_space<vmem>>, vector<1x16x32xf32>,
    %c0_113 = arith.constant 0 : index
    %c0_114 = arith.constant 0 : index
    %c192_115 = arith.constant 192 : index
    %70 = vector.load %arg13[%c0_113, %c0_114, %c192_115] : memref<16x16x288xf32, #tpu.memory_space<vmem>>, vector<16x1x32xf32>
    tpu.vector_store %arg13[%c0_113, %c0_114, %c192_115], %48 {strides = array<i32>} : memref<16x16x288xf32, #tpu.memory_space<vmem>>, vector<16x1x32xf32>,
    %71 = vector.extract_strided_slice %46 {offsets = [1, 0, 0], sizes = [15, 16, 32], strides = [1, 1, 1]} : vector<16x16x32xf32> to vector<15x16x32xf32>
    %c0_116 = arith.constant 0 : index
    %c0_117 = arith.constant 0 : index
    %c224 = arith.constant 224 : index
    %72 = vector.load %arg13[%c0_116, %c0_117, %c224] : memref<16x16x288xf32, #tpu.memory_space<vmem>>, vector<15x16x32xf32>
    tpu.vector_store %arg13[%c0_116, %c0_117, %c224], %71 {strides = array<i32>} : memref<16x16x288xf32, #tpu.memory_space<vmem>>, vector<15x16x32xf32>,
    %c15_118 = arith.constant 15 : index
    %c0_119 = arith.constant 0 : index
    %c224_120 = arith.constant 224 : index
    %73 = vector.load %arg13[%c15_118, %c0_119, %c224_120] : memref<16x16x288xf32, #tpu.memory_space<vmem>>, vector<1x16x32xf32>
    tpu.vector_store %arg13[%c15_118, %c0_119, %c224_120], %47 {strides = array<i32>} : memref<16x16x288xf32, #tpu.memory_space<vmem>>, vector<1x16x32xf32>,
    %74 = vector.extract_strided_slice %46 {offsets = [1, 1, 0], sizes = [15, 15, 32], strides = [1, 1, 1]} : vector<16x16x32xf32> to vector<15x15x32xf32>
    %c0_121 = arith.constant 0 : index
    %c0_122 = arith.constant 0 : index
    %c256 = arith.constant 256 : index
    %75 = vector.load %arg13[%c0_121, %c0_122, %c256] : memref<16x16x288xf32, #tpu.memory_space<vmem>>, vector<15x15x32xf32>
    tpu.vector_store %arg13[%c0_121, %c0_122, %c256], %74 {strides = array<i32>} : memref<16x16x288xf32, #tpu.memory_space<vmem>>, vector<15x15x32xf32>,
    %c15_123 = arith.constant 15 : index
    %c0_124 = arith.constant 0 : index
    %c256_125 = arith.constant 256 : index
    %76 = vector.load %arg13[%c15_123, %c0_124, %c256_125] : memref<16x16x288xf32, #tpu.memory_space<vmem>>, vector<1x16x32xf32>
    tpu.vector_store %arg13[%c15_123, %c0_124, %c256_125], %47 {strides = array<i32>} : memref<16x16x288xf32, #tpu.memory_space<vmem>>, vector<1x16x32xf32>,
    %c0_126 = arith.constant 0 : index
    %c15_127 = arith.constant 15 : index
    %c256_128 = arith.constant 256 : index
    %77 = vector.load %arg13[%c0_126, %c15_127, %c256_128] : memref<16x16x288xf32, #tpu.memory_space<vmem>>, vector<16x1x32xf32>
    tpu.vector_store %arg13[%c0_126, %c15_127, %c256_128], %48 {strides = array<i32>} : memref<16x16x288xf32, #tpu.memory_space<vmem>>, vector<16x1x32xf32>,
    %c0_129 = arith.constant 0 : index
    %c0_130 = arith.constant 0 : index
    %c0_131 = arith.constant 0 : index
    %78 = vector.load %arg13[%c0_129, %c0_130, %c0_131] : memref<16x16x288xf32, #tpu.memory_space<vmem>>, vector<16x16x288xf32>
    %c0_132 = arith.constant 0 : index
    %c0_133 = arith.constant 0 : index
    %79 = vector.load %arg5[%c0_132, %c0_133] : memref<288x64xf32, #tpu.memory_space<vmem>>, vector<288x64xf32>
    "tpu.trace_start"() <{level = 10 : i32, message = "hwk,ko->hwo"}> : () -> ()
    %cst_134 = arith.constant dense<0.000000e+00> : vector<16x16x64xf32>
    %80 = tpu.matmul %78, %79, %cst_134 {dimension_numbers = #tpu.dot_dimension_numbers<[2], [0], [0, 1], [1], [0, 0, 0, 1, 1, 1], [], []>} : vector<16x16x288xf32>, vector<288x64xf32>, vector<16x16x64xf32> -> vector<16x16x64xf32>
    "tpu.trace_stop"() : () -> ()
    %c0_135 = arith.constant 0 : index
    %c0_136 = arith.constant 0 : index
    %c0_137 = arith.constant 0 : index
    %81 = vector.load %arg6[%c0_135, %c0_136, %c0_137] : memref<1x1x64xf32, #tpu.memory_space<vmem>>, vector<1x1x64xf32>
    %82 = vector.broadcast %81 : vector<1x1x64xf32> to vector<16x16x64xf32>
    %83 = arith.addf %80, %82 : vector<16x16x64xf32>
    %cst_138 = arith.constant 0.000000e+00 : f32
    %84 = vector.broadcast %cst_138 : f32 to vector<16x16x64xf32>
    %85 = arith.maximumf %83, %84 : vector<16x16x64xf32>
    %cst_139 = arith.constant 0.000000e+00 : f32
    %86 = vector.broadcast %cst_139 : f32 to vector<16x16x64xf32>
    %87 = arith.minimumf %83, %86 : vector<16x16x64xf32>
    %88 = vector.broadcast %0 : vector<1x1x1xf32> to vector<16x16x64xf32>
    %89 = arith.mulf %88, %87 : vector<16x16x64xf32>
    %90 = arith.addf %85, %89 : vector<16x16x64xf32>
    %91 = vector.shape_cast %90 : vector<16x16x64xf32> to vector<8x2x16x64xf32>
    %92 = vector.extract_strided_slice %91 {offsets = [0, 0, 0, 0], sizes = [8, 1, 16, 64], strides = [1, 1, 1, 1]} : vector<8x2x16x64xf32> to vector<8x1x16x64xf32>
    %93 = vector.shape_cast %92 : vector<8x1x16x64xf32> to vector<8x16x64xf32>
    %94 = vector.extract_strided_slice %91 {offsets = [0, 1, 0, 0], sizes = [8, 1, 16, 64], strides = [1, 1, 1, 1]} : vector<8x2x16x64xf32> to vector<8x1x16x64xf32>
    %95 = vector.shape_cast %94 : vector<8x1x16x64xf32> to vector<8x16x64xf32>
    %96 = arith.maximumf %93, %95 : vector<8x16x64xf32>
    %97 = vector.extract_strided_slice %96 {offsets = [0, 0, 0], sizes = [8, 2, 64], strides = [1, 1, 1]} : vector<8x16x64xf32> to vector<8x2x64xf32>
    %c0_140 = arith.constant 0 : index
    %c0_141 = arith.constant 0 : index
    %c0_142 = arith.constant 0 : index
    %c0_143 = arith.constant 0 : index
    %98 = vector.load %arg16[%c0_140, %c0_141, %c0_142, %c0_143] : memref<8x2x8x64xf32, #tpu.memory_space<vmem>>, vector<8x2x1x64xf32>
    %99 = vector.shape_cast %98 : vector<8x2x1x64xf32> to vector<8x2x64xf32>
    %100 = vector.shape_cast %97 : vector<8x2x64xf32> to vector<8x2x1x64xf32>
    tpu.vector_store %arg16[%c0_140, %c0_141, %c0_142, %c0_143], %100 {strides = array<i32>} : memref<8x2x8x64xf32, #tpu.memory_space<vmem>>, vector<8x2x1x64xf32>,
    %101 = vector.extract_strided_slice %96 {offsets = [0, 2, 0], sizes = [8, 2, 64], strides = [1, 1, 1]} : vector<8x16x64xf32> to vector<8x2x64xf32>
    %c0_144 = arith.constant 0 : index
    %c0_145 = arith.constant 0 : index
    %c1_146 = arith.constant 1 : index
    %c0_147 = arith.constant 0 : index
    %102 = vector.load %arg16[%c0_144, %c0_145, %c1_146, %c0_147] : memref<8x2x8x64xf32, #tpu.memory_space<vmem>>, vector<8x2x1x64xf32>
    %103 = vector.shape_cast %102 : vector<8x2x1x64xf32> to vector<8x2x64xf32>
    %104 = vector.shape_cast %101 : vector<8x2x64xf32> to vector<8x2x1x64xf32>
    tpu.vector_store %arg16[%c0_144, %c0_145, %c1_146, %c0_147], %104 {strides = array<i32>} : memref<8x2x8x64xf32, #tpu.memory_space<vmem>>, vector<8x2x1x64xf32>,
    %105 = vector.extract_strided_slice %96 {offsets = [0, 4, 0], sizes = [8, 2, 64], strides = [1, 1, 1]} : vector<8x16x64xf32> to vector<8x2x64xf32>
    %c0_148 = arith.constant 0 : index
    %c0_149 = arith.constant 0 : index
    %c2_150 = arith.constant 2 : index
    %c0_151 = arith.constant 0 : index
    %106 = vector.load %arg16[%c0_148, %c0_149, %c2_150, %c0_151] : memref<8x2x8x64xf32, #tpu.memory_space<vmem>>, vector<8x2x1x64xf32>
    %107 = vector.shape_cast %106 : vector<8x2x1x64xf32> to vector<8x2x64xf32>
    %108 = vector.shape_cast %105 : vector<8x2x64xf32> to vector<8x2x1x64xf32>
    tpu.vector_store %arg16[%c0_148, %c0_149, %c2_150, %c0_151], %108 {strides = array<i32>} : memref<8x2x8x64xf32, #tpu.memory_space<vmem>>, vector<8x2x1x64xf32>,
    %109 = vector.extract_strided_slice %96 {offsets = [0, 6, 0], sizes = [8, 2, 64], strides = [1, 1, 1]} : vector<8x16x64xf32> to vector<8x2x64xf32>
    %c0_152 = arith.constant 0 : index
    %c0_153 = arith.constant 0 : index
    %c3_154 = arith.constant 3 : index
    %c0_155 = arith.constant 0 : index
    %110 = vector.load %arg16[%c0_152, %c0_153, %c3_154, %c0_155] : memref<8x2x8x64xf32, #tpu.memory_space<vmem>>, vector<8x2x1x64xf32>
    %111 = vector.shape_cast %110 : vector<8x2x1x64xf32> to vector<8x2x64xf32>
    %112 = vector.shape_cast %109 : vector<8x2x64xf32> to vector<8x2x1x64xf32>
    tpu.vector_store %arg16[%c0_152, %c0_153, %c3_154, %c0_155], %112 {strides = array<i32>} : memref<8x2x8x64xf32, #tpu.memory_space<vmem>>, vector<8x2x1x64xf32>,
    %113 = vector.extract_strided_slice %96 {offsets = [0, 8, 0], sizes = [8, 2, 64], strides = [1, 1, 1]} : vector<8x16x64xf32> to vector<8x2x64xf32>
    %c0_156 = arith.constant 0 : index
    %c0_157 = arith.constant 0 : index
    %c4_158 = arith.constant 4 : index
    %c0_159 = arith.constant 0 : index
    %114 = vector.load %arg16[%c0_156, %c0_157, %c4_158, %c0_159] : memref<8x2x8x64xf32, #tpu.memory_space<vmem>>, vector<8x2x1x64xf32>
    %115 = vector.shape_cast %114 : vector<8x2x1x64xf32> to vector<8x2x64xf32>
    %116 = vector.shape_cast %113 : vector<8x2x64xf32> to vector<8x2x1x64xf32>
    tpu.vector_store %arg16[%c0_156, %c0_157, %c4_158, %c0_159], %116 {strides = array<i32>} : memref<8x2x8x64xf32, #tpu.memory_space<vmem>>, vector<8x2x1x64xf32>,
    %117 = vector.extract_strided_slice %96 {offsets = [0, 10, 0], sizes = [8, 2, 64], strides = [1, 1, 1]} : vector<8x16x64xf32> to vector<8x2x64xf32>
    %c0_160 = arith.constant 0 : index
    %c0_161 = arith.constant 0 : index
    %c5_162 = arith.constant 5 : index
    %c0_163 = arith.constant 0 : index
    %118 = vector.load %arg16[%c0_160, %c0_161, %c5_162, %c0_163] : memref<8x2x8x64xf32, #tpu.memory_space<vmem>>, vector<8x2x1x64xf32>
    %119 = vector.shape_cast %118 : vector<8x2x1x64xf32> to vector<8x2x64xf32>
    %120 = vector.shape_cast %117 : vector<8x2x64xf32> to vector<8x2x1x64xf32>
    tpu.vector_store %arg16[%c0_160, %c0_161, %c5_162, %c0_163], %120 {strides = array<i32>} : memref<8x2x8x64xf32, #tpu.memory_space<vmem>>, vector<8x2x1x64xf32>,
    %121 = vector.extract_strided_slice %96 {offsets = [0, 12, 0], sizes = [8, 2, 64], strides = [1, 1, 1]} : vector<8x16x64xf32> to vector<8x2x64xf32>
    %c0_164 = arith.constant 0 : index
    %c0_165 = arith.constant 0 : index
    %c6_166 = arith.constant 6 : index
    %c0_167 = arith.constant 0 : index
    %122 = vector.load %arg16[%c0_164, %c0_165, %c6_166, %c0_167] : memref<8x2x8x64xf32, #tpu.memory_space<vmem>>, vector<8x2x1x64xf32>
    %123 = vector.shape_cast %122 : vector<8x2x1x64xf32> to vector<8x2x64xf32>
    %124 = vector.shape_cast %121 : vector<8x2x64xf32> to vector<8x2x1x64xf32>
    tpu.vector_store %arg16[%c0_164, %c0_165, %c6_166, %c0_167], %124 {strides = array<i32>} : memref<8x2x8x64xf32, #tpu.memory_space<vmem>>, vector<8x2x1x64xf32>,
    %125 = vector.extract_strided_slice %96 {offsets = [0, 14, 0], sizes = [8, 2, 64], strides = [1, 1, 1]} : vector<8x16x64xf32> to vector<8x2x64xf32>
    %c0_168 = arith.constant 0 : index
    %c0_169 = arith.constant 0 : index
    %c7_170 = arith.constant 7 : index
    %c0_171 = arith.constant 0 : index
    %126 = vector.load %arg16[%c0_168, %c0_169, %c7_170, %c0_171] : memref<8x2x8x64xf32, #tpu.memory_space<vmem>>, vector<8x2x1x64xf32>
    %127 = vector.shape_cast %126 : vector<8x2x1x64xf32> to vector<8x2x64xf32>
    %128 = vector.shape_cast %125 : vector<8x2x64xf32> to vector<8x2x1x64xf32>
    tpu.vector_store %arg16[%c0_168, %c0_169, %c7_170, %c0_171], %128 {strides = array<i32>} : memref<8x2x8x64xf32, #tpu.memory_space<vmem>>, vector<8x2x1x64xf32>,
    %c0_172 = arith.constant 0 : index
    %c0_173 = arith.constant 0 : index
    %c0_174 = arith.constant 0 : index
    %c0_175 = arith.constant 0 : index
    %129 = vector.load %arg16[%c0_172, %c0_173, %c0_174, %c0_175] : memref<8x2x8x64xf32, #tpu.memory_space<vmem>>, vector<8x1x8x64xf32>
    %130 = vector.shape_cast %129 : vector<8x1x8x64xf32> to vector<8x8x64xf32>
    %c0_176 = arith.constant 0 : index
    %c1_177 = arith.constant 1 : index
    %c0_178 = arith.constant 0 : index
    %c0_179 = arith.constant 0 : index
    %131 = vector.load %arg16[%c0_176, %c1_177, %c0_178, %c0_179] : memref<8x2x8x64xf32, #tpu.memory_space<vmem>>, vector<8x1x8x64xf32>
    %132 = vector.shape_cast %131 : vector<8x1x8x64xf32> to vector<8x8x64xf32>
    %133 = arith.maximumf %130, %132 : vector<8x8x64xf32>
    %cst_180 = arith.constant 0.000000e+00 : f32
    %134 = vector.broadcast %cst_180 : f32 to vector<1x8x64xf32>
    %cst_181 = arith.constant 0.000000e+00 : f32
    %135 = vector.broadcast %cst_181 : f32 to vector<8x1x64xf32>
    %136 = vector.extract_strided_slice %133 {offsets = [0, 0, 0], sizes = [7, 7, 64], strides = [1, 1, 1]} : vector<8x8x64xf32> to vector<7x7x64xf32>
    %c1_182 = arith.constant 1 : index
    %c1_183 = arith.constant 1 : index
    %c0_184 = arith.constant 0 : index
    %137 = vector.load %arg14[%c1_182, %c1_183, %c0_184] : memref<8x8x576xf32, #tpu.memory_space<vmem>>, vector<7x7x64xf32>
    tpu.vector_store %arg14[%c1_182, %c1_183, %c0_184], %136 {strides = array<i32>} : memref<8x8x576xf32, #tpu.memory_space<vmem>>, vector<7x7x64xf32>,
    %c0_185 = arith.constant 0 : index
    %c0_186 = arith.constant 0 : index
    %c0_187 = arith.constant 0 : index
    %138 = vector.load %arg14[%c0_185, %c0_186, %c0_187] : memref<8x8x576xf32, #tpu.memory_space<vmem>>, vector<1x8x64xf32>
    tpu.vector_store %arg14[%c0_185, %c0_186, %c0_187], %134 {strides = array<i32>} : memref<8x8x576xf32, #tpu.memory_space<vmem>>, vector<1x8x64xf32>,
    %c0_188 = arith.constant 0 : index
    %c0_189 = arith.constant 0 : index
    %c0_190 = arith.constant 0 : index
    %139 = vector.load %arg14[%c0_188, %c0_189, %c0_190] : memref<8x8x576xf32, #tpu.memory_space<vmem>>, vector<8x1x64xf32>
    tpu.vector_store %arg14[%c0_188, %c0_189, %c0_190], %135 {strides = array<i32>} : memref<8x8x576xf32, #tpu.memory_space<vmem>>, vector<8x1x64xf32>,
    %140 = vector.extract_strided_slice %133 {offsets = [0, 0, 0], sizes = [7, 8, 64], strides = [1, 1, 1]} : vector<8x8x64xf32> to vector<7x8x64xf32>
    %c1_191 = arith.constant 1 : index
    %c0_192 = arith.constant 0 : index
    %c64_193 = arith.constant 64 : index
    %141 = vector.load %arg14[%c1_191, %c0_192, %c64_193] : memref<8x8x576xf32, #tpu.memory_space<vmem>>, vector<7x8x64xf32>
    tpu.vector_store %arg14[%c1_191, %c0_192, %c64_193], %140 {strides = array<i32>} : memref<8x8x576xf32, #tpu.memory_space<vmem>>, vector<7x8x64xf32>,
    %c0_194 = arith.constant 0 : index
    %c0_195 = arith.constant 0 : index
    %c64_196 = arith.constant 64 : index
    %142 = vector.load %arg14[%c0_194, %c0_195, %c64_196] : memref<8x8x576xf32, #tpu.memory_space<vmem>>, vector<1x8x64xf32>
    tpu.vector_store %arg14[%c0_194, %c0_195, %c64_196], %134 {strides = array<i32>} : memref<8x8x576xf32, #tpu.memory_space<vmem>>, vector<1x8x64xf32>,
    %143 = vector.extract_strided_slice %133 {offsets = [0, 1, 0], sizes = [7, 7, 64], strides = [1, 1, 1]} : vector<8x8x64xf32> to vector<7x7x64xf32>
    %c1_197 = arith.constant 1 : index
    %c0_198 = arith.constant 0 : index
    %c128_199 = arith.constant 128 : index
    %144 = vector.load %arg14[%c1_197, %c0_198, %c128_199] : memref<8x8x576xf32, #tpu.memory_space<vmem>>, vector<7x7x64xf32>
    tpu.vector_store %arg14[%c1_197, %c0_198, %c128_199], %143 {strides = array<i32>} : memref<8x8x576xf32, #tpu.memory_space<vmem>>, vector<7x7x64xf32>,
    %c0_200 = arith.constant 0 : index
    %c0_201 = arith.constant 0 : index
    %c128_202 = arith.constant 128 : index
    %145 = vector.load %arg14[%c0_200, %c0_201, %c128_202] : memref<8x8x576xf32, #tpu.memory_space<vmem>>, vector<1x8x64xf32>
    tpu.vector_store %arg14[%c0_200, %c0_201, %c128_202], %134 {strides = array<i32>} : memref<8x8x576xf32, #tpu.memory_space<vmem>>, vector<1x8x64xf32>,
    %c0_203 = arith.constant 0 : index
    %c7_204 = arith.constant 7 : index
    %c128_205 = arith.constant 128 : index
    %146 = vector.load %arg14[%c0_203, %c7_204, %c128_205] : memref<8x8x576xf32, #tpu.memory_space<vmem>>, vector<8x1x64xf32>
    tpu.vector_store %arg14[%c0_203, %c7_204, %c128_205], %135 {strides = array<i32>} : memref<8x8x576xf32, #tpu.memory_space<vmem>>, vector<8x1x64xf32>,
    %147 = vector.extract_strided_slice %133 {offsets = [0, 0, 0], sizes = [8, 7, 64], strides = [1, 1, 1]} : vector<8x8x64xf32> to vector<8x7x64xf32>
    %c0_206 = arith.constant 0 : index
    %c1_207 = arith.constant 1 : index
    %c192_208 = arith.constant 192 : index
    %148 = vector.load %arg14[%c0_206, %c1_207, %c192_208] : memref<8x8x576xf32, #tpu.memory_space<vmem>>, vector<8x7x64xf32>
    tpu.vector_store %arg14[%c0_206, %c1_207, %c192_208], %147 {strides = array<i32>} : memref<8x8x576xf32, #tpu.memory_space<vmem>>, vector<8x7x64xf32>,
    %c0_209 = arith.constant 0 : index
    %c0_210 = arith.constant 0 : index
    %c192_211 = arith.constant 192 : index
    %149 = vector.load %arg14[%c0_209, %c0_210, %c192_211] : memref<8x8x576xf32, #tpu.memory_space<vmem>>, vector<8x1x64xf32>
    tpu.vector_store %arg14[%c0_209, %c0_210, %c192_211], %135 {strides = array<i32>} : memref<8x8x576xf32, #tpu.memory_space<vmem>>, vector<8x1x64xf32>,
    %c0_212 = arith.constant 0 : index
    %c0_213 = arith.constant 0 : index
    %c256_214 = arith.constant 256 : index
    %150 = vector.load %arg14[%c0_212, %c0_213, %c256_214] : memref<8x8x576xf32, #tpu.memory_space<vmem>>, vector<8x8x64xf32>
    tpu.vector_store %arg14[%c0_212, %c0_213, %c256_214], %133 {strides = array<i32>} : memref<8x8x576xf32, #tpu.memory_space<vmem>>, vector<8x8x64xf32>,
    %151 = vector.extract_strided_slice %133 {offsets = [0, 1, 0], sizes = [8, 7, 64], strides = [1, 1, 1]} : vector<8x8x64xf32> to vector<8x7x64xf32>
    %c0_215 = arith.constant 0 : index
    %c0_216 = arith.constant 0 : index
    %c320 = arith.constant 320 : index
    %152 = vector.load %arg14[%c0_215, %c0_216, %c320] : memref<8x8x576xf32, #tpu.memory_space<vmem>>, vector<8x7x64xf32>
    tpu.vector_store %arg14[%c0_215, %c0_216, %c320], %151 {strides = array<i32>} : memref<8x8x576xf32, #tpu.memory_space<vmem>>, vector<8x7x64xf32>,
    %c0_217 = arith.constant 0 : index
    %c7_218 = arith.constant 7 : index
    %c320_219 = arith.constant 320 : index
    %153 = vector.load %arg14[%c0_217, %c7_218, %c320_219] : memref<8x8x576xf32, #tpu.memory_space<vmem>>, vector<8x1x64xf32>
    tpu.vector_store %arg14[%c0_217, %c7_218, %c320_219], %135 {strides = array<i32>} : memref<8x8x576xf32, #tpu.memory_space<vmem>>, vector<8x1x64xf32>,
    %154 = vector.extract_strided_slice %133 {offsets = [1, 0, 0], sizes = [7, 7, 64], strides = [1, 1, 1]} : vector<8x8x64xf32> to vector<7x7x64xf32>
    %c0_220 = arith.constant 0 : index
    %c1_221 = arith.constant 1 : index
    %c384 = arith.constant 384 : index
    %155 = vector.load %arg14[%c0_220, %c1_221, %c384] : memref<8x8x576xf32, #tpu.memory_space<vmem>>, vector<7x7x64xf32>
    tpu.vector_store %arg14[%c0_220, %c1_221, %c384], %154 {strides = array<i32>} : memref<8x8x576xf32, #tpu.memory_space<vmem>>, vector<7x7x64xf32>,
    %c7_222 = arith.constant 7 : index
    %c0_223 = arith.constant 0 : index
    %c384_224 = arith.constant 384 : index
    %156 = vector.load %arg14[%c7_222, %c0_223, %c384_224] : memref<8x8x576xf32, #tpu.memory_space<vmem>>, vector<1x8x64xf32>
    tpu.vector_store %arg14[%c7_222, %c0_223, %c384_224], %134 {strides = array<i32>} : memref<8x8x576xf32, #tpu.memory_space<vmem>>, vector<1x8x64xf32>,
    %c0_225 = arith.constant 0 : index
    %c0_226 = arith.constant 0 : index
    %c384_227 = arith.constant 384 : index
    %157 = vector.load %arg14[%c0_225, %c0_226, %c384_227] : memref<8x8x576xf32, #tpu.memory_space<vmem>>, vector<8x1x64xf32>
    tpu.vector_store %arg14[%c0_225, %c0_226, %c384_227], %135 {strides = array<i32>} : memref<8x8x576xf32, #tpu.memory_space<vmem>>, vector<8x1x64xf32>,
    %158 = vector.extract_strided_slice %133 {offsets = [1, 0, 0], sizes = [7, 8, 64], strides = [1, 1, 1]} : vector<8x8x64xf32> to vector<7x8x64xf32>
    %c0_228 = arith.constant 0 : index
    %c0_229 = arith.constant 0 : index
    %c448 = arith.constant 448 : index
    %159 = vector.load %arg14[%c0_228, %c0_229, %c448] : memref<8x8x576xf32, #tpu.memory_space<vmem>>, vector<7x8x64xf32>
    tpu.vector_store %arg14[%c0_228, %c0_229, %c448], %158 {strides = array<i32>} : memref<8x8x576xf32, #tpu.memory_space<vmem>>, vector<7x8x64xf32>,
    %c7_230 = arith.constant 7 : index
    %c0_231 = arith.constant 0 : index
    %c448_232 = arith.constant 448 : index
    %160 = vector.load %arg14[%c7_230, %c0_231, %c448_232] : memref<8x8x576xf32, #tpu.memory_space<vmem>>, vector<1x8x64xf32>
    tpu.vector_store %arg14[%c7_230, %c0_231, %c448_232], %134 {strides = array<i32>} : memref<8x8x576xf32, #tpu.memory_space<vmem>>, vector<1x8x64xf32>,
    %161 = vector.extract_strided_slice %133 {offsets = [1, 1, 0], sizes = [7, 7, 64], strides = [1, 1, 1]} : vector<8x8x64xf32> to vector<7x7x64xf32>
    %c0_233 = arith.constant 0 : index
    %c0_234 = arith.constant 0 : index
    %c512 = arith.constant 512 : index
    %162 = vector.load %arg14[%c0_233, %c0_234, %c512] : memref<8x8x576xf32, #tpu.memory_space<vmem>>, vector<7x7x64xf32>
    tpu.vector_store %arg14[%c0_233, %c0_234, %c512], %161 {strides = array<i32>} : memref<8x8x576xf32, #tpu.memory_space<vmem>>, vector<7x7x64xf32>,
    %c7_235 = arith.constant 7 : index
    %c0_236 = arith.constant 0 : index
    %c512_237 = arith.constant 512 : index
    %163 = vector.load %arg14[%c7_235, %c0_236, %c512_237] : memref<8x8x576xf32, #tpu.memory_space<vmem>>, vector<1x8x64xf32>
    tpu.vector_store %arg14[%c7_235, %c0_236, %c512_237], %134 {strides = array<i32>} : memref<8x8x576xf32, #tpu.memory_space<vmem>>, vector<1x8x64xf32>,
    %c0_238 = arith.constant 0 : index
    %c7_239 = arith.constant 7 : index
    %c512_240 = arith.constant 512 : index
    %164 = vector.load %arg14[%c0_238, %c7_239, %c512_240] : memref<8x8x576xf32, #tpu.memory_space<vmem>>, vector<8x1x64xf32>
    tpu.vector_store %arg14[%c0_238, %c7_239, %c512_240], %135 {strides = array<i32>} : memref<8x8x576xf32, #tpu.memory_space<vmem>>, vector<8x1x64xf32>,
    %c0_241 = arith.constant 0 : index
    %c0_242 = arith.constant 0 : index
    %c0_243 = arith.constant 0 : index
    %165 = vector.load %arg14[%c0_241, %c0_242, %c0_243] : memref<8x8x576xf32, #tpu.memory_space<vmem>>, vector<8x8x576xf32>
    %c0_244 = arith.constant 0 : index
    %c0_245 = arith.constant 0 : index
    %166 = vector.load %arg7[%c0_244, %c0_245] : memref<576x32xf32, #tpu.memory_space<vmem>>, vector<576x32xf32>
    "tpu.trace_start"() <{level = 10 : i32, message = "hwk,ko->hwo"}> : () -> ()
    %cst_246 = arith.constant dense<0.000000e+00> : vector<8x8x32xf32>
    %167 = tpu.matmul %165, %166, %cst_246 {dimension_numbers = #tpu.dot_dimension_numbers<[2], [0], [0, 1], [1], [0, 0, 0, 1, 1, 1], [], []>} : vector<8x8x576xf32>, vector<576x32xf32>, vector<8x8x32xf32> -> vector<8x8x32xf32>
    "tpu.trace_stop"() : () -> ()
    %c0_247 = arith.constant 0 : index
    %c0_248 = arith.constant 0 : index
    %c0_249 = arith.constant 0 : index
    %168 = vector.load %arg8[%c0_247, %c0_248, %c0_249] : memref<1x1x32xf32, #tpu.memory_space<vmem>>, vector<1x1x32xf32>
    %169 = vector.broadcast %168 : vector<1x1x32xf32> to vector<8x8x32xf32>
    %170 = arith.addf %167, %169 : vector<8x8x32xf32>
    %cst_250 = arith.constant 0.000000e+00 : f32
    %171 = vector.broadcast %cst_250 : f32 to vector<8x8x32xf32>
    %172 = arith.maximumf %170, %171 : vector<8x8x32xf32>
    %cst_251 = arith.constant 0.000000e+00 : f32
    %173 = vector.broadcast %cst_251 : f32 to vector<8x8x32xf32>
    %174 = arith.minimumf %170, %173 : vector<8x8x32xf32>
    %175 = vector.broadcast %0 : vector<1x1x1xf32> to vector<8x8x32xf32>
    %176 = arith.mulf %175, %174 : vector<8x8x32xf32>
    %177 = arith.addf %172, %176 : vector<8x8x32xf32>
    %178 = vector.shape_cast %177 : vector<8x8x32xf32> to vector<4x2x8x32xf32>
    %179 = vector.extract_strided_slice %178 {offsets = [0, 0, 0, 0], sizes = [4, 1, 8, 32], strides = [1, 1, 1, 1]} : vector<4x2x8x32xf32> to vector<4x1x8x32xf32>
    %180 = vector.shape_cast %179 : vector<4x1x8x32xf32> to vector<4x8x32xf32>
    %181 = vector.extract_strided_slice %178 {offsets = [0, 1, 0, 0], sizes = [4, 1, 8, 32], strides = [1, 1, 1, 1]} : vector<4x2x8x32xf32> to vector<4x1x8x32xf32>
    %182 = vector.shape_cast %181 : vector<4x1x8x32xf32> to vector<4x8x32xf32>
    %183 = arith.maximumf %180, %182 : vector<4x8x32xf32>
    %184 = vector.extract_strided_slice %183 {offsets = [0, 0, 0], sizes = [4, 2, 32], strides = [1, 1, 1]} : vector<4x8x32xf32> to vector<4x2x32xf32>
    %c0_252 = arith.constant 0 : index
    %c0_253 = arith.constant 0 : index
    %c0_254 = arith.constant 0 : index
    %c0_255 = arith.constant 0 : index
    %185 = vector.load %arg17[%c0_252, %c0_253, %c0_254, %c0_255] : memref<4x2x4x32xf32, #tpu.memory_space<vmem>>, vector<4x2x1x32xf32>
    %186 = vector.shape_cast %185 : vector<4x2x1x32xf32> to vector<4x2x32xf32>
    %187 = vector.shape_cast %184 : vector<4x2x32xf32> to vector<4x2x1x32xf32>
    tpu.vector_store %arg17[%c0_252, %c0_253, %c0_254, %c0_255], %187 {strides = array<i32>} : memref<4x2x4x32xf32, #tpu.memory_space<vmem>>, vector<4x2x1x32xf32>,
    %188 = vector.extract_strided_slice %183 {offsets = [0, 2, 0], sizes = [4, 2, 32], strides = [1, 1, 1]} : vector<4x8x32xf32> to vector<4x2x32xf32>
    %c0_256 = arith.constant 0 : index
    %c0_257 = arith.constant 0 : index
    %c1_258 = arith.constant 1 : index
    %c0_259 = arith.constant 0 : index
    %189 = vector.load %arg17[%c0_256, %c0_257, %c1_258, %c0_259] : memref<4x2x4x32xf32, #tpu.memory_space<vmem>>, vector<4x2x1x32xf32>
    %190 = vector.shape_cast %189 : vector<4x2x1x32xf32> to vector<4x2x32xf32>
    %191 = vector.shape_cast %188 : vector<4x2x32xf32> to vector<4x2x1x32xf32>
    tpu.vector_store %arg17[%c0_256, %c0_257, %c1_258, %c0_259], %191 {strides = array<i32>} : memref<4x2x4x32xf32, #tpu.memory_space<vmem>>, vector<4x2x1x32xf32>,
    %192 = vector.extract_strided_slice %183 {offsets = [0, 4, 0], sizes = [4, 2, 32], strides = [1, 1, 1]} : vector<4x8x32xf32> to vector<4x2x32xf32>
    %c0_260 = arith.constant 0 : index
    %c0_261 = arith.constant 0 : index
    %c2_262 = arith.constant 2 : index
    %c0_263 = arith.constant 0 : index
    %193 = vector.load %arg17[%c0_260, %c0_261, %c2_262, %c0_263] : memref<4x2x4x32xf32, #tpu.memory_space<vmem>>, vector<4x2x1x32xf32>
    %194 = vector.shape_cast %193 : vector<4x2x1x32xf32> to vector<4x2x32xf32>
    %195 = vector.shape_cast %192 : vector<4x2x32xf32> to vector<4x2x1x32xf32>
    tpu.vector_store %arg17[%c0_260, %c0_261, %c2_262, %c0_263], %195 {strides = array<i32>} : memref<4x2x4x32xf32, #tpu.memory_space<vmem>>, vector<4x2x1x32xf32>,
    %196 = vector.extract_strided_slice %183 {offsets = [0, 6, 0], sizes = [4, 2, 32], strides = [1, 1, 1]} : vector<4x8x32xf32> to vector<4x2x32xf32>
    %c0_264 = arith.constant 0 : index
    %c0_265 = arith.constant 0 : index
    %c3_266 = arith.constant 3 : index
    %c0_267 = arith.constant 0 : index
    %197 = vector.load %arg17[%c0_264, %c0_265, %c3_266, %c0_267] : memref<4x2x4x32xf32, #tpu.memory_space<vmem>>, vector<4x2x1x32xf32>
    %198 = vector.shape_cast %197 : vector<4x2x1x32xf32> to vector<4x2x32xf32>
    %199 = vector.shape_cast %196 : vector<4x2x32xf32> to vector<4x2x1x32xf32>
    tpu.vector_store %arg17[%c0_264, %c0_265, %c3_266, %c0_267], %199 {strides = array<i32>} : memref<4x2x4x32xf32, #tpu.memory_space<vmem>>, vector<4x2x1x32xf32>,
    %c0_268 = arith.constant 0 : index
    %c0_269 = arith.constant 0 : index
    %c0_270 = arith.constant 0 : index
    %c0_271 = arith.constant 0 : index
    %200 = vector.load %arg17[%c0_268, %c0_269, %c0_270, %c0_271] : memref<4x2x4x32xf32, #tpu.memory_space<vmem>>, vector<4x1x4x32xf32>
    %201 = vector.shape_cast %200 : vector<4x1x4x32xf32> to vector<4x4x32xf32>
    %c0_272 = arith.constant 0 : index
    %c1_273 = arith.constant 1 : index
    %c0_274 = arith.constant 0 : index
    %c0_275 = arith.constant 0 : index
    %202 = vector.load %arg17[%c0_272, %c1_273, %c0_274, %c0_275] : memref<4x2x4x32xf32, #tpu.memory_space<vmem>>, vector<4x1x4x32xf32>
    %203 = vector.shape_cast %202 : vector<4x1x4x32xf32> to vector<4x4x32xf32>
    %204 = arith.maximumf %201, %203 : vector<4x4x32xf32>
    %cst_276 = arith.constant 0.000000e+00 : f32
    %205 = vector.broadcast %cst_276 : f32 to vector<1x4x32xf32>
    %cst_277 = arith.constant 0.000000e+00 : f32
    %206 = vector.broadcast %cst_277 : f32 to vector<4x1x32xf32>
    %207 = vector.extract_strided_slice %204 {offsets = [0, 0, 0], sizes = [3, 3, 32], strides = [1, 1, 1]} : vector<4x4x32xf32> to vector<3x3x32xf32>
    %c1_278 = arith.constant 1 : index
    %c1_279 = arith.constant 1 : index
    %c0_280 = arith.constant 0 : index
    %208 = vector.load %arg15[%c1_278, %c1_279, %c0_280] : memref<4x4x288xf32, #tpu.memory_space<vmem>>, vector<3x3x32xf32>
    tpu.vector_store %arg15[%c1_278, %c1_279, %c0_280], %207 {strides = array<i32>} : memref<4x4x288xf32, #tpu.memory_space<vmem>>, vector<3x3x32xf32>,
    %c0_281 = arith.constant 0 : index
    %c0_282 = arith.constant 0 : index
    %c0_283 = arith.constant 0 : index
    %209 = vector.load %arg15[%c0_281, %c0_282, %c0_283] : memref<4x4x288xf32, #tpu.memory_space<vmem>>, vector<1x4x32xf32>
    tpu.vector_store %arg15[%c0_281, %c0_282, %c0_283], %205 {strides = array<i32>} : memref<4x4x288xf32, #tpu.memory_space<vmem>>, vector<1x4x32xf32>,
    %c0_284 = arith.constant 0 : index
    %c0_285 = arith.constant 0 : index
    %c0_286 = arith.constant 0 : index
    %210 = vector.load %arg15[%c0_284, %c0_285, %c0_286] : memref<4x4x288xf32, #tpu.memory_space<vmem>>, vector<4x1x32xf32>
    tpu.vector_store %arg15[%c0_284, %c0_285, %c0_286], %206 {strides = array<i32>} : memref<4x4x288xf32, #tpu.memory_space<vmem>>, vector<4x1x32xf32>,
    %211 = vector.extract_strided_slice %204 {offsets = [0, 0, 0], sizes = [3, 4, 32], strides = [1, 1, 1]} : vector<4x4x32xf32> to vector<3x4x32xf32>
    %c1_287 = arith.constant 1 : index
    %c0_288 = arith.constant 0 : index
    %c32_289 = arith.constant 32 : index
    %212 = vector.load %arg15[%c1_287, %c0_288, %c32_289] : memref<4x4x288xf32, #tpu.memory_space<vmem>>, vector<3x4x32xf32>
    tpu.vector_store %arg15[%c1_287, %c0_288, %c32_289], %211 {strides = array<i32>} : memref<4x4x288xf32, #tpu.memory_space<vmem>>, vector<3x4x32xf32>,
    %c0_290 = arith.constant 0 : index
    %c0_291 = arith.constant 0 : index
    %c32_292 = arith.constant 32 : index
    %213 = vector.load %arg15[%c0_290, %c0_291, %c32_292] : memref<4x4x288xf32, #tpu.memory_space<vmem>>, vector<1x4x32xf32>
    tpu.vector_store %arg15[%c0_290, %c0_291, %c32_292], %205 {strides = array<i32>} : memref<4x4x288xf32, #tpu.memory_space<vmem>>, vector<1x4x32xf32>,
    %214 = vector.extract_strided_slice %204 {offsets = [0, 1, 0], sizes = [3, 3, 32], strides = [1, 1, 1]} : vector<4x4x32xf32> to vector<3x3x32xf32>
    %c1_293 = arith.constant 1 : index
    %c0_294 = arith.constant 0 : index
    %c64_295 = arith.constant 64 : index
    %215 = vector.load %arg15[%c1_293, %c0_294, %c64_295] : memref<4x4x288xf32, #tpu.memory_space<vmem>>, vector<3x3x32xf32>
    tpu.vector_store %arg15[%c1_293, %c0_294, %c64_295], %214 {strides = array<i32>} : memref<4x4x288xf32, #tpu.memory_space<vmem>>, vector<3x3x32xf32>,
    %c0_296 = arith.constant 0 : index
    %c0_297 = arith.constant 0 : index
    %c64_298 = arith.constant 64 : index
    %216 = vector.load %arg15[%c0_296, %c0_297, %c64_298] : memref<4x4x288xf32, #tpu.memory_space<vmem>>, vector<1x4x32xf32>
    tpu.vector_store %arg15[%c0_296, %c0_297, %c64_298], %205 {strides = array<i32>} : memref<4x4x288xf32, #tpu.memory_space<vmem>>, vector<1x4x32xf32>,
    %c0_299 = arith.constant 0 : index
    %c3_300 = arith.constant 3 : index
    %c64_301 = arith.constant 64 : index
    %217 = vector.load %arg15[%c0_299, %c3_300, %c64_301] : memref<4x4x288xf32, #tpu.memory_space<vmem>>, vector<4x1x32xf32>
    tpu.vector_store %arg15[%c0_299, %c3_300, %c64_301], %206 {strides = array<i32>} : memref<4x4x288xf32, #tpu.memory_space<vmem>>, vector<4x1x32xf32>,
    %218 = vector.extract_strided_slice %204 {offsets = [0, 0, 0], sizes = [4, 3, 32], strides = [1, 1, 1]} : vector<4x4x32xf32> to vector<4x3x32xf32>
    %c0_302 = arith.constant 0 : index
    %c1_303 = arith.constant 1 : index
    %c96_304 = arith.constant 96 : index
    %219 = vector.load %arg15[%c0_302, %c1_303, %c96_304] : memref<4x4x288xf32, #tpu.memory_space<vmem>>, vector<4x3x32xf32>
    tpu.vector_store %arg15[%c0_302, %c1_303, %c96_304], %218 {strides = array<i32>} : memref<4x4x288xf32, #tpu.memory_space<vmem>>, vector<4x3x32xf32>,
    %c0_305 = arith.constant 0 : index
    %c0_306 = arith.constant 0 : index
    %c96_307 = arith.constant 96 : index
    %220 = vector.load %arg15[%c0_305, %c0_306, %c96_307] : memref<4x4x288xf32, #tpu.memory_space<vmem>>, vector<4x1x32xf32>
    tpu.vector_store %arg15[%c0_305, %c0_306, %c96_307], %206 {strides = array<i32>} : memref<4x4x288xf32, #tpu.memory_space<vmem>>, vector<4x1x32xf32>,
    %c0_308 = arith.constant 0 : index
    %c0_309 = arith.constant 0 : index
    %c128_310 = arith.constant 128 : index
    %221 = vector.load %arg15[%c0_308, %c0_309, %c128_310] : memref<4x4x288xf32, #tpu.memory_space<vmem>>, vector<4x4x32xf32>
    tpu.vector_store %arg15[%c0_308, %c0_309, %c128_310], %204 {strides = array<i32>} : memref<4x4x288xf32, #tpu.memory_space<vmem>>, vector<4x4x32xf32>,
    %222 = vector.extract_strided_slice %204 {offsets = [0, 1, 0], sizes = [4, 3, 32], strides = [1, 1, 1]} : vector<4x4x32xf32> to vector<4x3x32xf32>
    %c0_311 = arith.constant 0 : index
    %c0_312 = arith.constant 0 : index
    %c160_313 = arith.constant 160 : index
    %223 = vector.load %arg15[%c0_311, %c0_312, %c160_313] : memref<4x4x288xf32, #tpu.memory_space<vmem>>, vector<4x3x32xf32>
    tpu.vector_store %arg15[%c0_311, %c0_312, %c160_313], %222 {strides = array<i32>} : memref<4x4x288xf32, #tpu.memory_space<vmem>>, vector<4x3x32xf32>,
    %c0_314 = arith.constant 0 : index
    %c3_315 = arith.constant 3 : index
    %c160_316 = arith.constant 160 : index
    %224 = vector.load %arg15[%c0_314, %c3_315, %c160_316] : memref<4x4x288xf32, #tpu.memory_space<vmem>>, vector<4x1x32xf32>
    tpu.vector_store %arg15[%c0_314, %c3_315, %c160_316], %206 {strides = array<i32>} : memref<4x4x288xf32, #tpu.memory_space<vmem>>, vector<4x1x32xf32>,
    %225 = vector.extract_strided_slice %204 {offsets = [1, 0, 0], sizes = [3, 3, 32], strides = [1, 1, 1]} : vector<4x4x32xf32> to vector<3x3x32xf32>
    %c0_317 = arith.constant 0 : index
    %c1_318 = arith.constant 1 : index
    %c192_319 = arith.constant 192 : index
    %226 = vector.load %arg15[%c0_317, %c1_318, %c192_319] : memref<4x4x288xf32, #tpu.memory_space<vmem>>, vector<3x3x32xf32>
    tpu.vector_store %arg15[%c0_317, %c1_318, %c192_319], %225 {strides = array<i32>} : memref<4x4x288xf32, #tpu.memory_space<vmem>>, vector<3x3x32xf32>,
    %c3_320 = arith.constant 3 : index
    %c0_321 = arith.constant 0 : index
    %c192_322 = arith.constant 192 : index
    %227 = vector.load %arg15[%c3_320, %c0_321, %c192_322] : memref<4x4x288xf32, #tpu.memory_space<vmem>>, vector<1x4x32xf32>
    tpu.vector_store %arg15[%c3_320, %c0_321, %c192_322], %205 {strides = array<i32>} : memref<4x4x288xf32, #tpu.memory_space<vmem>>, vector<1x4x32xf32>,
    %c0_323 = arith.constant 0 : index
    %c0_324 = arith.constant 0 : index
    %c192_325 = arith.constant 192 : index
    %228 = vector.load %arg15[%c0_323, %c0_324, %c192_325] : memref<4x4x288xf32, #tpu.memory_space<vmem>>, vector<4x1x32xf32>
    tpu.vector_store %arg15[%c0_323, %c0_324, %c192_325], %206 {strides = array<i32>} : memref<4x4x288xf32, #tpu.memory_space<vmem>>, vector<4x1x32xf32>,
    %229 = vector.extract_strided_slice %204 {offsets = [1, 0, 0], sizes = [3, 4, 32], strides = [1, 1, 1]} : vector<4x4x32xf32> to vector<3x4x32xf32>
    %c0_326 = arith.constant 0 : index
    %c0_327 = arith.constant 0 : index
    %c224_328 = arith.constant 224 : index
    %230 = vector.load %arg15[%c0_326, %c0_327, %c224_328] : memref<4x4x288xf32, #tpu.memory_space<vmem>>, vector<3x4x32xf32>
    tpu.vector_store %arg15[%c0_326, %c0_327, %c224_328], %229 {strides = array<i32>} : memref<4x4x288xf32, #tpu.memory_space<vmem>>, vector<3x4x32xf32>,
    %c3_329 = arith.constant 3 : index
    %c0_330 = arith.constant 0 : index
    %c224_331 = arith.constant 224 : index
    %231 = vector.load %arg15[%c3_329, %c0_330, %c224_331] : memref<4x4x288xf32, #tpu.memory_space<vmem>>, vector<1x4x32xf32>
    tpu.vector_store %arg15[%c3_329, %c0_330, %c224_331], %205 {strides = array<i32>} : memref<4x4x288xf32, #tpu.memory_space<vmem>>, vector<1x4x32xf32>,
    %232 = vector.extract_strided_slice %204 {offsets = [1, 1, 0], sizes = [3, 3, 32], strides = [1, 1, 1]} : vector<4x4x32xf32> to vector<3x3x32xf32>
    %c0_332 = arith.constant 0 : index
    %c0_333 = arith.constant 0 : index
    %c256_334 = arith.constant 256 : index
    %233 = vector.load %arg15[%c0_332, %c0_333, %c256_334] : memref<4x4x288xf32, #tpu.memory_space<vmem>>, vector<3x3x32xf32>
    tpu.vector_store %arg15[%c0_332, %c0_333, %c256_334], %232 {strides = array<i32>} : memref<4x4x288xf32, #tpu.memory_space<vmem>>, vector<3x3x32xf32>,
    %c3_335 = arith.constant 3 : index
    %c0_336 = arith.constant 0 : index
    %c256_337 = arith.constant 256 : index
    %234 = vector.load %arg15[%c3_335, %c0_336, %c256_337] : memref<4x4x288xf32, #tpu.memory_space<vmem>>, vector<1x4x32xf32>
    tpu.vector_store %arg15[%c3_335, %c0_336, %c256_337], %205 {strides = array<i32>} : memref<4x4x288xf32, #tpu.memory_space<vmem>>, vector<1x4x32xf32>,
    %c0_338 = arith.constant 0 : index
    %c3_339 = arith.constant 3 : index
    %c256_340 = arith.constant 256 : index
    %235 = vector.load %arg15[%c0_338, %c3_339, %c256_340] : memref<4x4x288xf32, #tpu.memory_space<vmem>>, vector<4x1x32xf32>
    tpu.vector_store %arg15[%c0_338, %c3_339, %c256_340], %206 {strides = array<i32>} : memref<4x4x288xf32, #tpu.memory_space<vmem>>, vector<4x1x32xf32>,
    %c0_341 = arith.constant 0 : index
    %c0_342 = arith.constant 0 : index
    %c0_343 = arith.constant 0 : index
    %236 = vector.load %arg15[%c0_341, %c0_342, %c0_343] : memref<4x4x288xf32, #tpu.memory_space<vmem>>, vector<4x4x288xf32>
    %c0_344 = arith.constant 0 : index
    %c0_345 = arith.constant 0 : index
    %237 = vector.load %arg9[%c0_344, %c0_345] : memref<288x1xf32, #tpu.memory_space<vmem>>, vector<288x1xf32>
    "tpu.trace_start"() <{level = 10 : i32, message = "hwk,ko->hwo"}> : () -> ()
    %cst_346 = arith.constant dense<0.000000e+00> : vector<4x4x1xf32>
    %238 = tpu.matmul %236, %237, %cst_346 {dimension_numbers = #tpu.dot_dimension_numbers<[2], [0], [0, 1], [1], [0, 0, 0, 1, 1, 1], [], []>} : vector<4x4x288xf32>, vector<288x1xf32>, vector<4x4x1xf32> -> vector<4x4x1xf32>
    "tpu.trace_stop"() : () -> ()
    %c0_347 = arith.constant 0 : index
    %c0_348 = arith.constant 0 : index
    %c0_349 = arith.constant 0 : index
    %239 = vector.load %arg10[%c0_347, %c0_348, %c0_349] : memref<1x1x1xf32, #tpu.memory_space<vmem>>, vector<1x1x1xf32>
    %240 = vector.broadcast %239 : vector<1x1x1xf32> to vector<4x4x1xf32>
    %241 = arith.addf %238, %240 : vector<4x4x1xf32>
    %c0_350 = arith.constant 0 : index
    %c0_351 = arith.constant 0 : index
    %c0_352 = arith.constant 0 : index
    %c0_353 = arith.constant 0 : index
    %242 = vector.load %arg11[%c0_350, %c0_351, %c0_352, %c0_353] : memref<1x4x4x1xf32, #tpu.memory_space<vmem>>, vector<1x4x4x1xf32>
    %243 = vector.shape_cast %242 : vector<1x4x4x1xf32> to vector<4x4x1xf32>
    %244 = vector.shape_cast %241 : vector<4x4x1xf32> to vector<1x4x4x1xf32>
    tpu.vector_store %arg11[%c0_350, %c0_351, %c0_352, %c0_353], %244 {strides = array<i32>} : memref<1x4x4x1xf32, #tpu.memory_space<vmem>>, vector<1x4x4x1xf32>,
    return
  }
  func.func @transform_0(%arg0: i32) -> (i32, i32, i32) {
    %c0_i32 = arith.constant 0 : i32
    %c0_i32_0 = arith.constant 0 : i32
    %c0_i32_1 = arith.constant 0 : i32
    %c0_i32_2 = arith.constant 0 : i32
    return %c0_i32, %c0_i32_0, %c0_i32_1 : i32, i32, i32
  }
  func.func @transform_1(%arg0: i32) -> (i32, i32, i32, i32) {
    %c0_i32 = arith.constant 0 : i32
    %c0_i32_0 = arith.constant 0 : i32
    %c0_i32_1 = arith.constant 0 : i32
    %c0_i32_2 = arith.constant 0 : i32
    return %arg0, %c0_i32, %c0_i32_0, %c0_i32_1 : i32, i32, i32, i32
  }
  func.func @transform_2(%arg0: i32) -> (i32, i32) {
    %c0_i32 = arith.constant 0 : i32
    %c0_i32_0 = arith.constant 0 : i32
    %c0_i32_1 = arith.constant 0 : i32
    return %c0_i32, %c0_i32_0 : i32, i32
  }
  func.func @transform_3(%arg0: i32) -> (i32, i32, i32) {
    %c0_i32 = arith.constant 0 : i32
    %c0_i32_0 = arith.constant 0 : i32
    %c0_i32_1 = arith.constant 0 : i32
    %c0_i32_2 = arith.constant 0 : i32
    return %c0_i32, %c0_i32_0, %c0_i32_1 : i32, i32, i32
  }
  func.func @transform_4(%arg0: i32) -> (i32, i32) {
    %c0_i32 = arith.constant 0 : i32
    %c0_i32_0 = arith.constant 0 : i32
    %c0_i32_1 = arith.constant 0 : i32
    return %c0_i32, %c0_i32_0 : i32, i32
  }
  func.func @transform_5(%arg0: i32) -> (i32, i32, i32) {
    %c0_i32 = arith.constant 0 : i32
    %c0_i32_0 = arith.constant 0 : i32
    %c0_i32_1 = arith.constant 0 : i32
    %c0_i32_2 = arith.constant 0 : i32
    return %c0_i32, %c0_i32_0, %c0_i32_1 : i32, i32, i32
  }
  func.func @transform_6(%arg0: i32) -> (i32, i32) {
    %c0_i32 = arith.constant 0 : i32
    %c0_i32_0 = arith.constant 0 : i32
    %c0_i32_1 = arith.constant 0 : i32
    return %c0_i32, %c0_i32_0 : i32, i32
  }
  func.func @transform_7(%arg0: i32) -> (i32, i32, i32) {
    %c0_i32 = arith.constant 0 : i32
    %c0_i32_0 = arith.constant 0 : i32
    %c0_i32_1 = arith.constant 0 : i32
    %c0_i32_2 = arith.constant 0 : i32
    return %c0_i32, %c0_i32_0, %c0_i32_1 : i32, i32, i32
  }
  func.func @transform_8(%arg0: i32) -> (i32, i32) {
    %c0_i32 = arith.constant 0 : i32
    %c0_i32_0 = arith.constant 0 : i32
    %c0_i32_1 = arith.constant 0 : i32
    return %c0_i32, %c0_i32_0 : i32, i32
  }
  func.func @transform_9(%arg0: i32) -> (i32, i32, i32) {
    %c0_i32 = arith.constant 0 : i32
    %c0_i32_0 = arith.constant 0 : i32
    %c0_i32_1 = arith.constant 0 : i32
    %c0_i32_2 = arith.constant 0 : i32
    return %c0_i32, %c0_i32_0, %c0_i32_1 : i32, i32, i32
  }
  func.func @transform_10(%arg0: i32) -> (i32, i32, i32, i32) {
    %c0_i32 = arith.constant 0 : i32
    %c0_i32_0 = arith.constant 0 : i32
    %c0_i32_1 = arith.constant 0 : i32
    %c0_i32_2 = arith.constant 0 : i32
    return %arg0, %c0_i32, %c0_i32_0, %c0_i32_1 : i32, i32, i32, i32
  }
}

</mosaic_0001>

<bundles_post_ra>
// kernel: downscale_forward.1
= control target key start
LH: loop header
LB: loop body
LE: loop exit
PB: predicated region body
PF: predicated region fallthrough
CT: control target
= control target key end

     0   :  { %s7371_s17 = smov 0   ;;  %s11452_s0 = inlined_call_operand.<no memory space> [shape: f32[1,1,1], index: 0, kind: input, shape index: {}]   ;;  %s11453_s1 = inlined_call_operand.vmem [shape: f32[2,16,16,1], index: 1, kind: input, shape index: {}]   ;;  %s11454_s2 = inlined_call_operand.vmem [shape: f32[9,32], index: 2, kind: input, shape index: {}]   ;;  %s11455_s3 = inlined_call_operand.vmem [shape: f32[1,1,32], index: 3, kind: input, shape index: {}]   ;;  %s11456_s4 = inlined_call_operand.vmem [shape: f32[288,64], index: 4, kind: input, shape index: {}]   ;;  %s11457_s5 = inlined_call_operand.vmem [shape: f32[1,1,64], index: 5, kind: input, shape index: {}]   ;;  %s11458_s6 = inlined_call_operand.vmem [shape: f32[576,32], index: 6, kind: input, shape index: {}]   ;;  %s11459_s7 = inlined_call_operand.vmem [shape: f32[1,1,32], index: 7, kind: input, shape index: {}]   ;;  %s11460_s8 = inlined_call_operand.vmem [shape: f32[288,1], index: 8, kind: input, shape index: {}]   ;;  %s11461_s10 = inlined_call_operand.vmem [shape: f32[2,4,4,1], index: 10, kind: output, shape index: {}]   ;;  %s11462_s9 = inlined_call_operand.<no memory space> [shape: f32[1,1,1], index: 9, kind: input, shape index: {}]  }
   0x1   :  { %v15_v0 = vstv %s11452_s0  ;;  %v17_v1 = vstv %s11462_s9 }
   0x2   :  { %16 = vst [vmem:[#allocation8] sm:$0x1] %v15_v0  ;;  %18 = vst [vmem:[#allocation9] sm:$0x1] %v17_v1 }
   0x3 LB: > { %s6586_s18 = sadd.s32 4294967295, %s7292_s17   ;;  %p6590_p0 = scmp.ge.s32.totalorder %s7292_s17, 1  ;;  %s7292_s17 = sphi %s7371_s17, %s24_s17  }
   0x4   : > { %p316_p1 = scmp.lt.s32.totalorder %s7292_s17, 3 }
   0x6   : > { %p317_p2 = pnand %p6590_p0, %p316_p1 }
   0x8   : > { %320 = sbr.rel (%p317_p2) target bundleno = 2156 (0x86c), region = 60 }
   0xf   : > { %p7379_p3 = scmp.lt.s32.totalorder %s6586_s18, 1  ;;  %vm11471_vm0 = vcmask 7168   ;;  %vm432_vm1 = vcmask 0   ;;  %vm11469_vm2 = vcmask 15368   ;;  %v11476_v2 = vmov 0.0   ;;  %s7295_s22 = smov 4  }
  0x10   : > { %430 = vst.msk [vmem:[#allocation2] sm:$0xff] %vm11471_vm0, %v11476_v2  ;;  %431 = vst.msk [vmem:[#allocation2 + $0x8] sm:$0xff] %vm11471_vm0, %v11476_v2  ;;  %vm11472_vm3 = vcmask 23568   ;;  %vm11470_vm4 = vcmask 16400   ;;  %vm11464_vm5 = vcmask 24600   ;;  %vm400_vm6 = vcmask 6144  }
  0x11   : > { %434 = vst.msk [vmem:[#allocation2 + $0x10] sm:$0x1] %vm432_vm1, %v11476_v2  ;;  %435 = vst.msk [vmem:[#allocation2 + $0x20] sm:$0x1] %vm432_vm1, %v11476_v2  ;;  %s11762_s18 = smov (!%p7379_p3, %s6586_s18), 1  ;;  %s7296_s23 = smov 3  }
  0x12   : > { %436 = vst.msk [vmem:[#allocation2 + $0x30] sm:$0x1] %vm432_vm1, %v11476_v2  ;;  %437 = vst.msk [vmem:[#allocation2 + $0x40] sm:$0x1] %vm432_vm1, %v11476_v2  ;;  %s6677_s9 = sshll.u32 %s11762_s18, 8  ;;  %s7297_s24 = smov 1  }
  0x13   : > { %438 = vst.msk [vmem:[#allocation2 + $0x50] sm:$0x1] %vm432_vm1, %v11476_v2  ;;  %439 = vst.msk [vmem:[#allocation2 + $0x60] sm:$0x1] %vm432_vm1, %v11476_v2  ;;  %s7437_s21 = scalar_lea.vmem %s11453_s1, %s6677_s9  ;;  %s7298_s25 = smov 5   ;;  %v1606_v15 = vld [vmem:[%s11454_s2] sm:$0xff] }
  0x14   : > { %440 = vst.msk [vmem:[#allocation2 + $0x70] sm:$0x1] %vm432_vm1, %v11476_v2  ;;  %441 = vst.msk [vmem:[#allocation2 + $0x80] sm:$0x1] %vm432_vm1, %v11476_v2  ;;  %v365_v3 = vld [vmem:[%s7437_s21] sm:$0xff]  ;;  %v366_v4 = vld [vmem:[%s7437_s21 + $0x8] sm:$0xff] }
  0x15   : > { %442 = vst.msk [vmem:[#allocation2 + $0x90] sm:$0x1] %vm432_vm1, %v11476_v2  ;;  %443 = vst.msk [vmem:[#allocation2 + $0xa0] sm:$0x1] %vm432_vm1, %v11476_v2  ;;  %v7444_v5 = vld [vmem:[%s7437_s21 + $0x18] sm:$0xff]  ;;  %892 = vrot.lane.b32.xlu1 %v365_v3, %s7295_s22  ;;  %745 = vrot.lane.b32.xlu0 %v365_v3, %s7296_s23  ;;  %v7449_v6 = vld [vmem:[%s7437_s21 + $0x10] sm:$0xff] }
  0x16   : > { %444 = vst.msk [vmem:[#allocation2 + $0xb0] sm:$0x1] %vm432_vm1, %v11476_v2  ;;  %445 = vst.msk [vmem:[#allocation2 + $0xc0] sm:$0x1] %vm432_vm1, %v11476_v2  ;;  %v7452_v7 = vld [vmem:[%s7437_s21 + $0x28] sm:$0xff]  ;;  %v7459_v8 = vld [vmem:[%s7437_s21 + $0x20] sm:$0xff] }
  0x17   : > { %446 = vst.msk [vmem:[#allocation2 + $0xd0] sm:$0x1] %vm432_vm1, %v11476_v2  ;;  %447 = vst.msk [vmem:[#allocation2 + $0xe0] sm:$0x1] %vm432_vm1, %v11476_v2  ;;  %v7462_v9 = vld [vmem:[%s7437_s21 + $0x38] sm:$0xff]  ;;  %v7465_v10 = vld [vmem:[%s7437_s21 + $0x30] sm:$0xff] }
  0x18   : > { %448 = vst.msk [vmem:[#allocation2 + $0xf0] sm:$0x1] %vm432_vm1, %v11476_v2  ;;  %433 = vst.msk [vmem:[#allocation2] sm:$0x1] %vm432_vm1, %v11476_v2  ;;  %v7472_v11 = vld [vmem:[%s7437_s21 + $0x48] sm:$0xff]  ;;  %v7475_v12 = vld [vmem:[%s7437_s21 + $0x40] sm:$0xff] }
  0x19   : > { %601 = vst.msk [vmem:[#allocation2 + $0x8] sm:$0xff] %vm11469_vm2, %v11476_v2  ;;  %600 = vst.msk [vmem:[#allocation2] sm:$0xff] %vm11469_vm2, %v11476_v2  ;;  %894 = vrot.lane.b32.xlu1 %v366_v4, %s7295_s22  ;;  %747 = vrot.lane.b32.xlu0 %v366_v4, %s7296_s23  ;;  %v7492_v13 = vld [vmem:[%s7437_s21 + $0x58] sm:$0xff]  ;;  %v7495_v14 = vld [vmem:[%s7437_s21 + $0x50] sm:$0xff]  ;;  %s7299_s26 = smov 2   ;;  %s7300_s27 = smov 6  }
  0x1a   : > { %725 = vst.msk [vmem:[#allocation2 + $0x8] sm:$0xff] %vm11472_vm3, %v11476_v2  ;;  %724 = vst.msk [vmem:[#allocation2] sm:$0xff] %vm11472_vm3, %v11476_v2  ;;  %s7301_s28 = smov 7   ;;  %s7302_s29 = smov 8   ;;  %v1607_v16 = vld [vmem:[%s11454_s2 + $0x8] sm:$0x1] }
  0x1b   : > { %727 = vst.msk [vmem:[#allocation2 + $0xf] sm:$0x1] %vm11470_vm4, %v11476_v2  ;;  %vm11463_vm7 = vcmask 1040384   ;;  %v7068_v17 = vpack.c.bf16 %v1607_v16, %v1606_v15  ;;  %vm7303_vm8 = vmmov 1   ;;  %v7537_v18 = vld [vmem:[%s7437_s21 + $0x68] sm:$0xff]  ;;  %v7540_v19 = vld [vmem:[%s7437_s21 + $0x60] sm:$0xff] }
  0x1c   : > { %876 = vst.msk [vmem:[#allocation2] sm:$0x1] %vm11464_vm5, %v11476_v2  ;;  %vm7069_vm9 = vmpackc.low %vm11463_vm7, %vm7303_vm8  ;;  %v7579_v20 = vld [vmem:[%s7437_s21 + $0x78] sm:$0xff]  ;;  %v7582_v21 = vld [vmem:[%s7437_s21 + $0x70] sm:$0xff]  ;;  %vm11466_vm10 = vcmask 31768   ;;  %vm988_vm11 = vcmask 39968  }
  0x1d   : > { %399 = vst.msk [vmem:[#allocation2 + $0x11] sm:$0xff] %vm11471_vm0, %v365_v3  ;;  %402 = vst.msk [vmem:[#allocation2 + $0x21] sm:$0xff] %vm11471_vm0, %v7449_v6  ;;  %481 = vrot.lane.b32.xlu1 %v366_v4, %s7297_s24  ;;  %479 = vrot.lane.b32.xlu0 %v365_v3, %s7297_s24  ;;  %v7621_v22 = vld [vmem:[%s7437_s21 + $0x88] sm:$0xff]  ;;  %v7624_v23 = vld [vmem:[%s7437_s21 + $0x80] sm:$0xff]  ;;  %vm11465_vm12 = vcmask 30744   ;;  %vm11468_vm13 = vcmask 41000  }
  0x1e   : > { %401 = vst.msk [vmem:[#allocation2 + $0x19] sm:$0x7f] %vm400_vm6, %v366_v4  ;;  %403 = vst.msk [vmem:[#allocation2 + $0x29] sm:$0x7f] %vm400_vm6, %v7444_v5  ;;  %7070 = vmatprep.subr.msk.bf16.mxu0 %vm7069_vm9, %v7068_v17  ;;  %vm1119_vm14 = vcmask 48168   ;;  %vm1117_vm15 = vcmask 48169  }
  0x1f   : > { %405 = vst.msk [vmem:[#allocation2 + $0x39] sm:$0x7f] %vm400_vm6, %v7452_v7  ;;  %407 = vst.msk [vmem:[#allocation2 + $0x49] sm:$0x7f] %vm400_vm6, %v7462_v9  ;;  %7073 = vmatpush3.bf16.msk.msra.mxu0 %vm7069_vm9, %v7068_v17  ;;  %vm1293_vm1 = vcmask 49200   ;;  %vm11467_vm8 = vcmask 23569  }
  0x20   : > { %404 = vst.msk [vmem:[#allocation2 + $0x31] sm:$0xff] %vm11471_vm0, %v7459_v8  ;;  %406 = vst.msk [vmem:[#allocation2 + $0x41] sm:$0xff] %vm11471_vm0, %v7465_v10  ;;  %vm1260_vm9 = vcmask 55344   ;;  %vm1258_vm7 = vcmask 56368   ;;  %v7685_v38 = vld [vmem:[%s7437_s21 + $0x98] sm:$0xff]  ;;  %v7688_v39 = vld [vmem:[%s7437_s21 + $0x90] sm:$0xff] }
  0x21   : > { %408 = vst.msk [vmem:[#allocation2 + $0x51] sm:$0xff] %vm11471_vm0, %v7475_v12  ;;  %1023 = vrot.lane.b32.xlu1 %v366_v4, %s7298_s25  ;;  %1021 = vrot.lane.b32.xlu0 %v365_v3, %s7298_s25  ;;  %410 = vst.msk [vmem:[#allocation2 + $0x61] sm:$0xff] %vm11471_vm0, %v7495_v14  ;;  %v7753_v58 = vld [vmem:[%s7437_s21 + $0xa8] sm:$0xff]  ;;  %v7756_v59 = vld [vmem:[%s7437_s21 + $0xa0] sm:$0xff]  ;;  %s7308_s30 = smov 64   ;;  %s6678_s16 = sshll.u32 %s11762_s18, 4 }
  0x22   : > { %409 = vst.msk [vmem:[#allocation2 + $0x59] sm:$0x7f] %vm400_vm6, %v7472_v11  ;;  %411 = vst.msk [vmem:[#allocation2 + $0x69] sm:$0x7f] %vm400_vm6, %v7492_v13  ;;  %v7823_v15 = vld [vmem:[%s7437_s21 + $0xb8] sm:$0xff]  ;;  %v7826_v16 = vld [vmem:[%s7437_s21 + $0xb0] sm:$0xff]  ;;  %s363_s19 = scalar_lea.vmem %s11461_s10, %s6678_s16 }
  0x23   : > { %413 = vst.msk [vmem:[#allocation2 + $0x79] sm:$0x7f] %vm400_vm6, %v7537_v18  ;;  %415 = vst.msk [vmem:[#allocation2 + $0x89] sm:$0x7f] %vm400_vm6, %v7579_v20 }
  0x24   : > { %412 = vst.msk [vmem:[#allocation2 + $0x71] sm:$0xff] %vm11471_vm0, %v7540_v19  ;;  %414 = vst.msk [vmem:[#allocation2 + $0x81] sm:$0xff] %vm11471_vm0, %v7582_v21 }
  0x25   : > { %604 = vrot.lane.b32.xlu1 %v366_v4, %s7299_s26  ;;  %602 = vrot.lane.b32.xlu0 %v365_v3, %s7299_s26  ;;  %417 = vst.msk [vmem:[#allocation2 + $0x99] sm:$0x7f] %vm400_vm6, %v7621_v22  ;;  %419 = vst.msk [vmem:[#allocation2 + $0xa9] sm:$0x7f] %vm400_vm6, %v7685_v38 }
  0x26   : > { %416 = vst.msk [vmem:[#allocation2 + $0x91] sm:$0xff] %vm11471_vm0, %v7624_v23  ;;  %418 = vst.msk [vmem:[#allocation2 + $0xa1] sm:$0xff] %vm11471_vm0, %v7688_v39 }
  0x27   : > { %421 = vst.msk [vmem:[#allocation2 + $0xb9] sm:$0x7f] %vm400_vm6, %v7753_v58  ;;  %423 = vst.msk [vmem:[#allocation2 + $0xc9] sm:$0x7f] %vm400_vm6, %v7823_v15 }
  0x28   : > { %420 = vst.msk [vmem:[#allocation2 + $0xb1] sm:$0xff] %vm11471_vm0, %v7756_v59  ;;  %vm11493_vm0 = vcmask 30744  }
  0x29   : > { %1170 = vrot.lane.b32.xlu1 %v7444_v5, %s7300_s27  ;;  %1168 = vrot.lane.b32.xlu0 %v7449_v6, %s7300_s27 }
  0x2d   : > { %751 = vrot.lane.b32.xlu1 %v7444_v5, %s7296_s23  ;;  %749 = vrot.lane.b32.xlu0 %v7449_v6, %s7296_s23 }
  0x31   : > { %1312 = vrot.lane.b32.xlu1 %v7444_v5, %s7301_s28  ;;  %1310 = vrot.lane.b32.xlu0 %v7449_v6, %s7301_s28 }
  0x35   : > { %898 = vrot.lane.b32.xlu1 %v7444_v5, %s7295_s22  ;;  %896 = vrot.lane.b32.xlu0 %v7449_v6, %s7295_s22 }
  0x39   : > { %1435 = vrot.lane.b32.xlu1 %v7444_v5, %s7302_s29  ;;  %1433 = vrot.lane.b32.xlu0 %v7449_v6, %s7302_s29 }
  0x3d   : > { %1027 = vrot.lane.b32.xlu1 %v7444_v5, %s7298_s25  ;;  %1025 = vrot.lane.b32.xlu0 %v7449_v6, %s7298_s25 }
  0x41   : > { %1174 = vrot.lane.b32.xlu1 %v7452_v7, %s7300_s27  ;;  %1172 = vrot.lane.b32.xlu0 %v7459_v8, %s7300_s27 }
  0x45   : > { %1316 = vrot.lane.b32.xlu1 %v7452_v7, %s7301_s28  ;;  %1314 = vrot.lane.b32.xlu0 %v7459_v8, %s7301_s28 }
  0x49   : > { %1439 = vrot.lane.b32.xlu1 %v7452_v7, %s7302_s29  ;;  %1437 = vrot.lane.b32.xlu0 %v7459_v8, %s7302_s29 }
  0x4d   : > { %485 = vrot.lane.b32.xlu1 %v7444_v5, %s7297_s24  ;;  %483 = vrot.lane.b32.xlu0 %v7449_v6, %s7297_s24 }
  0x51   : > { %608 = vrot.lane.b32.xlu1 %v7444_v5, %s7299_s26  ;;  %606 = vrot.lane.b32.xlu0 %v7449_v6, %s7299_s26 }
  0x55   : > { %755 = vrot.lane.b32.xlu1 %v7452_v7, %s7296_s23  ;;  %753 = vrot.lane.b32.xlu0 %v7459_v8, %s7296_s23 }
  0x59   : > { %902 = vrot.lane.b32.xlu1 %v7452_v7, %s7295_s22  ;;  %900 = vrot.lane.b32.xlu0 %v7459_v8, %s7295_s22 }
  0x5d   : > { %1031 = vrot.lane.b32.xlu1 %v7452_v7, %s7298_s25  ;;  %1029 = vrot.lane.b32.xlu0 %v7459_v8, %s7298_s25 }
  0x61   : > { %1178 = vrot.lane.b32.xlu1 %v7462_v9, %s7300_s27  ;;  %1176 = vrot.lane.b32.xlu0 %v7465_v10, %s7300_s27 }
  0x65   : > { %1320 = vrot.lane.b32.xlu1 %v7462_v9, %s7301_s28  ;;  %1318 = vrot.lane.b32.xlu0 %v7465_v10, %s7301_s28 }
  0x69   : > { %1443 = vrot.lane.b32.xlu1 %v7462_v9, %s7302_s29  ;;  %1441 = vrot.lane.b32.xlu0 %v7465_v10, %s7302_s29 }
  0x6d   : > { %489 = vrot.lane.b32.xlu1 %v7452_v7, %s7297_s24  ;;  %487 = vrot.lane.b32.xlu0 %v7459_v8, %s7297_s24 }
  0x71   : > { %612 = vrot.lane.b32.xlu1 %v7452_v7, %s7299_s26  ;;  %610 = vrot.lane.b32.xlu0 %v7459_v8, %s7299_s26 }
  0x75   : > { %759 = vrot.lane.b32.xlu1 %v7462_v9, %s7296_s23  ;;  %757 = vrot.lane.b32.xlu0 %v7465_v10, %s7296_s23 }
  0x79   : > { %906 = vrot.lane.b32.xlu1 %v7462_v9, %s7295_s22  ;;  %904 = vrot.lane.b32.xlu0 %v7465_v10, %s7295_s22 }
  0x7d   : > { %1035 = vrot.lane.b32.xlu1 %v7462_v9, %s7298_s25  ;;  %1033 = vrot.lane.b32.xlu0 %v7465_v10, %s7298_s25 }
  0x81   : > { %1182 = vrot.lane.b32.xlu1 %v7472_v11, %s7300_s27  ;;  %1180 = vrot.lane.b32.xlu0 %v7475_v12, %s7300_s27 }
  0x85   : > { %1324 = vrot.lane.b32.xlu1 %v7472_v11, %s7301_s28  ;;  %1322 = vrot.lane.b32.xlu0 %v7475_v12, %s7301_s28 }
  0x87   : > { %v893_v24 = vpop.permute.xlu1 %892  ;;  %v746_v25 = vpop.permute.xlu0 %745 }
  0x88   : > { %842 = vst.msk [vmem:[#allocation2 + $0x1] sm:$0xff] %vm11466_vm10, %v746_v25 }
  0x89   : > { %1447 = vrot.lane.b32.xlu1 %v7472_v11, %s7302_s29  ;;  %1445 = vrot.lane.b32.xlu0 %v7475_v12, %s7302_s29  ;;  %989 = vst.msk [vmem:[#allocation2] sm:$0xff] %vm988_vm11, %v893_v24 }
  0x8b   : > { %v895_v26 = vpop.permute.xlu1 %894  ;;  %v748_v27 = vpop.permute.xlu0 %747 }
  0x8c   : > { %844 = vst.msk [vmem:[#allocation2 + $0x9] sm:$0x7f] %vm11465_vm12, %v748_v27 }
  0x8d   : > { %493 = vrot.lane.b32.xlu1 %v7462_v9, %s7297_s24  ;;  %491 = vrot.lane.b32.xlu0 %v7465_v10, %s7297_s24  ;;  %990 = vst.msk [vmem:[#allocation2 + $0x8] sm:$0xff] %vm988_vm11, %v895_v26 }
  0x8e   : > { %1152 = vst.msk [vmem:[#allocation2 + $0xf] sm:$0x1] %vm11468_vm13, %v11476_v2 }
  0x8f   : > { %v482_v28 = vpop.permute.xlu1 %481  ;;  %v480_v29 = vpop.permute.xlu0 %479 }
  0x90   : > { %571 = vst.msk [vmem:[#allocation2 + $0x18] sm:$0xff] %vm11469_vm2, %v482_v28  ;;  %570 = vst.msk [vmem:[#allocation2 + $0x10] sm:$0xff] %vm11469_vm2, %v480_v29 }
  0x91   : > { %728 = vst.msk [vmem:[#allocation2 + $0x1f] sm:$0x1] %vm11470_vm4, %v11476_v2  ;;  %616 = vrot.lane.b32.xlu1 %v7462_v9, %s7299_s26  ;;  %614 = vrot.lane.b32.xlu0 %v7465_v10, %s7299_s26 }
  0x93   : > { %v1024_v30 = vpop.permute.xlu1 %1023  ;;  %v1022_v31 = vpop.permute.xlu0 %1021 }
  0x94   : > { %1120 = vst.msk [vmem:[#allocation2 + $0x7] sm:$0xff] %vm1119_vm14, %v1024_v30 }
  0x95   : > { %1118 = vst.msk [vmem:[#allocation2 - $0x1] sm:$0xfe] %vm1117_vm15, %v1022_v31  ;;  %763 = vrot.lane.b32.xlu1 %v7472_v11, %s7296_s23  ;;  %761 = vrot.lane.b32.xlu0 %v7475_v12, %s7296_s23 }
  0x96   : > { %1294 = vst.msk [vmem:[#allocation2] sm:$0x1] %vm1293_vm1, %v11476_v2 }
  0x97   : > { %v605_v32 = vpop.permute.xlu1 %604  ;;  %v603_v33 = vpop.permute.xlu0 %602 }
  0x98   : > { %695 = vst.msk [vmem:[#allocation2 + $0x17] sm:$0xff] %vm11472_vm3, %v605_v32 }
  0x99   : > { %693 = vst.msk [vmem:[#allocation2 + $0xf] sm:$0xfe] %vm11467_vm8, %v603_v33  ;;  %910 = vrot.lane.b32.xlu1 %v7472_v11, %s7295_s22  ;;  %908 = vrot.lane.b32.xlu0 %v7475_v12, %s7295_s22  ;;  %vm11473_vm8 = vcmask 72769  }
  0x9a   : > { %877 = vst.msk [vmem:[#allocation2 + $0x10] sm:$0x1] %vm11464_vm5, %v11476_v2  ;;  %vm1400_vm5 = vcmask 64568  }
  0x9b   : > { %v1171_v34 = vpop.permute.xlu1 %1170  ;;  %v1169_v35 = vpop.permute.xlu0 %1168 }
  0x9c   : > { %1261 = vst.msk [vmem:[#allocation2 + $0x9] sm:$0x7f] %vm1260_vm9, %v1171_v34 }
  0x9d   : > { %1259 = vst.msk [vmem:[#allocation2 + $0x1] sm:$0xff] %vm1258_vm7, %v1169_v35  ;;  %1039 = vrot.lane.b32.xlu1 %v7472_v11, %s7298_s25  ;;  %1037 = vrot.lane.b32.xlu0 %v7475_v12, %s7298_s25 }
  0x9f   : > { %v752_v36 = vpop.permute.xlu1 %751  ;;  %v750_v37 = vpop.permute.xlu0 %749 }
  0xa0   : > { %846 = vst.msk [vmem:[#allocation2 + $0x19] sm:$0x7f] %vm11465_vm12, %v752_v36  ;;  %vm1557_vm12 = vcmask 65600  }
  0xa1   : > { %845 = vst.msk [vmem:[#allocation2 + $0x11] sm:$0xff] %vm11466_vm10, %v750_v37  ;;  %1186 = vrot.lane.b32.xlu1 %v7492_v13, %s7300_s27  ;;  %1184 = vrot.lane.b32.xlu0 %v7495_v14, %s7300_s27  ;;  %vm1525_vm10 = vcmask 72768  }
  0xa3   : > { %v1313_v40 = vpop.permute.xlu1 %1312  ;;  %v1311_v41 = vpop.permute.xlu0 %1310 }
  0xa4   : > { %1402 = vst.msk [vmem:[#allocation2 + $0x8] sm:$0xff] %vm1400_vm5, %v1313_v40  ;;  %1401 = vst.msk [vmem:[#allocation2] sm:$0xff] %vm1400_vm5, %v1311_v41  ;;  %v7893_v41 = vld [vmem:[%s7437_s21 + $0xc8] sm:$0xff] }
  0xa5   : > { %1558 = vst.msk [vmem:[#allocation2 + $0xf] sm:$0x1] %vm1557_vm12, %v11476_v2  ;;  %1328 = vrot.lane.b32.xlu1 %v7492_v13, %s7301_s28  ;;  %1326 = vrot.lane.b32.xlu0 %v7495_v14, %s7301_s28 }
  0xa6   : > { %425 = vst.msk [vmem:[#allocation2 + $0xd9] sm:$0x7f] %vm400_vm6, %v7893_v41 }
  0xa7   : > { %v899_v42 = vpop.permute.xlu1 %898  ;;  %v897_v43 = vpop.permute.xlu0 %896 }
  0xa8   : > { %992 = vst.msk [vmem:[#allocation2 + $0x18] sm:$0xff] %vm988_vm11, %v899_v42  ;;  %991 = vst.msk [vmem:[#allocation2 + $0x10] sm:$0xff] %vm988_vm11, %v897_v43  ;;  %v7896_v42 = vld [vmem:[%s7437_s21 + $0xc0] sm:$0xff] }
  0xa9   : > { %1153 = vst.msk [vmem:[#allocation2 + $0x1f] sm:$0x1] %vm11468_vm13, %v11476_v2  ;;  %1451 = vrot.lane.b32.xlu1 %v7492_v13, %s7302_s29  ;;  %1449 = vrot.lane.b32.xlu0 %v7495_v14, %s7302_s29  ;;  %vm1615_vm13 = vcmask 72704  }
  0xab   : > { %v1436_v44 = vpop.permute.xlu1 %1435  ;;  %v1434_v45 = vpop.permute.xlu0 %1433 }
  0xac   : > { %1526 = vst.msk [vmem:[#allocation2 + $0x7] sm:$0xff] %vm1525_vm10, %v1436_v44 }
  0xad   : > { %1524 = vst.msk [vmem:[#allocation2 - $0x1] sm:$0xfe] %vm11473_vm8, %v1434_v45  ;;  %497 = vrot.lane.b32.xlu1 %v7472_v11, %s7297_s24  ;;  %495 = vrot.lane.b32.xlu0 %v7475_v12, %s7297_s24 }
  0xaf   : > { %v1028_v46 = vpop.permute.xlu1 %1027  ;;  %v1026_v47 = vpop.permute.xlu0 %1025 }
  0xb0   : > { %1122 = vst.msk [vmem:[#allocation2 + $0x17] sm:$0xff] %vm1119_vm14, %v1028_v46 }
  0xb1   : > { %1121 = vst.msk [vmem:[#allocation2 + $0xf] sm:$0xfe] %vm1117_vm15, %v1026_v47  ;;  %620 = vrot.lane.b32.xlu1 %v7472_v11, %s7299_s26  ;;  %618 = vrot.lane.b32.xlu0 %v7475_v12, %s7299_s26 }
  0xb2   : > { %1295 = vst.msk [vmem:[#allocation2 + $0x10] sm:$0x1] %vm1293_vm1, %v11476_v2 }
  0xb3   : > { %v1175_v48 = vpop.permute.xlu1 %1174  ;;  %v1173_v49 = vpop.permute.xlu0 %1172  ;;  %v1575_v51 = vld [vmem:[#allocation2 + $0x8] sm:$0xff] }
  0xb4   : > { %v1574_v50 = vld [vmem:[#allocation2] sm:$0xff]  ;;  %1263 = vst.msk [vmem:[#allocation2 + $0x19] sm:$0x7f] %vm1260_vm9, %v1175_v48 }
  0xb5   : > { %1262 = vst.msk [vmem:[#allocation2 + $0x11] sm:$0xff] %vm1258_vm7, %v1173_v49  ;;  %6925 = vmatprep.mubr.msk.f32.mxu0 %vm1615_vm13, %v1574_v50  ;;  %767 = vrot.lane.b32.xlu1 %v7492_v13, %s7296_s23 }
  0xb6   : > { %765 = vrot.lane.b32.xlu0 %v7495_v14, %s7296_s23  ;;  %6926 = vmatmul.mubr.msk.f32.vlgmr.msra.gmra.mrb[0].mxu0 %vm1615_vm13, %v1575_v51 }
  0xb7   : > { %v1317_v52 = vpop.permute.xlu1 %1316  ;;  %v1315_v53 = vpop.permute.xlu0 %1314 }
  0xb8   : > { %1404 = vst.msk [vmem:[#allocation2 + $0x18] sm:$0xff] %vm1400_vm5, %v1317_v52  ;;  %1403 = vst.msk [vmem:[#allocation2 + $0x10] sm:$0xff] %vm1400_vm5, %v1315_v53 }
  0xb9   : > { %1559 = vst.msk [vmem:[#allocation2 + $0x1f] sm:$0x1] %vm1557_vm12, %v11476_v2  ;;  %914 = vrot.lane.b32.xlu1 %v7492_v13, %s7295_s22 }
  0xba   : > { %912 = vrot.lane.b32.xlu0 %v7495_v14, %s7295_s22 }
  0xbb   : > { %v1440_v54 = vpop.permute.xlu1 %1439  ;;  %v1438_v55 = vpop.permute.xlu0 %1437 }
  0xbc   : > { %1528 = vst.msk [vmem:[#allocation2 + $0x17] sm:$0xff] %vm1525_vm10, %v1440_v54 }
  0xbd   : > { %1527 = vst.msk [vmem:[#allocation2 + $0xf] sm:$0xfe] %vm11473_vm8, %v1438_v55  ;;  %1043 = vrot.lane.b32.xlu1 %v7492_v13, %s7298_s25 }
  0xbe   : > { %1041 = vrot.lane.b32.xlu0 %v7495_v14, %s7298_s25 }
  0xbf   : > { %v486_v56 = vpop.permute.xlu1 %485  ;;  %v484_v57 = vpop.permute.xlu0 %483 }
  0xc0   : > { %573 = vst.msk [vmem:[#allocation2 + $0x28] sm:$0xff] %vm11469_vm2, %v486_v56  ;;  %572 = vst.msk [vmem:[#allocation2 + $0x20] sm:$0xff] %vm11469_vm2, %v484_v57  ;;  %vm11491_vm2 = vcmask 23569  }
  0xc1   : > { %729 = vst.msk [vmem:[#allocation2 + $0x2f] sm:$0x1] %vm11470_vm4, %v11476_v2  ;;  %1190 = vrot.lane.b32.xlu1 %v7537_v18, %s7300_s27  ;;  %vm11492_vm4 = vcmask 24600  }
  0xc2   : > { %1188 = vrot.lane.b32.xlu0 %v7540_v19, %s7300_s27 }
  0xc3   : > { %v609_v60 = vpop.permute.xlu1 %608  ;;  %v607_v61 = vpop.permute.xlu0 %606  ;;  %v1577_v63 = vld [vmem:[#allocation2 + $0x18] sm:$0xff] }
  0xc4   : > { %v1576_v62 = vld [vmem:[#allocation2 + $0x10] sm:$0xff]  ;;  %697 = vst.msk [vmem:[#allocation2 + $0x27] sm:$0xff] %vm11472_vm3, %v609_v60  ;;  %vm11494_vm3 = vcmask 31768  }
  0xc5   : > { %696 = vst.msk [vmem:[#allocation2 + $0x1f] sm:$0xfe] %vm11491_vm2, %v607_v61  ;;  %6928 = vmatprep.mubr.msk.f32.mxu0 %vm1615_vm13, %v1576_v62  ;;  %1332 = vrot.lane.b32.xlu1 %v7537_v18, %s7301_s28  ;;  %vm11495_vm2 = vcmask 41000   ;;  %v7963_v61 = vld [vmem:[%s7437_s21 + $0xd8] sm:$0xff]  ;;  %v7966_v62 = vld [vmem:[%s7437_s21 + $0xd0] sm:$0xff] }
  0xc6   : > { %878 = vst.msk [vmem:[#allocation2 + $0x20] sm:$0x1] %vm11492_vm4, %v11476_v2  ;;  %1330 = vrot.lane.b32.xlu0 %v7540_v19, %s7301_s28  ;;  %6929 = vmatmul.mubr.msk.f32.gmra.mrb[2].mxu0 %vm1615_vm13, %v1577_v63  ;;  %vm11498_vm4 = vcmask 16400  }
  0xc7   : > { %v756_v0 = vpop.permute.xlu1 %755  ;;  %v754_v1 = vpop.permute.xlu0 %753  ;;  %427 = vst.msk [vmem:[#allocation2 + $0xe9] sm:$0x7f] %vm400_vm6, %v7963_v61 }
  0xc8   : > { %848 = vst.msk [vmem:[#allocation2 + $0x29] sm:$0x7f] %vm11493_vm0, %v756_v0  ;;  %vm11496_vm0 = vcmask 15368  }
  0xc9   : > { %847 = vst.msk [vmem:[#allocation2 + $0x21] sm:$0xff] %vm11494_vm3, %v754_v1  ;;  %1455 = vrot.lane.b32.xlu1 %v7537_v18, %s7302_s29  ;;  %vm11497_vm3 = vmmov %vm11496_vm0 }
  0xca   : > { %1453 = vrot.lane.b32.xlu0 %v7540_v19, %s7302_s29 }
  0xcb   : > { %v903_v3 = vpop.permute.xlu1 %902  ;;  %v901_v4 = vpop.permute.xlu0 %900 }
  0xcc   : > { %994 = vst.msk [vmem:[#allocation2 + $0x28] sm:$0xff] %vm988_vm11, %v903_v3  ;;  %993 = vst.msk [vmem:[#allocation2 + $0x20] sm:$0xff] %vm988_vm11, %v901_v4 }
  0xcd   : > { %1154 = vst.msk [vmem:[#allocation2 + $0x2f] sm:$0x1] %vm11495_vm2, %v11476_v2  ;;  %501 = vrot.lane.b32.xlu1 %v7492_v13, %s7297_s24  ;;  %vm11499_vm2 = vcmask 7168  }
  0xce   : > { %499 = vrot.lane.b32.xlu0 %v7495_v14, %s7297_s24  ;;  %422 = vst.msk [vmem:[#allocation2 + $0xc1] sm:$0xff] %vm11499_vm2, %v7826_v16  ;;  %vm11503_vm2 = vcmask 30744  }
  0xcf   : > { %v1032_v5 = vpop.permute.xlu1 %1031  ;;  %v1030_v6 = vpop.permute.xlu0 %1029 }
  0xd0   : > { %1124 = vst.msk [vmem:[#allocation2 + $0x27] sm:$0xff] %vm1119_vm14, %v1032_v5 }
  0xd1   : > { %1123 = vst.msk [vmem:[#allocation2 + $0x1f] sm:$0xfe] %vm1117_vm15, %v1030_v6  ;;  %624 = vrot.lane.b32.xlu1 %v7492_v13, %s7299_s26 }
  0xd2   : > { %1296 = vst.msk [vmem:[#allocation2 + $0x20] sm:$0x1] %vm1293_vm1, %v11476_v2  ;;  %622 = vrot.lane.b32.xlu0 %v7495_v14, %s7299_s26 }
  0xd3   : > { %v1179_v7 = vpop.permute.xlu1 %1178  ;;  %v1177_v8 = vpop.permute.xlu0 %1176 }
  0xd4   : > { %1265 = vst.msk [vmem:[#allocation2 + $0x29] sm:$0x7f] %vm1260_vm9, %v1179_v7 }
  0xd5   : > { %1264 = vst.msk [vmem:[#allocation2 + $0x21] sm:$0xff] %vm1258_vm7, %v1177_v8  ;;  %771 = vrot.lane.b32.xlu1 %v7537_v18, %s7296_s23 }
  0xd6   : > { %769 = vrot.lane.b32.xlu0 %v7540_v19, %s7296_s23 }
  0xd7   : > { %v1321_v9 = vpop.permute.xlu1 %1320  ;;  %v1319_v10 = vpop.permute.xlu0 %1318 }
  0xd8   : > { %1406 = vst.msk [vmem:[#allocation2 + $0x28] sm:$0xff] %vm1400_vm5, %v1321_v9  ;;  %1405 = vst.msk [vmem:[#allocation2 + $0x20] sm:$0xff] %vm1400_vm5, %v1319_v10 }
  0xd9   : > { %1560 = vst.msk [vmem:[#allocation2 + $0x2f] sm:$0x1] %vm1557_vm12, %v11476_v2  ;;  %918 = vrot.lane.b32.xlu1 %v7537_v18, %s7295_s22 }
  0xda   : > { %916 = vrot.lane.b32.xlu0 %v7540_v19, %s7295_s22 }
  0xdb   : > { %v1444_v11 = vpop.permute.xlu1 %1443  ;;  %v1442_v12 = vpop.permute.xlu0 %1441 }
  0xdc   : > { %1530 = vst.msk [vmem:[#allocation2 + $0x27] sm:$0xff] %vm1525_vm10, %v1444_v11 }
  0xdd   : > { %1529 = vst.msk [vmem:[#allocation2 + $0x1f] sm:$0xfe] %vm11473_vm8, %v1442_v12  ;;  %1047 = vrot.lane.b32.xlu1 %v7537_v18, %s7298_s25 }
  0xde   : > { %1045 = vrot.lane.b32.xlu0 %v7540_v19, %s7298_s25 }
  0xdf   : > { %v490_v13 = vpop.permute.xlu1 %489  ;;  %v488_v14 = vpop.permute.xlu0 %487 }
  0xe0   : > { %575 = vst.msk [vmem:[#allocation2 + $0x38] sm:$0xff] %vm11496_vm0, %v490_v13  ;;  %vm11500_vm0 = vcmask 23568  }
  0xe1   : > { %574 = vst.msk [vmem:[#allocation2 + $0x30] sm:$0xff] %vm11497_vm3, %v488_v14  ;;  %1194 = vrot.lane.b32.xlu1 %v7579_v20, %s7300_s27  ;;  %vm11501_vm3 = vcmask 23569  }
  0xe2   : > { %730 = vst.msk [vmem:[#allocation2 + $0x3f] sm:$0x1] %vm11498_vm4, %v11476_v2  ;;  %1192 = vrot.lane.b32.xlu0 %v7582_v21, %s7300_s27  ;;  %vm11502_vm4 = vcmask 24600  }
  0xe3   : > { %v613_v17 = vpop.permute.xlu1 %612  ;;  %v611_v24 = vpop.permute.xlu0 %610  ;;  %v1579_v26 = vld [vmem:[#allocation2 + $0x28] sm:$0xff] }
  0xe4   : > { %v1578_v25 = vld [vmem:[#allocation2 + $0x20] sm:$0xff]  ;;  %699 = vst.msk [vmem:[#allocation2 + $0x37] sm:$0xff] %vm11500_vm0, %v613_v17  ;;  %vm11504_vm0 = vcmask 31768  }
  0xe5   : > { %698 = vst.msk [vmem:[#allocation2 + $0x2f] sm:$0xfe] %vm11501_vm3, %v611_v24  ;;  %6931 = vmatprep.mubr.msk.f32.mxu0 %vm1615_vm13, %v1578_v25  ;;  %1336 = vrot.lane.b32.xlu1 %v7579_v20, %s7301_s28  ;;  %vm11505_vm3 = vcmask 41000   ;;  %v8033_v24 = vld [vmem:[%s7437_s21 + $0xe8] sm:$0xff]  ;;  %v8036_v25 = vld [vmem:[%s7437_s21 + $0xe0] sm:$0xff] }
  0xe6   : > { %879 = vst.msk [vmem:[#allocation2 + $0x30] sm:$0x1] %vm11502_vm4, %v11476_v2  ;;  %1334 = vrot.lane.b32.xlu0 %v7582_v21, %s7301_s28  ;;  %6932 = vmatmul.mubr.msk.f32.gmra.mrb[4].mxu0 %vm1615_vm13, %v1579_v26  ;;  %vm11506_vm4 = vcmask 15368  }
  0xe7   : > { %v760_v27 = vpop.permute.xlu1 %759  ;;  %v758_v28 = vpop.permute.xlu0 %757  ;;  %429 = vst.msk [vmem:[#allocation2 + $0xf9] sm:$0x7f] %vm400_vm6, %v8033_v24  ;;  %vm11533_vm6 = vcmask 30744  }
  0xe8   : > { %850 = vst.msk [vmem:[#allocation2 + $0x39] sm:$0x7f] %vm11503_vm2, %v760_v27  ;;  %vm11507_vm2 = vmmov %vm11506_vm4 }
  0xe9   : > { %849 = vst.msk [vmem:[#allocation2 + $0x31] sm:$0xff] %vm11504_vm0, %v758_v28  ;;  %1459 = vrot.lane.b32.xlu1 %v7579_v20, %s7302_s29  ;;  %vm11508_vm0 = vcmask 16400  }
  0xea   : > { %1457 = vrot.lane.b32.xlu0 %v7582_v21, %s7302_s29 }
  0xeb   : > { %v907_v29 = vpop.permute.xlu1 %906  ;;  %v905_v30 = vpop.permute.xlu0 %904 }
  0xec   : > { %996 = vst.msk [vmem:[#allocation2 + $0x38] sm:$0xff] %vm988_vm11, %v907_v29  ;;  %995 = vst.msk [vmem:[#allocation2 + $0x30] sm:$0xff] %vm988_vm11, %v905_v30 }
  0xed   : > { %1155 = vst.msk [vmem:[#allocation2 + $0x3f] sm:$0x1] %vm11505_vm3, %v11476_v2  ;;  %505 = vrot.lane.b32.xlu1 %v7537_v18, %s7297_s24  ;;  %vm11509_vm3 = vcmask 7168  }
  0xee   : > { %503 = vrot.lane.b32.xlu0 %v7540_v19, %s7297_s24  ;;  %424 = vst.msk [vmem:[#allocation2 + $0xd1] sm:$0xff] %vm11509_vm3, %v7896_v42  ;;  %vm11513_vm3 = vcmask 30744  }
  0xef   : > { %v1036_v31 = vpop.permute.xlu1 %1035  ;;  %v1034_v32 = vpop.permute.xlu0 %1033 }
  0xf0   : > { %1126 = vst.msk [vmem:[#allocation2 + $0x37] sm:$0xff] %vm1119_vm14, %v1036_v31 }
  0xf1   : > { %1125 = vst.msk [vmem:[#allocation2 + $0x2f] sm:$0xfe] %vm1117_vm15, %v1034_v32  ;;  %628 = vrot.lane.b32.xlu1 %v7537_v18, %s7299_s26 }
  0xf2   : > { %1297 = vst.msk [vmem:[#allocation2 + $0x30] sm:$0x1] %vm1293_vm1, %v11476_v2  ;;  %626 = vrot.lane.b32.xlu0 %v7540_v19, %s7299_s26 }
  0xf3   : > { %v1183_v33 = vpop.permute.xlu1 %1182  ;;  %v1181_v34 = vpop.permute.xlu0 %1180 }
  0xf4   : > { %1267 = vst.msk [vmem:[#allocation2 + $0x39] sm:$0x7f] %vm1260_vm9, %v1183_v33 }
  0xf5   : > { %1266 = vst.msk [vmem:[#allocation2 + $0x31] sm:$0xff] %vm1258_vm7, %v1181_v34  ;;  %775 = vrot.lane.b32.xlu1 %v7579_v20, %s7296_s23 }
  0xf6   : > { %773 = vrot.lane.b32.xlu0 %v7582_v21, %s7296_s23 }
  0xf7   : > { %v1325_v35 = vpop.permute.xlu1 %1324  ;;  %v1323_v36 = vpop.permute.xlu0 %1322 }
  0xf8   : > { %1408 = vst.msk [vmem:[#allocation2 + $0x38] sm:$0xff] %vm1400_vm5, %v1325_v35  ;;  %1407 = vst.msk [vmem:[#allocation2 + $0x30] sm:$0xff] %vm1400_vm5, %v1323_v36 }
  0xf9   : > { %1561 = vst.msk [vmem:[#allocation2 + $0x3f] sm:$0x1] %vm1557_vm12, %v11476_v2  ;;  %922 = vrot.lane.b32.xlu1 %v7579_v20, %s7295_s22 }
  0xfa   : > { %920 = vrot.lane.b32.xlu0 %v7582_v21, %s7295_s22 }
  0xfb   : > { %v1448_v18 = vpop.permute.xlu1 %1447  ;;  %v1446_v19 = vpop.permute.xlu0 %1445 }
  0xfc   : > { %1532 = vst.msk [vmem:[#allocation2 + $0x37] sm:$0xff] %vm1525_vm10, %v1448_v18 }
  0xfd   : > { %1531 = vst.msk [vmem:[#allocation2 + $0x2f] sm:$0xfe] %vm11473_vm8, %v1446_v19  ;;  %1051 = vrot.lane.b32.xlu1 %v7579_v20, %s7298_s25 }
  0xfe   : > { %1049 = vrot.lane.b32.xlu0 %v7582_v21, %s7298_s25 }
  0xff   : > { %v494_v37 = vpop.permute.xlu1 %493  ;;  %v492_v40 = vpop.permute.xlu0 %491 }
 0x100   : > { %577 = vst.msk [vmem:[#allocation2 + $0x48] sm:$0xff] %vm11506_vm4, %v494_v37  ;;  %vm11510_vm4 = vcmask 23568  }
 0x101   : > { %576 = vst.msk [vmem:[#allocation2 + $0x40] sm:$0xff] %vm11507_vm2, %v492_v40  ;;  %1198 = vrot.lane.b32.xlu1 %v7621_v22, %s7300_s27  ;;  %vm11511_vm2 = vcmask 23569  }
 0x102   : > { %731 = vst.msk [vmem:[#allocation2 + $0x4f] sm:$0x1] %vm11508_vm0, %v11476_v2  ;;  %1196 = vrot.lane.b32.xlu0 %v7624_v23, %s7300_s27  ;;  %vm11512_vm0 = vcmask 24600  }
 0x103   : > { %v617_v43 = vpop.permute.xlu1 %616  ;;  %v615_v44 = vpop.permute.xlu0 %614  ;;  %v1581_v46 = vld [vmem:[#allocation2 + $0x38] sm:$0xff] }
 0x104   : > { %v1580_v45 = vld [vmem:[#allocation2 + $0x30] sm:$0xff]  ;;  %701 = vst.msk [vmem:[#allocation2 + $0x47] sm:$0xff] %vm11510_vm4, %v617_v43  ;;  %vm11514_vm4 = vcmask 31768  }
 0x105   : > { %700 = vst.msk [vmem:[#allocation2 + $0x3f] sm:$0xfe] %vm11511_vm2, %v615_v44  ;;  %6934 = vmatprep.mubr.msk.f32.mxu0 %vm1615_vm13, %v1580_v45  ;;  %1340 = vrot.lane.b32.xlu1 %v7621_v22, %s7301_s28  ;;  %vm11515_vm2 = vcmask 41000  }
 0x106   : > { %880 = vst.msk [vmem:[#allocation2 + $0x40] sm:$0x1] %vm11512_vm0, %v11476_v2  ;;  %1338 = vrot.lane.b32.xlu0 %v7624_v23, %s7301_s28  ;;  %6935 = vmatmul.mubr.msk.f32.gmra.mrb[6].mxu0 %vm1615_vm13, %v1581_v46  ;;  %vm11516_vm0 = vcmask 15368  }
 0x107   : > { %v764_v47 = vpop.permute.xlu1 %763  ;;  %v762_v48 = vpop.permute.xlu0 %761 }
 0x108   : > { %852 = vst.msk [vmem:[#allocation2 + $0x49] sm:$0x7f] %vm11513_vm3, %v764_v47  ;;  %vm11517_vm3 = vmmov %vm11516_vm0 }
 0x109   : > { %851 = vst.msk [vmem:[#allocation2 + $0x41] sm:$0xff] %vm11514_vm4, %v762_v48  ;;  %1463 = vrot.lane.b32.xlu1 %v7621_v22, %s7302_s29  ;;  %vm11518_vm4 = vcmask 16400  }
 0x10a   : > { %1461 = vrot.lane.b32.xlu0 %v7624_v23, %s7302_s29 }
 0x10b   : > { %v911_v49 = vpop.permute.xlu1 %910  ;;  %v909_v50 = vpop.permute.xlu0 %908 }
 0x10c   : > { %998 = vst.msk [vmem:[#allocation2 + $0x48] sm:$0xff] %vm988_vm11, %v911_v49  ;;  %997 = vst.msk [vmem:[#allocation2 + $0x40] sm:$0xff] %vm988_vm11, %v909_v50 }
 0x10d   : > { %1156 = vst.msk [vmem:[#allocation2 + $0x4f] sm:$0x1] %vm11515_vm2, %v11476_v2  ;;  %509 = vrot.lane.b32.xlu1 %v7579_v20, %s7297_s24  ;;  %vm11519_vm2 = vcmask 7168  }
 0x10e   : > { %507 = vrot.lane.b32.xlu0 %v7582_v21, %s7297_s24  ;;  %426 = vst.msk [vmem:[#allocation2 + $0xe1] sm:$0xff] %vm11519_vm2, %v7966_v62  ;;  %vm11523_vm2 = vcmask 30744  }
 0x10f   : > { %v1040_v51 = vpop.permute.xlu1 %1039  ;;  %v1038_v52 = vpop.permute.xlu0 %1037 }
 0x110   : > { %1128 = vst.msk [vmem:[#allocation2 + $0x47] sm:$0xff] %vm1119_vm14, %v1040_v51 }
 0x111   : > { %1127 = vst.msk [vmem:[#allocation2 + $0x3f] sm:$0xfe] %vm1117_vm15, %v1038_v52  ;;  %632 = vrot.lane.b32.xlu1 %v7579_v20, %s7299_s26 }
 0x112   : > { %1298 = vst.msk [vmem:[#allocation2 + $0x40] sm:$0x1] %vm1293_vm1, %v11476_v2  ;;  %630 = vrot.lane.b32.xlu0 %v7582_v21, %s7299_s26 }
 0x113   : > { %v1187_v53 = vpop.permute.xlu1 %1186  ;;  %v1185_v54 = vpop.permute.xlu0 %1184 }
 0x114   : > { %1269 = vst.msk [vmem:[#allocation2 + $0x49] sm:$0x7f] %vm1260_vm9, %v1187_v53 }
 0x115   : > { %1268 = vst.msk [vmem:[#allocation2 + $0x41] sm:$0xff] %vm1258_vm7, %v1185_v54  ;;  %779 = vrot.lane.b32.xlu1 %v7621_v22, %s7296_s23 }
 0x116   : > { %777 = vrot.lane.b32.xlu0 %v7624_v23, %s7296_s23 }
 0x117   : > { %v1329_v55 = vpop.permute.xlu1 %1328  ;;  %v1327_v56 = vpop.permute.xlu0 %1326 }
 0x118   : > { %1410 = vst.msk [vmem:[#allocation2 + $0x48] sm:$0xff] %vm1400_vm5, %v1329_v55  ;;  %1409 = vst.msk [vmem:[#allocation2 + $0x40] sm:$0xff] %vm1400_vm5, %v1327_v56 }
 0x119   : > { %1562 = vst.msk [vmem:[#allocation2 + $0x4f] sm:$0x1] %vm1557_vm12, %v11476_v2  ;;  %926 = vrot.lane.b32.xlu1 %v7621_v22, %s7295_s22 }
 0x11a   : > { %924 = vrot.lane.b32.xlu0 %v7624_v23, %s7295_s22 }
 0x11b   : > { %v1452_v20 = vpop.permute.xlu1 %1451  ;;  %v1450_v21 = vpop.permute.xlu0 %1449 }
 0x11c   : > { %1534 = vst.msk [vmem:[#allocation2 + $0x47] sm:$0xff] %vm1525_vm10, %v1452_v20 }
 0x11d   : > { %1533 = vst.msk [vmem:[#allocation2 + $0x3f] sm:$0xfe] %vm11473_vm8, %v1450_v21  ;;  %1055 = vrot.lane.b32.xlu1 %v7621_v22, %s7298_s25 }
 0x11e   : > { %1053 = vrot.lane.b32.xlu0 %v7624_v23, %s7298_s25 }
 0x11f   : > { %v498_v57 = vpop.permute.xlu1 %497  ;;  %v496_v60 = vpop.permute.xlu0 %495 }
 0x120   : > { %579 = vst.msk [vmem:[#allocation2 + $0x58] sm:$0xff] %vm11516_vm0, %v498_v57  ;;  %vm11520_vm0 = vcmask 23568  }
 0x121   : > { %578 = vst.msk [vmem:[#allocation2 + $0x50] sm:$0xff] %vm11517_vm3, %v496_v60  ;;  %1202 = vrot.lane.b32.xlu1 %v7685_v38, %s7300_s27  ;;  %vm11521_vm3 = vcmask 23569   ;;  %v7304_v60 = vmov 0  }
 0x122   : > { %732 = vst.msk [vmem:[#allocation2 + $0x5f] sm:$0x1] %vm11518_vm4, %v11476_v2  ;;  %1200 = vrot.lane.b32.xlu0 %v7688_v39, %s7300_s27  ;;  %vm11522_vm4 = vcmask 24600  }
 0x123   : > { %v621_v63 = vpop.permute.xlu1 %620  ;;  %v619_v0 = vpop.permute.xlu0 %618  ;;  %v1583_v3 = vld [vmem:[#allocation2 + $0x48] sm:$0xff]  ;;  %7274 = vset.pattern.permute.xlu0 %v7304_v60  ;;  %v396_v60 = vld [vmem:[%s7437_s21 + $0xf8] sm:$0xff] }
 0x124   : > { %v1582_v1 = vld [vmem:[#allocation2 + $0x40] sm:$0xff]  ;;  %703 = vst.msk [vmem:[#allocation2 + $0x57] sm:$0xff] %vm11520_vm0, %v621_v63  ;;  %vm11524_vm0 = vcmask 31768  }
 0x125   : > { %702 = vst.msk [vmem:[#allocation2 + $0x4f] sm:$0xfe] %vm11521_vm3, %v619_v0  ;;  %6937 = vmatprep.mubr.msk.f32.mxu0 %vm1615_vm13, %v1582_v1  ;;  %1344 = vrot.lane.b32.xlu1 %v7685_v38, %s7301_s28  ;;  %vm11525_vm3 = vcmask 41000  }
 0x126   : > { %881 = vst.msk [vmem:[#allocation2 + $0x50] sm:$0x1] %vm11522_vm4, %v11476_v2  ;;  %1342 = vrot.lane.b32.xlu0 %v7688_v39, %s7301_s28  ;;  %6938 = vmatmul.mubr.msk.f32.gmra.mrb[8].mxu0 %vm1615_vm13, %v1583_v3  ;;  %vm11526_vm4 = vcmask 15368  }
 0x127   : > { %v768_v4 = vpop.permute.xlu1 %767 }
 0x128   : > { %v766_v5 = vpop.permute.xlu0 %765  ;;  %854 = vst.msk [vmem:[#allocation2 + $0x59] sm:$0x7f] %vm11523_vm2, %v768_v4  ;;  %vm11527_vm2 = vmmov %vm11526_vm4 }
 0x129   : > { %853 = vst.msk [vmem:[#allocation2 + $0x51] sm:$0xff] %vm11524_vm0, %v766_v5  ;;  %1467 = vrot.lane.b32.xlu1 %v7685_v38, %s7302_s29  ;;  %vm11528_vm0 = vcmask 16400  }
 0x12a   : > { %1465 = vrot.lane.b32.xlu0 %v7688_v39, %s7302_s29 }
 0x12b   : > { %v915_v6 = vpop.permute.xlu1 %914 }
 0x12c   : > { %v913_v7 = vpop.permute.xlu0 %912  ;;  %1000 = vst.msk [vmem:[#allocation2 + $0x58] sm:$0xff] %vm988_vm11, %v915_v6 }
 0x12d   : > { %999 = vst.msk [vmem:[#allocation2 + $0x50] sm:$0xff] %vm988_vm11, %v913_v7  ;;  %513 = vrot.lane.b32.xlu1 %v7621_v22, %s7297_s24 }
 0x12e   : > { %1157 = vst.msk [vmem:[#allocation2 + $0x5f] sm:$0x1] %vm11525_vm3, %v11476_v2  ;;  %511 = vrot.lane.b32.xlu0 %v7624_v23, %s7297_s24  ;;  %vm11529_vm3 = vcmask 7168  }
 0x12f   : > { %v1044_v8 = vpop.permute.xlu1 %1043  ;;  %428 = vst.msk [vmem:[#allocation2 + $0xf1] sm:$0xff] %vm11529_vm3, %v8036_v25  ;;  %vm11534_vm3 = vcmask 31768  }
 0x130   : > { %v1042_v9 = vpop.permute.xlu0 %1041  ;;  %1130 = vst.msk [vmem:[#allocation2 + $0x57] sm:$0xff] %vm1119_vm14, %v1044_v8 }
 0x131   : > { %1129 = vst.msk [vmem:[#allocation2 + $0x4f] sm:$0xfe] %vm1117_vm15, %v1042_v9  ;;  %636 = vrot.lane.b32.xlu1 %v7621_v22, %s7299_s26 }
 0x132   : > { %1299 = vst.msk [vmem:[#allocation2 + $0x50] sm:$0x1] %vm1293_vm1, %v11476_v2  ;;  %634 = vrot.lane.b32.xlu0 %v7624_v23, %s7299_s26 }
 0x133   : > { %v1191_v10 = vpop.permute.xlu1 %1190 }
 0x134   : > { %v1189_v11 = vpop.permute.xlu0 %1188  ;;  %1271 = vst.msk [vmem:[#allocation2 + $0x59] sm:$0x7f] %vm1260_vm9, %v1191_v10 }
 0x135   : > { %1270 = vst.msk [vmem:[#allocation2 + $0x51] sm:$0xff] %vm1258_vm7, %v1189_v11  ;;  %783 = vrot.lane.b32.xlu1 %v7685_v38, %s7296_s23 }
 0x136   : > { %781 = vrot.lane.b32.xlu0 %v7688_v39, %s7296_s23 }
 0x137   : > { %v1333_v12 = vpop.permute.xlu1 %1332 }
 0x138   : > { %v1331_v13 = vpop.permute.xlu0 %1330  ;;  %1412 = vst.msk [vmem:[#allocation2 + $0x58] sm:$0xff] %vm1400_vm5, %v1333_v12 }
 0x139   : > { %1411 = vst.msk [vmem:[#allocation2 + $0x50] sm:$0xff] %vm1400_vm5, %v1331_v13  ;;  %930 = vrot.lane.b32.xlu1 %v7685_v38, %s7295_s22 }
 0x13a   : > { %1563 = vst.msk [vmem:[#allocation2 + $0x5f] sm:$0x1] %vm1557_vm12, %v11476_v2  ;;  %928 = vrot.lane.b32.xlu0 %v7688_v39, %s7295_s22 }
 0x13b   : > { %v1456_v22 = vpop.permute.xlu1 %1455 }
 0x13c   : > { %v1454_v23 = vpop.permute.xlu0 %1453  ;;  %1536 = vst.msk [vmem:[#allocation2 + $0x57] sm:$0xff] %vm1525_vm10, %v1456_v22 }
 0x13d   : > { %1535 = vst.msk [vmem:[#allocation2 + $0x4f] sm:$0xfe] %vm11473_vm8, %v1454_v23  ;;  %1059 = vrot.lane.b32.xlu1 %v7685_v38, %s7298_s25 }
 0x13e   : > { %1057 = vrot.lane.b32.xlu0 %v7688_v39, %s7298_s25 }
 0x13f   : > { %v502_v14 = vpop.permute.xlu1 %501 }
 0x140   : > { %v500_v17 = vpop.permute.xlu0 %499  ;;  %581 = vst.msk [vmem:[#allocation2 + $0x68] sm:$0xff] %vm11526_vm4, %v502_v14  ;;  %vm11530_vm4 = vcmask 23568  }
 0x141   : > { %580 = vst.msk [vmem:[#allocation2 + $0x60] sm:$0xff] %vm11527_vm2, %v500_v17  ;;  %1206 = vrot.lane.b32.xlu1 %v7753_v58, %s7300_s27  ;;  %vm11531_vm2 = vcmask 23569  }
 0x142   : > { %733 = vst.msk [vmem:[#allocation2 + $0x6f] sm:$0x1] %vm11528_vm0, %v11476_v2  ;;  %1204 = vrot.lane.b32.xlu0 %v7756_v59, %s7300_s27  ;;  %vm11532_vm0 = vcmask 24600  }
 0x143   : > { %v625_v26 = vpop.permute.xlu1 %624  ;;  %v1585_v29 = vld [vmem:[#allocation2 + $0x58] sm:$0xff] }
 0x144   : > { %v623_v27 = vpop.permute.xlu0 %622  ;;  %v1584_v28 = vld [vmem:[#allocation2 + $0x50] sm:$0xff]  ;;  %705 = vst.msk [vmem:[#allocation2 + $0x67] sm:$0xff] %vm11530_vm4, %v625_v26  ;;  %vm11535_vm4 = vcmask 41000  }
 0x145   : > { %704 = vst.msk [vmem:[#allocation2 + $0x5f] sm:$0xfe] %vm11531_vm2, %v623_v27  ;;  %6940 = vmatprep.mubr.msk.f32.mxu0 %vm1615_vm13, %v1584_v28  ;;  %1348 = vrot.lane.b32.xlu1 %v7753_v58, %s7301_s28  ;;  %vm11536_vm2 = vcmask 15368  }
 0x146   : > { %882 = vst.msk [vmem:[#allocation2 + $0x60] sm:$0x1] %vm11532_vm0, %v11476_v2  ;;  %1346 = vrot.lane.b32.xlu0 %v7756_v59, %s7301_s28  ;;  %6941 = vmatmul.mubr.msk.f32.gmra.mrb[10].mxu0 %vm1615_vm13, %v1585_v29  ;;  %vm11537_vm0 = vmmov %vm11536_vm2 }
 0x147   : > { %v772_v30 = vpop.permute.xlu1 %771 }
 0x148   : > { %v770_v31 = vpop.permute.xlu0 %769  ;;  %856 = vst.msk [vmem:[#allocation2 + $0x69] sm:$0x7f] %vm11533_vm6, %v772_v30  ;;  %vm11538_vm6 = vcmask 16400  }
 0x149   : > { %855 = vst.msk [vmem:[#allocation2 + $0x61] sm:$0xff] %vm11534_vm3, %v770_v31  ;;  %1471 = vrot.lane.b32.xlu1 %v7753_v58, %s7302_s29  ;;  %vm11539_vm3 = vcmask 23568  }
 0x14a   : > { %1469 = vrot.lane.b32.xlu0 %v7756_v59, %s7302_s29 }
 0x14b   : > { %v919_v32 = vpop.permute.xlu1 %918 }
 0x14c   : > { %v917_v33 = vpop.permute.xlu0 %916  ;;  %1002 = vst.msk [vmem:[#allocation2 + $0x68] sm:$0xff] %vm988_vm11, %v919_v32 }
 0x14d   : > { %1001 = vst.msk [vmem:[#allocation2 + $0x60] sm:$0xff] %vm988_vm11, %v917_v33  ;;  %517 = vrot.lane.b32.xlu1 %v7685_v38, %s7297_s24 }
 0x14e   : > { %1158 = vst.msk [vmem:[#allocation2 + $0x6f] sm:$0x1] %vm11535_vm4, %v11476_v2  ;;  %515 = vrot.lane.b32.xlu0 %v7688_v39, %s7297_s24  ;;  %vm11540_vm4 = vcmask 23569  }
 0x14f   : > { %v1048_v34 = vpop.permute.xlu1 %1047 }
 0x150   : > { %v1046_v35 = vpop.permute.xlu0 %1045  ;;  %1132 = vst.msk [vmem:[#allocation2 + $0x67] sm:$0xff] %vm1119_vm14, %v1048_v34 }
 0x151   : > { %1131 = vst.msk [vmem:[#allocation2 + $0x5f] sm:$0xfe] %vm1117_vm15, %v1046_v35  ;;  %640 = vrot.lane.b32.xlu1 %v7685_v38, %s7299_s26 }
 0x152   : > { %1300 = vst.msk [vmem:[#allocation2 + $0x60] sm:$0x1] %vm1293_vm1, %v11476_v2  ;;  %638 = vrot.lane.b32.xlu0 %v7688_v39, %s7299_s26 }
 0x153   : > { %v1195_v36 = vpop.permute.xlu1 %1194 }
 0x154   : > { %v1193_v18 = vpop.permute.xlu0 %1192  ;;  %1273 = vst.msk [vmem:[#allocation2 + $0x69] sm:$0x7f] %vm1260_vm9, %v1195_v36 }
 0x155   : > { %1272 = vst.msk [vmem:[#allocation2 + $0x61] sm:$0xff] %vm1258_vm7, %v1193_v18  ;;  %787 = vrot.lane.b32.xlu1 %v7753_v58, %s7296_s23 }
 0x156   : > { %785 = vrot.lane.b32.xlu0 %v7756_v59, %s7296_s23 }
 0x157   : > { %v1337_v19 = vpop.permute.xlu1 %1336 }
 0x158   : > { %v1335_v37 = vpop.permute.xlu0 %1334  ;;  %1414 = vst.msk [vmem:[#allocation2 + $0x68] sm:$0xff] %vm1400_vm5, %v1337_v19 }
 0x159   : > { %1413 = vst.msk [vmem:[#allocation2 + $0x60] sm:$0xff] %vm1400_vm5, %v1335_v37  ;;  %934 = vrot.lane.b32.xlu1 %v7753_v58, %s7295_s22 }
 0x15a   : > { %1564 = vst.msk [vmem:[#allocation2 + $0x6f] sm:$0x1] %vm1557_vm12, %v11476_v2  ;;  %932 = vrot.lane.b32.xlu0 %v7756_v59, %s7295_s22 }
 0x15b   : > { %v1460_v38 = vpop.permute.xlu1 %1459 }
 0x15c   : > { %v1458_v39 = vpop.permute.xlu0 %1457  ;;  %1538 = vst.msk [vmem:[#allocation2 + $0x67] sm:$0xff] %vm1525_vm10, %v1460_v38 }
 0x15d   : > { %1537 = vst.msk [vmem:[#allocation2 + $0x5f] sm:$0xfe] %vm11473_vm8, %v1458_v39  ;;  %1063 = vrot.lane.b32.xlu1 %v7753_v58, %s7298_s25 }
 0x15e   : > { %1061 = vrot.lane.b32.xlu0 %v7756_v59, %s7298_s25 }
 0x15f   : > { %v506_v40 = vpop.permute.xlu1 %505 }
 0x160   : > { %v504_v43 = vpop.permute.xlu0 %503  ;;  %583 = vst.msk [vmem:[#allocation2 + $0x78] sm:$0xff] %vm11536_vm2, %v506_v40  ;;  %vm11541_vm2 = vcmask 24600  }
 0x161   : > { %582 = vst.msk [vmem:[#allocation2 + $0x70] sm:$0xff] %vm11537_vm0, %v504_v43  ;;  %1210 = vrot.lane.b32.xlu1 %v7823_v15, %s7300_s27  ;;  %vm11542_vm0 = vcmask 30744  }
 0x162   : > { %734 = vst.msk [vmem:[#allocation2 + $0x7f] sm:$0x1] %vm11538_vm6, %v11476_v2  ;;  %1208 = vrot.lane.b32.xlu0 %v7826_v16, %s7300_s27  ;;  %vm11543_vm6 = vcmask 31768  }
 0x163   : > { %v629_v44 = vpop.permute.xlu1 %628  ;;  %v1587_v47 = vld [vmem:[#allocation2 + $0x68] sm:$0xff] }
 0x164   : > { %v627_v45 = vpop.permute.xlu0 %626  ;;  %v1586_v46 = vld [vmem:[#allocation2 + $0x60] sm:$0xff]  ;;  %707 = vst.msk [vmem:[#allocation2 + $0x77] sm:$0xff] %vm11539_vm3, %v629_v44  ;;  %vm11544_vm3 = vcmask 41000  }
 0x165   : > { %706 = vst.msk [vmem:[#allocation2 + $0x6f] sm:$0xfe] %vm11540_vm4, %v627_v45  ;;  %6943 = vmatprep.mubr.msk.f32.mxu0 %vm1615_vm13, %v1586_v46  ;;  %1352 = vrot.lane.b32.xlu1 %v7823_v15, %s7301_s28  ;;  %vm11545_vm4 = vcmask 15368  }
 0x166   : > { %883 = vst.msk [vmem:[#allocation2 + $0x70] sm:$0x1] %vm11541_vm2, %v11476_v2  ;;  %1350 = vrot.lane.b32.xlu0 %v7826_v16, %s7301_s28  ;;  %6944 = vmatmul.mubr.msk.f32.gmra.mrb[12].mxu0 %vm1615_vm13, %v1587_v47  ;;  %vm11546_vm2 = vmmov %vm11545_vm4 }
 0x167   : > { %v776_v48 = vpop.permute.xlu1 %775 }
 0x168   : > { %v774_v49 = vpop.permute.xlu0 %773  ;;  %858 = vst.msk [vmem:[#allocation2 + $0x79] sm:$0x7f] %vm11542_vm0, %v776_v48  ;;  %vm11547_vm0 = vcmask 16400  }
 0x169   : > { %857 = vst.msk [vmem:[#allocation2 + $0x71] sm:$0xff] %vm11543_vm6, %v774_v49  ;;  %1475 = vrot.lane.b32.xlu1 %v7823_v15, %s7302_s29  ;;  %vm11548_vm6 = vcmask 23568  }
 0x16a   : > { %1473 = vrot.lane.b32.xlu0 %v7826_v16, %s7302_s29 }
 0x16b   : > { %v923_v50 = vpop.permute.xlu1 %922 }
 0x16c   : > { %v921_v51 = vpop.permute.xlu0 %920  ;;  %1004 = vst.msk [vmem:[#allocation2 + $0x78] sm:$0xff] %vm988_vm11, %v923_v50 }
 0x16d   : > { %1003 = vst.msk [vmem:[#allocation2 + $0x70] sm:$0xff] %vm988_vm11, %v921_v51  ;;  %521 = vrot.lane.b32.xlu1 %v7753_v58, %s7297_s24 }
 0x16e   : > { %1159 = vst.msk [vmem:[#allocation2 + $0x7f] sm:$0x1] %vm11544_vm3, %v11476_v2  ;;  %519 = vrot.lane.b32.xlu0 %v7756_v59, %s7297_s24  ;;  %vm11549_vm3 = vcmask 23569  }
 0x16f   : > { %v1052_v52 = vpop.permute.xlu1 %1051 }
 0x170   : > { %v1050_v53 = vpop.permute.xlu0 %1049  ;;  %1134 = vst.msk [vmem:[#allocation2 + $0x77] sm:$0xff] %vm1119_vm14, %v1052_v52 }
 0x171   : > { %1133 = vst.msk [vmem:[#allocation2 + $0x6f] sm:$0xfe] %vm1117_vm15, %v1050_v53  ;;  %644 = vrot.lane.b32.xlu1 %v7753_v58, %s7299_s26 }
 0x172   : > { %1301 = vst.msk [vmem:[#allocation2 + $0x70] sm:$0x1] %vm1293_vm1, %v11476_v2  ;;  %642 = vrot.lane.b32.xlu0 %v7756_v59, %s7299_s26 }
 0x173   : > { %v1199_v54 = vpop.permute.xlu1 %1198 }
 0x174   : > { %v1197_v55 = vpop.permute.xlu0 %1196  ;;  %1275 = vst.msk [vmem:[#allocation2 + $0x79] sm:$0x7f] %vm1260_vm9, %v1199_v54 }
 0x175   : > { %1274 = vst.msk [vmem:[#allocation2 + $0x71] sm:$0xff] %vm1258_vm7, %v1197_v55  ;;  %791 = vrot.lane.b32.xlu1 %v7823_v15, %s7296_s23 }
 0x176   : > { %789 = vrot.lane.b32.xlu0 %v7826_v16, %s7296_s23 }
 0x177   : > { %v1341_v56 = vpop.permute.xlu1 %1340 }
 0x178   : > { %v1339_v20 = vpop.permute.xlu0 %1338  ;;  %1416 = vst.msk [vmem:[#allocation2 + $0x78] sm:$0xff] %vm1400_vm5, %v1341_v56 }
 0x179   : > { %1415 = vst.msk [vmem:[#allocation2 + $0x70] sm:$0xff] %vm1400_vm5, %v1339_v20  ;;  %938 = vrot.lane.b32.xlu1 %v7823_v15, %s7295_s22 }
 0x17a   : > { %1565 = vst.msk [vmem:[#allocation2 + $0x7f] sm:$0x1] %vm1557_vm12, %v11476_v2  ;;  %936 = vrot.lane.b32.xlu0 %v7826_v16, %s7295_s22 }
 0x17b   : > { %v1464_v58 = vpop.permute.xlu1 %1463 }
 0x17c   : > { %v1462_v59 = vpop.permute.xlu0 %1461  ;;  %1540 = vst.msk [vmem:[#allocation2 + $0x77] sm:$0xff] %vm1525_vm10, %v1464_v58 }
 0x17d   : > { %1539 = vst.msk [vmem:[#allocation2 + $0x6f] sm:$0xfe] %vm11473_vm8, %v1462_v59  ;;  %1067 = vrot.lane.b32.xlu1 %v7823_v15, %s7298_s25 }
 0x17e   : > { %1065 = vrot.lane.b32.xlu0 %v7826_v16, %s7298_s25 }
 0x17f   : > { %v510_v21 = vpop.permute.xlu1 %509 }
 0x180   : > { %v508_v57 = vpop.permute.xlu0 %507  ;;  %585 = vst.msk [vmem:[#allocation2 + $0x88] sm:$0xff] %vm11545_vm4, %v510_v21  ;;  %vm11550_vm4 = vcmask 24600  }
 0x181   : > { %584 = vst.msk [vmem:[#allocation2 + $0x80] sm:$0xff] %vm11546_vm2, %v508_v57  ;;  %1214 = vrot.lane.b32.xlu1 %v7893_v41, %s7300_s27  ;;  %vm11551_vm2 = vcmask 30744  }
 0x182   : > { %735 = vst.msk [vmem:[#allocation2 + $0x8f] sm:$0x1] %vm11547_vm0, %v11476_v2  ;;  %1212 = vrot.lane.b32.xlu0 %v7896_v42, %s7300_s27  ;;  %vm11552_vm0 = vcmask 31768  }
 0x183   : > { %v633_v63 = vpop.permute.xlu1 %632  ;;  %v1589_v3 = vld [vmem:[#allocation2 + $0x78] sm:$0xff] }
 0x184   : > { %v631_v0 = vpop.permute.xlu0 %630  ;;  %v1588_v1 = vld [vmem:[#allocation2 + $0x70] sm:$0xff]  ;;  %709 = vst.msk [vmem:[#allocation2 + $0x87] sm:$0xff] %vm11548_vm6, %v633_v63  ;;  %vm11553_vm6 = vcmask 41000  }
 0x185   : > { %708 = vst.msk [vmem:[#allocation2 + $0x7f] sm:$0xfe] %vm11549_vm3, %v631_v0  ;;  %6946 = vmatprep.mubr.msk.f32.mxu0 %vm1615_vm13, %v1588_v1  ;;  %1356 = vrot.lane.b32.xlu1 %v7893_v41, %s7301_s28  ;;  %vm11554_vm3 = vcmask 15368   ;;  %v395_v63 = vld [vmem:[%s7437_s21 + $0xf0] sm:$0xff] }
 0x186   : > { %884 = vst.msk [vmem:[#allocation2 + $0x80] sm:$0x1] %vm11550_vm4, %v11476_v2  ;;  %1354 = vrot.lane.b32.xlu0 %v7896_v42, %s7301_s28  ;;  %6947 = vmatmul.mubr.msk.f32.gmra.mrb[14].mxu0 %vm1615_vm13, %v1589_v3  ;;  %vm11555_vm4 = vmmov %vm11554_vm3 }
 0x187   : > { %v780_v4 = vpop.permute.xlu1 %779 }
 0x188   : > { %v778_v5 = vpop.permute.xlu0 %777  ;;  %860 = vst.msk [vmem:[#allocation2 + $0x89] sm:$0x7f] %vm11551_vm2, %v780_v4  ;;  %vm11556_vm2 = vcmask 16400  }
 0x189   : > { %859 = vst.msk [vmem:[#allocation2 + $0x81] sm:$0xff] %vm11552_vm0, %v778_v5  ;;  %1479 = vrot.lane.b32.xlu1 %v7893_v41, %s7302_s29  ;;  %v8184_v6 = vpop.f32.mrb[0].mxu0  ;;  %vm11557_vm0 = vcmask 23568  }
 0x18a   : > { %1477 = vrot.lane.b32.xlu0 %v7896_v42, %s7302_s29  ;;  %v8186_v7 = vpop.f32.mrb[1].mxu0 }
 0x18b   : > { %v927_v8 = vpop.permute.xlu1 %926 }
 0x18c   : > { %v925_v9 = vpop.permute.xlu0 %924  ;;  %1006 = vst.msk [vmem:[#allocation2 + $0x88] sm:$0xff] %vm988_vm11, %v927_v8 }
 0x18d   : > { %1005 = vst.msk [vmem:[#allocation2 + $0x80] sm:$0xff] %vm988_vm11, %v925_v9  ;;  %525 = vrot.lane.b32.xlu1 %v7823_v15, %s7297_s24 }
 0x18e   : > { %1160 = vst.msk [vmem:[#allocation2 + $0x8f] sm:$0x1] %vm11553_vm6, %v11476_v2  ;;  %523 = vrot.lane.b32.xlu0 %v7826_v16, %s7297_s24  ;;  %vm11558_vm6 = vcmask 23569  }
 0x18f   : > { %v1056_v10 = vpop.permute.xlu1 %1055 }
 0x190   : > { %v1054_v11 = vpop.permute.xlu0 %1053  ;;  %1136 = vst.msk [vmem:[#allocation2 + $0x87] sm:$0xff] %vm1119_vm14, %v1056_v10 }
 0x191   : > { %1135 = vst.msk [vmem:[#allocation2 + $0x7f] sm:$0xfe] %vm1117_vm15, %v1054_v11  ;;  %648 = vrot.lane.b32.xlu1 %v7823_v15, %s7299_s26 }
 0x192   : > { %1302 = vst.msk [vmem:[#allocation2 + $0x80] sm:$0x1] %vm1293_vm1, %v11476_v2  ;;  %646 = vrot.lane.b32.xlu0 %v7826_v16, %s7299_s26 }
 0x193   : > { %v1203_v12 = vpop.permute.xlu1 %1202 }
 0x194   : > { %v1201_v13 = vpop.permute.xlu0 %1200  ;;  %1277 = vst.msk [vmem:[#allocation2 + $0x89] sm:$0x7f] %vm1260_vm9, %v1203_v12 }
 0x195   : > { %1276 = vst.msk [vmem:[#allocation2 + $0x81] sm:$0xff] %vm1258_vm7, %v1201_v13  ;;  %795 = vrot.lane.b32.xlu1 %v7893_v41, %s7296_s23 }
 0x196   : > { %793 = vrot.lane.b32.xlu0 %v7896_v42, %s7296_s23 }
 0x197   : > { %v1345_v22 = vpop.permute.xlu1 %1344 }
 0x198   : > { %v1343_v23 = vpop.permute.xlu0 %1342  ;;  %1418 = vst.msk [vmem:[#allocation2 + $0x88] sm:$0xff] %vm1400_vm5, %v1345_v22 }
 0x199   : > { %1417 = vst.msk [vmem:[#allocation2 + $0x80] sm:$0xff] %vm1400_vm5, %v1343_v23  ;;  %942 = vrot.lane.b32.xlu1 %v7893_v41, %s7295_s22  ;;  %v8218_v15 = vpop.f32.mrb[2].mxu0 }
 0x19a   : > { %1566 = vst.msk [vmem:[#allocation2 + $0x8f] sm:$0x1] %vm1557_vm12, %v11476_v2  ;;  %940 = vrot.lane.b32.xlu0 %v7896_v42, %s7295_s22  ;;  %v8220_v16 = vpop.f32.mrb[3].mxu0 }
 0x19b   : > { %v1468_v14 = vpop.permute.xlu1 %1467 }
 0x19c   : > { %v1466_v17 = vpop.permute.xlu0 %1465  ;;  %1542 = vst.msk [vmem:[#allocation2 + $0x87] sm:$0xff] %vm1525_vm10, %v1468_v14 }
 0x19d   : > { %1541 = vst.msk [vmem:[#allocation2 + $0x7f] sm:$0xfe] %vm11473_vm8, %v1466_v17  ;;  %1071 = vrot.lane.b32.xlu1 %v7893_v41, %s7298_s25 }
 0x19e   : > { %1069 = vrot.lane.b32.xlu0 %v7896_v42, %s7298_s25 }
 0x19f   : > { %v514_v26 = vpop.permute.xlu1 %513 }
 0x1a0   : > { %v512_v27 = vpop.permute.xlu0 %511  ;;  %587 = vst.msk [vmem:[#allocation2 + $0x98] sm:$0xff] %vm11554_vm3, %v514_v26  ;;  %vm11559_vm3 = vcmask 24600  }
 0x1a1   : > { %586 = vst.msk [vmem:[#allocation2 + $0x90] sm:$0xff] %vm11555_vm4, %v512_v27  ;;  %1218 = vrot.lane.b32.xlu1 %v7963_v61, %s7300_s27  ;;  %vm11560_vm4 = vcmask 30744  }
 0x1a2   : > { %736 = vst.msk [vmem:[#allocation2 + $0x9f] sm:$0x1] %vm11556_vm2, %v11476_v2  ;;  %1216 = vrot.lane.b32.xlu0 %v7966_v62, %s7300_s27  ;;  %vm11561_vm2 = vcmask 31768  }
 0x1a3   : > { %v637_v28 = vpop.permute.xlu1 %636  ;;  %v1591_v31 = vld [vmem:[#allocation2 + $0x88] sm:$0xff] }
 0x1a4   : > { %v635_v29 = vpop.permute.xlu0 %634  ;;  %v1590_v30 = vld [vmem:[#allocation2 + $0x80] sm:$0xff]  ;;  %711 = vst.msk [vmem:[#allocation2 + $0x97] sm:$0xff] %vm11557_vm0, %v637_v28  ;;  %vm11562_vm0 = vcmask 41000  }
 0x1a5   : > { %710 = vst.msk [vmem:[#allocation2 + $0x8f] sm:$0xfe] %vm11558_vm6, %v635_v29  ;;  %6949 = vmatprep.mubr.msk.f32.mxu0 %vm1615_vm13, %v1590_v30  ;;  %1360 = vrot.lane.b32.xlu1 %v7963_v61, %s7301_s28  ;;  %vm11563_vm6 = vcmask 15368   ;;  %v6629_v29 = vld [vmem:[#allocation8] ss:$0 sm:$0xff] }
 0x1a6   : > { %885 = vst.msk [vmem:[#allocation2 + $0x90] sm:$0x1] %vm11559_vm3, %v11476_v2  ;;  %1358 = vrot.lane.b32.xlu0 %v7966_v62, %s7301_s28  ;;  %6950 = vmatmul.mubr.msk.f32.gmra.mrb[16].mxu0 %vm1615_vm13, %v1591_v31  ;;  %vm11564_vm3 = vmmov %vm11563_vm6 }
 0x1a7   : > { %v784_v32 = vpop.permute.xlu1 %783 }
 0x1a8   : > { %v782_v33 = vpop.permute.xlu0 %781  ;;  %862 = vst.msk [vmem:[#allocation2 + $0x99] sm:$0x7f] %vm11560_vm4, %v784_v32  ;;  %vm11565_vm4 = vcmask 16400  }
 0x1a9   : > { %861 = vst.msk [vmem:[#allocation2 + $0x91] sm:$0xff] %vm11561_vm2, %v782_v33  ;;  %1483 = vrot.lane.b32.xlu1 %v7963_v61, %s7302_s29  ;;  %vm11566_vm2 = vcmask 23568  }
 0x1aa   : > { %1481 = vrot.lane.b32.xlu0 %v7966_v62, %s7302_s29 }
 0x1ab   : > { %v931_v34 = vpop.permute.xlu1 %930 }
 0x1ac   : > { %v929_v35 = vpop.permute.xlu0 %928  ;;  %1008 = vst.msk [vmem:[#allocation2 + $0x98] sm:$0xff] %vm988_vm11, %v931_v34 }
 0x1ad   : > { %1007 = vst.msk [vmem:[#allocation2 + $0x90] sm:$0xff] %vm988_vm11, %v929_v35  ;;  %529 = vrot.lane.b32.xlu1 %v7893_v41, %s7297_s24 }
 0x1ae   : > { %1161 = vst.msk [vmem:[#allocation2 + $0x9f] sm:$0x1] %vm11562_vm0, %v11476_v2  ;;  %527 = vrot.lane.b32.xlu0 %v7896_v42, %s7297_s24  ;;  %vm11567_vm0 = vcmask 23569  }
 0x1af   : > { %v1060_v36 = vpop.permute.xlu1 %1059 }
 0x1b0   : > { %v1058_v18 = vpop.permute.xlu0 %1057  ;;  %1138 = vst.msk [vmem:[#allocation2 + $0x97] sm:$0xff] %vm1119_vm14, %v1060_v36 }
 0x1b1   : > { %1137 = vst.msk [vmem:[#allocation2 + $0x8f] sm:$0xfe] %vm1117_vm15, %v1058_v18  ;;  %652 = vrot.lane.b32.xlu1 %v7893_v41, %s7299_s26 }
 0x1b2   : > { %1303 = vst.msk [vmem:[#allocation2 + $0x90] sm:$0x1] %vm1293_vm1, %v11476_v2  ;;  %650 = vrot.lane.b32.xlu0 %v7896_v42, %s7299_s26 }
 0x1b3   : > { %v1207_v19 = vpop.permute.xlu1 %1206 }
 0x1b4   : > { %v1205_v37 = vpop.permute.xlu0 %1204  ;;  %1279 = vst.msk [vmem:[#allocation2 + $0x99] sm:$0x7f] %vm1260_vm9, %v1207_v19  ;;  %v3347_v19 = vld [vmem:[%s11456_s4 + $0x100] sm:$0xff] }
 0x1b5   : > { %1278 = vst.msk [vmem:[#allocation2 + $0x91] sm:$0xff] %vm1258_vm7, %v1205_v37  ;;  %799 = vrot.lane.b32.xlu1 %v7963_v61, %s7296_s23  ;;  %v3348_v37 = vld [vmem:[%s11456_s4 + $0x108] sm:$0xff] }
 0x1b6   : > { %797 = vrot.lane.b32.xlu0 %v7966_v62, %s7296_s23 }
 0x1b7   : > { %v1349_v38 = vpop.permute.xlu1 %1348 }
 0x1b8   : > { %v1347_v39 = vpop.permute.xlu0 %1346  ;;  %1420 = vst.msk [vmem:[#allocation2 + $0x98] sm:$0xff] %vm1400_vm5, %v1349_v38  ;;  %v7122_v38 = vpack.c.bf16 %v3348_v37, %v3347_v19  ;;  %v3317_v37 = vld [vmem:[%s11456_s4 + $0x10] sm:$0xff] }
 0x1b9   : > { %1419 = vst.msk [vmem:[#allocation2 + $0x90] sm:$0xff] %vm1400_vm5, %v1347_v39  ;;  %946 = vrot.lane.b32.xlu1 %v7963_v61, %s7295_s22  ;;  %v8282_v41 = vpop.f32.mrb[4].mxu0 }
 0x1ba   : > { %1567 = vst.msk [vmem:[#allocation2 + $0x9f] sm:$0x1] %vm1557_vm12, %v11476_v2  ;;  %944 = vrot.lane.b32.xlu0 %v7966_v62, %s7295_s22  ;;  %v8284_v42 = vpop.f32.mrb[5].mxu0  ;;  %7123 = vmatprep.subr.bf16.mxu0 %v7122_v38 }
 0x1bb   : > { %v1472_v40 = vpop.permute.xlu1 %1471  ;;  %7125 = vmatpush3.bf16.msra.mxu0 %v7122_v38  ;;  %v3318_v38 = vld [vmem:[%s11456_s4 + $0x18] sm:$0xff] }
 0x1bc   : > { %v1470_v43 = vpop.permute.xlu0 %1469  ;;  %1544 = vst.msk [vmem:[#allocation2 + $0x97] sm:$0xff] %vm1525_vm10, %v1472_v40 }
 0x1bd   : > { %1543 = vst.msk [vmem:[#allocation2 + $0x8f] sm:$0xfe] %vm11473_vm8, %v1470_v43  ;;  %1075 = vrot.lane.b32.xlu1 %v7963_v61, %s7298_s25  ;;  %v3349_v43 = vld [vmem:[%s11456_s4 + $0x110] sm:$0xff] }
 0x1be   : > { %1073 = vrot.lane.b32.xlu0 %v7966_v62, %s7298_s25 }
 0x1bf   : > { %v518_v44 = vpop.permute.xlu1 %517 }
 0x1c0   : > { %v516_v45 = vpop.permute.xlu0 %515  ;;  %589 = vst.msk [vmem:[#allocation2 + $0xa8] sm:$0xff] %vm11563_vm6, %v518_v44  ;;  %vm11568_vm6 = vcmask 24600   ;;  %v3350_v44 = vld [vmem:[%s11456_s4 + $0x118] sm:$0xff] }
 0x1c1   : > { %588 = vst.msk [vmem:[#allocation2 + $0xa0] sm:$0xff] %vm11564_vm3, %v516_v45  ;;  %1222 = vrot.lane.b32.xlu1 %v8033_v24, %s7300_s27  ;;  %vm11569_vm3 = vcmask 30744   ;;  %v7126_v45 = vpack.c.bf16 %v3350_v44, %v3349_v43  ;;  %v3320_v43 = vld [vmem:[%s11456_s4 + $0x28] sm:$0xff] }
 0x1c2   : > { %737 = vst.msk [vmem:[#allocation2 + $0xaf] sm:$0x1] %vm11565_vm4, %v11476_v2  ;;  %1220 = vrot.lane.b32.xlu0 %v8036_v25, %s7300_s27  ;;  %vm11570_vm4 = vcmask 31768  }
 0x1c3   : > { %v641_v46 = vpop.permute.xlu1 %640  ;;  %v1593_v49 = vld [vmem:[#allocation2 + $0x98] sm:$0xff]  ;;  %7127 = vmatprep.subr.bf16.mxu0 %v7126_v45 }
 0x1c4   : > { %v639_v47 = vpop.permute.xlu0 %638  ;;  %v1592_v48 = vld [vmem:[#allocation2 + $0x90] sm:$0xff]  ;;  %713 = vst.msk [vmem:[#allocation2 + $0xa7] sm:$0xff] %vm11566_vm2, %v641_v46  ;;  %vm11571_vm2 = vcmask 41000   ;;  %7129 = vmatpush3.bf16.msra.mxu0 %v7126_v45 }
 0x1c5   : > { %712 = vst.msk [vmem:[#allocation2 + $0x9f] sm:$0xfe] %vm11567_vm0, %v639_v47  ;;  %6952 = vmatprep.mubr.msk.f32.mxu0 %vm1615_vm13, %v1592_v48  ;;  %1364 = vrot.lane.b32.xlu1 %v8033_v24, %s7301_s28  ;;  %vm11572_vm0 = vcmask 15368  }
 0x1c6   : > { %886 = vst.msk [vmem:[#allocation2 + $0xa0] sm:$0x1] %vm11568_vm6, %v11476_v2  ;;  %1362 = vrot.lane.b32.xlu0 %v8036_v25, %s7301_s28  ;;  %6953 = vmatmul.mubr.msk.f32.gmra.mrb[18].mxu0 %vm1615_vm13, %v1593_v49  ;;  %vm11573_vm6 = vmmov %vm11572_vm0 }
 0x1c7   : > { %v788_v50 = vpop.permute.xlu1 %787 }
 0x1c8   : > { %v786_v51 = vpop.permute.xlu0 %785  ;;  %864 = vst.msk [vmem:[#allocation2 + $0xa9] sm:$0x7f] %vm11569_vm3, %v788_v50  ;;  %vm11574_vm3 = vcmask 16400  }
 0x1c9   : > { %863 = vst.msk [vmem:[#allocation2 + $0xa1] sm:$0xff] %vm11570_vm4, %v786_v51  ;;  %1487 = vrot.lane.b32.xlu1 %v8033_v24, %s7302_s29  ;;  %vm11575_vm4 = vcmask 23568  }
 0x1ca   : > { %1485 = vrot.lane.b32.xlu0 %v8036_v25, %s7302_s29 }
 0x1cb   : > { %v935_v52 = vpop.permute.xlu1 %934 }
 0x1cc   : > { %v933_v53 = vpop.permute.xlu0 %932  ;;  %1010 = vst.msk [vmem:[#allocation2 + $0xa8] sm:$0xff] %vm988_vm11, %v935_v52 }
 0x1cd   : > { %1009 = vst.msk [vmem:[#allocation2 + $0xa0] sm:$0xff] %vm988_vm11, %v933_v53  ;;  %533 = vrot.lane.b32.xlu1 %v7963_v61, %s7297_s24 }
 0x1ce   : > { %1162 = vst.msk [vmem:[#allocation2 + $0xaf] sm:$0x1] %vm11571_vm2, %v11476_v2  ;;  %531 = vrot.lane.b32.xlu0 %v7966_v62, %s7297_s24  ;;  %vm11576_vm2 = vcmask 23569  }
 0x1cf   : > { %v1064_v54 = vpop.permute.xlu1 %1063 }
 0x1d0   : > { %v1062_v55 = vpop.permute.xlu0 %1061  ;;  %1140 = vst.msk [vmem:[#allocation2 + $0xa7] sm:$0xff] %vm1119_vm14, %v1064_v54 }
 0x1d1   : > { %1139 = vst.msk [vmem:[#allocation2 + $0x9f] sm:$0xfe] %vm1117_vm15, %v1062_v55  ;;  %656 = vrot.lane.b32.xlu1 %v7963_v61, %s7299_s26 }
 0x1d2   : > { %1304 = vst.msk [vmem:[#allocation2 + $0xa0] sm:$0x1] %vm1293_vm1, %v11476_v2  ;;  %654 = vrot.lane.b32.xlu0 %v7966_v62, %s7299_s26 }
 0x1d3   : > { %v1211_v56 = vpop.permute.xlu1 %1210 }
 0x1d4   : > { %v1209_v20 = vpop.permute.xlu0 %1208  ;;  %1281 = vst.msk [vmem:[#allocation2 + $0xa9] sm:$0x7f] %vm1260_vm9, %v1211_v56 }
 0x1d5   : > { %1280 = vst.msk [vmem:[#allocation2 + $0xa1] sm:$0xff] %vm1258_vm7, %v1209_v20  ;;  %803 = vrot.lane.b32.xlu1 %v8033_v24, %s7296_s23 }
 0x1d6   : > { %801 = vrot.lane.b32.xlu0 %v8036_v25, %s7296_s23 }
 0x1d7   : > { %v1353_v58 = vpop.permute.xlu1 %1352 }
 0x1d8   : > { %v1351_v59 = vpop.permute.xlu0 %1350  ;;  %1422 = vst.msk [vmem:[#allocation2 + $0xa8] sm:$0xff] %vm1400_vm5, %v1353_v58 }
 0x1d9   : > { %1421 = vst.msk [vmem:[#allocation2 + $0xa0] sm:$0xff] %vm1400_vm5, %v1351_v59  ;;  %950 = vrot.lane.b32.xlu1 %v8033_v24, %s7295_s22  ;;  %v8346_v61 = vpop.f32.mrb[6].mxu0 }
 0x1da   : > { %1568 = vst.msk [vmem:[#allocation2 + $0xaf] sm:$0x1] %vm1557_vm12, %v11476_v2  ;;  %948 = vrot.lane.b32.xlu0 %v8036_v25, %s7295_s22  ;;  %v8348_v62 = vpop.f32.mrb[7].mxu0 }
 0x1db   : > { %v1476_v21 = vpop.permute.xlu1 %1475 }
 0x1dc   : > { %v1474_v57 = vpop.permute.xlu0 %1473  ;;  %1546 = vst.msk [vmem:[#allocation2 + $0xa7] sm:$0xff] %vm1525_vm10, %v1476_v21 }
 0x1dd   : > { %1545 = vst.msk [vmem:[#allocation2 + $0x9f] sm:$0xfe] %vm11473_vm8, %v1474_v57  ;;  %1079 = vrot.lane.b32.xlu1 %v8033_v24, %s7298_s25 }
 0x1de   : > { %1077 = vrot.lane.b32.xlu0 %v8036_v25, %s7298_s25 }
 0x1df   : > { %v522_v0 = vpop.permute.xlu1 %521 }
 0x1e0   : > { %v520_v1 = vpop.permute.xlu0 %519  ;;  %591 = vst.msk [vmem:[#allocation2 + $0xb8] sm:$0xff] %vm11572_vm0, %v522_v0  ;;  %vm11577_vm0 = vcmask 24600  }
 0x1e1   : > { %590 = vst.msk [vmem:[#allocation2 + $0xb0] sm:$0xff] %vm11573_vm6, %v520_v1  ;;  %1226 = vrot.lane.b32.xlu1 %v396_v60, %s7300_s27  ;;  %vm11578_vm6 = vcmask 30744  }
 0x1e2   : > { %738 = vst.msk [vmem:[#allocation2 + $0xbf] sm:$0x1] %vm11574_vm3, %v11476_v2  ;;  %1224 = vrot.lane.b32.xlu0 %v395_v63, %s7300_s27  ;;  %vm11579_vm3 = vcmask 31768  }
 0x1e3   : > { %v645_v3 = vpop.permute.xlu1 %644  ;;  %v1595_v8 = vld [vmem:[#allocation2 + $0xa8] sm:$0xff] }
 0x1e4   : > { %v643_v4 = vpop.permute.xlu0 %642  ;;  %v1594_v5 = vld [vmem:[#allocation2 + $0xa0] sm:$0xff]  ;;  %715 = vst.msk [vmem:[#allocation2 + $0xb7] sm:$0xff] %vm11575_vm4, %v645_v3  ;;  %vm11580_vm4 = vcmask 41000  }
 0x1e5   : > { %714 = vst.msk [vmem:[#allocation2 + $0xaf] sm:$0xfe] %vm11576_vm2, %v643_v4  ;;  %6955 = vmatprep.mubr.msk.f32.mxu0 %vm1615_vm13, %v1594_v5  ;;  %1368 = vrot.lane.b32.xlu1 %v396_v60, %s7301_s28  ;;  %vm11581_vm2 = vcmask 15368  }
 0x1e6   : > { %887 = vst.msk [vmem:[#allocation2 + $0xb0] sm:$0x1] %vm11577_vm0, %v11476_v2  ;;  %1366 = vrot.lane.b32.xlu0 %v395_v63, %s7301_s28  ;;  %6956 = vmatmul.mubr.msk.f32.gmra.mrb[20].mxu0 %vm1615_vm13, %v1595_v8  ;;  %vm11582_vm0 = vmmov %vm11581_vm2  ;;  %s7306_s28 = smov 96  }
 0x1e7   : > { %v792_v9 = vpop.permute.xlu1 %791 }
 0x1e8   : > { %v790_v10 = vpop.permute.xlu0 %789  ;;  %866 = vst.msk [vmem:[#allocation2 + $0xb9] sm:$0x7f] %vm11578_vm6, %v792_v9  ;;  %vm11583_vm6 = vcmask 16400  }
 0x1e9   : > { %865 = vst.msk [vmem:[#allocation2 + $0xb1] sm:$0xff] %vm11579_vm3, %v790_v10  ;;  %537 = vrot.lane.b32.xlu1 %v8033_v24, %s7297_s24  ;;  %vm11584_vm3 = vcmask 23568  }
 0x1ea   : > { %535 = vrot.lane.b32.xlu0 %v8036_v25, %s7297_s24 }
 0x1eb   : > { %v939_v11 = vpop.permute.xlu1 %938 }
 0x1ec   : > { %v937_v12 = vpop.permute.xlu0 %936  ;;  %1012 = vst.msk [vmem:[#allocation2 + $0xb8] sm:$0xff] %vm988_vm11, %v939_v11 }
 0x1ed   : > { %1011 = vst.msk [vmem:[#allocation2 + $0xb0] sm:$0xff] %vm988_vm11, %v937_v12  ;;  %1491 = vrot.lane.b32.xlu1 %v396_v60, %s7302_s29 }
 0x1ee   : > { %1163 = vst.msk [vmem:[#allocation2 + $0xbf] sm:$0x1] %vm11580_vm4, %v11476_v2  ;;  %1489 = vrot.lane.b32.xlu0 %v395_v63, %s7302_s29  ;;  %vm11585_vm4 = vcmask 23569   ;;  %s7307_s29 = smov 32  }
 0x1ef   : > { %v1068_v13 = vpop.permute.xlu1 %1067 }
 0x1f0   : > { %v1066_v22 = vpop.permute.xlu0 %1065  ;;  %1142 = vst.msk [vmem:[#allocation2 + $0xb7] sm:$0xff] %vm1119_vm14, %v1068_v13 }
 0x1f1   : > { %1141 = vst.msk [vmem:[#allocation2 + $0xaf] sm:$0xfe] %vm1117_vm15, %v1066_v22  ;;  %660 = vrot.lane.b32.xlu1 %v8033_v24, %s7299_s26 }
 0x1f2   : > { %1305 = vst.msk [vmem:[#allocation2 + $0xb0] sm:$0x1] %vm1293_vm1, %v11476_v2  ;;  %658 = vrot.lane.b32.xlu0 %v8036_v25, %s7299_s26 }
 0x1f3   : > { %v1215_v23 = vpop.permute.xlu1 %1214 }
 0x1f4   : > { %v1213_v14 = vpop.permute.xlu0 %1212  ;;  %1283 = vst.msk [vmem:[#allocation2 + $0xb9] sm:$0x7f] %vm1260_vm9, %v1215_v23 }
 0x1f5   : > { %1282 = vst.msk [vmem:[#allocation2 + $0xb1] sm:$0xff] %vm1258_vm7, %v1213_v14  ;;  %807 = vrot.lane.b32.xlu1 %v396_v60, %s7296_s23 }
 0x1f6   : > { %805 = vrot.lane.b32.xlu0 %v395_v63, %s7296_s23 }
 0x1f7   : > { %v1357_v17 = vpop.permute.xlu1 %1356 }
 0x1f8   : > { %v1355_v26 = vpop.permute.xlu0 %1354  ;;  %1424 = vst.msk [vmem:[#allocation2 + $0xb8] sm:$0xff] %vm1400_vm5, %v1357_v17 }
 0x1f9   : > { %1423 = vst.msk [vmem:[#allocation2 + $0xb0] sm:$0xff] %vm1400_vm5, %v1355_v26  ;;  %954 = vrot.lane.b32.xlu1 %v396_v60, %s7295_s22  ;;  %v8402_v24 = vpop.f32.mrb[8].mxu0 }
 0x1fa   : > { %1569 = vst.msk [vmem:[#allocation2 + $0xbf] sm:$0x1] %vm1557_vm12, %v11476_v2  ;;  %952 = vrot.lane.b32.xlu0 %v395_v63, %s7295_s22  ;;  %v8404_v25 = vpop.f32.mrb[9].mxu0 }
 0x1fb   : > { %v1480_v27 = vpop.permute.xlu1 %1479 }
 0x1fc   : > { %v1478_v28 = vpop.permute.xlu0 %1477  ;;  %1548 = vst.msk [vmem:[#allocation2 + $0xb7] sm:$0xff] %vm1525_vm10, %v1480_v27 }
 0x1fd   : > { %1547 = vst.msk [vmem:[#allocation2 + $0xaf] sm:$0xfe] %vm11473_vm8, %v1478_v28  ;;  %1083 = vrot.lane.b32.xlu1 %v396_v60, %s7298_s25  ;;  %vm11586_vm8 = vcmask 24600  }
 0x1fe   : > { %1081 = vrot.lane.b32.xlu0 %v395_v63, %s7298_s25 }
 0x1ff   : > { %v526_v30 = vpop.permute.xlu1 %525 }
 0x200   : > { %v524_v31 = vpop.permute.xlu0 %523  ;;  %593 = vst.msk [vmem:[#allocation2 + $0xc8] sm:$0xff] %vm11581_vm2, %v526_v30  ;;  %vm11475_vm2 = vcmask 261120  }
 0x201   : > { %592 = vst.msk [vmem:[#allocation2 + $0xc0] sm:$0xff] %vm11582_vm0, %v524_v31  ;;  %vm11587_vm0 = vcmask 30744   ;;  %v3315_v31 = vld [vmem:[%s11456_s4] sm:$0xff] }
 0x202   : > { %739 = vst.msk [vmem:[#allocation2 + $0xcf] sm:$0x1] %vm11583_vm6, %v11476_v2  ;;  %2011 = vperm.xlu0 %7274, %v6629_v29   ;;  %vm11588_vm6 = vcmask 31768  }
 0x203   : > { %v649_v32 = vpop.permute.xlu1 %648  ;;  %v1597_v35 = vld [vmem:[#allocation2 + $0xb8] sm:$0xff]  ;;  %2216 = vst.msk [vmem:[#allocation3] sm:$0xff] %vm11475_vm2, %v11476_v2  ;;  %2217 = vst.msk [vmem:[#allocation3 + $0x18] sm:$0xff] %vm11475_vm2, %v11476_v2 }
 0x204   : > { %v647_v33 = vpop.permute.xlu0 %646  ;;  %v1596_v34 = vld [vmem:[#allocation2 + $0xb0] sm:$0xff]  ;;  %717 = vst.msk [vmem:[#allocation2 + $0xc7] sm:$0xff] %vm11584_vm3, %v649_v32  ;;  %vm11589_vm3 = vcmask 41000   ;;  %v3316_v32 = vld [vmem:[%s11456_s4 + $0x8] sm:$0xff] }
 0x205   : > { %716 = vst.msk [vmem:[#allocation2 + $0xbf] sm:$0xfe] %vm11585_vm4, %v647_v33  ;;  %6958 = vmatprep.mubr.msk.f32.mxu0 %vm1615_vm13, %v1596_v34  ;;  %vm11590_vm4 = vcmask 72769   ;;  %v11478_v33 = vmov 0.0|0.0   ;;  %v7075_v34 = vpack.c.bf16 %v3316_v32, %v3315_v31 }
 0x206   : > { %888 = vst.msk [vmem:[#allocation2 + $0xc0] sm:$0x1] %vm11586_vm8, %v11476_v2  ;;  %6959 = vmatmul.mubr.msk.f32.gmra.mrb[22].mxu0 %vm1615_vm13, %v1597_v35  ;;  %vm11474_vm8 = vcmask 253952   ;;  %7074 = vmatprep.subr.bf16.mxu1 %v11478_v33 }
 0x207   : > { %3201 = vst.msk [vmem:[#allocation3 + $0x2e0] sm:$0xff] %vm11475_vm2, %v11476_v2  ;;  %3202 = vst.msk [vmem:[#allocation3 + $0x2f8] sm:$0xff] %vm11475_vm2, %v11476_v2  ;;  %v796_v36 = vpop.permute.xlu1 %795  ;;  %vm11595_vm2 = vcmask 23569   ;;  %7076 = vmatpush1.bf16.msra.mxu1 %v7075_v34 }
 0x208   : > { %v794_v18 = vpop.permute.xlu0 %793  ;;  %868 = vst.msk [vmem:[#allocation2 + $0xc9] sm:$0x7f] %vm11587_vm0, %v796_v36  ;;  %vm11591_vm0 = vcmask 15368   ;;  %7077 = vmatprep.subr.bf16.mxu1 %v11478_v33 }
 0x209   : > { %867 = vst.msk [vmem:[#allocation2 + $0xc1] sm:$0xff] %vm11588_vm6, %v794_v18  ;;  %vm11592_vm6 = vmmov %vm11591_vm0 }
 0x20a   : > { %3203 = vst.msk [vmem:[#allocation3 + $0x2f] sm:$0x1] %vm11474_vm8, %v11476_v2  ;;  %2219 = vst.msk [vmem:[#allocation3] sm:$0x1] %vm11474_vm8, %v11476_v2 }
 0x20b   : > { %2220 = vst.msk [vmem:[#allocation3 + $0x30] sm:$0x1] %vm11474_vm8, %v11476_v2  ;;  %2221 = vst.msk [vmem:[#allocation3 + $0x60] sm:$0x1] %vm11474_vm8, %v11476_v2  ;;  %v943_v39 = vpop.permute.xlu1 %942 }
 0x20c   : > { %2222 = vst.msk [vmem:[#allocation3 + $0x90] sm:$0x1] %vm11474_vm8, %v11476_v2  ;;  %2223 = vst.msk [vmem:[#allocation3 + $0xc0] sm:$0x1] %vm11474_vm8, %v11476_v2  ;;  %v941_v40 = vpop.permute.xlu0 %940 }
 0x20d   : > { %2224 = vst.msk [vmem:[#allocation3 + $0xf0] sm:$0x1] %vm11474_vm8, %v11476_v2  ;;  %2225 = vst.msk [vmem:[#allocation3 + $0x120] sm:$0x1] %vm11474_vm8, %v11476_v2 }
 0x20e   : > { %2226 = vst.msk [vmem:[#allocation3 + $0x150] sm:$0x1] %vm11474_vm8, %v11476_v2  ;;  %2227 = vst.msk [vmem:[#allocation3 + $0x180] sm:$0x1] %vm11474_vm8, %v11476_v2 }
 0x20f   : > { %2228 = vst.msk [vmem:[#allocation3 + $0x1b0] sm:$0x1] %vm11474_vm8, %v11476_v2  ;;  %2229 = vst.msk [vmem:[#allocation3 + $0x1e0] sm:$0x1] %vm11474_vm8, %v11476_v2  ;;  %v1072_v46 = vpop.permute.xlu1 %1071 }
 0x210   : > { %2230 = vst.msk [vmem:[#allocation3 + $0x210] sm:$0x1] %vm11474_vm8, %v11476_v2  ;;  %2231 = vst.msk [vmem:[#allocation3 + $0x240] sm:$0x1] %vm11474_vm8, %v11476_v2  ;;  %v1070_v47 = vpop.permute.xlu0 %1069 }
 0x211   : > { %2232 = vst.msk [vmem:[#allocation3 + $0x270] sm:$0x1] %vm11474_vm8, %v11476_v2  ;;  %2233 = vst.msk [vmem:[#allocation3 + $0x2a0] sm:$0x1] %vm11474_vm8, %v11476_v2 }
 0x212   : > { %2234 = vst.msk [vmem:[#allocation3 + $0x2d0] sm:$0x1] %vm11474_vm8, %v11476_v2  ;;  %3204 = vst.msk [vmem:[#allocation3 + $0x5f] sm:$0x1] %vm11474_vm8, %v11476_v2 }
 0x213   : > { %3205 = vst.msk [vmem:[#allocation3 + $0x8f] sm:$0x1] %vm11474_vm8, %v11476_v2  ;;  %3206 = vst.msk [vmem:[#allocation3 + $0xbf] sm:$0x1] %vm11474_vm8, %v11476_v2  ;;  %v1219_v48 = vpop.permute.xlu1 %1218 }
 0x214   : > { %3207 = vst.msk [vmem:[#allocation3 + $0xef] sm:$0x1] %vm11474_vm8, %v11476_v2  ;;  %3208 = vst.msk [vmem:[#allocation3 + $0x11f] sm:$0x1] %vm11474_vm8, %v11476_v2  ;;  %v1217_v49 = vpop.permute.xlu0 %1216 }
 0x215   : > { %3209 = vst.msk [vmem:[#allocation3 + $0x14f] sm:$0x1] %vm11474_vm8, %v11476_v2  ;;  %3210 = vst.msk [vmem:[#allocation3 + $0x17f] sm:$0x1] %vm11474_vm8, %v11476_v2 }
 0x216   : > { %3211 = vst.msk [vmem:[#allocation3 + $0x1af] sm:$0x1] %vm11474_vm8, %v11476_v2  ;;  %3212 = vst.msk [vmem:[#allocation3 + $0x1df] sm:$0x1] %vm11474_vm8, %v11476_v2 }
 0x217   : > { %3213 = vst.msk [vmem:[#allocation3 + $0x20f] sm:$0x1] %vm11474_vm8, %v11476_v2  ;;  %3214 = vst.msk [vmem:[#allocation3 + $0x23f] sm:$0x1] %vm11474_vm8, %v11476_v2  ;;  %v1361_v50 = vpop.permute.xlu1 %1360 }
 0x218   : > { %3215 = vst.msk [vmem:[#allocation3 + $0x26f] sm:$0x1] %vm11474_vm8, %v11476_v2  ;;  %3216 = vst.msk [vmem:[#allocation3 + $0x29f] sm:$0x1] %vm11474_vm8, %v11476_v2  ;;  %v1359_v51 = vpop.permute.xlu0 %1358 }
 0x219   : > { %3217 = vst.msk [vmem:[#allocation3 + $0x2cf] sm:$0x1] %vm11474_vm8, %v11476_v2  ;;  %3218 = vst.msk [vmem:[#allocation3 + $0x2ff] sm:$0x1] %vm11474_vm8, %v11476_v2  ;;  %v8532_v52 = vpop.f32.mrb[10].mxu0 }
 0x21a   : > { %6159 = vst.msk [vmem:[#allocation5 + $0xc] sm:$0x1] %vm11474_vm8, %v11476_v2  ;;  %6160 = vst.msk [vmem:[#allocation5 + $0x18] sm:$0x1] %vm11474_vm8, %v11476_v2  ;;  %v8534_v53 = vpop.f32.mrb[11].mxu0 }
 0x21b   : > { %6161 = vst.msk [vmem:[#allocation5 + $0x24] sm:$0x1] %vm11474_vm8, %v11476_v2  ;;  %6292 = vst.msk [vmem:[#allocation5 + $0xb] sm:$0x1] %vm11474_vm8, %v11476_v2  ;;  %v1484_v54 = vpop.permute.xlu1 %1483 }
 0x21c   : > { %6293 = vst.msk [vmem:[#allocation5 + $0x17] sm:$0x1] %vm11474_vm8, %v11476_v2  ;;  %6294 = vst.msk [vmem:[#allocation5 + $0x23] sm:$0x1] %vm11474_vm8, %v11476_v2  ;;  %v1482_v55 = vpop.permute.xlu0 %1481  ;;  %vm11594_vm8 = vcmask 23568  }
 0x21d   : > { %1014 = vst.msk [vmem:[#allocation2 + $0xc8] sm:$0xff] %vm988_vm11, %v943_v39  ;;  %1013 = vst.msk [vmem:[#allocation2 + $0xc0] sm:$0xff] %vm988_vm11, %v941_v40  ;;  %v7078_v39 = vpack.c.bf16 %v3318_v38, %v3317_v37  ;;  %v3319_v40 = vld [vmem:[%s11456_s4 + $0x20] sm:$0xff] }
 0x21e   : > { %1164 = vst.msk [vmem:[#allocation2 + $0xcf] sm:$0x1] %vm11589_vm3, %v11476_v2  ;;  %vm11593_vm3 = vcmask 16400   ;;  %v7081_v44 = vpack.c.bf16 %v3320_v43, %v3319_v40 }
 0x21f   : > { %1144 = vst.msk [vmem:[#allocation2 + $0xc7] sm:$0xff] %vm1119_vm14, %v1072_v46  ;;  %v530_v56 = vpop.permute.xlu1 %529  ;;  %7079 = vmatpush1.bf16.msra.mxu1 %v7078_v39 }
 0x220   : > { %1143 = vst.msk [vmem:[#allocation2 + $0xbf] sm:$0xfe] %vm1117_vm15, %v1070_v47  ;;  %v528_v20 = vpop.permute.xlu0 %527  ;;  %7080 = vmatprep.subr.bf16.mxu1 %v11478_v33 }
 0x221   : > { %1306 = vst.msk [vmem:[#allocation2 + $0xc0] sm:$0x1] %vm1293_vm1, %v11476_v2 }
 0x222   : > { %1285 = vst.msk [vmem:[#allocation2 + $0xc9] sm:$0x7f] %vm1260_vm9, %v1219_v48 }
 0x223   : > { %1284 = vst.msk [vmem:[#allocation2 + $0xc1] sm:$0xff] %vm1258_vm7, %v1217_v49  ;;  %v653_v58 = vpop.permute.xlu1 %652  ;;  %7082 = vmatpush1.bf16.msra.mxu1 %v7081_v44 }
 0x224   : > { %1426 = vst.msk [vmem:[#allocation2 + $0xc8] sm:$0xff] %vm1400_vm5, %v1361_v50  ;;  %1425 = vst.msk [vmem:[#allocation2 + $0xc0] sm:$0xff] %vm1400_vm5, %v1359_v51  ;;  %v651_v59 = vpop.permute.xlu0 %650  ;;  %7083 = vmatprep.subr.bf16.mxu1 %v11478_v33 }
 0x225   : > { %1570 = vst.msk [vmem:[#allocation2 + $0xcf] sm:$0x1] %vm1557_vm12, %v11476_v2 }
 0x226   : > { %1550 = vst.msk [vmem:[#allocation2 + $0xc7] sm:$0xff] %vm1525_vm10, %v1484_v54 }
 0x227   : > { %1549 = vst.msk [vmem:[#allocation2 + $0xbf] sm:$0xfe] %vm11590_vm4, %v1482_v55  ;;  %vm11596_vm4 = vcmask 24600   ;;  %v800_v60 = vpop.permute.xlu1 %799 }
 0x228   : > { %595 = vst.msk [vmem:[#allocation2 + $0xd8] sm:$0xff] %vm11591_vm0, %v530_v56  ;;  %v798_v63 = vpop.permute.xlu0 %797  ;;  %vm11597_vm0 = vcmask 30744  }
 0x229   : > { %594 = vst.msk [vmem:[#allocation2 + $0xd0] sm:$0xff] %vm11592_vm6, %v528_v20  ;;  %vm11598_vm6 = vcmask 31768  }
 0x22a   : > { %740 = vst.msk [vmem:[#allocation2 + $0xdf] sm:$0x1] %vm11593_vm3, %v11476_v2  ;;  %vm11601_vm3 = vcmask 15368  }
 0x22b   : > { %719 = vst.msk [vmem:[#allocation2 + $0xd7] sm:$0xff] %vm11594_vm8, %v653_v58  ;;  %v947_v0 = vpop.permute.xlu1 %946  ;;  %vm11600_vm8 = vcmask 72769  }
 0x22c   : > { %718 = vst.msk [vmem:[#allocation2 + $0xcf] sm:$0xfe] %vm11595_vm2, %v651_v59  ;;  %v945_v1 = vpop.permute.xlu0 %944  ;;  %vm11599_vm2 = vcmask 41000   ;;  %v3321_v59 = vld [vmem:[%s11456_s4 + $0x30] sm:$0xff] }
 0x22d   : > { %v1599_v57 = vld [vmem:[#allocation2 + $0xc8] sm:$0xff]  ;;  %889 = vst.msk [vmem:[#allocation2 + $0xd0] sm:$0x1] %vm11596_vm4, %v11476_v2  ;;  %vm11602_vm4 = vmmov %vm11601_vm3 }
 0x22e   : > { %v1598_v21 = vld [vmem:[#allocation2 + $0xc0] sm:$0xff]  ;;  %870 = vst.msk [vmem:[#allocation2 + $0xd9] sm:$0x7f] %vm11597_vm0, %v800_v60  ;;  %vm11603_vm0 = vcmask 16400  }
 0x22f   : > { %6961 = vmatprep.mubr.msk.f32.mxu0 %vm1615_vm13, %v1598_v21  ;;  %869 = vst.msk [vmem:[#allocation2 + $0xd1] sm:$0xff] %vm11598_vm6, %v798_v63  ;;  %v1076_v3 = vpop.permute.xlu1 %1075  ;;  %vm11604_vm6 = vcmask 23568   ;;  %v3322_v21 = vld [vmem:[%s11456_s4 + $0x38] sm:$0xff]  ;;  %v3323_v60 = vld [vmem:[%s11456_s4 + $0x40] sm:$0xff]  ;;  %v3324_v63 = vld [vmem:[%s11456_s4 + $0x48] sm:$0xff] }
 0x230   : > { %6962 = vmatmul.mubr.msk.f32.gmra.mrb[24].mxu0 %vm1615_vm13, %v1599_v57  ;;  %1016 = vst.msk [vmem:[#allocation2 + $0xd8] sm:$0xff] %vm988_vm11, %v947_v0  ;;  %1015 = vst.msk [vmem:[#allocation2 + $0xd0] sm:$0xff] %vm988_vm11, %v945_v1  ;;  %v1074_v4 = vpop.permute.xlu0 %1073  ;;  %v7084_v57 = vpack.c.bf16 %v3322_v21, %v3321_v59  ;;  %v7087_v0 = vpack.c.bf16 %v3324_v63, %v3323_v60  ;;  %v3325_v1 = vld [vmem:[%s11456_s4 + $0x50] sm:$0xff] }
 0x231   : > { %1165 = vst.msk [vmem:[#allocation2 + $0xdf] sm:$0x1] %vm11599_vm2, %v11476_v2  ;;  %vm11605_vm2 = vcmask 23569  }
 0x232   : > { %1146 = vst.msk [vmem:[#allocation2 + $0xd7] sm:$0xff] %vm1119_vm14, %v1076_v3  ;;  %7085 = vmatpush1.bf16.msra.mxu1 %v7084_v57 }
 0x233   : > { %1145 = vst.msk [vmem:[#allocation2 + $0xcf] sm:$0xfe] %vm1117_vm15, %v1074_v4  ;;  %v1223_v5 = vpop.permute.xlu1 %1222  ;;  %7086 = vmatprep.subr.bf16.mxu1 %v11478_v33 }
 0x234   : > { %1307 = vst.msk [vmem:[#allocation2 + $0xd0] sm:$0x1] %vm1293_vm1, %v11476_v2  ;;  %v1221_v8 = vpop.permute.xlu0 %1220 }
 0x235   : > { %1287 = vst.msk [vmem:[#allocation2 + $0xd9] sm:$0x7f] %vm1260_vm9, %v1223_v5 }
 0x236   : > { %1286 = vst.msk [vmem:[#allocation2 + $0xd1] sm:$0xff] %vm1258_vm7, %v1221_v8  ;;  %7088 = vmatpush1.bf16.msra.mxu1 %v7087_v0 }
 0x237   : > { %v1365_v9 = vpop.permute.xlu1 %1364  ;;  %7089 = vmatprep.subr.bf16.mxu1 %v11478_v33 }
 0x238   : > { %v1363_v10 = vpop.permute.xlu0 %1362  ;;  %1428 = vst.msk [vmem:[#allocation2 + $0xd8] sm:$0xff] %vm1400_vm5, %v1365_v9  ;;  %v3326_v9 = vld [vmem:[%s11456_s4 + $0x58] sm:$0xff] }
 0x239   : > { %1427 = vst.msk [vmem:[#allocation2 + $0xd0] sm:$0xff] %vm1400_vm5, %v1363_v10  ;;  %v8564_v11 = vpop.f32.mrb[12].mxu0  ;;  %v7090_v10 = vpack.c.bf16 %v3326_v9, %v3325_v1  ;;  %v3336_v9 = vld [vmem:[%s11456_s4 + $0xa8] sm:$0xff] }
 0x23a   : > { %1571 = vst.msk [vmem:[#allocation2 + $0xdf] sm:$0x1] %vm1557_vm12, %v11476_v2  ;;  %v8566_v12 = vpop.f32.mrb[13].mxu0 }
 0x23b   : > { %v1488_v13 = vpop.permute.xlu1 %1487  ;;  %7091 = vmatpush1.bf16.msra.mxu1 %v7090_v10 }
 0x23c   : > { %v1486_v22 = vpop.permute.xlu0 %1485  ;;  %1552 = vst.msk [vmem:[#allocation2 + $0xd7] sm:$0xff] %vm1525_vm10, %v1488_v13  ;;  %7092 = vmatprep.subr.bf16.mxu1 %v11478_v33 }
 0x23d   : > { %1551 = vst.msk [vmem:[#allocation2 + $0xcf] sm:$0xfe] %vm11600_vm8, %v1486_v22  ;;  %vm11606_vm8 = vcmask 24600  }
 0x23f   : > { %v534_v23 = vpop.permute.xlu1 %533 }
 0x240   : > { %v532_v14 = vpop.permute.xlu0 %531  ;;  %597 = vst.msk [vmem:[#allocation2 + $0xe8] sm:$0xff] %vm11601_vm3, %v534_v23  ;;  %vm11607_vm3 = vcmask 30744   ;;  %v3327_v23 = vld [vmem:[%s11456_s4 + $0x60] sm:$0xff] }
 0x241   : > { %596 = vst.msk [vmem:[#allocation2 + $0xe0] sm:$0xff] %vm11602_vm4, %v532_v14  ;;  %vm11608_vm4 = vcmask 31768   ;;  %v3328_v14 = vld [vmem:[%s11456_s4 + $0x68] sm:$0xff] }
 0x242   : > { %741 = vst.msk [vmem:[#allocation2 + $0xef] sm:$0x1] %vm11603_vm0, %v11476_v2  ;;  %vm11609_vm0 = vcmask 41000  }
 0x243   : > { %v657_v17 = vpop.permute.xlu1 %656  ;;  %v1601_v28 = vld [vmem:[#allocation2 + $0xd8] sm:$0xff] }
 0x244   : > { %v655_v26 = vpop.permute.xlu0 %654  ;;  %v1600_v27 = vld [vmem:[#allocation2 + $0xd0] sm:$0xff]  ;;  %721 = vst.msk [vmem:[#allocation2 + $0xe7] sm:$0xff] %vm11604_vm6, %v657_v17  ;;  %v8667_v17 = vld [vmem:[%s11455_s3] ss:$0 sm:$0xff] }
 0x245   : > { %720 = vst.msk [vmem:[#allocation2 + $0xdf] sm:$0xfe] %vm11605_vm2, %v655_v26  ;;  %6964 = vmatprep.mubr.msk.f32.mxu0 %vm1615_vm13, %v1600_v27  ;;  %vm11612_vm2 = vcmask 16400   ;;  %v7093_v26 = vpack.c.bf16 %v3328_v14, %v3327_v23  ;;  %v8680_v31 = vadd.f32 %v8184_v6, %v8667_v17  ;;  %v8686_v32 = vadd.f32 %v8667_v17, %v8186_v7 }
 0x246   : > { %890 = vst.msk [vmem:[#allocation2 + $0xe0] sm:$0x1] %vm11606_vm8, %v11476_v2  ;;  %6965 = vmatmul.mubr.msk.f32.gmra.mrb[26].mxu0 %vm1615_vm13, %v1601_v28  ;;  %vm11613_vm8 = vcmask 72769   ;;  %v8690_v34 = vadd.f32 %v8218_v15, %v8667_v17  ;;  %v8698_v6 = vadd.f32 %v8667_v17, %v8220_v16  ;;  %v8706_v15 = vadd.f32 %v8282_v41, %v8667_v17  ;;  %v3331_v16 = vld [vmem:[%s11456_s4 + $0x80] sm:$0xff]  ;;  %v3332_v41 = vld [vmem:[%s11456_s4 + $0x88] sm:$0xff] }
 0x247   : > { %v804_v29 = vpop.permute.xlu1 %803  ;;  %7094 = vmatpush1.bf16.msra.mxu1 %v7093_v26  ;;  %v1941_v37 = vmax.f32 %v8686_v32, 0.0  ;;  %v1973_v38 = vmin.f32 %v8686_v32, 0.0  ;;  %v7099_v44 = vpack.c.bf16 %v3332_v41, %v3331_v16  ;;  %v8769_v59 = vadd.f32 %v8532_v52, %v8667_v17  ;;  %v3335_v52 = vld [vmem:[%s11456_s4 + $0xa0] sm:$0xff] }
 0x248   : > { %v802_v30 = vpop.permute.xlu0 %801  ;;  %872 = vst.msk [vmem:[#allocation2 + $0xe9] sm:$0x7f] %vm11607_vm3, %v804_v29  ;;  %vm11614_vm3 = vcmask 23568   ;;  %v3329_v29 = vld [vmem:[%s11456_s4 + $0x70] sm:$0xff]  ;;  %7095 = vmatprep.subr.bf16.mxu1 %v11478_v33  ;;  %v1944_v39 = vmax.f32 %v8690_v34, 0.0  ;;  %v1976_v40 = vmin.f32 %v8690_v34, 0.0  ;;  %v8773_v21 = vadd.f32 %v8667_v17, %v8534_v53 }
 0x249   : > { %871 = vst.msk [vmem:[#allocation2 + $0xe1] sm:$0xff] %vm11608_vm4, %v802_v30  ;;  %vm11615_vm4 = vcmask 23569   ;;  %v3330_v30 = vld [vmem:[%s11456_s4 + $0x78] sm:$0xff]  ;;  %v1975_v43 = vmin.f32 %v8698_v6, 0.0  ;;  %v8778_v63 = vadd.f32 %v8564_v11, %v8667_v17  ;;  %v8782_v0 = vadd.f32 %v8667_v17, %v8566_v12 }
 0x24a   : > { %v7096_v7 = vpack.c.bf16 %v3330_v30, %v3329_v29  ;;  %v1952_v10 = vmax.f32 %v8769_v59, 0.0  ;;  %v1983_v23 = vmin.f32 %v8773_v21, 0.0  ;;  %v7105_v29 = vpack.c.bf16 %v3336_v9, %v3335_v52 }
 0x24b   : > { %v951_v35 = vpop.permute.xlu1 %950  ;;  %v1954_v14 = vmax.f32 %v8778_v63, 0.0  ;;  %v1986_v26 = vmin.f32 %v8778_v63, 0.0 }
 0x24c   : > { %v949_v36 = vpop.permute.xlu0 %948  ;;  %1018 = vst.msk [vmem:[#allocation2 + $0xe8] sm:$0xff] %vm988_vm11, %v951_v35  ;;  %v8710_v35 = vadd.f32 %v8667_v17, %v8284_v42  ;;  %v1974_v42 = vmin.f32 %v8680_v31, 0.0  ;;  %7097 = vmatpush1.bf16.msra.mxu1 %v7096_v7 }
 0x24d   : > { %1017 = vst.msk [vmem:[#allocation2 + $0xe0] sm:$0xff] %vm988_vm11, %v949_v36  ;;  %v1942_v36 = vmax.f32 %v8680_v31, 0.0  ;;  %7098 = vmatprep.subr.bf16.mxu1 %v11478_v33 }
 0x24e   : > { %1166 = vst.msk [vmem:[#allocation2 + $0xef] sm:$0x1] %vm11609_vm0, %v11476_v2  ;;  %vm11616_vm0 = vcmask 24600  }
 0x24f   : > { %v1080_v18 = vpop.permute.xlu1 %1079 }
 0x250   : > { %v1078_v19 = vpop.permute.xlu0 %1077  ;;  %1148 = vst.msk [vmem:[#allocation2 + $0xe7] sm:$0xff] %vm1119_vm14, %v1080_v18  ;;  %v8727_v18 = vadd.f32 %v8346_v61, %v8667_v17  ;;  %v8742_v61 = vadd.f32 %v8402_v24, %v8667_v17  ;;  %v3333_v24 = vld [vmem:[%s11456_s4 + $0x90] sm:$0xff]  ;;  %7100 = vmatpush1.bf16.msra.mxu1 %v7099_v44 }
 0x251   : > { %1147 = vst.msk [vmem:[#allocation2 + $0xdf] sm:$0xfe] %vm1117_vm15, %v1078_v19  ;;  %v8731_v19 = vadd.f32 %v8667_v17, %v8348_v62  ;;  %v1943_v62 = vmax.f32 %v8698_v6, 0.0  ;;  %7101 = vmatprep.subr.bf16.mxu1 %v11478_v33 }
 0x252   : > { %1308 = vst.msk [vmem:[#allocation2 + $0xe0] sm:$0x1] %vm1293_vm1, %v11476_v2  ;;  %v1982_v60 = vmin.f32 %v8742_v61, 0.0 }
 0x253   : > { %v1227_v45 = vpop.permute.xlu1 %1226 }
 0x254   : > { %v1225_v46 = vpop.permute.xlu0 %1224  ;;  %1289 = vst.msk [vmem:[#allocation2 + $0xe9] sm:$0x7f] %vm1260_vm9, %v1227_v45  ;;  %vm11610_vm9 = vcmask 15368   ;;  %v1946_v45 = vmax.f32 %v8706_v15, 0.0 }
 0x255   : > { %1288 = vst.msk [vmem:[#allocation2 + $0xe1] sm:$0xff] %vm1258_vm7, %v1225_v46  ;;  %vm11611_vm6 = vmmov %vm11610_vm9  ;;  %v1978_v46 = vmin.f32 %v8706_v15, 0.0 }
 0x257   : > { %v1369_v47 = vpop.permute.xlu1 %1368 }
 0x258   : > { %v1367_v48 = vpop.permute.xlu0 %1366  ;;  %1430 = vst.msk [vmem:[#allocation2 + $0xe8] sm:$0xff] %vm1400_vm5, %v1369_v47  ;;  %v1945_v47 = vmax.f32 %v8710_v35, 0.0 }
 0x259   : > { %1429 = vst.msk [vmem:[#allocation2 + $0xe0] sm:$0xff] %vm1400_vm5, %v1367_v48  ;;  %v8618_v49 = vpop.f32.mrb[14].mxu0  ;;  %v8752_v48 = vadd.f32 %v8667_v17, %v8404_v25  ;;  %v1979_v25 = vmin.f32 %v8731_v19, 0.0 }
 0x25a   : > { %1572 = vst.msk [vmem:[#allocation2 + $0xef] sm:$0x1] %vm1557_vm12, %v11476_v2  ;;  %v8620_v50 = vpop.f32.mrb[15].mxu0 }
 0x25b   : > { %v538_v51 = vpop.permute.xlu1 %537  ;;  %v1949_v53 = vmax.f32 %v8752_v48, 0.0  ;;  %v8795_v11 = vadd.f32 %v8667_v17, %v8620_v50  ;;  %v1984_v50 = vmin.f32 %v8769_v59, 0.0 }
 0x25c   : > { %v536_v54 = vpop.permute.xlu0 %535  ;;  %599 = vst.msk [vmem:[#allocation2 + $0xf8] sm:$0xff] %vm11610_vm9, %v538_v51  ;;  %vm11617_vm9 = vcmask 30744   ;;  %v3334_v51 = vld [vmem:[%s11456_s4 + $0x98] sm:$0xff] }
 0x25d   : > { %598 = vst.msk [vmem:[#allocation2 + $0xf0] sm:$0xff] %vm11611_vm6, %v536_v54  ;;  %vm11618_vm6 = vcmask 31768   ;;  %v1977_v54 = vmin.f32 %v8710_v35, 0.0  ;;  %v1955_v16 = vmax.f32 %v8795_v11, 0.0  ;;  %v1987_v41 = vmin.f32 %v8795_v11, 0.0 }
 0x25e   : > { %742 = vst.msk [vmem:[#allocation2 + $0xff] sm:$0x1] %vm11612_vm2, %v11476_v2  ;;  %vm11619_vm2 = vcmask 41000  }
 0x25f   : > { %v1492_v55 = vpop.permute.xlu1 %1491 }
 0x260   : > { %v1490_v56 = vpop.permute.xlu0 %1489  ;;  %1554 = vst.msk [vmem:[#allocation2 + $0xe7] sm:$0xff] %vm1525_vm10, %v1492_v55  ;;  %v1948_v55 = vmax.f32 %v8727_v18, 0.0 }
 0x261   : > { %1553 = vst.msk [vmem:[#allocation2 + $0xdf] sm:$0xfe] %vm11613_vm8, %v1490_v56  ;;  %v1980_v56 = vmin.f32 %v8727_v18, 0.0 }
 0x263   : > { %v661_v20 = vpop.permute.xlu1 %660 }
 0x264   : > { %v659_v58 = vpop.permute.xlu0 %658  ;;  %723 = vst.msk [vmem:[#allocation2 + $0xf7] sm:$0xff] %vm11614_vm3, %v661_v20  ;;  %v1947_v20 = vmax.f32 %v8731_v19, 0.0 }
 0x265   : > { %722 = vst.msk [vmem:[#allocation2 + $0xef] sm:$0xfe] %vm11615_vm4, %v659_v58  ;;  %v1950_v58 = vmax.f32 %v8742_v61, 0.0 }
 0x266   : > { %891 = vst.msk [vmem:[#allocation2 + $0xf0] sm:$0x1] %vm11616_vm0, %v11476_v2 }
 0x267   : > { %v808_v3 = vpop.permute.xlu1 %807  ;;  %v1603_v8 = vld [vmem:[#allocation2 + $0xe8] sm:$0xff] }
 0x268   : > { %v806_v4 = vpop.permute.xlu0 %805  ;;  %v1602_v5 = vld [vmem:[#allocation2 + $0xe0] sm:$0xff]  ;;  %874 = vst.msk [vmem:[#allocation2 + $0xf9] sm:$0x7f] %vm11617_vm9, %v808_v3  ;;  %v7102_v3 = vpack.c.bf16 %v3334_v51, %v3333_v24  ;;  %vm11630_vm9 = vcmask 1040384  }
 0x269   : > { %873 = vst.msk [vmem:[#allocation2 + $0xf1] sm:$0xff] %vm11618_vm6, %v806_v4  ;;  %6967 = vmatprep.mubr.msk.f32.mxu0 %vm1615_vm13, %v1602_v5  ;;  %v1981_v4 = vmin.f32 %v8752_v48, 0.0  ;;  %v8791_v5 = vadd.f32 %v8618_v49, %v8667_v17 }
 0x26a   : > { %6968 = vmatmul.mubr.msk.f32.gmra.mrb[28].mxu0 %vm1615_vm13, %v1603_v8  ;;  %7103 = vmatpush1.bf16.msra.mxu1 %v7102_v3 }
 0x26b   : > { %v955_v13 = vpop.permute.xlu1 %954  ;;  %v1956_v30 = vmax.f32 %v8791_v5, 0.0  ;;  %v1988_v7 = vmin.f32 %v8791_v5, 0.0  ;;  %7104 = vmatprep.subr.bf16.mxu1 %v11478_v33 }
 0x26c   : > { %v953_v22 = vpop.permute.xlu0 %952  ;;  %1020 = vst.msk [vmem:[#allocation2 + $0xf8] sm:$0xff] %vm988_vm11, %v955_v13 }
 0x26d   : > { %1019 = vst.msk [vmem:[#allocation2 + $0xf0] sm:$0xff] %vm988_vm11, %v953_v22  ;;  %v1951_v22 = vmax.f32 %v8773_v21, 0.0  ;;  %vm11620_vm11 = vcmask 261120  }
 0x26e   : > { %1167 = vst.msk [vmem:[#allocation2 + $0xff] sm:$0x1] %vm11619_vm2, %v11476_v2  ;;  %7106 = vmatpush1.bf16.msra.mxu1 %v7105_v29  ;;  %vm11632_vm2 = vmmov %vm11630_vm9 }
 0x26f   : > { %v1084_v27 = vpop.permute.xlu1 %1083  ;;  %7107 = vmatprep.subr.bf16.mxu1 %v11478_v33 }
 0x270   : > { %v1082_v28 = vpop.permute.xlu0 %1081  ;;  %1150 = vst.msk [vmem:[#allocation2 + $0xf7] sm:$0xff] %vm1119_vm14, %v1084_v27  ;;  %v1953_v27 = vmax.f32 %v8782_v0, 0.0  ;;  %vm11623_vm14 = vmmov %vm11620_vm11 }
 0x271   : > { %1149 = vst.msk [vmem:[#allocation2 + $0xef] sm:$0xfe] %vm1117_vm15, %v1082_v28  ;;  %v1985_v28 = vmin.f32 %v8782_v0, 0.0  ;;  %vm11624_vm15 = vmmov %vm11620_vm11 }
 0x272   : > { %1292 = vst.msk [vmem:[#allocation2 + $0xf8] sm:$0xff] %vm1258_vm7, %v11476_v2  ;;  %1291 = vst.msk [vmem:[#allocation2 + $0xf0] sm:$0xff] %vm1258_vm7, %v11476_v2  ;;  %vm2184_vm7 = vcmask 261121  }
 0x273   : > { %1432 = vst.msk [vmem:[#allocation2 + $0xf8] sm:$0xff] %vm1400_vm5, %v11476_v2 }
 0x274   : > { %1309 = vst.msk [vmem:[#allocation2 + $0xf0] sm:$0x1] %vm1293_vm1, %v11476_v2  ;;  %vm11625_vm1 = vmmov %vm11620_vm11 }
 0x275   : > { %1556 = vst.msk [vmem:[#allocation2 + $0xf8] sm:$0xff] %vm1525_vm10, %v11476_v2  ;;  %vm11626_vm8 = vmmov %vm11625_vm1 }
 0x276   : > { %1431 = vst.msk [vmem:[#allocation2 + $0xf0] sm:$0xff] %vm1400_vm5, %v11476_v2  ;;  %vm2358_vm5 = vcmask 1046528   ;;  %vm11627_vm3 = vmmov %vm11625_vm1 }
 0x277   : > { %1573 = vst.msk [vmem:[#allocation2 + $0xff] sm:$0x1] %vm1557_vm12, %v11476_v2  ;;  %vm11621_vm12 = vmmov %vm11620_vm11 }
 0x278   : > { %1555 = vst.msk [vmem:[#allocation2 + $0xf0] sm:$0xff] %vm1525_vm10, %v11476_v2  ;;  %vm3171_vm10 = vcmask 260096   ;;  %vm11628_vm4 = vmmov %vm11625_vm1 }
 0x279   : > { %v6951_v57 = vpop.f32.mrb[16].mxu0  ;;  %vm11629_vm0 = vmmov %vm11625_vm1 }
 0x27a   : > { %v1862_v1 = vpop.f32.mrb[17].mxu0  ;;  %v8803_v13 = vadd.f32 %v6951_v57, %v8667_v17  ;;  %vm11631_vm6 = vmmov %vm11629_vm0 }
 0x27b   : > { %v8806_v49 = vadd.f32 %v8667_v17, %v1862_v1 }
 0x27c   : > { %v1990_v24 = vmin.f32 %v8803_v13, 0.0  ;;  %v11647_v5 = vmax.f32 %v8803_v13, 0.0 }
 0x27d   : > { %v1957_v51 = vmax.f32 %v8806_v49, 0.0  ;;  %v1989_v57 = vmin.f32 %v8806_v49, 0.0 }
 0x27e   : > { %v1605_v8 = vld [vmem:[#allocation2 + $0xf8] sm:$0xff] }
 0x27f   : > { %v1604_v12 = vld [vmem:[#allocation2 + $0xf0] sm:$0xff] }
 0x280   : > { %6970 = vmatprep.mubr.msk.f32.mxu0 %vm1615_vm13, %v1604_v12 }
 0x281   : > { %6971 = vmatmul.mubr.msk.f32.gmra.mrb[30].mxu0 %vm1615_vm13, %v1605_v8  ;;  %v8826_v1 = vpop.permute.xlu0 %2011  ;;  %vm11622_vm13 = vmmov %vm11620_vm11 }
 0x282   : > { %v2016_v3 = vmul.f32 %v8826_v1, %v1975_v43  ;;  %v2014_v52 = vmul.f32 %v8826_v1, %v1973_v38  ;;  %v2015_v12 = vmul.f32 %v8826_v1, %v1974_v42  ;;  %v2017_v8 = vmul.f32 %v8826_v1, %v1976_v40 }
 0x283   : > { %v2018_v9 = vmul.f32 %v8826_v1, %v1977_v54  ;;  %v2019_v2 = vmul.f32 %v8826_v1, %v1978_v46  ;;  %v2020_v44 = vmul.f32 %v8826_v1, %v1979_v25  ;;  %v2021_v43 = vmul.f32 %v8826_v1, %v1980_v56 }
 0x284   : > { %v8844_v38 = vadd.f32 %v2016_v3, %v1943_v62  ;;  %v8848_v42 = vadd.f32 %v2014_v52, %v1941_v37  ;;  %v8852_v40 = vadd.f32 %v2015_v12, %v1942_v36  ;;  %v8856_v46 = vadd.f32 %v2017_v8, %v1944_v39 }
 0x285   : > { %v8861_v54 = vadd.f32 %v2018_v9, %v1945_v47  ;;  %v8865_v6 = vadd.f32 %v2019_v2, %v1946_v45  ;;  %v8869_v32 = vadd.f32 %v2020_v44, %v1947_v20  ;;  %v8873_v31 = vadd.f32 %v2021_v43, %v1948_v55 }
 0x286   : > { %3018 = vrot.lane.b32.xlu0 %v8844_v38, %s7306_s28  ;;  %v2362_v34 = vrot.slane %v8844_v38, 1  ;;  %v2359_v35 = vrot.slane %v8848_v42, 1  ;;  %v8880_v15 = vrot.slane %v8852_v40, 1  ;;  %v8883_v2 = vrot.slane %v8844_v38, 7  ;;  %2697 = vst.msk [vmem:[#allocation3 + $0x8] sm:$0xff] %vm11620_vm11, %v8848_v42  ;;  %vm11633_vm11 = vmmov %vm11629_vm0 }
 0x287   : > { %2698 = vst.msk [vmem:[#allocation3 + $0x20] sm:$0xff] %vm11621_vm12, %v8852_v40  ;;  %v8894_v36 = vrot.slane %v8856_v46, 1  ;;  %v8897_v18 = vrot.slane %v8848_v42, 7  ;;  %v2365_v19 = vrot.slane %v8861_v54, 1  ;;  %v8901_v37 = vrot.slane %v8865_v6, 1  ;;  %vm11634_vm12 = vmmov %vm11629_vm0 }
 0x288   : > { %2699 = vst.msk [vmem:[#allocation3 + $0x38] sm:$0xff] %vm11622_vm13, %v8844_v38  ;;  %v8913_v39 = vsel %vm2358_vm5, %v2359_v35, %v8880_v15  ;;  %v2112_v62 = vrot.slane %v8856_v46, 7  ;;  %v8917_v45 = vrot.slane %v8861_v54, 7  ;;  %v2368_v47 = vrot.slane %v8869_v32, 1  ;;  %vm11635_vm13 = vmmov %vm11632_vm2 }
 0x289   : > { %2700 = vst.msk [vmem:[#allocation3 + $0x50] sm:$0xff] %vm11623_vm14, %v8856_v46  ;;  %2732 = vrot.lane.b32.xlu1 %v8913_v39, %s7307_s29  ;;  %v8928_v55 = vsel %vm2358_vm5, %v2362_v34, %v8894_v36  ;;  %v8932_v56 = vsel %vm2358_vm5, %v2365_v19, %v8901_v37  ;;  %v8937_v20 = vrot.slane %v8873_v31, 1  ;;  %v2109_v25 = vrot.slane %v8852_v40, 7  ;;  %vm11636_vm14 = vmmov %vm11629_vm0 }
 0x28a   : > { %2701 = vst.msk [vmem:[#allocation3 + $0x68] sm:$0xff] %vm11624_vm15, %v8861_v54  ;;  %2734 = vrot.lane.b32.xlu0 %v8880_v15, %s7307_s29  ;;  %v8950_v29 = vsel %vm11630_vm9, %v8883_v2, %v2112_v62  ;;  %v2022_v44 = vmul.f32 %v8826_v1, %v1981_v4  ;;  %v2023_v3 = vmul.f32 %v8826_v1, %v1982_v60  ;;  %vm11637_vm15 = vmmov %vm11629_vm0  ;;  %v9100_v19 = vrot.slane %v8869_v32, 7 }
 0x28b   : > { %2702 = vst.msk [vmem:[#allocation3 + $0x80] sm:$0xff] %vm11625_vm1, %v8865_v6  ;;  %v2024_v52 = vmul.f32 %v8826_v1, %v1983_v23  ;;  %v8967_v12 = vsel %vm2358_vm5, %v2368_v47, %v8937_v20  ;;  %v8973_v60 = vsel %vm11632_vm2, %v8897_v18, %v2109_v25  ;;  %v2025_v4 = vmul.f32 %v8826_v1, %v1984_v50  ;;  %vm11638_vm1 = vmmov %vm11629_vm0 }
 0x28c   : > { %2703 = vst.msk [vmem:[#allocation3 + $0x98] sm:$0xff] %vm11626_vm8, %v8869_v32  ;;  %v2115_v23 = vrot.slane %v8865_v6, 7  ;;  %v8985_v8 = vadd.f32 %v2022_v44, %v1949_v53  ;;  %v8989_v9 = vadd.f32 %v2023_v3, %v1950_v58  ;;  %v2026_v50 = vmul.f32 %v8826_v1, %v1985_v28  ;;  %vm11639_vm8 = vmmov %vm11629_vm0  ;;  %v3337_v44 = vld [vmem:[%s11456_s4 + $0xb0] sm:$0xff]  ;;  %v3338_v3 = vld [vmem:[%s11456_s4 + $0xb8] sm:$0xff] }
 0x28d   : > { %2704 = vst.msk [vmem:[#allocation3 + $0xb0] sm:$0xff] %vm11627_vm3, %v8873_v31  ;;  %v8993_v43 = vadd.f32 %v2024_v52, %v1951_v22  ;;  %2878 = vrot.lane.b32.xlu1 %v8883_v2, %s7308_s30  ;;  %v9002_v48 = vadd.f32 %v2025_v4, %v1952_v10  ;;  %v2027_v58 = vmul.f32 %v8826_v1, %v1986_v26  ;;  %vm11640_vm3 = vmmov %vm11629_vm0  ;;  %v2118_v62 = vrot.slane %v8873_v31, 7 }
 0x28e   : > { %2188 = vst.msk [vmem:[#allocation3 + $0x60] sm:$0xfe] %vm2184_vm7, %v8883_v2  ;;  %2185 = vst.msk [vmem:[#allocation3 + $0x30] sm:$0xfe] %vm2184_vm7, %v8897_v18  ;;  %v9006_v61 = vsel %vm11635_vm13, %v8917_v45, %v2115_v23  ;;  %v2028_v21 = vmul.f32 %v8826_v1, %v1987_v41  ;;  %3020 = vrot.lane.b32.xlu0 %v8856_v46, %s7306_s28  ;;  %v2371_v53 = vrot.slane %v8985_v8, 1  ;;  %v9018_v59 = vrot.slane %v8989_v9, 1 }
 0x28f   : > { %3172 = vst.msk [vmem:[#allocation3 + $0x28] sm:$0x7f] %vm3171_vm10, %v8894_v36  ;;  %3174 = vst.msk [vmem:[#allocation3 + $0x58] sm:$0x7f] %vm3171_vm10, %v8901_v37  ;;  %v2374_v10 = vrot.slane %v8993_v43, 1  ;;  %v9031_v22 = vadd.f32 %v2026_v50, %v1953_v27  ;;  %v9034_v26 = vrot.slane %v9002_v48, 1  ;;  %v9040_v28 = vadd.f32 %v2027_v58, %v1954_v14 }
 0x290   : > { %3170 = vst.msk [vmem:[#allocation3 + $0x10] sm:$0xff] %vm11628_vm4, %v8928_v55  ;;  %v2029_v41 = vmul.f32 %v8826_v1, %v1988_v7  ;;  %v9047_v34 = vadd.f32 %v2028_v21, %v1955_v16  ;;  %v9051_v0 = vsel %vm2358_vm5, %v2371_v53, %v9018_v59  ;;  %vm11641_vm4 = vmmov %vm11629_vm0  ;;  %v2030_v63 = vmul.f32 %v8826_v1, %v1989_v57 }
 0x291   : > { %3173 = vst.msk [vmem:[#allocation3 + $0x40] sm:$0xff] %vm11629_vm0, %v8932_v56  ;;  %v2377_v27 = vrot.slane %v9031_v22, 1  ;;  %v2031_v11 = vmul.f32 %v8826_v1, %v1990_v24  ;;  %2550 = vrot.lane.b32.xlu1 %v8897_v18, %s7306_s28  ;;  %3177 = vst.msk [vmem:[#allocation3 + $0xa0] sm:$0xff] %vm11629_vm0, %v9051_v0  ;;  %v9070_v7 = vsel %vm2358_vm5, %v2374_v10, %v9034_v26  ;;  %v9075_v16 = vrot.slane %v9040_v28, 1 }
 0x292   : > { %2190 = vst.msk [vmem:[#allocation3 + $0x90] sm:$0xfe] %vm2184_vm7, %v8917_v45  ;;  %vm11642_vm9 = vmmov %vm11629_vm0  ;;  %v9081_v24 = vadd.f32 %v2029_v41, %v1956_v30  ;;  %v2380_v57 = vrot.slane %v9047_v34, 1  ;;  %2736 = vrot.lane.b32.xlu0 %v8928_v55, %s7307_s29  ;;  %v9093_v18 = vadd.f32 %v2030_v63, %v1957_v51  ;;  %v9116_v13 = vrot.slane %v8985_v8, 7  ;;  %v3339_v41 = vld [vmem:[%s11456_s4 + $0xc0] sm:$0xff] }
 0x293   : > { %2189 = vst.msk [vmem:[#allocation3 + $0x78] sm:$0xff] %vm11631_vm6, %v8950_v29  ;;  %vm11643_vm6 = vmmov %vm11629_vm0  ;;  %v9097_v30 = vadd.f32 %v2031_v11, %v11647_v5  ;;  %v9106_v25 = vsel %vm2358_vm5, %v2377_v27, %v9075_v16  ;;  %v2121_v51 = vrot.slane %v8989_v9, 7  ;;  %v9141_v50 = vrot.slane %v8993_v43, 7  ;;  %v3340_v27 = vld [vmem:[%s11456_s4 + $0xc8] sm:$0xff] }
 0x294   : > { %3176 = vst.msk [vmem:[#allocation3 + $0x88] sm:$0x7f] %vm3171_vm10, %v8937_v20  ;;  %3178 = vst.msk [vmem:[#allocation3 + $0xb8] sm:$0x7f] %vm3171_vm10, %v9018_v59  ;;  %v9111_v49 = vrot.slane %v9081_v24, 1  ;;  %v2383_v52 = vrot.slane %v9093_v18, 1 }
 0x295   : > { %3175 = vst.msk [vmem:[#allocation3 + $0x70] sm:$0xff] %vm11633_vm11, %v8967_v12  ;;  %vm11644_vm2 = vmmov %vm11629_vm0  ;;  %v9130_v4 = vrot.slane %v9097_v30, 1  ;;  %2880 = vrot.lane.b32.xlu1 %v8950_v29, %s7308_s30  ;;  %v2124_v53 = vrot.slane %v9002_v48, 7  ;;  %v9161_v10 = vrot.slane %v9031_v22, 7  ;;  %v11666_v5 = vmov 0.0  }
 0x296   : > { %2187 = vst.msk [vmem:[#allocation3 + $0x48] sm:$0xff] %vm11634_vm12, %v8973_v60  ;;  %v3224_v35 = vld [vmem:[#allocation3 + $0x28] sm:$0xff]  ;;  %vm11645_vm11 = vmmov %vm11629_vm0  ;;  %v9149_v58 = vsel %vm2358_vm5, %v2380_v57, %v9111_v49  ;;  %2882 = vrot.lane.b32.xlu0 %v8917_v45, %s7308_s30  ;;  %v3230_v63 = vld [vmem:[#allocation3 + $0x58] sm:$0xff] }
 0x297   : > { %2705 = vst.msk [vmem:[#allocation3 + $0xc8] sm:$0xff] %vm11636_vm14, %v8985_v8  ;;  %v3221_v14 = vld [vmem:[#allocation3 + $0x10] sm:$0xff]  ;;  %11646 = vst [vmem:[#allocation10_spill] sm:$0xff] %v9093_v18  ;;  %v9177_v11 = vsel %vm2358_vm5, %v2383_v52, %v9130_v4 }
 0x298   : > { %2706 = vst.msk [vmem:[#allocation3 + $0xe0] sm:$0xff] %vm11637_vm15, %v8989_v9  ;;  %6981 = vmatprep.mubr.msk.f32.mxu0 %vm11644_vm2, %v3221_v14  ;;  %11648 = vst [vmem:[#allocation11_spill] sm:$0xff] %v9097_v30  ;;  %v3227_v47 = vld [vmem:[#allocation3 + $0x40] sm:$0xff]  ;;  %v7108_v14 = vpack.c.bf16 %v3338_v3, %v3337_v44  ;;  %vm2325_vm2 = vcmask 523520   ;;  %v3342_v44 = vld [vmem:[%s11456_s4 + $0xd8] sm:$0xff] }
 0x299   : > { %2707 = vst.msk [vmem:[#allocation3 + $0xf8] sm:$0xff] %vm11638_vm1, %v8993_v43  ;;  %vm11649_vm12 = vmmov %vm11629_vm0  ;;  %2552 = vrot.lane.b32.xlu1 %v8973_v60, %s7306_s28  ;;  %v6954_v3 = vpop.f32.mrb[18].mxu0 }
 0x29a   : > { %2191 = vst.msk [vmem:[#allocation3 + $0xa8] sm:$0xff] %vm11639_vm8, %v9006_v61  ;;  %6982 = vmatmul.mubr.msk.f32.vlgmr.msra.gmra.mrb[32].mxu0 %vm11649_vm12, %v3224_v35  ;;  %11650 = vst [vmem:[#allocation12_spill] sm:$0xff] %v9111_v49  ;;  %7109 = vmatpush1.bf16.msra.mxu1 %v7108_v14  ;;  %v3239_v14 = vld [vmem:[#allocation3 + $0xa0] sm:$0xff] }
 0x29b   : > { %2708 = vst.msk [vmem:[#allocation3 + $0x110] sm:$0xff] %vm11640_vm3, %v9002_v48  ;;  %vm11651_vm13 = vmmov %vm11629_vm0  ;;  %vm11657_vm3 = vcmask 1040384   ;;  %7110 = vmatprep.subr.bf16.mxu1 %v11478_v33  ;;  %3022 = vrot.lane.b32.xlu0 %v8861_v54, %s7306_s28  ;;  %v3236_v52 = vld [vmem:[#allocation3 + $0x88] sm:$0xff] }
 0x29c   : > { %2709 = vst.msk [vmem:[#allocation3 + $0x128] sm:$0xff] %vm11641_vm4, %v9031_v22  ;;  %vm11652_vm14 = vmmov %vm11629_vm0  ;;  %v9138_v23 = vsel %vm11657_vm3, %v9100_v19, %v2118_v62  ;;  %v3233_v57 = vld [vmem:[#allocation3 + $0x70] sm:$0xff]  ;;  %v7111_v62 = vpack.c.bf16 %v3340_v27, %v3339_v41  ;;  %v2130_v41 = vrot.slane %v9081_v24, 7  ;;  %v1878_v27 = vadd.f32 %v6954_v3, %v8667_v17 }
 0x29d   : > { %3180 = vst.msk [vmem:[#allocation3 + $0xe8] sm:$0x7f] %vm3171_vm10, %v9034_v26  ;;  %3182 = vst.msk [vmem:[#allocation3 + $0x118] sm:$0x7f] %vm3171_vm10, %v9075_v16  ;;  %6984 = vmatprep.mubr.msk.f32.mxu0 %vm11652_vm14, %v3227_v47  ;;  %vm2861_vm14 = vcmask 516352   ;;  %v2127_v47 = vrot.slane %v9040_v28, 7  ;;  %2235 = vrot.lane.b32.xlu1 %v8848_v42, %s7307_s29 }
 0x29e   : > { %2710 = vst.msk [vmem:[#allocation3 + $0x140] sm:$0xff] %vm11642_vm9, %v9040_v28  ;;  %vm11653_vm15 = vmmov %vm11629_vm0  ;;  %7112 = vmatpush1.bf16.msra.mxu1 %v7111_v62  ;;  %v3344_v62 = vld [vmem:[%s11456_s4 + $0xe8] sm:$0xff] }
 0x29f   : > { %2711 = vst.msk [vmem:[#allocation3 + $0x158] sm:$0xff] %vm11643_vm6, %v9047_v34  ;;  %11654 = vst [vmem:[#allocation13_spill] sm:$0xff] %v9130_v4  ;;  %2738 = vrot.lane.b32.xlu0 %v8894_v36, %s7307_s29 }
 0x2a0   : > { %3179 = vst.msk [vmem:[#allocation3 + $0xd0] sm:$0xff] %vm11645_vm11, %v9070_v7  ;;  %vm11655_vm1 = vmmov %vm11629_vm0 }
 0x2a1   : > { %2712 = vst.msk [vmem:[#allocation3 + $0x170] sm:$0xff] %vm11651_vm13, %v9081_v24  ;;  %vm11656_vm8 = vmmov %vm11629_vm0  ;;  %2404 = vrot.lane.b32.xlu1 %v8913_v39, %s7308_s30 }
 0x2a2   : > { %3181 = vst.msk [vmem:[#allocation3 + $0x100] sm:$0xff] %vm11653_vm15, %v9106_v25  ;;  %vm11658_vm4 = vmmov %vm11629_vm0 }
 0x2a3   : > { %2713 = vst.msk [vmem:[#allocation3 + $0x188] sm:$0xff] %vm11655_vm1, %v9093_v18  ;;  %vm11659_vm0 = vmmov %vm11657_vm3  ;;  %vm2680_vm3 = vcmask 1041152   ;;  %2884 = vrot.lane.b32.xlu0 %v9006_v61, %s7308_s30 }
 0x2a4   : > { %2714 = vst.msk [vmem:[#allocation3 + $0x1a0] sm:$0xff] %vm11656_vm8, %v9097_v30  ;;  %v9157_v21 = vsel %vm11659_vm0, %v9116_v13, %v2121_v51  ;;  %vm11660_vm9 = vmmov %vm11655_vm1  ;;  %v3341_v51 = vld [vmem:[%s11456_s4 + $0xd0] sm:$0xff]  ;;  %vm2494_vm8 = vcmask 785920   ;;  %v9233_v60 = vsel %vm11659_vm0, %v9161_v10, %v2127_v47  ;;  %v2133_v47 = vrot.slane %v9097_v30, 7 }
 0x2a5   : > { %2192 = vst.msk [vmem:[#allocation3 + $0xc0] sm:$0xfe] %vm2184_vm7, %v9100_v19  ;;  %2194 = vst.msk [vmem:[#allocation3 + $0xf0] sm:$0xfe] %vm2184_vm7, %v9116_v13  ;;  %2554 = vrot.lane.b32.xlu1 %v8883_v2, %s7306_s28 }
 0x2a6   : > { %3184 = vst.msk [vmem:[#allocation3 + $0x148] sm:$0x7f] %vm3171_vm10, %v9111_v49  ;;  %11661 = vst [vmem:[#allocation14_spill] sm:$0xff] %v9177_v11  ;;  %v11672_v49 = vmov 0.0|0.0  }
 0x2a7   : > { %2193 = vst.msk [vmem:[#allocation3 + $0xd8] sm:$0xff] %vm11658_vm4, %v9138_v23  ;;  %vm11662_vm6 = vmmov %vm11655_vm1  ;;  %vm2528_vm4 = vcmask 778752   ;;  %7113 = vmatprep.subr.bf16.mxu1 %v11672_v49  ;;  %3024 = vrot.lane.b32.xlu0 %v8865_v6, %s7306_s28 }
 0x2a8   : > { %3183 = vst.msk [vmem:[#allocation3 + $0x130] sm:$0xff] %vm11660_vm9, %v9149_v58  ;;  %vm11663_vm11 = vmmov %vm11655_vm1 }
 0x2a9   : > { %3186 = vst.msk [vmem:[#allocation3 + $0x178] sm:$0x7f] %vm3171_vm10, %v9130_v4  ;;  %6985 = vmatmul.mubr.msk.f32.gmra.mrb[34].mxu0 %vm11663_vm11, %v3230_v63  ;;  %vm11664_vm12 = vmmov %vm11655_vm1  ;;  %v1872_v63 = vpop.f32.mrb[19].mxu0  ;;  %v1960_v4 = vmax.f32 %v1878_v27, 0.0  ;;  %v3251_v39 = vld [vmem:[#allocation3 + $0x100] sm:$0xff]  ;;  %2237 = vrot.lane.b32.xlu1 %v8852_v40, %s7307_s29 }
 0x2aa   : > { %2195 = vst.msk [vmem:[#allocation3 + $0x108] sm:$0xff] %vm11662_vm6, %v9157_v21  ;;  %vm11665_vm13 = vmmov %vm11659_vm0  ;;  %v1873_v3 = vadd.f32 %v8667_v17, %v1872_v63  ;;  %v3343_v63 = vld [vmem:[%s11456_s4 + $0xe0] sm:$0xff] }
 0x2ab   : > { %2196 = vst.msk [vmem:[#allocation3 + $0x120] sm:$0xfe] %vm2184_vm7, %v9141_v50  ;;  %v9190_v35 = vsel %vm11665_vm13, %v9141_v50, %v2124_v53  ;;  %2198 = vst.msk [vmem:[#allocation3 + $0x150] sm:$0xfe] %vm2184_vm7, %v9161_v10  ;;  %v9240_v53 = vrot.slane %v9047_v34, 7  ;;  %2740 = vrot.lane.b32.xlu0 %v8932_v56, %s7307_s29 }
 0x2ac   : > { %3185 = vst.msk [vmem:[#allocation3 + $0x160] sm:$0xff] %vm11664_vm12, %v9177_v11  ;;  %vm11667_vm15 = vmmov %vm11655_vm1  ;;  %v1992_v11 = vmin.f32 %v1878_v27, 0.0  ;;  %v1959_v42 = vmax.f32 %v1873_v3, 0.0 }
 0x2ad   : > { %2356 = vst.msk [vmem:[#allocation3] sm:$0xff] %vm2325_vm2, %v11666_v5  ;;  %2357 = vst.msk [vmem:[#allocation3 + $0x18] sm:$0xff] %vm2325_vm2, %v11666_v5  ;;  %6987 = vmatprep.mubr.msk.f32.mxu0 %vm11667_vm15, %v3233_v57  ;;  %v9252_v57 = vrot.slane %v9093_v18, 7  ;;  %2406 = vrot.lane.b32.xlu1 %v8880_v15, %s7308_s30 }
 0x2ae   : > { %2197 = vst.msk [vmem:[#allocation3 + $0x138] sm:$0xff] %vm11655_vm1, %v9190_v35  ;;  %vm11668_vm9 = vmmov %vm11655_vm1  ;;  %v2033_v27 = vmul.f32 %v8826_v1, %v1992_v11  ;;  %v3345_v11 = vld [vmem:[%s11456_s4 + $0xf0] sm:$0xff] }
 0x2af   : > { %2862 = vst.msk [vmem:[#allocation3 + $0x27] sm:$0x1] %vm2861_vm14, %v11666_v5  ;;  %2863 = vst.msk [vmem:[#allocation3 + $0x57] sm:$0x1] %vm2861_vm14, %v11666_v5  ;;  %6988 = vmatmul.mubr.msk.f32.gmra.mrb[36].mxu0 %vm11668_vm9, %v3236_v52  ;;  %v7114_v52 = vpack.c.bf16 %v3342_v44, %v3341_v51  ;;  %v1991_v44 = vmin.f32 %v1873_v3, 0.0  ;;  %v3346_v3 = vld [vmem:[%s11456_s4 + $0xf8] sm:$0xff]  ;;  %2886 = vrot.lane.b32.xlu0 %v9100_v19, %s7308_s30 }
 0x2b0   : > { %2864 = vst.msk [vmem:[#allocation3 + $0x87] sm:$0x1] %vm2861_vm14, %v11666_v5  ;;  %2865 = vst.msk [vmem:[#allocation3 + $0xb7] sm:$0x1] %vm2861_vm14, %v11666_v5  ;;  %v9288_v18 = vadd.f32 %v2033_v27, %v1960_v4  ;;  %v3248_v4 = vld [vmem:[#allocation3 + $0xe8] sm:$0xff]  ;;  %v3254_v27 = vld [vmem:[#allocation3 + $0x118] sm:$0xff] }
 0x2b1   : > { %2866 = vst.msk [vmem:[#allocation3 + $0xe7] sm:$0x1] %vm2861_vm14, %v11666_v5  ;;  %2867 = vst.msk [vmem:[#allocation3 + $0x117] sm:$0x1] %vm2861_vm14, %v11666_v5  ;;  %v2032_v30 = vmul.f32 %v8826_v1, %v1991_v44  ;;  %7115 = vmatpush1.bf16.msra.mxu1 %v7114_v52  ;;  %v3257_v2 = vld [vmem:[#allocation3 + $0x130] sm:$0xff]  ;;  %2556 = vrot.lane.b32.xlu1 %v8950_v29, %s7306_s28 }
 0x2b2   : > { %2868 = vst.msk [vmem:[#allocation3 + $0x147] sm:$0x1] %vm2861_vm14, %v11666_v5  ;;  %2869 = vst.msk [vmem:[#allocation3 + $0x177] sm:$0x1] %vm2861_vm14, %v11666_v5  ;;  %7116 = vmatprep.subr.bf16.mxu1 %v11672_v49  ;;  %v9304_v52 = vrot.slane %v9288_v18, 1 }
 0x2b3   : > { %2870 = vst.msk [vmem:[#allocation3 + $0x1a7] sm:$0x1] %vm2861_vm14, %v11666_v5  ;;  %vm11669_vm6 = vmmov %vm11655_vm1  ;;  %v9299_v44 = vadd.f32 %v2032_v30, %v1959_v42  ;;  %v7120_v30 = vpack.c.bf16 %v3346_v3, %v3345_v11  ;;  %v3266_v11 = vld [vmem:[#allocation3 + $0x178] sm:$0xff]  ;;  %3026 = vrot.lane.b32.xlu0 %v8869_v32, %s7306_s28 }
 0x2b4   : > { %2526 = vst.msk [vmem:[#allocation3] sm:$0xff] %vm2494_vm8, %v11666_v5  ;;  %2527 = vst.msk [vmem:[#allocation3 + $0x18] sm:$0xff] %vm2494_vm8, %v11666_v5 }
 0x2b5   : > { %2199 = vst.msk [vmem:[#allocation3 + $0x168] sm:$0xff] %vm11669_vm6, %v9233_v60  ;;  %vm11670_vm11 = vmmov %vm11655_vm1  ;;  %v9317_v42 = vrot.slane %v9299_v44, 7  ;;  %2239 = vrot.lane.b32.xlu1 %v8844_v38, %s7307_s29 }
 0x2b6   : > { %2681 = vst.msk [vmem:[#allocation3] sm:$0x1] %vm2680_vm3, %v11666_v5  ;;  %6990 = vmatprep.mubr.msk.f32.mxu0 %vm11670_vm11, %v3239_v14  ;;  %vm11671_vm12 = vmmov %vm11659_vm0  ;;  %v3245_v14 = vld [vmem:[#allocation3 + $0xd0] sm:$0xff] }
 0x2b7   : > { %2529 = vst.msk [vmem:[#allocation3 + $0x1f] sm:$0x1] %vm2528_vm4, %v11666_v5  ;;  %v9261_v33 = vsel %vm11671_vm12, %v9240_v53, %v2130_v41  ;;  %vm11673_vm13 = vmmov %vm11655_vm1  ;;  %v3242_v41 = vld [vmem:[#allocation3 + $0xb8] sm:$0xff]  ;;  %2742 = vrot.lane.b32.xlu0 %v8901_v37, %s7307_s29 }
 0x2b8   : > { %2200 = vst.msk [vmem:[#allocation3 + $0x180] sm:$0xfe] %vm2184_vm7, %v9240_v53  ;;  %2202 = vst.msk [vmem:[#allocation3 + $0x1b0] sm:$0xfe] %vm2184_vm7, %v9252_v57 }
 0x2b9   : > { %2201 = vst.msk [vmem:[#allocation3 + $0x198] sm:$0xff] %vm11673_vm13, %v9261_v33  ;;  %vm11674_vm15 = vmmov %vm11659_vm0  ;;  %2408 = vrot.lane.b32.xlu1 %v8928_v55, %s7308_s30  ;;  %v6957_v15 = vpop.f32.mrb[20].mxu0 }
 0x2ba   : > { %v9278_v51 = vsel %vm11674_vm15, %v9252_v57, %v2133_v47  ;;  %vm11675_vm0 = vmmov %vm11655_vm1  ;;  %v7117_v47 = vpack.c.bf16 %v3344_v62, %v3343_v63  ;;  %v2136_v63 = vrot.slane %v9288_v18, 7  ;;  %v2386_v62 = vrot.slane %v9299_v44, 1  ;;  %3188 = vst.msk [vmem:[#allocation3 + $0x1a8] sm:$0x7f] %vm3171_vm10, %v9304_v52 }
 0x2bb   : > { %2203 = vst.msk [vmem:[#allocation3 + $0x1c8] sm:$0xff] %vm11655_vm1, %v9278_v51  ;;  %6991 = vmatmul.mubr.msk.f32.gmra.mrb[38].mxu0 %vm11675_vm0, %v3242_v41  ;;  %vm11676_vm9 = vmmov %vm11675_vm0  ;;  %2888 = vrot.lane.b32.xlu0 %v9138_v23, %s7308_s30  ;;  %v1888_v29 = vadd.f32 %v6957_v15, %v8667_v17 }
 0x2bc   : > { %6993 = vmatprep.mubr.msk.f32.mxu0 %vm11676_vm9, %v3245_v14  ;;  %vm11677_vm6 = vmmov %vm11675_vm0  ;;  %7118 = vmatpush1.bf16.msra.mxu1 %v7117_v47  ;;  %v9326_v41 = vsel %vm2358_vm5, %v2386_v62, %v9304_v52  ;;  %2204 = vst.msk [vmem:[#allocation3 + $0x1e0] sm:$0xfe] %vm2184_vm7, %v9317_v42  ;;  %v9334_v14 = vsel %vm11674_vm15, %v9317_v42, %v2136_v63  ;;  %v3263_v47 = vld [vmem:[#allocation3 + $0x160] sm:$0xff] }
 0x2bd   : > { %2716 = vst.msk [vmem:[#allocation3 + $0x1d0] sm:$0xff] %vm11677_vm6, %v9288_v18  ;;  %vm11678_vm11 = vmmov %vm11675_vm0  ;;  %7119 = vmatprep.subr.bf16.mxu1 %v11672_v49  ;;  %v3260_v49 = vld [vmem:[#allocation3 + $0x148] sm:$0xff]  ;;  %v1962_v63 = vmax.f32 %v1888_v29, 0.0  ;;  %v1994_v62 = vmin.f32 %v1888_v29, 0.0  ;;  %2558 = vrot.lane.b32.xlu1 %v8917_v45, %s7306_s28 }
 0x2be   : > { %vm11679_vm12 = vmmov %vm11675_vm0  ;;  %2871 = vst.msk [vmem:[#allocation3 + $0x1d7] sm:$0x1] %vm2861_vm14, %v11666_v5 }
 0x2bf   : > { %6994 = vmatmul.mubr.msk.f32.gmra.mrb[40].mxu0 %vm11678_vm11, %v3248_v4  ;;  %2715 = vst.msk [vmem:[#allocation3 + $0x1b8] sm:$0xff] %vm11679_vm12, %v9299_v44  ;;  %vm11680_vm13 = vmmov %vm11675_vm0  ;;  %v1882_v4 = vpop.f32.mrb[21].mxu0  ;;  %3028 = vrot.lane.b32.xlu0 %v8873_v31, %s7306_s28  ;;  %v2035_v55 = vmul.f32 %v8826_v1, %v1994_v62 }
 0x2c0   : > { %6996 = vmatprep.mubr.msk.f32.mxu0 %vm11680_vm13, %v3251_v39  ;;  %vm11681_vm1 = vmmov %vm11675_vm0  ;;  %7121 = vmatpush1.bf16.msra.mxu1 %v7120_v30  ;;  %v1883_v39 = vadd.f32 %v8667_v17, %v1882_v4 }
 0x2c1   : > { %3187 = vst.msk [vmem:[#allocation3 + $0x190] sm:$0xff] %vm11681_vm1, %v9326_v41  ;;  %vm11682_vm9 = vmmov %vm11675_vm0  ;;  %v3272_v40 = vld [vmem:[#allocation3 + $0x1a8] sm:$0xff]  ;;  %2241 = vrot.lane.b32.xlu1 %v8856_v46, %s7307_s29 }
 0x2c2   : > { %2205 = vst.msk [vmem:[#allocation3 + $0x1f8] sm:$0xff] %vm11682_vm9, %v9334_v14  ;;  %vm11683_vm6 = vmmov %vm11675_vm0  ;;  %v1961_v38 = vmax.f32 %v1883_v39, 0.0  ;;  %v1993_v30 = vmin.f32 %v1883_v39, 0.0 }
 0x2c3   : > { %6997 = vmatmul.mubr.msk.f32.gmra.mrb[42].mxu0 %vm11675_vm0, %v3254_v27  ;;  %vm11684_vm11 = vmmov %vm11675_vm0  ;;  %2744 = vrot.lane.b32.xlu0 %v8967_v12, %s7307_s29 }
 0x2c4   : > { %6999 = vmatprep.mubr.msk.f32.mxu0 %vm11683_vm6, %v3257_v2  ;;  %vm11685_vm12 = vmmov %vm11675_vm0  ;;  %v2034_v27 = vmul.f32 %v8826_v1, %v1993_v30  ;;  %v9375_v2 = vadd.f32 %v2035_v55, %v1962_v63  ;;  %vm11690_vm6 = vcmask 1040384  }
 0x2c5   : > { %vm11686_vm13 = vmmov %vm11675_vm0  ;;  %2410 = vrot.lane.b32.xlu1 %v8894_v36, %s7308_s30 }
 0x2c6   : > { %vm11687_vm15 = vmmov %vm11675_vm0  ;;  %v9384_v45 = vrot.slane %v9375_v2, 1  ;;  %2718 = vst.msk [vmem:[#allocation3 + $0x200] sm:$0xff] %vm11675_vm0, %v9375_v2 }
 0x2c7   : > { %7000 = vmatmul.mubr.msk.f32.gmra.mrb[44].mxu0 %vm11684_vm11, %v3260_v49  ;;  %vm11688_vm1 = vmmov %vm11675_vm0  ;;  %v9379_v49 = vadd.f32 %v2034_v27, %v1961_v38  ;;  %2872 = vst.msk [vmem:[#allocation3 + $0x207] sm:$0x1] %vm2861_vm14, %v11666_v5  ;;  %2890 = vrot.lane.b32.xlu0 %v9116_v13, %s7308_s30 }
 0x2c8   : > { %7002 = vmatprep.mubr.msk.f32.mxu0 %vm11685_vm12, %v3263_v47  ;;  %v3269_v3 = vld [vmem:[#allocation3 + $0x190] sm:$0xff]  ;;  %v2139_v47 = vrot.slane %v9375_v2, 7  ;;  %vm11689_vm9 = vmmov %vm11675_vm0  ;;  %3190 = vst.msk [vmem:[#allocation3 + $0x1d8] sm:$0x7f] %vm3171_vm10, %v9384_v45 }
 0x2c9   : > { %2717 = vst.msk [vmem:[#allocation3 + $0x1e8] sm:$0xff] %vm11689_vm9, %v9379_v49  ;;  %v9395_v46 = vrot.slane %v9379_v49, 7  ;;  %vm11691_vm11 = vmmov %vm11675_vm0  ;;  %2560 = vrot.lane.b32.xlu1 %v9006_v61, %s7306_s28 }
 0x2ca   : > { %vm11692_vm12 = vmmov %vm11675_vm0 }
 0x2cb   : > { %7003 = vmatmul.mubr.msk.f32.gmra.mrb[46].mxu0 %vm11686_vm13, %v3266_v11  ;;  %v2389_v11 = vrot.slane %v9379_v49, 1  ;;  %2206 = vst.msk [vmem:[#allocation3 + $0x210] sm:$0xfe] %vm2184_vm7, %v9395_v46  ;;  %3030 = vrot.lane.b32.xlu0 %v8985_v8, %s7306_s28  ;;  %vm11693_vm13 = vmmov %vm11675_vm0 }
 0x2cc   : > { %7005 = vmatprep.mubr.msk.f32.mxu0 %vm11687_vm15, %v3269_v3  ;;  %vm11694_vm15 = vmmov %vm11675_vm0 }
 0x2cd   : > { %v9403_v3 = vsel %vm2358_vm5, %v2389_v11, %v9384_v45  ;;  %2243 = vrot.lane.b32.xlu1 %v8861_v54, %s7307_s29  ;;  %vm11696_vm9 = vmmov %vm11690_vm6 }
 0x2ce   : > { %3189 = vst.msk [vmem:[#allocation3 + $0x1c0] sm:$0xff] %vm11691_vm11, %v9403_v3  ;;  %vm11698_vm11 = vmmov %vm11675_vm0 }
 0x2cf   : > { %7006 = vmatmul.mubr.msk.f32.gmra.mrb[48].mxu0 %vm11688_vm1, %v3272_v40  ;;  %v9411_v40 = vsel %vm11690_vm6, %v9395_v46, %v2139_v47  ;;  %2746 = vrot.lane.b32.xlu0 %v8937_v20, %s7307_s29  ;;  %v3278_v15 = vld [vmem:[#allocation3 + $0x1d8] sm:$0xff]  ;;  %vm11695_vm1 = vmmov %vm11675_vm0 }
 0x2d0   : > { %2207 = vst.msk [vmem:[#allocation3 + $0x228] sm:$0xff] %vm11692_vm12, %v9411_v40  ;;  %vm11697_vm6 = vmmov %vm11675_vm0 }
 0x2d1   : > { %2412 = vrot.lane.b32.xlu1 %v8932_v56, %s7308_s30  ;;  %vm11699_vm12 = vmmov %vm11675_vm0 }
 0x2d3   : > { %2892 = vrot.lane.b32.xlu0 %v9157_v21, %s7308_s30 }
 0x2d5   : > { %v3275_v36 = vld [vmem:[#allocation3 + $0x1c0] sm:$0xff]  ;;  %2562 = vrot.lane.b32.xlu1 %v9100_v19, %s7306_s28 }
 0x2d6   : > { %7008 = vmatprep.mubr.msk.f32.mxu0 %vm11693_vm13, %v3275_v36  ;;  %vm11700_vm13 = vmmov %vm11675_vm0 }
 0x2d7   : > { %7009 = vmatmul.mubr.msk.f32.gmra.mrb[50].mxu0 %vm11694_vm15, %v3278_v15  ;;  %3032 = vrot.lane.b32.xlu0 %v8989_v9, %s7306_s28  ;;  %vm2829_vm15 = vcmask 522496  }
 0x2d9   : > { %v6960_v54 = vpop.f32.mrb[22].mxu0  ;;  %2245 = vrot.lane.b32.xlu1 %v8865_v6, %s7307_s29 }
 0x2da   : > { %v1898_v61 = vadd.f32 %v6960_v54, %v8667_v17  ;;  %v1892_v29 = vpop.f32.mrb[23].mxu0 }
 0x2db   : > { %2748 = vrot.lane.b32.xlu0 %v9051_v0, %s7307_s29  ;;  %v1893_v56 = vadd.f32 %v8667_v17, %v1892_v29 }
 0x2dc   : > { %v1964_v4 = vmax.f32 %v1898_v61, 0.0  ;;  %v1996_v39 = vmin.f32 %v1898_v61, 0.0 }
 0x2dd   : > { %v1963_v63 = vmax.f32 %v1893_v56, 0.0  ;;  %v1995_v62 = vmin.f32 %v1893_v56, 0.0  ;;  %2414 = vrot.lane.b32.xlu1 %v8901_v37, %s7308_s30 }
 0x2de   : > { %v2037_v19 = vmul.f32 %v8826_v1, %v1996_v39 }
 0x2df   : > { %2894 = vrot.lane.b32.xlu0 %v9141_v50, %s7308_s30  ;;  %v2036_v6 = vmul.f32 %v8826_v1, %v1995_v62 }
 0x2e0   : > { %v9447_v38 = vadd.f32 %v2037_v19, %v1964_v4 }
 0x2e1   : > { %v9449_v30 = vadd.f32 %v2036_v6, %v1963_v63  ;;  %2564 = vrot.lane.b32.xlu1 %v9138_v23, %s7306_s28 }
 0x2e2   : > { %v9454_v55 = vrot.slane %v9447_v38, 1  ;;  %2720 = vst.msk [vmem:[#allocation3 + $0x230] sm:$0xff] %vm11695_vm1, %v9447_v38  ;;  %v2142_v37 = vrot.slane %v9447_v38, 7  ;;  %vm2968_vm1 = vcmask 785921  }
 0x2e3   : > { %3034 = vrot.lane.b32.xlu0 %v8993_v43, %s7306_s28  ;;  %v2392_v27 = vrot.slane %v9449_v30, 1  ;;  %2719 = vst.msk [vmem:[#allocation3 + $0x218] sm:$0xff] %vm11675_vm0, %v9449_v30  ;;  %v9467_v23 = vrot.slane %v9449_v30, 7  ;;  %vm2648_vm0 = vcmask 1048320  }
 0x2e4   : > { %2873 = vst.msk [vmem:[#allocation3 + $0x237] sm:$0x1] %vm2861_vm14, %v11666_v5 }
 0x2e5   : > { %3192 = vst.msk [vmem:[#allocation3 + $0x208] sm:$0x7f] %vm3171_vm10, %v9454_v55  ;;  %v9473_v47 = vsel %vm2358_vm5, %v2392_v27, %v9454_v55  ;;  %2247 = vrot.lane.b32.xlu1 %v8869_v32, %s7307_s29  ;;  %v9481_v11 = vsel %vm11696_vm9, %v9467_v23, %v2142_v37  ;;  %vm2646_vm9 = vcmask 1048321  }
 0x2e6   : > { %2208 = vst.msk [vmem:[#allocation3 + $0x240] sm:$0xfe] %vm2184_vm7, %v9467_v23 }
 0x2e7   : > { %3191 = vst.msk [vmem:[#allocation3 + $0x1f0] sm:$0xff] %vm11697_vm6, %v9473_v47  ;;  %2750 = vrot.lane.b32.xlu0 %v9018_v59, %s7307_s29 }
 0x2e8   : > { %2209 = vst.msk [vmem:[#allocation3 + $0x258] sm:$0xff] %vm11698_vm11, %v9481_v11  ;;  %vm11701_vm11 = vmmov %vm11697_vm6 }
 0x2e9   : > { %2416 = vrot.lane.b32.xlu1 %v8967_v12, %s7308_s30 }
 0x2eb   : > { %2896 = vrot.lane.b32.xlu0 %v9190_v35, %s7308_s30 }
 0x2ec   : > { %v3284_v36 = vld [vmem:[#allocation3 + $0x208] sm:$0xff] }
 0x2ed   : > { %2566 = vrot.lane.b32.xlu1 %v9116_v13, %s7306_s28 }
 0x2ee   : > { %v3281_v32 = vld [vmem:[#allocation3 + $0x1f0] sm:$0xff] }
 0x2ef   : > { %3036 = vrot.lane.b32.xlu0 %v9002_v48, %s7306_s28  ;;  %7011 = vmatprep.mubr.msk.f32.mxu0 %vm11699_vm12, %v3281_v32  ;;  %vm11702_vm12 = vcmask 1040384  }
 0x2f0   : > { %7012 = vmatmul.mubr.msk.f32.gmra.mrb[52].mxu0 %vm11700_vm13, %v3284_v36  ;;  %vm11703_vm13 = vmmov %vm11697_vm6 }
 0x2f1   : > { %2249 = vrot.lane.b32.xlu1 %v8873_v31, %s7307_s29 }
 0x2f3   : > { %2752 = vrot.lane.b32.xlu0 %v9070_v7, %s7307_s29 }
 0x2f5   : > { %2418 = vrot.lane.b32.xlu1 %v8937_v20, %s7308_s30 }
 0x2f7   : > { %2898 = vrot.lane.b32.xlu0 %v9161_v10, %s7308_s30 }
 0x2f8   : > { %v3019_v12 = vpop.permute.xlu0 %3018 }
 0x2f9   : > { %2568 = vrot.lane.b32.xlu1 %v9157_v21, %s7306_s28 }
 0x2fb   : > { %3038 = vrot.lane.b32.xlu0 %v9031_v22, %s7306_s28  ;;  %v2733_v61 = vpop.permute.xlu1 %2732 }
 0x2fc   : > { %2828 = vst.msk [vmem:[#allocation3 + $0x8] sm:$0xff] %vm2325_vm2, %v2733_v61  ;;  %v2735_v56 = vpop.permute.xlu0 %2734 }
 0x2fd   : > { %3002 = vst.msk [vmem:[#allocation3 + $0x8] sm:$0x1] %vm2528_vm4, %v11666_v5  ;;  %2251 = vrot.lane.b32.xlu1 %v8985_v8, %s7307_s29 }
 0x2fe   : > { %2830 = vst.msk [vmem:[#allocation3 + $0x20] sm:$0x7f] %vm2829_vm15, %v2735_v56 }
 0x2ff   : > { %2754 = vrot.lane.b32.xlu0 %v9034_v26, %s7307_s29  ;;  %v2879_v63 = vpop.permute.xlu1 %2878 }
 0x300   : > { %2969 = vst.msk [vmem:[#allocation3 + $0x8] sm:$0xfe] %vm2968_vm1, %v2879_v63  ;;  %v3021_v19 = vpop.permute.xlu0 %3020 }
 0x301   : > { %3108 = vst.msk [vmem:[#allocation3 + $0x8] sm:$0xff] %vm2648_vm0, %v3019_v12  ;;  %2420 = vrot.lane.b32.xlu1 %v9051_v0, %s7308_s30 }
 0x303   : > { %v6963_v13 = vpop.f32.mrb[24].mxu0  ;;  %2900 = vrot.lane.b32.xlu0 %v9233_v60, %s7308_s30  ;;  %v2551_v0 = vpop.permute.xlu1 %2550 }
 0x304   : > { %v1908_v15 = vadd.f32 %v6963_v13, %v8667_v17  ;;  %v1902_v54 = vpop.f32.mrb[25].mxu0  ;;  %2647 = vst.msk [vmem:[#allocation3] sm:$0xfe] %vm2646_vm9, %v2551_v0  ;;  %v2737_v36 = vpop.permute.xlu0 %2736 }
 0x305   : > { %v1903_v31 = vadd.f32 %v8667_v17, %v1902_v54  ;;  %2831 = vst.msk [vmem:[#allocation3 + $0x38] sm:$0xff] %vm2325_vm2, %v2737_v36  ;;  %2570 = vrot.lane.b32.xlu1 %v9141_v50, %s7306_s28 }
 0x306   : > { %v1966_v29 = vmax.f32 %v1908_v15, 0.0  ;;  %v1998_v20 = vmin.f32 %v1908_v15, 0.0  ;;  %3003 = vst.msk [vmem:[#allocation3 + $0x38] sm:$0x1] %vm2528_vm4, %v11666_v5 }
 0x307   : > { %v1965_v4 = vmax.f32 %v1903_v31, 0.0  ;;  %v1997_v39 = vmin.f32 %v1903_v31, 0.0  ;;  %3040 = vrot.lane.b32.xlu0 %v9040_v28, %s7306_s28  ;;  %v2881_v50 = vpop.permute.xlu1 %2880 }
 0x308   : > { %v2039_v21 = vmul.f32 %v8826_v1, %v1998_v20  ;;  %2970 = vst.msk [vmem:[#allocation3 + $0x20] sm:$0xff] %vm2494_vm8, %v2881_v50  ;;  %v2883_v15 = vpop.permute.xlu0 %2882  ;;  %v3220_v54 = vld [vmem:[#allocation3 + $0x8] sm:$0xff] }
 0x309   : > { %v2038_v17 = vmul.f32 %v8826_v1, %v1997_v39  ;;  %3109 = vst.msk [vmem:[#allocation3 + $0x20] sm:$0xff] %vm2648_vm0, %v3021_v19  ;;  %3518 = vmatprep.mubr.f32.mxu1 %v3220_v54  ;;  %2253 = vrot.lane.b32.xlu1 %v8989_v9, %s7307_s29 }
 0x30a   : > { %v9523_v62 = vadd.f32 %v2039_v21, %v1966_v29  ;;  %2971 = vst.msk [vmem:[#allocation3 + $0x38] sm:$0xfe] %vm2968_vm1, %v2883_v15 }
 0x30b   : > { %v9526_v6 = vadd.f32 %v2038_v17, %v1965_v4  ;;  %2756 = vrot.lane.b32.xlu0 %v9106_v25, %s7307_s29  ;;  %v2553_v31 = vpop.permute.xlu1 %2552  ;;  %v3219_v61 = vld [vmem:[#allocation3] sm:$0xff] }
 0x30c   : > { %v9532_v8 = vrot.slane %v9523_v62, 1  ;;  %2722 = vst.msk [vmem:[#allocation3 + $0x260] sm:$0xff] %vm11697_vm6, %v9523_v62  ;;  %v2145_v37 = vrot.slane %v9523_v62, 7  ;;  %3519 = vmatmul.mubr.f32.vlgmr.msra.gmra.mrb[0].mxu1 %v3219_v61 }
 0x30d   : > { %v2395_v27 = vrot.slane %v9526_v6, 1  ;;  %2721 = vst.msk [vmem:[#allocation3 + $0x248] sm:$0xff] %vm11701_vm11, %v9526_v6  ;;  %v9545_v32 = vrot.slane %v9526_v6, 7  ;;  %v3023_v29 = vpop.permute.xlu0 %3022  ;;  %2422 = vrot.lane.b32.xlu1 %v9018_v59, %s7308_s30  ;;  %vm11704_vm11 = vmmov %vm11697_vm6 }
 0x30e   : > { %2874 = vst.msk [vmem:[#allocation3 + $0x267] sm:$0x1] %vm2861_vm14, %v11666_v5 }
 0x30f   : > { %3194 = vst.msk [vmem:[#allocation3 + $0x238] sm:$0x7f] %vm3171_vm10, %v9532_v8  ;;  %v9552_v12 = vsel %vm2358_vm5, %v2395_v27, %v9532_v8  ;;  %v9561_v13 = vsel %vm11702_vm12, %v9545_v32, %v2145_v37  ;;  %2902 = vrot.lane.b32.xlu0 %v9240_v53, %s7308_s30  ;;  %vm11705_vm12 = vmmov %vm11697_vm6  ;;  %v2236_v56 = vpop.permute.xlu1 %2235  ;;  %v9607_v27 = vld [vmem:[%s11455_s3] ss:$0 sm:$0xff] }
 0x310   : > { %2210 = vst.msk [vmem:[#allocation3 + $0x270] sm:$0xfe] %vm2184_vm7, %v9545_v32  ;;  %v3223_v39 = vld [vmem:[#allocation3 + $0x20] sm:$0xff] }
 0x311   : > { %3193 = vst.msk [vmem:[#allocation3 + $0x220] sm:$0xff] %vm11703_vm13, %v9552_v12  ;;  %v2739_v4 = vpop.permute.xlu0 %2738  ;;  %2572 = vrot.lane.b32.xlu1 %v9190_v35, %s7306_s28  ;;  %3523 = vmatprep.mubr.f32.mxu1 %v3223_v39  ;;  %vm2496_vm13 = vcmask 784896  }
 0x312   : > { %2211 = vst.msk [vmem:[#allocation3 + $0x288] sm:$0xff] %vm11697_vm6, %v9561_v13 }
 0x313   : > { %2649 = vst.msk [vmem:[#allocation3 + $0x18] sm:$0xff] %vm2648_vm0, %v2553_v31  ;;  %3110 = vst.msk [vmem:[#allocation3 + $0x38] sm:$0xff] %vm2648_vm0, %v3023_v29  ;;  %3042 = vrot.lane.b32.xlu0 %v9047_v34, %s7306_s28  ;;  %v2405_v59 = vpop.permute.xlu1 %2404 }
 0x314   : > { %2326 = vst.msk [vmem:[#allocation3 + $0x30] sm:$0xff] %vm2325_vm2, %v2236_v56 }
 0x315   : > { %2832 = vst.msk [vmem:[#allocation3 + $0x50] sm:$0x7f] %vm2829_vm15, %v2739_v4  ;;  %v2885_v17 = vpop.permute.xlu0 %2884  ;;  %2255 = vrot.lane.b32.xlu1 %v8993_v43, %s7307_s29 }
 0x316   : > { %v3290_v9 = vld [vmem:[#allocation3 + $0x238] sm:$0xff]  ;;  %2495 = vst.msk [vmem:[#allocation3 + $0x30] sm:$0xff] %vm2494_vm8, %v2405_v59  ;;  %2972 = vst.msk [vmem:[#allocation3 + $0x50] sm:$0xff] %vm2494_vm8, %v2885_v17 }
 0x317   : > { %2682 = vst.msk [vmem:[#allocation3 + $0x30] sm:$0x1] %vm2680_vm3, %v11666_v5  ;;  %2758 = vrot.lane.b32.xlu0 %v9075_v16, %s7307_s29  ;;  %v2555_v35 = vpop.permute.xlu1 %2554 }
 0x318   : > { %v3287_v20 = vld [vmem:[#allocation3 + $0x220] sm:$0xff]  ;;  %2650 = vst.msk [vmem:[#allocation3 + $0x30] sm:$0xfe] %vm2646_vm9, %v2555_v35 }
 0x319   : > { %7014 = vmatprep.mubr.msk.f32.mxu0 %vm11704_vm11, %v3287_v20  ;;  %v3025_v19 = vpop.permute.xlu0 %3024  ;;  %v6966_v37 = vpop.f32.mrb[26].mxu0  ;;  %2424 = vrot.lane.b32.xlu1 %v9070_v7, %s7308_s30  ;;  %vm11706_vm11 = vmmov %vm11697_vm6 }
 0x31a   : > { %7015 = vmatmul.mubr.msk.f32.gmra.mrb[54].mxu0 %vm11705_vm12, %v3290_v9  ;;  %v3222_v21 = vld [vmem:[#allocation3 + $0x18] sm:$0xff]  ;;  %3111 = vst.msk [vmem:[#allocation3 + $0x50] sm:$0xff] %vm2648_vm0, %v3025_v19  ;;  %v1918_v43 = vadd.f32 %v9607_v27, %v6966_v37  ;;  %v1912_v0 = vpop.f32.mrb[27].mxu0  ;;  %vm11707_vm12 = vcmask 1040384  }
 0x31b   : > { %3524 = vmatmul.mubr.f32.gmra.mrb[2].mxu1 %v3222_v21  ;;  %v3226_v63 = vld [vmem:[#allocation3 + $0x38] sm:$0xff]  ;;  %2904 = vrot.lane.b32.xlu0 %v9261_v33, %s7308_s30  ;;  %v1913_v36 = vadd.f32 %v9607_v27, %v1912_v0  ;;  %v2238_v50 = vpop.permute.xlu1 %2237 }
 0x31c   : > { %3528 = vmatprep.mubr.f32.mxu1 %v3226_v63  ;;  %v1968_v15 = vmax.f32 %v1918_v43, 0.0  ;;  %v2000_v54 = vmin.f32 %v1918_v43, 0.0  ;;  %2327 = vst.msk [vmem:[#allocation3 + $0x48] sm:$0xff] %vm2325_vm2, %v2238_v50 }
 0x31d   : > { %v2741_v31 = vpop.permute.xlu0 %2740  ;;  %v1967_v7 = vmax.f32 %v1913_v36, 0.0  ;;  %v1999_v61 = vmin.f32 %v1913_v36, 0.0  ;;  %2530 = vst.msk [vmem:[#allocation3 + $0x4f] sm:$0x1] %vm2528_vm4, %v11666_v5  ;;  %2574 = vrot.lane.b32.xlu1 %v9161_v10, %s7306_s28  ;;  %v11709_v36 = vld [vmem:[#allocation10_spill] sm:$0xff] }
 0x31e   : > { %2833 = vst.msk [vmem:[#allocation3 + $0x68] sm:$0xff] %vm2325_vm2, %v2741_v31  ;;  %v2041_v29 = vmul.f32 %v8826_v1, %v2000_v54 }
 0x31f   : > { %3004 = vst.msk [vmem:[#allocation3 + $0x68] sm:$0x1] %vm2528_vm4, %v11666_v5  ;;  %3044 = vrot.lane.b32.xlu0 %v9081_v24, %s7306_s28  ;;  %v2040_v20 = vmul.f32 %v8826_v1, %v1999_v61  ;;  %v2407_v9 = vpop.permute.xlu1 %2406  ;;  %v3225_v56 = vld [vmem:[#allocation3 + $0x30] sm:$0xff] }
 0x320   : > { %v9625_v4 = vadd.f32 %v2041_v29, %v1968_v15  ;;  %2497 = vst.msk [vmem:[#allocation3 + $0x48] sm:$0x7f] %vm2496_vm13, %v2407_v9  ;;  %3529 = vmatmul.mubr.f32.gmra.mrb[4].mxu1 %v3225_v56 }
 0x321   : > { %v2887_v39 = vpop.permute.xlu0 %2886  ;;  %v3229_v10 = vld [vmem:[#allocation3 + $0x50] sm:$0xff]  ;;  %v9628_v59 = vadd.f32 %v2040_v20, %v1967_v7  ;;  %2257 = vrot.lane.b32.xlu1 %v9002_v48, %s7307_s29  ;;  %v11710_v7 = vld [vmem:[#allocation12_spill] sm:$0xff] }
 0x322   : > { %2973 = vst.msk [vmem:[#allocation3 + $0x68] sm:$0xfe] %vm2968_vm1, %v2887_v39  ;;  %3533 = vmatprep.mubr.f32.mxu1 %v3229_v10  ;;  %v9634_v21 = vrot.slane %v9625_v4, 1  ;;  %v2148_v17 = vrot.slane %v9625_v4, 7 }
 0x323   : > { %2724 = vst.msk [vmem:[#allocation3 + $0x290] sm:$0xff] %vm11697_vm6, %v9625_v4  ;;  %2760 = vrot.lane.b32.xlu0 %v9149_v58, %s7307_s29  ;;  %v2398_v63 = vrot.slane %v9628_v59, 1  ;;  %v2557_v48 = vpop.permute.xlu1 %2556  ;;  %v9647_v35 = vrot.slane %v9628_v59, 7 }
 0x324   : > { %2875 = vst.msk [vmem:[#allocation3 + $0x297] sm:$0x1] %vm2861_vm14, %v11666_v5 }
 0x325   : > { %2723 = vst.msk [vmem:[#allocation3 + $0x278] sm:$0xff] %vm11706_vm11, %v9628_v59  ;;  %v3027_v19 = vpop.permute.xlu0 %3026  ;;  %v9654_v37 = vsel %vm2358_vm5, %v2398_v63, %v9634_v21  ;;  %2426 = vrot.lane.b32.xlu1 %v9034_v26, %s7308_s30  ;;  %v9663_v43 = vsel %vm11707_vm12, %v9647_v35, %v2148_v17  ;;  %vm11708_vm11 = vmmov %vm11697_vm6 }
 0x326   : > { %3196 = vst.msk [vmem:[#allocation3 + $0x268] sm:$0x7f] %vm3171_vm10, %v9634_v21  ;;  %vm11711_vm12 = vmmov %vm11697_vm6 }
 0x327   : > { %2651 = vst.msk [vmem:[#allocation3 + $0x48] sm:$0xff] %vm2648_vm0, %v2557_v48  ;;  %3112 = vst.msk [vmem:[#allocation3 + $0x68] sm:$0xff] %vm2648_vm0, %v3027_v19  ;;  %2906 = vrot.lane.b32.xlu0 %v9252_v57, %s7308_s30  ;;  %v2240_v0 = vpop.permute.xlu1 %2239 }
 0x328   : > { %2212 = vst.msk [vmem:[#allocation3 + $0x2a0] sm:$0xfe] %vm2184_vm7, %v9647_v35 }
 0x329   : > { %3195 = vst.msk [vmem:[#allocation3 + $0x250] sm:$0xff] %vm11697_vm6, %v9654_v37  ;;  %v2743_v26 = vpop.permute.xlu0 %2742  ;;  %2576 = vrot.lane.b32.xlu1 %v9233_v60, %s7306_s28 }
 0x32a   : > { %2213 = vst.msk [vmem:[#allocation3 + $0x2b8] sm:$0xff] %vm11708_vm11, %v9663_v43  ;;  %vm11714_vm11 = vmmov %vm11697_vm6 }
 0x32b   : > { %2328 = vst.msk [vmem:[#allocation3 + $0x60] sm:$0xff] %vm2325_vm2, %v2240_v0  ;;  %3046 = vrot.lane.b32.xlu0 %v11709_v36, %s7306_s28  ;;  %v2409_v50 = vpop.permute.xlu1 %2408 }
 0x32c   : > { %2834 = vst.msk [vmem:[#allocation3 + $0x80] sm:$0x7f] %vm2829_vm15, %v2743_v26 }
 0x32d   : > { %2498 = vst.msk [vmem:[#allocation3 + $0x60] sm:$0xff] %vm2494_vm8, %v2409_v50  ;;  %v2889_v54 = vpop.permute.xlu0 %2888  ;;  %2259 = vrot.lane.b32.xlu1 %v9031_v22, %s7307_s29  ;;  %v3296_v61 = vld [vmem:[#allocation3 + $0x268] sm:$0xff] }
 0x32e   : > { %v3228_v15 = vld [vmem:[#allocation3 + $0x48] sm:$0xff]  ;;  %2683 = vst.msk [vmem:[#allocation3 + $0x60] sm:$0x1] %vm2680_vm3, %v11666_v5 }
 0x32f   : > { %3534 = vmatmul.mubr.f32.gmra.mrb[6].mxu1 %v3228_v15  ;;  %v3232_v31 = vld [vmem:[#allocation3 + $0x68] sm:$0xff]  ;;  %2974 = vst.msk [vmem:[#allocation3 + $0x80] sm:$0xff] %vm2494_vm8, %v2889_v54  ;;  %2762 = vrot.lane.b32.xlu0 %v11710_v7, %s7307_s29  ;;  %v2559_v29 = vpop.permute.xlu1 %2558 }
 0x330   : > { %3538 = vmatprep.mubr.f32.mxu1 %v3232_v31  ;;  %v3293_v60 = vld [vmem:[#allocation3 + $0x250] sm:$0xff]  ;;  %2652 = vst.msk [vmem:[#allocation3 + $0x60] sm:$0xfe] %vm2646_vm9, %v2559_v29 }
 0x331   : > { %7017 = vmatprep.mubr.msk.f32.mxu0 %vm11711_vm12, %v3293_v60  ;;  %v3029_v20 = vpop.permute.xlu0 %3028  ;;  %2428 = vrot.lane.b32.xlu1 %v9106_v25, %s7308_s30  ;;  %v11712_v25 = vld [vmem:[#allocation11_spill] sm:$0xff]  ;;  %vm11716_vm12 = vmmov %vm11697_vm6 }
 0x332   : > { %7018 = vmatmul.mubr.msk.f32.gmra.mrb[56].mxu0 %vm11697_vm6, %v3296_v61  ;;  %3113 = vst.msk [vmem:[#allocation3 + $0x80] sm:$0xff] %vm2648_vm0, %v3029_v20  ;;  %vm11717_vm6 = vcmask 1040384  }
 0x333   : > { %2908 = vrot.lane.b32.xlu0 %v9278_v51, %s7308_s30  ;;  %v2242_v22 = vpop.permute.xlu1 %2241 }
 0x334   : > { %2329 = vst.msk [vmem:[#allocation3 + $0x78] sm:$0xff] %vm2325_vm2, %v2242_v22 }
 0x335   : > { %v2745_v9 = vpop.permute.xlu0 %2744  ;;  %2531 = vst.msk [vmem:[#allocation3 + $0x7f] sm:$0x1] %vm2528_vm4, %v11666_v5  ;;  %2578 = vrot.lane.b32.xlu1 %v9240_v53, %s7306_s28  ;;  %v11713_v53 = vld [vmem:[#allocation14_spill] sm:$0xff] }
 0x336   : > { %2835 = vst.msk [vmem:[#allocation3 + $0x98] sm:$0xff] %vm2325_vm2, %v2745_v9 }
 0x337   : > { %3005 = vst.msk [vmem:[#allocation3 + $0x98] sm:$0x1] %vm2528_vm4, %v11666_v5  ;;  %3048 = vrot.lane.b32.xlu0 %v11712_v25, %s7306_s28  ;;  %v2411_v56 = vpop.permute.xlu1 %2410  ;;  %v3231_v39 = vld [vmem:[#allocation3 + $0x60] sm:$0xff] }
 0x338   : > { %2499 = vst.msk [vmem:[#allocation3 + $0x78] sm:$0x7f] %vm2496_vm13, %v2411_v56  ;;  %3539 = vmatmul.mubr.f32.gmra.mrb[8].mxu1 %v3231_v39 }
 0x339   : > { %v2891_v10 = vpop.permute.xlu0 %2890  ;;  %v3235_v17 = vld [vmem:[#allocation3 + $0x80] sm:$0xff]  ;;  %2261 = vrot.lane.b32.xlu1 %v9040_v28, %s7307_s29 }
 0x33a   : > { %2975 = vst.msk [vmem:[#allocation3 + $0x98] sm:$0xfe] %vm2968_vm1, %v2891_v10  ;;  %3543 = vmatprep.mubr.f32.mxu1 %v3235_v17  ;;  %v11715_v17 = vld [vmem:[#allocation13_spill] sm:$0xff] }
 0x33b   : > { %2764 = vrot.lane.b32.xlu0 %v11713_v53, %s7307_s29  ;;  %v2561_v63 = vpop.permute.xlu1 %2560 }
 0x33c   : > { %2653 = vst.msk [vmem:[#allocation3 + $0x78] sm:$0xff] %vm2648_vm0, %v2561_v63 }
 0x33d   : > { %v3031_v48 = vpop.permute.xlu0 %3030  ;;  %v6969_v19 = vpop.f32.mrb[28].mxu0  ;;  %2430 = vrot.lane.b32.xlu1 %v9075_v16, %s7308_s30 }
 0x33e   : > { %3114 = vst.msk [vmem:[#allocation3 + $0x98] sm:$0xff] %vm2648_vm0, %v3031_v48  ;;  %v1928_v0 = vadd.f32 %v9607_v27, %v6969_v19  ;;  %v1922_v26 = vpop.f32.mrb[29].mxu0 }
 0x33f   : > { %2910 = vrot.lane.b32.xlu0 %v9317_v42, %s7308_s30  ;;  %v1923_v28 = vadd.f32 %v9607_v27, %v1922_v26  ;;  %v2244_v50 = vpop.permute.xlu1 %2243 }
 0x340   : > { %v1970_v15 = vmax.f32 %v1928_v0, 0.0  ;;  %v2002_v54 = vmin.f32 %v1928_v0, 0.0  ;;  %2330 = vst.msk [vmem:[#allocation3 + $0x90] sm:$0xff] %vm2325_vm2, %v2244_v50 }
 0x341   : > { %v2747_v31 = vpop.permute.xlu0 %2746  ;;  %v1969_v60 = vmax.f32 %v1923_v28, 0.0  ;;  %v2001_v61 = vmin.f32 %v1923_v28, 0.0  ;;  %2580 = vrot.lane.b32.xlu1 %v9261_v33, %s7306_s28 }
 0x342   : > { %2836 = vst.msk [vmem:[#allocation3 + $0xb0] sm:$0x7f] %vm2829_vm15, %v2747_v31  ;;  %v2043_v16 = vmul.f32 %v8826_v1, %v2002_v54 }
 0x343   : > { %3050 = vrot.lane.b32.xlu0 %v9299_v44, %s7306_s28  ;;  %v2042_v29 = vmul.f32 %v8826_v1, %v2001_v61  ;;  %v2413_v20 = vpop.permute.xlu1 %2412  ;;  %v3234_v22 = vld [vmem:[#allocation3 + $0x78] sm:$0xff] }
 0x344   : > { %v9725_v9 = vadd.f32 %v2043_v16, %v1970_v15  ;;  %2500 = vst.msk [vmem:[#allocation3 + $0x90] sm:$0xff] %vm2494_vm8, %v2413_v20  ;;  %3544 = vmatmul.mubr.f32.gmra.mrb[10].mxu1 %v3234_v22 }
 0x345   : > { %v2893_v56 = vpop.permute.xlu0 %2892  ;;  %v3238_v39 = vld [vmem:[#allocation3 + $0x98] sm:$0xff]  ;;  %v9728_v10 = vadd.f32 %v2042_v29, %v1969_v60  ;;  %2684 = vst.msk [vmem:[#allocation3 + $0x90] sm:$0x1] %vm2680_vm3, %v11666_v5  ;;  %2263 = vrot.lane.b32.xlu1 %v9047_v34, %s7307_s29 }
 0x346   : > { %2976 = vst.msk [vmem:[#allocation3 + $0xb0] sm:$0xff] %vm2494_vm8, %v2893_v56  ;;  %3548 = vmatprep.mubr.f32.mxu1 %v3238_v39  ;;  %v9736_v33 = vrot.slane %v9725_v9, 1  ;;  %v2151_v63 = vrot.slane %v9725_v9, 7 }
 0x347   : > { %2726 = vst.msk [vmem:[#allocation3 + $0x2c0] sm:$0xff] %vm11714_vm11, %v9725_v9  ;;  %2766 = vrot.lane.b32.xlu0 %v11715_v17, %s7307_s29  ;;  %v2401_v48 = vrot.slane %v9728_v10, 1  ;;  %v2563_v34 = vpop.permute.xlu1 %2562  ;;  %v9749_v19 = vrot.slane %v9728_v10, 7 }
 0x348   : > { %2876 = vst.msk [vmem:[#allocation3 + $0x2c7] sm:$0x1] %vm2861_vm14, %v11666_v5 }
 0x349   : > { %2725 = vst.msk [vmem:[#allocation3 + $0x2a8] sm:$0xff] %vm11716_vm12, %v9728_v10  ;;  %v3033_v0 = vpop.permute.xlu0 %3032  ;;  %v9756_v26 = vsel %vm2358_vm5, %v2401_v48, %v9736_v33  ;;  %2432 = vrot.lane.b32.xlu1 %v9149_v58, %s7308_s30  ;;  %v9765_v28 = vsel %vm11717_vm6, %v9749_v19, %v2151_v63  ;;  %vm11718_vm12 = vmmov %vm11714_vm11 }
 0x34a   : > { %3198 = vst.msk [vmem:[#allocation3 + $0x298] sm:$0x7f] %vm3171_vm10, %v9736_v33 }
 0x34b   : > { %2654 = vst.msk [vmem:[#allocation3 + $0x90] sm:$0xfe] %vm2646_vm9, %v2563_v34  ;;  %2912 = vrot.lane.b32.xlu0 %v9334_v14, %s7308_s30  ;;  %v2246_v50 = vpop.permute.xlu1 %2245 }
 0x34c   : > { %3115 = vst.msk [vmem:[#allocation3 + $0xb0] sm:$0xff] %vm2648_vm0, %v3033_v0 }
 0x34d   : > { %2214 = vst.msk [vmem:[#allocation3 + $0x2d0] sm:$0xfe] %vm2184_vm7, %v9749_v19  ;;  %v2749_v58 = vpop.permute.xlu0 %2748  ;;  %2582 = vrot.lane.b32.xlu1 %v9252_v57, %s7306_s28  ;;  %vm11719_vm7 = vmmov %vm11714_vm11 }
 0x34e   : > { %3197 = vst.msk [vmem:[#allocation3 + $0x280] sm:$0xff] %vm11714_vm11, %v9756_v26  ;;  %vm11720_vm6 = vmmov %vm11719_vm7 }
 0x34f   : > { %2215 = vst.msk [vmem:[#allocation3 + $0x2e8] sm:$0xff] %vm11718_vm12, %v9765_v28  ;;  %3052 = vrot.lane.b32.xlu0 %v9288_v18, %s7306_s28  ;;  %v2415_v15 = vpop.permute.xlu1 %2414  ;;  %vm11721_vm11 = vmmov %vm11720_vm6 }
 0x350   : > { %2331 = vst.msk [vmem:[#allocation3 + $0xa8] sm:$0xff] %vm2325_vm2, %v2246_v50  ;;  %2837 = vst.msk [vmem:[#allocation3 + $0xc8] sm:$0xff] %vm2325_vm2, %v2749_v58 }
 0x351   : > { %2532 = vst.msk [vmem:[#allocation3 + $0xaf] sm:$0x1] %vm2528_vm4, %v11666_v5  ;;  %3006 = vst.msk [vmem:[#allocation3 + $0xc8] sm:$0x1] %vm2528_vm4, %v11666_v5  ;;  %v2895_v31 = vpop.permute.xlu0 %2894  ;;  %2265 = vrot.lane.b32.xlu1 %v9081_v24, %s7307_s29  ;;  %v3302_v20 = vld [vmem:[#allocation3 + $0x298] sm:$0xff] }
 0x352   : > { %v3237_v54 = vld [vmem:[#allocation3 + $0x90] sm:$0xff]  ;;  %2501 = vst.msk [vmem:[#allocation3 + $0xa8] sm:$0x7f] %vm2496_vm13, %v2415_v15  ;;  %vm11722_vm12 = vmmov %vm11720_vm6 }
 0x353   : > { %3549 = vmatmul.mubr.f32.gmra.mrb[12].mxu1 %v3237_v54  ;;  %v3241_v60 = vld [vmem:[#allocation3 + $0xb0] sm:$0xff]  ;;  %2977 = vst.msk [vmem:[#allocation3 + $0xc8] sm:$0xfe] %vm2968_vm1, %v2895_v31  ;;  %2768 = vrot.lane.b32.xlu0 %v9326_v41, %s7307_s29  ;;  %v2565_v56 = vpop.permute.xlu1 %2564 }
 0x354   : > { %v6972_v61 = vpop.f32.mrb[30].mxu0  ;;  %3553 = vmatprep.mubr.f32.mxu1 %v3241_v60  ;;  %2655 = vst.msk [vmem:[#allocation3 + $0xa8] sm:$0xff] %vm2648_vm0, %v2565_v56 }
 0x355   : > { %v3299_v57 = vld [vmem:[#allocation3 + $0x280] sm:$0xff]  ;;  %v1938_v16 = vadd.f32 %v9607_v27, %v6972_v61  ;;  %v1932_v29 = vpop.f32.mrb[31].mxu0  ;;  %v3035_v24 = vpop.permute.xlu0 %3034  ;;  %2434 = vrot.lane.b32.xlu1 %v11710_v7, %s7308_s30 }
 0x356   : > { %7020 = vmatprep.mubr.msk.f32.mxu0 %vm11719_vm7, %v3299_v57  ;;  %v1933_v22 = vadd.f32 %v9607_v27, %v1932_v29  ;;  %3116 = vst.msk [vmem:[#allocation3 + $0xc8] sm:$0xff] %vm2648_vm0, %v3035_v24 }
 0x357   : > { %7021 = vmatmul.mubr.msk.f32.gmra.mrb[58].mxu0 %vm11720_vm6, %v3302_v20  ;;  %v1972_v39 = vmax.f32 %v1938_v16, 0.0  ;;  %v2004_v63 = vmin.f32 %v1938_v16, 0.0  ;;  %2914 = vrot.lane.b32.xlu0 %v9395_v46, %s7308_s30  ;;  %v2248_v50 = vpop.permute.xlu1 %2247 }
 0x358   : > { %v1971_v48 = vmax.f32 %v1933_v22, 0.0  ;;  %v2003_v34 = vmin.f32 %v1933_v22, 0.0  ;;  %2332 = vst.msk [vmem:[#allocation3 + $0xc0] sm:$0xff] %vm2325_vm2, %v2248_v50 }
 0x359   : > { %v2045_v0 = vmul.f32 %v8826_v1, %v2004_v63  ;;  %v2751_v15 = vpop.permute.xlu0 %2750  ;;  %2584 = vrot.lane.b32.xlu1 %v9278_v51, %s7306_s28 }
 0x35a   : > { %v2044_v27 = vmul.f32 %v8826_v1, %v2003_v34  ;;  %2838 = vst.msk [vmem:[#allocation3 + $0xe0] sm:$0x7f] %vm2829_vm15, %v2751_v15 }
 0x35b   : > { %v9801_v58 = vadd.f32 %v2045_v0, %v1972_v39  ;;  %3054 = vrot.lane.b32.xlu0 %v9379_v49, %s7306_s28  ;;  %v2417_v60 = vpop.permute.xlu1 %2416  ;;  %v3240_v61 = vld [vmem:[#allocation3 + $0xa8] sm:$0xff] }
 0x35c   : > { %v9804_v54 = vadd.f32 %v2044_v27, %v1971_v48  ;;  %2502 = vst.msk [vmem:[#allocation3 + $0xc0] sm:$0xff] %vm2494_vm8, %v2417_v60  ;;  %3554 = vmatmul.mubr.f32.gmra.mrb[14].mxu1 %v3240_v61 }
 0x35d   : > { %v9810_v7 = vrot.slane %v9801_v58, 1  ;;  %2728 = vst.msk [vmem:[#allocation3 + $0x2f0] sm:$0xff] %vm11721_vm11, %v9801_v58  ;;  %v2897_v51 = vpop.permute.xlu0 %2896  ;;  %v3244_v57 = vld [vmem:[#allocation3 + $0xc8] sm:$0xff]  ;;  %2267 = vrot.lane.b32.xlu1 %v11709_v36, %s7307_s29  ;;  %vm5160_vm11 = vcmask 523264  }
 0x35e   : > { %2877 = vst.msk [vmem:[#allocation3 + $0x2f7] sm:$0x1] %vm2861_vm14, %v11666_v5  ;;  %v2729_v31 = vrot.slane %v9804_v54, 1  ;;  %3558 = vmatprep.mubr.f32.mxu1 %v3244_v57 }
 0x35f   : > { %2727 = vst.msk [vmem:[#allocation3 + $0x2d8] sm:$0xff] %vm11722_vm12, %v9804_v54  ;;  %2770 = vrot.lane.b32.xlu0 %v9304_v52, %s7307_s29  ;;  %v2567_v29 = vpop.permute.xlu1 %2566  ;;  %vm11726_vm12 = vcmask 1040384  }
 0x360   : > { %3200 = vst.msk [vmem:[#allocation3 + $0x2c8] sm:$0x7f] %vm3171_vm10, %v9810_v7  ;;  %v9826_v16 = vsel %vm2358_vm5, %v2729_v31, %v9810_v7  ;;  %vm11723_vm10 = vmmov %vm11720_vm6 }
 0x361   : > { %2685 = vst.msk [vmem:[#allocation3 + $0xc0] sm:$0x1] %vm2680_vm3, %v11666_v5  ;;  %v3037_v20 = vpop.permute.xlu0 %3036  ;;  %2436 = vrot.lane.b32.xlu1 %v11713_v53, %s7308_s30  ;;  %vm11724_vm5 = vmmov %vm11720_vm6  ;;  %vm4248_vm6 = vcmask 516096  }
 0x362   : > { %2978 = vst.msk [vmem:[#allocation3 + $0xe0] sm:$0xff] %vm2494_vm8, %v2897_v51  ;;  %vm11725_vm7 = vmmov %vm11724_vm5 }
 0x363   : > { %3199 = vst.msk [vmem:[#allocation3 + $0x2b0] sm:$0xff] %vm11723_vm10, %v9826_v16  ;;  %2916 = vrot.lane.b32.xlu0 %v9411_v40, %s7308_s30  ;;  %v2250_v36 = vpop.permute.xlu1 %2249  ;;  %vm11727_vm10 = vmmov %vm11724_vm5 }
 0x364   : > { %2656 = vst.msk [vmem:[#allocation3 + $0xc0] sm:$0xfe] %vm2646_vm9, %v2567_v29 }
 0x365   : > { %3117 = vst.msk [vmem:[#allocation3 + $0xe0] sm:$0xff] %vm2648_vm0, %v3037_v20  ;;  %v2753_v22 = vpop.permute.xlu0 %2752  ;;  %2586 = vrot.lane.b32.xlu1 %v9317_v42, %s7306_s28 }
 0x366   : > { %2333 = vst.msk [vmem:[#allocation3 + $0xd8] sm:$0xff] %vm2325_vm2, %v2250_v36  ;;  %2839 = vst.msk [vmem:[#allocation3 + $0xf8] sm:$0xff] %vm2325_vm2, %v2753_v22 }
 0x367   : > { %2533 = vst.msk [vmem:[#allocation3 + $0xdf] sm:$0x1] %vm2528_vm4, %v11666_v5  ;;  %3007 = vst.msk [vmem:[#allocation3 + $0xf8] sm:$0x1] %vm2528_vm4, %v11666_v5  ;;  %3056 = vrot.lane.b32.xlu0 %v9375_v2, %s7306_s28  ;;  %v3308_v39 = vld [vmem:[#allocation3 + $0x2c8] sm:$0xff]  ;;  %v2419_v24 = vpop.permute.xlu1 %2418 }
 0x368   : > { %2503 = vst.msk [vmem:[#allocation3 + $0xd8] sm:$0x7f] %vm2496_vm13, %v2419_v24 }
 0x369   : > { %v2899_v42 = vpop.permute.xlu0 %2898  ;;  %2269 = vrot.lane.b32.xlu1 %v11712_v25, %s7307_s29  ;;  %5163 = vst.msk [vmem:[#allocation4 + $0x28] sm:$0x1] %vm4248_vm6, %v11666_v5  ;;  %5164 = vst.msk [vmem:[#allocation4 + $0x50] sm:$0x1] %vm4248_vm6, %v11666_v5 }
 0x36a   : > { %v3305_v56 = vld [vmem:[#allocation3 + $0x2b0] sm:$0xff]  ;;  %2979 = vst.msk [vmem:[#allocation3 + $0xf8] sm:$0xfe] %vm2968_vm1, %v2899_v42 }
 0x36b   : > { %7023 = vmatprep.mubr.msk.f32.mxu0 %vm11724_vm5, %v3305_v56  ;;  %v3243_v48 = vld [vmem:[#allocation3 + $0xc0] sm:$0xff]  ;;  %2772 = vrot.lane.b32.xlu0 %v9403_v3, %s7307_s29  ;;  %v2569_v50 = vpop.permute.xlu1 %2568  ;;  %5165 = vst.msk [vmem:[#allocation4 + $0x78] sm:$0x1] %vm4248_vm6, %v11666_v5  ;;  %5166 = vst.msk [vmem:[#allocation4 + $0xa0] sm:$0x1] %vm4248_vm6, %v11666_v5 }
 0x36c   : > { %7024 = vmatmul.mubr.msk.f32.gmra.mrb[60].mxu0 %vm11725_vm7, %v3308_v39  ;;  %3559 = vmatmul.mubr.f32.gmra.mrb[16].mxu1 %v3243_v48  ;;  %v3247_v34 = vld [vmem:[#allocation3 + $0xe0] sm:$0xff]  ;;  %2657 = vst.msk [vmem:[#allocation3 + $0xd8] sm:$0xff] %vm2648_vm0, %v2569_v50  ;;  %vm5214_vm7 = vcmask 522240  }
 0x36d   : > { %v9851_v53 = vpop.f32.mrb[32].mxu0  ;;  %3563 = vmatprep.mubr.f32.mxu1 %v3247_v34  ;;  %v3039_v15 = vpop.permute.xlu0 %3038  ;;  %2438 = vrot.lane.b32.xlu1 %v11715_v17, %s7308_s30  ;;  %5167 = vst.msk [vmem:[#allocation4 + $0xc8] sm:$0x1] %vm4248_vm6, %v11666_v5  ;;  %5168 = vst.msk [vmem:[#allocation4 + $0xf0] sm:$0x1] %vm4248_vm6, %v11666_v5 }
 0x36e   : > { %v9856_v63 = vpop.f32.mrb[33].mxu0  ;;  %3118 = vst.msk [vmem:[#allocation3 + $0xf8] sm:$0xff] %vm2648_vm0, %v3039_v15 }
 0x36f   : > { %2918 = vrot.lane.b32.xlu0 %v9467_v23, %s7308_s30  ;;  %v2252_v60 = vpop.permute.xlu1 %2251  ;;  %5169 = vst.msk [vmem:[#allocation4 + $0x118] sm:$0x1] %vm4248_vm6, %v11666_v5  ;;  %5224 = vst.msk [vmem:[#allocation4 + $0x37] sm:$0x1] %vm4248_vm6, %v11666_v5 }
 0x370   : > { %2334 = vst.msk [vmem:[#allocation3 + $0xf0] sm:$0xff] %vm2325_vm2, %v2252_v60 }
 0x371   : > { %v2755_v61 = vpop.permute.xlu0 %2754  ;;  %2588 = vrot.lane.b32.xlu1 %v9334_v14, %s7306_s28  ;;  %5225 = vst.msk [vmem:[#allocation4 + $0x5f] sm:$0x1] %vm4248_vm6, %v11666_v5  ;;  %5226 = vst.msk [vmem:[#allocation4 + $0x87] sm:$0x1] %vm4248_vm6, %v11666_v5 }
 0x372   : > { %2840 = vst.msk [vmem:[#allocation3 + $0x110] sm:$0x7f] %vm2829_vm15, %v2755_v61 }
 0x373   : > { %3058 = vrot.lane.b32.xlu0 %v9449_v30, %s7306_s28  ;;  %v2421_v57 = vpop.permute.xlu1 %2420  ;;  %v3246_v29 = vld [vmem:[#allocation3 + $0xd8] sm:$0xff]  ;;  %5227 = vst.msk [vmem:[#allocation4 + $0xaf] sm:$0x1] %vm4248_vm6, %v11666_v5  ;;  %5228 = vst.msk [vmem:[#allocation4 + $0xd7] sm:$0x1] %vm4248_vm6, %v11666_v5 }
 0x374   : > { %2504 = vst.msk [vmem:[#allocation3 + $0xf0] sm:$0xff] %vm2494_vm8, %v2421_v57  ;;  %3564 = vmatmul.mubr.f32.gmra.mrb[18].mxu1 %v3246_v29 }
 0x375   : > { %v2901_v20 = vpop.permute.xlu0 %2900  ;;  %v3250_v36 = vld [vmem:[#allocation3 + $0xf8] sm:$0xff]  ;;  %2686 = vst.msk [vmem:[#allocation3 + $0xf0] sm:$0x1] %vm2680_vm3, %v11666_v5  ;;  %2271 = vrot.lane.b32.xlu1 %v9299_v44, %s7307_s29 }
 0x376   : > { %2980 = vst.msk [vmem:[#allocation3 + $0x110] sm:$0xff] %vm2494_vm8, %v2901_v20  ;;  %3568 = vmatprep.mubr.f32.mxu1 %v3250_v36 }
 0x377   : > { %2774 = vrot.lane.b32.xlu0 %v9384_v45, %s7307_s29  ;;  %v2571_v56 = vpop.permute.xlu1 %2570  ;;  %5229 = vst.msk [vmem:[#allocation4 + $0xff] sm:$0x1] %vm4248_vm6, %v11666_v5  ;;  %5230 = vst.msk [vmem:[#allocation4 + $0x127] sm:$0x1] %vm4248_vm6, %v11666_v5 }
 0x378   : > { %2658 = vst.msk [vmem:[#allocation3 + $0xf0] sm:$0xfe] %vm2646_vm9, %v2571_v56 }
 0x379   : > { %v3041_v39 = vpop.permute.xlu0 %3040  ;;  %2440 = vrot.lane.b32.xlu1 %v9326_v41, %s7308_s30  ;;  %5335 = vst.msk [vmem:[#allocation4 + $0x18] sm:$0x1] %vm4248_vm6, %v11666_v5  ;;  %5336 = vst.msk [vmem:[#allocation4 + $0x40] sm:$0x1] %vm4248_vm6, %v11666_v5 }
 0x37a   : > { %3119 = vst.msk [vmem:[#allocation3 + $0x110] sm:$0xff] %vm2648_vm0, %v3041_v39 }
 0x37b   : > { %2920 = vrot.lane.b32.xlu0 %v9481_v11, %s7308_s30  ;;  %v2254_v48 = vpop.permute.xlu1 %2253  ;;  %5337 = vst.msk [vmem:[#allocation4 + $0x68] sm:$0x1] %vm4248_vm6, %v11666_v5  ;;  %5338 = vst.msk [vmem:[#allocation4 + $0x90] sm:$0x1] %vm4248_vm6, %v11666_v5 }
 0x37c   : > { %v9863_v0 = vpop.f32.mrb[34].mxu0  ;;  %2335 = vst.msk [vmem:[#allocation3 + $0x108] sm:$0xff] %vm2325_vm2, %v2254_v48 }
 0x37d   : > { %v9867_v27 = vpop.f32.mrb[35].mxu0  ;;  %v2757_v42 = vpop.permute.xlu0 %2756  ;;  %2534 = vst.msk [vmem:[#allocation3 + $0x10f] sm:$0x1] %vm2528_vm4, %v11666_v5  ;;  %2590 = vrot.lane.b32.xlu1 %v9395_v46, %s7306_s28 }
 0x37e   : > { %2841 = vst.msk [vmem:[#allocation3 + $0x128] sm:$0xff] %vm2325_vm2, %v2757_v42 }
 0x37f   : > { %3008 = vst.msk [vmem:[#allocation3 + $0x128] sm:$0x1] %vm2528_vm4, %v11666_v5  ;;  %3060 = vrot.lane.b32.xlu0 %v9447_v38, %s7306_s28  ;;  %v2423_v50 = vpop.permute.xlu1 %2422  ;;  %v3249_v15 = vld [vmem:[#allocation3 + $0xf0] sm:$0xff] }
 0x380   : > { %2505 = vst.msk [vmem:[#allocation3 + $0x108] sm:$0x7f] %vm2496_vm13, %v2423_v50  ;;  %3569 = vmatmul.mubr.f32.gmra.mrb[20].mxu1 %v3249_v15 }
 0x381   : > { %v2903_v60 = vpop.permute.xlu0 %2902  ;;  %v3253_v61 = vld [vmem:[#allocation3 + $0x110] sm:$0xff]  ;;  %2273 = vrot.lane.b32.xlu1 %v9288_v18, %s7307_s29  ;;  %5339 = vst.msk [vmem:[#allocation4 + $0xb8] sm:$0x1] %vm4248_vm6, %v11666_v5  ;;  %5340 = vst.msk [vmem:[#allocation4 + $0xe0] sm:$0x1] %vm4248_vm6, %v11666_v5 }
 0x382   : > { %v9873_v31 = vpop.f32.mrb[36].mxu0  ;;  %2981 = vst.msk [vmem:[#allocation3 + $0x128] sm:$0xfe] %vm2968_vm1, %v2903_v60  ;;  %3573 = vmatprep.mubr.f32.mxu1 %v3253_v61 }
 0x383   : > { %v9877_v25 = vpop.f32.mrb[37].mxu0  ;;  %2776 = vrot.lane.b32.xlu0 %v9473_v47, %s7307_s29  ;;  %v2573_v29 = vpop.permute.xlu1 %2572  ;;  %5341 = vst.msk [vmem:[#allocation4 + $0x108] sm:$0x1] %vm4248_vm6, %v11666_v5  ;;  %5363 = vst.msk [vmem:[#allocation4 + $0x27] sm:$0x1] %vm4248_vm6, %v11666_v5 }
 0x384   : > { %2659 = vst.msk [vmem:[#allocation3 + $0x108] sm:$0xff] %vm2648_vm0, %v2573_v29 }
 0x385   : > { %v3043_v20 = vpop.permute.xlu0 %3042  ;;  %2442 = vrot.lane.b32.xlu1 %v9304_v52, %s7308_s30  ;;  %5364 = vst.msk [vmem:[#allocation4 + $0x4f] sm:$0x1] %vm4248_vm6, %v11666_v5  ;;  %5365 = vst.msk [vmem:[#allocation4 + $0x77] sm:$0x1] %vm4248_vm6, %v11666_v5 }
 0x386   : > { %3120 = vst.msk [vmem:[#allocation3 + $0x128] sm:$0xff] %vm2648_vm0, %v3043_v20 }
 0x387   : > { %5366 = vst.msk [vmem:[#allocation4 + $0x9f] sm:$0x1] %vm4248_vm6, %v11666_v5  ;;  %5367 = vst.msk [vmem:[#allocation4 + $0xc7] sm:$0x1] %vm4248_vm6, %v11666_v5  ;;  %2922 = vrot.lane.b32.xlu0 %v9545_v32, %s7308_s30  ;;  %v2256_v36 = vpop.permute.xlu1 %2255 }
 0x388   : > { %5368 = vst.msk [vmem:[#allocation4 + $0xef] sm:$0x1] %vm4248_vm6, %v11666_v5  ;;  %5369 = vst.msk [vmem:[#allocation4 + $0x117] sm:$0x1] %vm4248_vm6, %v11666_v5 }
 0x389   : > { %2336 = vst.msk [vmem:[#allocation3 + $0x120] sm:$0xff] %vm2325_vm2, %v2256_v36  ;;  %v2759_v56 = vpop.permute.xlu0 %2758  ;;  %2592 = vrot.lane.b32.xlu1 %v9411_v40, %s7306_s28 }
 0x38a   : > { %2842 = vst.msk [vmem:[#allocation3 + $0x140] sm:$0x7f] %vm2829_vm15, %v2759_v56 }
 0x38b   : > { %3062 = vrot.lane.b32.xlu0 %v9526_v6, %s7306_s28  ;;  %v2425_v39 = vpop.permute.xlu1 %2424  ;;  %v3252_v48 = vld [vmem:[#allocation3 + $0x108] sm:$0xff]  ;;  %5161 = vst.msk [vmem:[#allocation4] sm:$0xff] %vm5160_vm11, %v11666_v5  ;;  %5222 = vst.msk [vmem:[#allocation4 + $0x8] sm:$0xff] %vm5160_vm11, %v11666_v5 }
 0x38c   : > { %2506 = vst.msk [vmem:[#allocation3 + $0x120] sm:$0xff] %vm2494_vm8, %v2425_v39  ;;  %3574 = vmatmul.mubr.f32.gmra.mrb[22].mxu1 %v3252_v48 }
 0x38d   : > { %v2905_v42 = vpop.permute.xlu0 %2904  ;;  %v3256_v50 = vld [vmem:[#allocation3 + $0x128] sm:$0xff]  ;;  %2687 = vst.msk [vmem:[#allocation3 + $0x120] sm:$0x1] %vm2680_vm3, %v11666_v5  ;;  %2275 = vrot.lane.b32.xlu1 %v9379_v49, %s7307_s29 }
 0x38e   : > { %v9883_v51 = vpop.f32.mrb[38].mxu0  ;;  %2982 = vst.msk [vmem:[#allocation3 + $0x140] sm:$0xff] %vm2494_vm8, %v2905_v42  ;;  %3578 = vmatprep.mubr.f32.mxu1 %v3256_v50 }
 0x38f   : > { %v9887_v17 = vpop.f32.mrb[39].mxu0  ;;  %2778 = vrot.lane.b32.xlu0 %v9454_v55, %s7307_s29  ;;  %v2575_v40 = vpop.permute.xlu1 %2574  ;;  %5334 = vst.msk [vmem:[#allocation4 + $0x130] sm:$0xff] %vm5160_vm11, %v11666_v5  ;;  %5362 = vst.msk [vmem:[#allocation4 + $0x138] sm:$0xff] %vm5160_vm11, %v11666_v5 }
 0x390   : > { %2660 = vst.msk [vmem:[#allocation3 + $0x120] sm:$0xfe] %vm2646_vm9, %v2575_v40 }
 0x391   : > { %v3045_v15 = vpop.permute.xlu0 %3044  ;;  %2444 = vrot.lane.b32.xlu1 %v9403_v3, %s7308_s30  ;;  %5162 = vst.msk [vmem:[#allocation4] sm:$0x1] %vm4248_vm6, %v11666_v5  ;;  %5223 = vst.msk [vmem:[#allocation4 + $0xf] sm:$0x1] %vm4248_vm6, %v11666_v5 }
 0x392   : > { %v9895_v14 = vpop.f32.mrb[40].mxu0  ;;  %3121 = vst.msk [vmem:[#allocation3 + $0x140] sm:$0xff] %vm2648_vm0, %v3045_v15 }
 0x393   : > { %v9899_v22 = vpop.f32.mrb[41].mxu0  ;;  %2924 = vrot.lane.b32.xlu0 %v9561_v13, %s7308_s30  ;;  %v2258_v60 = vpop.permute.xlu1 %2257  ;;  %5342 = vst.msk [vmem:[#allocation4 + $0x130] sm:$0x1] %vm4248_vm6, %v11666_v5  ;;  %5370 = vst.msk [vmem:[#allocation4 + $0x13f] sm:$0x1] %vm4248_vm6, %v11666_v5 }
 0x394   : > { %2337 = vst.msk [vmem:[#allocation3 + $0x138] sm:$0xff] %vm2325_vm2, %v2258_v60 }
 0x395   : > { %v2761_v49 = vpop.permute.xlu0 %2760  ;;  %2535 = vst.msk [vmem:[#allocation3 + $0x13f] sm:$0x1] %vm2528_vm4, %v11666_v5  ;;  %2594 = vrot.lane.b32.xlu1 %v9467_v23, %s7306_s28 }
 0x396   : > { %v9905_v24 = vpop.f32.mrb[42].mxu0  ;;  %2843 = vst.msk [vmem:[#allocation3 + $0x158] sm:$0xff] %vm2325_vm2, %v2761_v49 }
 0x397   : > { %v9909_v44 = vpop.f32.mrb[43].mxu0  ;;  %3009 = vst.msk [vmem:[#allocation3 + $0x158] sm:$0x1] %vm2528_vm4, %v11666_v5  ;;  %3064 = vrot.lane.b32.xlu0 %v9523_v62, %s7306_s28  ;;  %v2427_v3 = vpop.permute.xlu1 %2426  ;;  %v3255_v61 = vld [vmem:[#allocation3 + $0x120] sm:$0xff] }
 0x398   : > { %2507 = vst.msk [vmem:[#allocation3 + $0x138] sm:$0x7f] %vm2496_vm13, %v2427_v3  ;;  %3579 = vmatmul.mubr.f32.gmra.mrb[24].mxu1 %v3255_v61 }
 0x399   : > { %v2907_v29 = vpop.permute.xlu0 %2906  ;;  %v3259_v20 = vld [vmem:[#allocation3 + $0x140] sm:$0xff]  ;;  %2277 = vrot.lane.b32.xlu1 %v9375_v2, %s7307_s29 }
 0x39a   : > { %v9919_v41 = vpop.f32.mrb[44].mxu0  ;;  %2983 = vst.msk [vmem:[#allocation3 + $0x158] sm:$0xfe] %vm2968_vm1, %v2907_v29  ;;  %3583 = vmatprep.mubr.f32.mxu1 %v3259_v20 }
 0x39b   : > { %v9923_v34 = vpop.f32.mrb[45].mxu0  ;;  %2780 = vrot.lane.b32.xlu0 %v9552_v12, %s7307_s29  ;;  %v2577_v23 = vpop.permute.xlu1 %2576 }
 0x39c   : > { %2661 = vst.msk [vmem:[#allocation3 + $0x138] sm:$0xff] %vm2648_vm0, %v2577_v23 }
 0x39d   : > { %v3047_v36 = vpop.permute.xlu0 %3046  ;;  %2446 = vrot.lane.b32.xlu1 %v9384_v45, %s7308_s30 }
 0x39e   : > { %v9929_v46 = vpop.f32.mrb[46].mxu0  ;;  %3122 = vst.msk [vmem:[#allocation3 + $0x158] sm:$0xff] %vm2648_vm0, %v3047_v36 }
 0x39f   : > { %v9933_v57 = vpop.f32.mrb[47].mxu0  ;;  %2926 = vrot.lane.b32.xlu0 %v9647_v35, %s7308_s30  ;;  %v2260_v56 = vpop.permute.xlu1 %2259 }
 0x3a0   : > { %2338 = vst.msk [vmem:[#allocation3 + $0x150] sm:$0xff] %vm2325_vm2, %v2260_v56 }
 0x3a1   : > { %v2763_v2 = vpop.permute.xlu0 %2762  ;;  %2596 = vrot.lane.b32.xlu1 %v9481_v11, %s7306_s28 }
 0x3a2   : > { %v9995_v18 = vpop.f32.mrb[48].mxu0  ;;  %2844 = vst.msk [vmem:[#allocation3 + $0x170] sm:$0x7f] %vm2829_vm15, %v2763_v2 }
 0x3a3   : > { %v9999_v52 = vpop.f32.mrb[49].mxu0  ;;  %3066 = vrot.lane.b32.xlu0 %v9628_v59, %s7306_s28  ;;  %v2429_v48 = vpop.permute.xlu1 %2428  ;;  %v3258_v42 = vld [vmem:[#allocation3 + $0x138] sm:$0xff] }
 0x3a4   : > { %2508 = vst.msk [vmem:[#allocation3 + $0x150] sm:$0xff] %vm2494_vm8, %v2429_v48  ;;  %3584 = vmatmul.mubr.f32.gmra.mrb[26].mxu1 %v3258_v42 }
 0x3a5   : > { %v2909_v50 = vpop.permute.xlu0 %2908  ;;  %v3262_v40 = vld [vmem:[#allocation3 + $0x158] sm:$0xff]  ;;  %2688 = vst.msk [vmem:[#allocation3 + $0x150] sm:$0x1] %vm2680_vm3, %v11666_v5  ;;  %2279 = vrot.lane.b32.xlu1 %v9449_v30, %s7307_s29 }
 0x3a6   : > { %2984 = vst.msk [vmem:[#allocation3 + $0x170] sm:$0xff] %vm2494_vm8, %v2909_v50  ;;  %3588 = vmatprep.mubr.f32.mxu1 %v3262_v40 }
 0x3a7   : > { %2782 = vrot.lane.b32.xlu0 %v9532_v8, %s7307_s29  ;;  %v2579_v11 = vpop.permute.xlu1 %2578 }
 0x3a8   : > { %2662 = vst.msk [vmem:[#allocation3 + $0x150] sm:$0xfe] %vm2646_vm9, %v2579_v11 }
 0x3a9   : > { %v3049_v15 = vpop.permute.xlu0 %3048  ;;  %2448 = vrot.lane.b32.xlu1 %v9473_v47, %s7308_s30 }
 0x3aa   : > { %v10049_v39 = vpop.f32.mrb[50].mxu0  ;;  %3123 = vst.msk [vmem:[#allocation3 + $0x170] sm:$0xff] %vm2648_vm0, %v3049_v15 }
 0x3ab   : > { %v10051_v45 = vpop.f32.mrb[51].mxu0  ;;  %2928 = vrot.lane.b32.xlu0 %v9663_v43, %s7308_s30  ;;  %v2262_v60 = vpop.permute.xlu1 %2261 }
 0x3ac   : > { %2339 = vst.msk [vmem:[#allocation3 + $0x168] sm:$0xff] %vm2325_vm2, %v2262_v60 }
 0x3ad   : > { %v2765_v30 = vpop.permute.xlu0 %2764  ;;  %2536 = vst.msk [vmem:[#allocation3 + $0x16f] sm:$0x1] %vm2528_vm4, %v11666_v5  ;;  %2598 = vrot.lane.b32.xlu1 %v9545_v32, %s7306_s28 }
 0x3ae   : > { %2845 = vst.msk [vmem:[#allocation3 + $0x188] sm:$0xff] %vm2325_vm2, %v2765_v30  ;;  %v10147_v30 = vrot.slane %v9804_v54, 7 }
 0x3af   : > { %3010 = vst.msk [vmem:[#allocation3 + $0x188] sm:$0x1] %vm2528_vm4, %v11666_v5  ;;  %3068 = vrot.lane.b32.xlu0 %v9625_v4, %s7306_s28  ;;  %v2431_v47 = vpop.permute.xlu1 %2430  ;;  %v3261_v49 = vld [vmem:[#allocation3 + $0x150] sm:$0xff] }
 0x3b0   : > { %2509 = vst.msk [vmem:[#allocation3 + $0x168] sm:$0x7f] %vm2496_vm13, %v2431_v47  ;;  %3589 = vmatmul.mubr.f32.gmra.mrb[28].mxu1 %v3261_v49 }
 0x3b1   : > { %v2911_v3 = vpop.permute.xlu0 %2910  ;;  %v3265_v61 = vld [vmem:[#allocation3 + $0x170] sm:$0xff]  ;;  %2281 = vrot.lane.b32.xlu1 %v9447_v38, %s7307_s29 }
 0x3b2   : > { %2985 = vst.msk [vmem:[#allocation3 + $0x188] sm:$0xfe] %vm2968_vm1, %v2911_v3  ;;  %3593 = vmatprep.mubr.f32.mxu1 %v3265_v61 }
 0x3b3   : > { %2784 = vrot.lane.b32.xlu0 %v9654_v37, %s7307_s29  ;;  %v2581_v32 = vpop.permute.xlu1 %2580 }
 0x3b4   : > { %2663 = vst.msk [vmem:[#allocation3 + $0x168] sm:$0xff] %vm2648_vm0, %v2581_v32 }
 0x3b5   : > { %v3051_v29 = vpop.permute.xlu0 %3050  ;;  %2450 = vrot.lane.b32.xlu1 %v9454_v55, %s7308_s30 }
 0x3b6   : > { %3124 = vst.msk [vmem:[#allocation3 + $0x188] sm:$0xff] %vm2648_vm0, %v3051_v29 }
 0x3b7   : > { %2930 = vrot.lane.b32.xlu0 %v9749_v19, %s7308_s30  ;;  %v2264_v38 = vpop.permute.xlu1 %2263 }
 0x3b8   : > { %2340 = vst.msk [vmem:[#allocation3 + $0x180] sm:$0xff] %vm2325_vm2, %v2264_v38 }
 0x3b9   : > { %v2767_v55 = vpop.permute.xlu0 %2766  ;;  %2600 = vrot.lane.b32.xlu1 %v9561_v13, %s7306_s28 }
 0x3ba   : > { %2846 = vst.msk [vmem:[#allocation3 + $0x1a0] sm:$0x7f] %vm2829_vm15, %v2767_v55 }
 0x3bb   : > { %3070 = vrot.lane.b32.xlu0 %v9728_v10, %s7306_s28  ;;  %v2433_v20 = vpop.permute.xlu1 %2432  ;;  %v3264_v23 = vld [vmem:[#allocation3 + $0x168] sm:$0xff] }
 0x3bc   : > { %2510 = vst.msk [vmem:[#allocation3 + $0x180] sm:$0xff] %vm2494_vm8, %v2433_v20  ;;  %3594 = vmatmul.mubr.f32.gmra.mrb[30].mxu1 %v3264_v23 }
 0x3bd   : > { %v2913_v36 = vpop.permute.xlu0 %2912  ;;  %v3268_v56 = vld [vmem:[#allocation3 + $0x188] sm:$0xff]  ;;  %2689 = vst.msk [vmem:[#allocation3 + $0x180] sm:$0x1] %vm2680_vm3, %v11666_v5  ;;  %2283 = vrot.lane.b32.xlu1 %v9526_v6, %s7307_s29 }
 0x3be   : > { %2986 = vst.msk [vmem:[#allocation3 + $0x1a0] sm:$0xff] %vm2494_vm8, %v2913_v36  ;;  %3598 = vmatprep.mubr.f32.mxu1 %v3268_v56 }
 0x3bf   : > { %2786 = vrot.lane.b32.xlu0 %v9634_v21, %s7307_s29  ;;  %v2583_v13 = vpop.permute.xlu1 %2582 }
 0x3c0   : > { %2664 = vst.msk [vmem:[#allocation3 + $0x180] sm:$0xfe] %vm2646_vm9, %v2583_v13 }
 0x3c1   : > { %v3053_v2 = vpop.permute.xlu0 %3052  ;;  %2452 = vrot.lane.b32.xlu1 %v9552_v12, %s7308_s30 }
 0x3c2   : > { %3125 = vst.msk [vmem:[#allocation3 + $0x1a0] sm:$0xff] %vm2648_vm0, %v3053_v2 }
 0x3c3   : > { %2932 = vrot.lane.b32.xlu0 %v9765_v28, %s7308_s30  ;;  %v10125_v48 = vpop.f32.mrb[52].mxu0  ;;  %v2266_v6 = vpop.permute.xlu1 %2265 }
 0x3c4   : > { %v10127_v42 = vpop.f32.mrb[53].mxu0  ;;  %2341 = vst.msk [vmem:[#allocation3 + $0x198] sm:$0xff] %vm2325_vm2, %v2266_v6 }
 0x3c5   : > { %v2769_v50 = vpop.permute.xlu0 %2768  ;;  %2537 = vst.msk [vmem:[#allocation3 + $0x19f] sm:$0x1] %vm2528_vm4, %v11666_v5  ;;  %2602 = vrot.lane.b32.xlu1 %v9647_v35, %s7306_s28 }
 0x3c6   : > { %2847 = vst.msk [vmem:[#allocation3 + $0x1b8] sm:$0xff] %vm2325_vm2, %v2769_v50 }
 0x3c7   : > { %3011 = vst.msk [vmem:[#allocation3 + $0x1b8] sm:$0x1] %vm2528_vm4, %v11666_v5  ;;  %3072 = vrot.lane.b32.xlu0 %v9725_v9, %s7306_s28  ;;  %v2435_v12 = vpop.permute.xlu1 %2434  ;;  %v3267_v40 = vld [vmem:[#allocation3 + $0x180] sm:$0xff] }
 0x3c8   : > { %2511 = vst.msk [vmem:[#allocation3 + $0x198] sm:$0x7f] %vm2496_vm13, %v2435_v12  ;;  %3599 = vmatmul.mubr.f32.gmra.mrb[32].mxu1 %v3267_v40 }
 0x3c9   : > { %v2915_v11 = vpop.permute.xlu0 %2914  ;;  %v3271_v15 = vld [vmem:[#allocation3 + $0x1a0] sm:$0xff]  ;;  %2285 = vrot.lane.b32.xlu1 %v9523_v62, %s7307_s29 }
 0x3ca   : > { %2987 = vst.msk [vmem:[#allocation3 + $0x1b8] sm:$0xfe] %vm2968_vm1, %v2915_v11  ;;  %3603 = vmatprep.mubr.f32.mxu1 %v3271_v15 }
 0x3cb   : > { %2788 = vrot.lane.b32.xlu0 %v9756_v26, %s7307_s29  ;;  %v2585_v35 = vpop.permute.xlu1 %2584 }
 0x3cc   : > { %2665 = vst.msk [vmem:[#allocation3 + $0x198] sm:$0xff] %vm2648_vm0, %v2585_v35 }
 0x3cd   : > { %v3055_v60 = vpop.permute.xlu0 %3054  ;;  %2454 = vrot.lane.b32.xlu1 %v9532_v8, %s7308_s30 }
 0x3ce   : > { %3126 = vst.msk [vmem:[#allocation3 + $0x1b8] sm:$0xff] %vm2648_vm0, %v3055_v60 }
 0x3cf   : > { %2934 = vrot.lane.b32.xlu0 %v10147_v30, %s7308_s30  ;;  %v2268_v62 = vpop.permute.xlu1 %2267 }
 0x3d0   : > { %2342 = vst.msk [vmem:[#allocation3 + $0x1b0] sm:$0xff] %vm2325_vm2, %v2268_v62 }
 0x3d1   : > { %v2771_v47 = vpop.permute.xlu0 %2770  ;;  %2604 = vrot.lane.b32.xlu1 %v9663_v43, %s7306_s28  ;;  %v2548_v43 = vrot.slane %v9801_v58, 7 }
 0x3d2   : > { %2848 = vst.msk [vmem:[#allocation3 + $0x1d0] sm:$0x7f] %vm2829_vm15, %v2771_v47 }
 0x3d3   : > { %3074 = vrot.lane.b32.xlu0 %v9804_v54, %s7306_s28  ;;  %v2437_v49 = vpop.permute.xlu1 %2436  ;;  %v3270_v3 = vld [vmem:[#allocation3 + $0x198] sm:$0xff]  ;;  %v10175_v29 = vsel %vm11726_vm12, %v10147_v30, %v2548_v43  ;;  %vm5152_vm12 = vcmask 523265  }
 0x3d4   : > { %2512 = vst.msk [vmem:[#allocation3 + $0x1b0] sm:$0xff] %vm2494_vm8, %v2437_v49  ;;  %3604 = vmatmul.mubr.f32.gmra.mrb[34].mxu1 %v3270_v3 }
 0x3d5   : > { %v2917_v8 = vpop.permute.xlu0 %2916  ;;  %v3274_v61 = vld [vmem:[#allocation3 + $0x1b8] sm:$0xff]  ;;  %2690 = vst.msk [vmem:[#allocation3 + $0x1b0] sm:$0x1] %vm2680_vm3, %v11666_v5  ;;  %2287 = vrot.lane.b32.xlu1 %v9628_v59, %s7307_s29 }
 0x3d6   : > { %2988 = vst.msk [vmem:[#allocation3 + $0x1d0] sm:$0xff] %vm2494_vm8, %v2917_v8  ;;  %3608 = vmatprep.mubr.f32.mxu1 %v3274_v61  ;;  %v4059_v8 = vlaneseq }
 0x3d7   : > { %2790 = vrot.lane.b32.xlu0 %v9736_v33, %s7307_s29  ;;  %v2587_v54 = vpop.permute.xlu1 %2586 }
 0x3d8   : > { %2666 = vst.msk [vmem:[#allocation3 + $0x1b0] sm:$0xfe] %vm2646_vm9, %v2587_v54 }
 0x3d9   : > { %v3057_v32 = vpop.permute.xlu0 %3056  ;;  %2456 = vrot.lane.b32.xlu1 %v9654_v37, %s7308_s30  ;;  %v10188_v37 = vld [vmem:[%s11457_s5] ss:$0 sm:$0xff] }
 0x3da   : > { %3127 = vst.msk [vmem:[#allocation3 + $0x1d0] sm:$0xff] %vm2648_vm0, %v3057_v32  ;;  %v3311_v32 = vld [vmem:[#allocation3 + $0x2e0] sm:$0xff] }
 0x3db   : > { %2936 = vrot.lane.b32.xlu0 %v10175_v29, %s7308_s30  ;;  %v2270_v59 = vpop.permute.xlu1 %2269  ;;  %7026 = vmatprep.mubr.msk.f32.mxu0 %vm11727_vm10, %v3311_v32  ;;  %v5479_v32 = vld [vmem:[%s11458_s6 + $0x220] sm:$0xff]  ;;  %vm5266_vm10 = vcmask 1040896  }
 0x3dc   : > { %2343 = vst.msk [vmem:[#allocation3 + $0x1c8] sm:$0xff] %vm2325_vm2, %v2270_v59  ;;  %v3314_v59 = vld [vmem:[#allocation3 + $0x2f8] sm:$0xff] }
 0x3dd   : > { %v2773_v38 = vpop.permute.xlu0 %2772  ;;  %2538 = vst.msk [vmem:[#allocation3 + $0x1cf] sm:$0x1] %vm2528_vm4, %v11666_v5  ;;  %2606 = vrot.lane.b32.xlu1 %v9749_v19, %s7306_s28  ;;  %7027 = vmatmul.mubr.msk.f32.gmra.mrb[62].mxu0 %vm11724_vm5, %v3314_v59  ;;  %v5480_v59 = vld [vmem:[%s11458_s6 + $0x228] sm:$0xff]  ;;  %vm5191_vm5 = vcmask 1048064  }
 0x3de   : > { %2849 = vst.msk [vmem:[#allocation3 + $0x1e8] sm:$0xff] %vm2325_vm2, %v2773_v38 }
 0x3df   : > { %3012 = vst.msk [vmem:[#allocation3 + $0x1e8] sm:$0x1] %vm2528_vm4, %v11666_v5  ;;  %3076 = vrot.lane.b32.xlu0 %v9801_v58, %s7306_s28  ;;  %v3520_v55 = vpop.f32.mrb[0].mxu1  ;;  %v2439_v20 = vpop.permute.xlu1 %2438  ;;  %v3273_v23 = vld [vmem:[#allocation3 + $0x1b0] sm:$0xff] }
 0x3e0   : > { %v3521_v36 = vadd.f32 %v10188_v37, %v3520_v55  ;;  %2513 = vst.msk [vmem:[#allocation3 + $0x1c8] sm:$0x7f] %vm2496_vm13, %v2439_v20  ;;  %v3522_v19 = vpop.f32.mrb[1].mxu1  ;;  %3609 = vmatmul.mubr.f32.gmra.mrb[36].mxu1 %v3273_v23  ;;  %v4060_v23 = vshrl.u32 %v4059_v8, 7 }
 0x3e1   : > { %v2919_v56 = vpop.permute.xlu0 %2918  ;;  %v3277_v13 = vld [vmem:[#allocation3 + $0x1d0] sm:$0xff]  ;;  %2289 = vrot.lane.b32.xlu1 %v9625_v4, %s7307_s29  ;;  %5267 = vst.msk [vmem:[#allocation4 + $0x8] sm:$0x1] %vm5266_vm10, %v11666_v5 }
 0x3e2   : > { %2989 = vst.msk [vmem:[#allocation3 + $0x1e8] sm:$0xfe] %vm2968_vm1, %v2919_v56  ;;  %3613 = vmatprep.mubr.f32.mxu1 %v3277_v13  ;;  %v10200_v2 = vadd.f32 %v9856_v63, %v3521_v36 }
 0x3e3   : > { %2792 = vrot.lane.b32.xlu0 %v9826_v16, %s7307_s29  ;;  %v2589_v50 = vpop.permute.xlu1 %2588  ;;  %5199 = vst.msk [vmem:[#allocation4] sm:$0xff] %vm5191_vm5, %v11666_v5  ;;  %5353 = vst.msk [vmem:[#allocation4 + $0x130] sm:$0xff] %vm5191_vm5, %v11666_v5 }
 0x3e4   : > { %2667 = vst.msk [vmem:[#allocation3 + $0x1c8] sm:$0xff] %vm2648_vm0, %v2589_v50  ;;  %v3936_v47 = vmin.f32 %v10200_v2, 0.0 }
 0x3e5   : > { %v3059_v12 = vpop.permute.xlu0 %3058  ;;  %2458 = vrot.lane.b32.xlu1 %v9634_v21, %s7308_s30 }
 0x3e6   : > { %3128 = vst.msk [vmem:[#allocation3 + $0x1e8] sm:$0xff] %vm2648_vm0, %v3059_v12  ;;  %v3968_v38 = vmul.f32 %v3936_v47, %v8826_v1  ;;  %v5478_v47 = vld [vmem:[%s11458_s6 + $0x218] sm:$0xff] }
 0x3e7   : > { %2460 = vrot.lane.b32.xlu0 %v9756_v26, %s7308_s30  ;;  %v2272_v63 = vpop.permute.xlu1 %2271 }
 0x3e8   : > { %2344 = vst.msk [vmem:[#allocation3 + $0x1e0] sm:$0xff] %vm2325_vm2, %v2272_v63 }
 0x3e9   : > { %v2775_v40 = vpop.permute.xlu0 %2774  ;;  %2608 = vrot.lane.b32.xlu1 %v9765_v28, %s7306_s28 }
 0x3ea   : > { %2850 = vst.msk [vmem:[#allocation3 + $0x200] sm:$0x7f] %vm2829_vm15, %v2775_v40 }
 0x3eb   : > { %2794 = vrot.lane.b32.xlu0 %v9810_v7, %s7307_s29  ;;  %v2441_v21 = vpop.permute.xlu1 %2440  ;;  %v3276_v26 = vld [vmem:[#allocation3 + $0x1c8] sm:$0xff] }
 0x3ec   : > { %2514 = vst.msk [vmem:[#allocation3 + $0x1e0] sm:$0xff] %vm2494_vm8, %v2441_v21  ;;  %3614 = vmatmul.mubr.f32.gmra.mrb[38].mxu1 %v3276_v26 }
 0x3ed   : > { %v10204_v58 = vpop.f32.mrb[54].mxu0  ;;  %v2921_v35 = vpop.permute.xlu0 %2920  ;;  %v3280_v60 = vld [vmem:[#allocation3 + $0x1e8] sm:$0xff]  ;;  %2691 = vst.msk [vmem:[#allocation3 + $0x1e0] sm:$0x1] %vm2680_vm3, %v11666_v5  ;;  %2291 = vrot.lane.b32.xlu1 %v9728_v10, %s7307_s29  ;;  %v7309_v10 = vmov 1966171168  }
 0x3ee   : > { %v10206_v6 = vpop.f32.mrb[55].mxu0  ;;  %v3525_v4 = vpop.f32.mrb[2].mxu1  ;;  %2990 = vst.msk [vmem:[#allocation3 + $0x200] sm:$0xff] %vm2494_vm8, %v2921_v35  ;;  %3618 = vmatprep.mubr.f32.mxu1 %v3280_v60  ;;  %v4057_v3 = vunpack.c.l.s4 %v7309_v10  ;;  %v5475_v60 = vld [vmem:[%s11458_s6 + $0x200] sm:$0xff] }
 0x3ef   : > { %v3526_v16 = vadd.f32 %v10188_v37, %v3525_v4  ;;  %v3527_v11 = vpop.f32.mrb[3].mxu1  ;;  %2462 = vrot.lane.b32.xlu0 %v9736_v33, %s7308_s30  ;;  %v2591_v28 = vpop.permute.xlu1 %2590 }
 0x3f0   : > { %2668 = vst.msk [vmem:[#allocation3 + $0x1e0] sm:$0xfe] %vm2646_vm9, %v2591_v28  ;;  %v4058_v20 = vunpack.c.0.s8 %v4057_v3  ;;  %v5476_v28 = vld [vmem:[%s11458_s6 + $0x208] sm:$0xff] }
 0x3f1   : > { %v10220_v15 = vadd.f32 %v9851_v53, %v3526_v16  ;;  %v3061_v7 = vpop.permute.xlu0 %3060  ;;  %2610 = vrot.lane.b32.xlu1 %v10147_v30, %s7306_s28 }
 0x3f2   : > { %3129 = vst.msk [vmem:[#allocation3 + $0x200] sm:$0xff] %vm2648_vm0, %v3061_v7  ;;  %v10256_v4 = vsub.s32 %v4058_v20, %v4060_v23  ;;  %v5477_v7 = vld [vmem:[%s11458_s6 + $0x210] sm:$0xff] }
 0x3f3   : > { %v3530_v53 = vpop.f32.mrb[4].mxu1  ;;  %v2274_v62 = vpop.permute.xlu1 %2273 }
 0x3f4   : > { %v3531_v49 = vadd.f32 %v10188_v37, %v3530_v53  ;;  %2345 = vst.msk [vmem:[#allocation3 + $0x1f8] sm:$0xff] %vm2325_vm2, %v2274_v62  ;;  %v3532_v61 = vpop.f32.mrb[5].mxu1  ;;  %v3937_v53 = vmin.f32 %v10220_v15, 0.0  ;;  %v7194_v62 = vpack.c.bf16 %v5476_v28, %v5475_v60 }
 0x3f5   : > { %v2777_v33 = vpop.permute.xlu0 %2776  ;;  %2539 = vst.msk [vmem:[#allocation3 + $0x1ff] sm:$0x1] %vm2528_vm4, %v11666_v5  ;;  %2293 = vrot.lane.b32.xlu1 %v9725_v9, %s7307_s29  ;;  %v3904_v9 = vmax.f32 %v10200_v2, 0.0 }
 0x3f6   : > { %2851 = vst.msk [vmem:[#allocation3 + $0x218] sm:$0xff] %vm2325_vm2, %v2777_v33  ;;  %v3756_v30 = vadd.f32 %v9867_v27, %v3531_v49  ;;  %7195 = vmatprep.subr.bf16.mxu1 %v7194_v62 }
 0x3f7   : > { %3013 = vst.msk [vmem:[#allocation3 + $0x218] sm:$0x1] %vm2528_vm4, %v11666_v5  ;;  %v2443_v43 = vpop.permute.xlu1 %2442  ;;  %v3279_v54 = vld [vmem:[#allocation3 + $0x1e0] sm:$0xff]  ;;  %v4000_v50 = vadd.f32 %v3968_v38, %v3904_v9  ;;  %7197 = vmatpush3.bf16.msra.mxu1 %v7194_v62 }
 0x3f8   : > { %v3938_v55 = vmin.f32 %v3756_v30, 0.0  ;;  %2515 = vst.msk [vmem:[#allocation3 + $0x1f8] sm:$0x7f] %vm2496_vm13, %v2443_v43  ;;  %3619 = vmatmul.mubr.f32.gmra.mrb[40].mxu1 %v3279_v54  ;;  %v3906_v27 = vmax.f32 %v3756_v30, 0.0  ;;  %v7198_v54 = vpack.c.bf16 %v5478_v47, %v5477_v7 }
 0x3f9   : > { %v2923_v36 = vpop.permute.xlu0 %2922  ;;  %v3283_v56 = vld [vmem:[#allocation3 + $0x200] sm:$0xff]  ;;  %2612 = vrot.lane.b32.xlu1 %v10175_v29, %s7306_s28 }
 0x3fa   : > { %2991 = vst.msk [vmem:[#allocation3 + $0x218] sm:$0xfe] %vm2968_vm1, %v2923_v36  ;;  %3623 = vmatprep.mubr.f32.mxu1 %v3283_v56  ;;  %v3970_v19 = vmul.f32 %v3938_v55, %v8826_v1  ;;  %v3969_v56 = vmul.f32 %v3937_v53, %v8826_v1  ;;  %7199 = vmatprep.subr.bf16.mxu1 %v7198_v54 }
 0x3fb   : > { %v2593_v13 = vpop.permute.xlu1 %2592  ;;  %7201 = vmatpush3.bf16.msra.mxu1 %v7198_v54 }
 0x3fc   : > { %v4002_v12 = vadd.f32 %v3970_v19, %v3906_v27  ;;  %2669 = vst.msk [vmem:[#allocation3 + $0x1f8] sm:$0xff] %vm2648_vm0, %v2593_v13 }
 0x3fd   : > { %v3063_v63 = vpop.permute.xlu0 %3062 }
 0x3fe   : > { %3130 = vst.msk [vmem:[#allocation3 + $0x218] sm:$0xff] %vm2648_vm0, %v3063_v63  ;;  %v4032_v16 = vmax.f32 %v4000_v50, %v4002_v12  ;;  %v7202_v50 = vpack.c.bf16 %v5480_v59, %v5479_v32  ;;  %v3905_v12 = vmax.f32 %v10220_v15, 0.0 }
 0x3ff   : > { %v2276_v40 = vpop.permute.xlu1 %2275 }
 0x400   : > { %v4062_v2 = vrot.slane %v4032_v16, %v10256_v4  ;;  %v4313_v11 = vcombine.high %v4032_v16, %v4032_v16  ;;  %2346 = vst.msk [vmem:[#allocation3 + $0x210] sm:$0xff] %vm2325_vm2, %v2276_v40  ;;  %7203 = vmatprep.subr.bf16.mxu1 %v7202_v50 }
 0x401   : > { %v2779_v26 = vpop.permute.xlu0 %2778  ;;  %7205 = vmatpush3.bf16.msra.mxu1 %v7202_v50 }
 0x402   : > { %v3535_v29 = vpop.f32.mrb[6].mxu1  ;;  %2852 = vst.msk [vmem:[#allocation3 + $0x230] sm:$0x7f] %vm2829_vm15, %v2779_v26  ;;  %v4063_v49 = vcombine.high %v4062_v2, %v4062_v2  ;;  %v4070_v10 = vrot.slane %v4062_v2, %v10256_v4  ;;  %v4320_v3 = vrot.slane %v4313_v11, %v10256_v4  ;;  %v4001_v11 = vadd.f32 %v3969_v56, %v3905_v12  ;;  %v5481_v12 = vld [vmem:[%s11458_s6 + $0x230] sm:$0xff] }
 0x403   : > { %v3536_v21 = vadd.f32 %v10188_v37, %v3535_v29  ;;  %v3537_v35 = vpop.f32.mrb[7].mxu1  ;;  %v2445_v30 = vpop.permute.xlu1 %2444  ;;  %v3282_v43 = vld [vmem:[#allocation3 + $0x1f8] sm:$0xff] }
 0x404   : > { %v4077_v38 = vrot.slane %v4063_v49, %v10256_v4  ;;  %4249 = vst.msk [vmem:[#allocation6] sm:$0x1] %vm4248_vm6, %v4070_v10  ;;  %v4321_v55 = vcombine.high %v4320_v3, %v4320_v3  ;;  %v4328_v20 = vrot.slane %v4320_v3, %v10256_v4  ;;  %3624 = vmatmul.mubr.f32.gmra.mrb[42].mxu1 %v3282_v43 }
 0x405   : > { %v3761_v8 = vadd.f32 %v9863_v0, %v3536_v21  ;;  %v10280_v33 = vpop.f32.mrb[56].mxu0  ;;  %v4265_v0 = vcombine.high %v4070_v10, %v4070_v10  ;;  %2516 = vst.msk [vmem:[#allocation3 + $0x210] sm:$0xff] %vm2494_vm8, %v2445_v30  ;;  %v2925_v23 = vpop.permute.xlu0 %2924  ;;  %v3286_v36 = vld [vmem:[#allocation3 + $0x218] sm:$0xff] }
 0x406   : > { %v10282_v61 = vpop.f32.mrb[57].mxu0  ;;  %2692 = vst.msk [vmem:[#allocation3 + $0x210] sm:$0x1] %vm2680_vm3, %v11666_v5  ;;  %3628 = vmatprep.mubr.f32.mxu1 %v3286_v36  ;;  %v4266_v27 = vcombine.high %v4077_v38, %v4077_v38  ;;  %v4335_v19 = vrot.slane %v4321_v55, %v10256_v4  ;;  %v4529_v13 = vcombine.high %v4328_v20, %v4328_v20 }
 0x407   : > { %v3939_v9 = vmin.f32 %v3761_v8, 0.0  ;;  %2992 = vst.msk [vmem:[#allocation3 + $0x230] sm:$0xff] %vm2494_vm8, %v2925_v23  ;;  %v3907_v63 = vmax.f32 %v3761_v8, 0.0  ;;  %v2595_v29 = vpop.permute.xlu1 %2594 }
 0x408   : > { %4250 = vst.msk [vmem:[#allocation6 + $0x8] sm:$0x1] %vm4248_vm6, %v4077_v38  ;;  %4297 = vst.msk [vmem:[#allocation6 + $0x1] sm:$0x1] %vm4248_vm6, %v4265_v0  ;;  %v4530_v40 = vcombine.high %v4335_v19, %v4335_v19 }
 0x409   : > { %4513 = vst.msk [vmem:[#allocation6 + $0x2] sm:$0x1] %vm4248_vm6, %v4328_v20  ;;  %v3971_v16 = vmul.f32 %v3939_v9, %v8826_v1  ;;  %4298 = vst.msk [vmem:[#allocation6 + $0x9] sm:$0x1] %vm4248_vm6, %v4266_v27  ;;  %v3065_v2 = vpop.permute.xlu0 %3064 }
 0x40a   : > { %4514 = vst.msk [vmem:[#allocation6 + $0xa] sm:$0x1] %vm4248_vm6, %v4335_v19  ;;  %4561 = vst.msk [vmem:[#allocation6 + $0x3] sm:$0x1] %vm4248_vm6, %v4529_v13 }
 0x40b   : > { %2670 = vst.msk [vmem:[#allocation3 + $0x210] sm:$0xfe] %vm2646_vm9, %v2595_v29  ;;  %v4003_v21 = vadd.f32 %v3971_v16, %v3907_v63  ;;  %v3540_v26 = vpop.f32.mrb[8].mxu1  ;;  %v2278_v35 = vpop.permute.xlu1 %2277  ;;  %v5482_v63 = vld [vmem:[%s11458_s6 + $0x238] sm:$0xff] }
 0x40c   : > { %3131 = vst.msk [vmem:[#allocation3 + $0x230] sm:$0xff] %vm2648_vm0, %v3065_v2  ;;  %v3541_v60 = vadd.f32 %v10188_v37, %v3540_v26  ;;  %v3542_v7 = vpop.f32.mrb[9].mxu1  ;;  %v7206_v16 = vpack.c.bf16 %v5482_v63, %v5481_v12 }
 0x40d   : > { %4562 = vst.msk [vmem:[#allocation6 + $0xb] sm:$0x1] %vm4248_vm6, %v4530_v40  ;;  %v4033_v15 = vmax.f32 %v4001_v11, %v4003_v21  ;;  %v2781_v28 = vpop.permute.xlu0 %2780 }
 0x40e   : > { %2347 = vst.msk [vmem:[#allocation3 + $0x228] sm:$0xff] %vm2325_vm2, %v2278_v35  ;;  %2853 = vst.msk [vmem:[#allocation3 + $0x248] sm:$0xff] %vm2325_vm2, %v2781_v28  ;;  %v10317_v47 = vadd.f32 %v9877_v25, %v3541_v60  ;;  %7207 = vmatprep.subr.bf16.mxu1 %v7206_v16 }
 0x40f   : > { %v4591_v53 = vrot.slane %v4033_v15, %v10256_v4  ;;  %v4841_v62 = vcombine.high %v4033_v15, %v4033_v15  ;;  %2540 = vst.msk [vmem:[#allocation3 + $0x22f] sm:$0x1] %vm2528_vm4, %v11666_v5  ;;  %3014 = vst.msk [vmem:[#allocation3 + $0x248] sm:$0x1] %vm2528_vm4, %v11666_v5  ;;  %v2447_v8 = vpop.permute.xlu1 %2446  ;;  %7209 = vmatpush3.bf16.msra.mxu1 %v7206_v16 }
 0x410   : > { %2517 = vst.msk [vmem:[#allocation3 + $0x228] sm:$0x7f] %vm2496_vm13, %v2447_v8 }
 0x411   : > { %v4592_v49 = vcombine.high %v4591_v53, %v4591_v53  ;;  %v4599_v10 = vrot.slane %v4591_v53, %v10256_v4  ;;  %v4848_v3 = vrot.slane %v4841_v62, %v10256_v4  ;;  %v2927_v43 = vpop.permute.xlu0 %2926 }
 0x412   : > { %v3285_v30 = vld [vmem:[#allocation3 + $0x210] sm:$0xff]  ;;  %2993 = vst.msk [vmem:[#allocation3 + $0x248] sm:$0xfe] %vm2968_vm1, %v2927_v43 }
 0x413   : > { %3629 = vmatmul.mubr.f32.gmra.mrb[44].mxu1 %v3285_v30  ;;  %v3289_v54 = vld [vmem:[#allocation3 + $0x230] sm:$0xff]  ;;  %v4606_v32 = vrot.slane %v4592_v49, %v10256_v4  ;;  %4777 = vst.msk [vmem:[#allocation6 + $0x4] sm:$0x1] %vm4248_vm6, %v4599_v10  ;;  %v4793_v25 = vcombine.high %v4599_v10, %v4599_v10  ;;  %v4849_v59 = vcombine.high %v4848_v3, %v4848_v3  ;;  %v2597_v23 = vpop.permute.xlu1 %2596  ;;  %v3940_v49 = vmin.f32 %v10317_v47, 0.0 }
 0x414   : > { %v4856_v38 = vrot.slane %v4848_v3, %v10256_v4  ;;  %3633 = vmatprep.mubr.f32.mxu1 %v3289_v54  ;;  %2671 = vst.msk [vmem:[#allocation3 + $0x228] sm:$0xff] %vm2648_vm0, %v2597_v23 }
 0x415   : > { %4778 = vst.msk [vmem:[#allocation6 + $0xc] sm:$0x1] %vm4248_vm6, %v4606_v32  ;;  %v4794_v0 = vcombine.high %v4606_v32, %v4606_v32  ;;  %4825 = vst.msk [vmem:[#allocation6 + $0x5] sm:$0x1] %vm4248_vm6, %v4793_v25  ;;  %v4863_v55 = vrot.slane %v4849_v59, %v10256_v4  ;;  %v3067_v36 = vpop.permute.xlu0 %3066  ;;  %v3972_v59 = vmul.f32 %v3940_v49, %v8826_v1 }
 0x416   : > { %5041 = vst.msk [vmem:[#allocation6 + $0x6] sm:$0x1] %vm4248_vm6, %v4856_v38  ;;  %v5057_v20 = vcombine.high %v4856_v38, %v4856_v38 }
 0x417   : > { %4826 = vst.msk [vmem:[#allocation6 + $0xd] sm:$0x1] %vm4248_vm6, %v4794_v0  ;;  %5042 = vst.msk [vmem:[#allocation6 + $0xe] sm:$0x1] %vm4248_vm6, %v4863_v55  ;;  %v5058_v56 = vcombine.high %v4863_v55, %v4863_v55  ;;  %v2280_v9 = vpop.permute.xlu1 %2279  ;;  %v3545_v27 = vpop.f32.mrb[10].mxu1  ;;  %v3908_v55 = vmax.f32 %v10317_v47, 0.0 }
 0x418   : > { %5089 = vst.msk [vmem:[#allocation6 + $0x7] sm:$0x1] %vm4248_vm6, %v5057_v20  ;;  %v3546_v19 = vadd.f32 %v10188_v37, %v3545_v27  ;;  %v3547_v50 = vpop.f32.mrb[11].mxu1 }
 0x419   : > { %3132 = vst.msk [vmem:[#allocation3 + $0x248] sm:$0xff] %vm2648_vm0, %v3067_v36  ;;  %v2783_v13 = vpop.permute.xlu0 %2782 }
 0x41a   : > { %5090 = vst.msk [vmem:[#allocation6 + $0xf] sm:$0x1] %vm4248_vm6, %v5058_v56  ;;  %v10348_v29 = vadd.f32 %v9873_v31, %v3546_v19  ;;  %v4004_v56 = vadd.f32 %v3972_v59, %v3908_v55 }
 0x41b   : > { %2348 = vst.msk [vmem:[#allocation3 + $0x240] sm:$0xff] %vm2325_vm2, %v2280_v9  ;;  %v2449_v40 = vpop.permute.xlu1 %2448  ;;  %v3288_v2 = vld [vmem:[#allocation3 + $0x228] sm:$0xff] }
 0x41c   : > { %2854 = vst.msk [vmem:[#allocation3 + $0x260] sm:$0x7f] %vm2829_vm15, %v2783_v13  ;;  %3634 = vmatmul.mubr.f32.gmra.mrb[46].mxu1 %v3288_v2  ;;  %v5427_v2 = vld [vmem:[%s11458_s6 + $0x80] sm:$0xff] }
 0x41d   : > { %2518 = vst.msk [vmem:[#allocation3 + $0x240] sm:$0xff] %vm2494_vm8, %v2449_v40  ;;  %v2929_v11 = vpop.permute.xlu0 %2928 }
 0x41e   : > { %2693 = vst.msk [vmem:[#allocation3 + $0x240] sm:$0x1] %vm2680_vm3, %v11666_v5 }
 0x41f   : > { %2994 = vst.msk [vmem:[#allocation3 + $0x260] sm:$0xff] %vm2494_vm8, %v2929_v11  ;;  %v5105_v15 = vld [vmem:[#allocation6] sm:$0xff]  ;;  %v2599_v35 = vpop.permute.xlu1 %2598  ;;  %v5428_v11 = vld [vmem:[%s11458_s6 + $0x88] sm:$0xff] }
 0x420   : > { %v3292_v21 = vld [vmem:[#allocation3 + $0x248] sm:$0xff]  ;;  %2672 = vst.msk [vmem:[#allocation3 + $0x240] sm:$0xfe] %vm2646_vm9, %v2599_v35 }
 0x421   : > { %3638 = vmatprep.mubr.f32.mxu1 %v3292_v21  ;;  %v5114_v26 = vld [vmem:[#allocation6 + $0x8] sm:$0xff]  ;;  %v3069_v60 = vpop.permute.xlu0 %3068  ;;  %v5411_v21 = vld [vmem:[%s11458_s6] sm:$0xff]  ;;  %v5412_v35 = vld [vmem:[%s11458_s6 + $0x8] sm:$0xff] }
 0x422   : > { %v10354_v31 = vmax.f32 %v5105_v15, %v5114_v26  ;;  %3133 = vst.msk [vmem:[#allocation3 + $0x260] sm:$0xff] %vm2648_vm0, %v3069_v60  ;;  %v3941_v15 = vmin.f32 %v10348_v29, 0.0  ;;  %v7130_v26 = vpack.c.bf16 %v5428_v11, %v5427_v2  ;;  %v5429_v60 = vld [vmem:[%s11458_s6 + $0x90] sm:$0xff] }
 0x423   : > { %v2282_v53 = vpop.permute.xlu1 %2281 }
 0x424   : > { %v5137_v28 = vrot.slane %v10354_v31, 7  ;;  %5275 = vst.msk [vmem:[#allocation4 + $0x10] sm:$0xff] %vm5160_vm11, %v10354_v31  ;;  %v5200_v7 = vrot.slane %v10354_v31, 1  ;;  %7131 = vmatprep.subr.bf16.mxu0 %v7130_v26 }
 0x425   : > { %2349 = vst.msk [vmem:[#allocation3 + $0x258] sm:$0xff] %vm2325_vm2, %v2282_v53  ;;  %v2785_v3 = vpop.permute.xlu0 %2784 }
 0x426   : > { %5233 = vrot.lane.b32.xlu0 %v5137_v28, %s7308_s30  ;;  %v3550_v62 = vpop.f32.mrb[12].mxu1  ;;  %5153 = vst.msk [vmem:[#allocation4 + $0x28] sm:$0xfe] %vm5152_vm12, %v5137_v28  ;;  %v5430_v28 = vld [vmem:[%s11458_s6 + $0x98] sm:$0xff] }
 0x427   : > { %5215 = vst.msk [vmem:[#allocation4 + $0x30] sm:$0x7f] %vm5214_vm7, %v5200_v7  ;;  %v3551_v10 = vadd.f32 %v10188_v37, %v3550_v62  ;;  %v3552_v8 = vpop.f32.mrb[13].mxu1  ;;  %v2451_v32 = vpop.permute.xlu1 %2450  ;;  %v3291_v25 = vld [vmem:[#allocation3 + $0x240] sm:$0xff]  ;;  %v7134_v59 = vpack.c.bf16 %v5430_v28, %v5429_v60 }
 0x428   : > { %2541 = vst.msk [vmem:[#allocation3 + $0x25f] sm:$0x1] %vm2528_vm4, %v11666_v5  ;;  %3639 = vmatmul.mubr.f32.gmra.mrb[48].mxu1 %v3291_v25  ;;  %v5414_v8 = vld [vmem:[%s11458_s6 + $0x18] sm:$0xff]  ;;  %v7132_v25 = vpack.c.bf16 %v5412_v35, %v5411_v21 }
 0x429   : > { %2855 = vst.msk [vmem:[#allocation3 + $0x278] sm:$0xff] %vm2325_vm2, %v2785_v3  ;;  %v3776_v30 = vadd.f32 %v9887_v17, %v3551_v10  ;;  %v2931_v17 = vpop.permute.xlu0 %2930  ;;  %v3295_v0 = vld [vmem:[#allocation3 + $0x260] sm:$0xff]  ;;  %v5413_v3 = vld [vmem:[%s11458_s6 + $0x10] sm:$0xff] }
 0x42a   : > { %3015 = vst.msk [vmem:[#allocation3 + $0x278] sm:$0x1] %vm2528_vm4, %v11666_v5  ;;  %v10376_v43 = vpop.f32.mrb[58].mxu0  ;;  %5170 = vrot.lane.b32.xlu0 %v10354_v31, %s7308_s30  ;;  %3643 = vmatprep.mubr.f32.mxu1 %v3295_v0 }
 0x42b   : > { %v10380_v54 = vpop.f32.mrb[59].mxu0  ;;  %v3942_v38 = vmin.f32 %v3776_v30, 0.0  ;;  %2519 = vst.msk [vmem:[#allocation3 + $0x258] sm:$0x7f] %vm2496_vm13, %v2451_v32  ;;  %v3910_v20 = vmax.f32 %v3776_v30, 0.0  ;;  %v2601_v36 = vpop.permute.xlu1 %2600  ;;  %7133 = vmatpush3.bf16.msra.mxu0 %v7132_v25 }
 0x42c   : > { %5317 = vst.msk [vmem:[#allocation4 + $0x17] sm:$0x1] %vm5266_vm10, %v11666_v5  ;;  %5268 = vst.msk [vmem:[#allocation4 + $0x30] sm:$0x1] %vm5266_vm10, %v11666_v5  ;;  %7135 = vmatprep.subr.bf16.mxu0 %v7134_v59 }
 0x42d   : > { %2995 = vst.msk [vmem:[#allocation3 + $0x278] sm:$0xfe] %vm2968_vm1, %v2931_v17  ;;  %v3974_v23 = vmul.f32 %v3942_v38, %v8826_v1  ;;  %v3071_v27 = vpop.permute.xlu0 %3070  ;;  %v5431_v38 = vld [vmem:[%s11458_s6 + $0xa0] sm:$0xff] }
 0x42e   : > { %2673 = vst.msk [vmem:[#allocation3 + $0x258] sm:$0xff] %vm2648_vm0, %v2601_v36  ;;  %3134 = vst.msk [vmem:[#allocation3 + $0x278] sm:$0xff] %vm2648_vm0, %v3071_v27  ;;  %v7136_v27 = vpack.c.bf16 %v5414_v8, %v5413_v3 }
 0x42f   : > { %v4006_v9 = vadd.f32 %v3974_v23, %v3910_v20  ;;  %v2284_v13 = vpop.permute.xlu1 %2283  ;;  %v3555_v50 = vpop.f32.mrb[14].mxu1 }
 0x430   : > { %2350 = vst.msk [vmem:[#allocation3 + $0x270] sm:$0xff] %vm2325_vm2, %v2284_v13  ;;  %v3556_v47 = vadd.f32 %v10188_v37, %v3555_v50  ;;  %v3557_v40 = vpop.f32.mrb[15].mxu1  ;;  %7137 = vmatpush3.bf16.msra.mxu0 %v7136_v27 }
 0x431   : > { %v4034_v19 = vmax.f32 %v4004_v56, %v4006_v9  ;;  %v2787_v16 = vpop.permute.xlu0 %2786  ;;  %v3973_v56 = vmul.f32 %v3941_v15, %v8826_v1 }
 0x432   : > { %2856 = vst.msk [vmem:[#allocation3 + $0x290] sm:$0x7f] %vm2829_vm15, %v2787_v16  ;;  %v3781_v10 = vadd.f32 %v9883_v51, %v3556_v47  ;;  %v5432_v51 = vld [vmem:[%s11458_s6 + $0xa8] sm:$0xff] }
 0x433   : > { %v4084_v12 = vrot.slane %v4034_v19, %v10256_v4  ;;  %v4336_v63 = vcombine.high %v4034_v19, %v4034_v19  ;;  %v2453_v30 = vpop.permute.xlu1 %2452 }
 0x434   : > { %2520 = vst.msk [vmem:[#allocation3 + $0x270] sm:$0xff] %vm2494_vm8, %v2453_v30  ;;  %v3943_v9 = vmin.f32 %v3781_v10, 0.0  ;;  %v3911_v47 = vmax.f32 %v3781_v10, 0.0 }
 0x435   : > { %v4085_v53 = vcombine.high %v4084_v12, %v4084_v12  ;;  %v4092_v62 = vrot.slane %v4084_v12, %v10256_v4  ;;  %v4343_v49 = vrot.slane %v4336_v63, %v10256_v4  ;;  %v3294_v32 = vld [vmem:[#allocation3 + $0x258] sm:$0xff]  ;;  %v2933_v23 = vpop.permute.xlu0 %2932  ;;  %2694 = vst.msk [vmem:[#allocation3 + $0x270] sm:$0x1] %vm2680_vm3, %v11666_v5  ;;  %v7138_v12 = vpack.c.bf16 %v5432_v51, %v5431_v38 }
 0x436   : > { %3644 = vmatmul.mubr.f32.gmra.mrb[50].mxu1 %v3294_v32  ;;  %v3298_v36 = vld [vmem:[#allocation3 + $0x278] sm:$0xff]  ;;  %2996 = vst.msk [vmem:[#allocation3 + $0x290] sm:$0xff] %vm2494_vm8, %v2933_v23  ;;  %v3909_v63 = vmax.f32 %v10348_v29, 0.0  ;;  %v3975_v16 = vmul.f32 %v3943_v9, %v8826_v1 }
 0x437   : > { %v4099_v17 = vrot.slane %v4085_v53, %v10256_v4  ;;  %4251 = vst.msk [vmem:[#allocation6 + $0x10] sm:$0x1] %vm4248_vm6, %v4092_v62  ;;  %v4267_v0 = vcombine.high %v4092_v62, %v4092_v62  ;;  %v4344_v55 = vcombine.high %v4343_v49, %v4343_v49  ;;  %v4351_v20 = vrot.slane %v4343_v49, %v10256_v4  ;;  %v2603_v40 = vpop.permute.xlu1 %2602 }
 0x438   : > { %3648 = vmatprep.mubr.f32.mxu1 %v3298_v36  ;;  %2674 = vst.msk [vmem:[#allocation3 + $0x270] sm:$0xfe] %vm2646_vm9, %v2603_v40  ;;  %v4005_v21 = vadd.f32 %v3973_v56, %v3909_v63  ;;  %v4007_v15 = vadd.f32 %v3975_v16, %v3911_v47  ;;  %7139 = vmatprep.subr.bf16.mxu0 %v7138_v12 }
 0x439   : > { %4252 = vst.msk [vmem:[#allocation6 + $0x18] sm:$0x1] %vm4248_vm6, %v4099_v17  ;;  %v4268_v19 = vcombine.high %v4099_v17, %v4099_v17  ;;  %4299 = vst.msk [vmem:[#allocation6 + $0x11] sm:$0x1] %vm4248_vm6, %v4267_v0  ;;  %v4358_v13 = vrot.slane %v4344_v55, %v10256_v4  ;;  %v4531_v50 = vcombine.high %v4351_v20, %v4351_v20  ;;  %v3073_v11 = vpop.permute.xlu0 %3072 }
 0x43a   : > { %4515 = vst.msk [vmem:[#allocation6 + $0x12] sm:$0x1] %vm4248_vm6, %v4351_v20  ;;  %v4035_v26 = vmax.f32 %v4005_v21, %v4007_v15  ;;  %v5434_v21 = vld [vmem:[%s11458_s6 + $0xb8] sm:$0xff] }
 0x43b   : > { %4300 = vst.msk [vmem:[#allocation6 + $0x19] sm:$0x1] %vm4248_vm6, %v4268_v19  ;;  %4516 = vst.msk [vmem:[#allocation6 + $0x1a] sm:$0x1] %vm4248_vm6, %v4358_v13  ;;  %v4532_v2 = vcombine.high %v4358_v13, %v4358_v13  ;;  %v2286_v60 = vpop.permute.xlu1 %2285  ;;  %v5415_v13 = vld [vmem:[%s11458_s6 + $0x20] sm:$0xff] }
 0x43c   : > { %4563 = vst.msk [vmem:[#allocation6 + $0x13] sm:$0x1] %vm4248_vm6, %v4531_v50  ;;  %v4613_v62 = vrot.slane %v4035_v26, %v10256_v4  ;;  %v4864_v49 = vcombine.high %v4035_v26, %v4035_v26  ;;  %v5416_v50 = vld [vmem:[%s11458_s6 + $0x28] sm:$0xff]  ;;  %v5417_v26 = vld [vmem:[%s11458_s6 + $0x30] sm:$0xff] }
 0x43d   : > { %3135 = vst.msk [vmem:[#allocation3 + $0x290] sm:$0xff] %vm2648_vm0, %v3073_v11  ;;  %v2789_v53 = vpop.permute.xlu0 %2788  ;;  %v7140_v12 = vpack.c.bf16 %v5416_v50, %v5415_v13  ;;  %v5433_v11 = vld [vmem:[%s11458_s6 + $0xb0] sm:$0xff] }
 0x43e   : > { %4564 = vst.msk [vmem:[#allocation6 + $0x1b] sm:$0x1] %vm4248_vm6, %v4532_v2  ;;  %v4614_v8 = vcombine.high %v4613_v62, %v4613_v62  ;;  %v4621_v30 = vrot.slane %v4613_v62, %v10256_v4  ;;  %v4871_v32 = vrot.slane %v4864_v49, %v10256_v4  ;;  %v7142_v15 = vpack.c.bf16 %v5434_v21, %v5433_v11  ;;  %v5435_v62 = vld [vmem:[%s11458_s6 + $0xc0] sm:$0xff]  ;;  %v5436_v49 = vld [vmem:[%s11458_s6 + $0xc8] sm:$0xff] }
 0x43f   : > { %v10457_v29 = vpop.f32.mrb[60].mxu0  ;;  %2351 = vst.msk [vmem:[#allocation3 + $0x288] sm:$0xff] %vm2325_vm2, %v2286_v60  ;;  %v3560_v28 = vpop.f32.mrb[16].mxu1  ;;  %2857 = vst.msk [vmem:[#allocation3 + $0x2a8] sm:$0xff] %vm2325_vm2, %v2789_v53  ;;  %v3297_v38 = vld [vmem:[#allocation3 + $0x270] sm:$0xff]  ;;  %7141 = vmatpush3.bf16.msra.mxu0 %v7140_v12  ;;  %v5418_v60 = vld [vmem:[%s11458_s6 + $0x38] sm:$0xff] }
 0x440   : > { %v10459_v35 = vpop.f32.mrb[61].mxu0  ;;  %2542 = vst.msk [vmem:[#allocation3 + $0x28f] sm:$0x1] %vm2528_vm4, %v11666_v5  ;;  %v3561_v10 = vadd.f32 %v10188_v37, %v3560_v28  ;;  %v3562_v3 = vpop.f32.mrb[17].mxu1  ;;  %3016 = vst.msk [vmem:[#allocation3 + $0x2a8] sm:$0x1] %vm2528_vm4, %v11666_v5  ;;  %3649 = vmatmul.mubr.f32.gmra.mrb[52].mxu1 %v3297_v38  ;;  %v4628_v0 = vrot.slane %v4614_v8, %v10256_v4  ;;  %v4795_v55 = vcombine.high %v4621_v30, %v4621_v30 }
 0x441   : > { %v2455_v59 = vpop.permute.xlu1 %2454  ;;  %v2935_v51 = vpop.permute.xlu0 %2934  ;;  %4779 = vst.msk [vmem:[#allocation6 + $0x14] sm:$0x1] %vm4248_vm6, %v4621_v30  ;;  %v4872_v20 = vcombine.high %v4871_v32, %v4871_v32  ;;  %v4879_v23 = vrot.slane %v4871_v32, %v10256_v4  ;;  %v7144_v53 = vpack.c.bf16 %v5418_v60, %v5417_v26  ;;  %7143 = vmatprep.subr.bf16.mxu0 %v7142_v15  ;;  %v5437_v32 = vld [vmem:[%s11458_s6 + $0xd0] sm:$0xff]  ;;  %v5440_v11 = vld [vmem:[%s11458_s6 + $0xe8] sm:$0xff]  ;;  %v5423_v21 = vld [vmem:[%s11458_s6 + $0x60] sm:$0xff] }
 0x442   : > { %v10472_v25 = vadd.f32 %v9899_v22, %v3561_v10  ;;  %2521 = vst.msk [vmem:[#allocation3 + $0x288] sm:$0x7f] %vm2496_vm13, %v2455_v59  ;;  %v4796_v22 = vcombine.high %v4628_v0, %v4628_v0  ;;  %v5419_v10 = vld [vmem:[%s11458_s6 + $0x40] sm:$0xff]  ;;  %v7146_v30 = vpack.c.bf16 %v5436_v49, %v5435_v62  ;;  %v5424_v15 = vld [vmem:[%s11458_s6 + $0x68] sm:$0xff]  ;;  %v5441_v49 = vld [vmem:[%s11458_s6 + $0xf0] sm:$0xff] }
 0x443   : > { %2997 = vst.msk [vmem:[#allocation3 + $0x2a8] sm:$0xfe] %vm2968_vm1, %v2935_v51  ;;  %v4886_v36 = vrot.slane %v4872_v20, %v10256_v4  ;;  %v5059_v56 = vcombine.high %v4879_v23, %v4879_v23  ;;  %7145 = vmatpush3.bf16.msra.mxu0 %v7144_v53  ;;  %v7156_v60 = vpack.c.bf16 %v5424_v15, %v5423_v21  ;;  %vm11728_vm1 = vcmask 253952  }
 0x444   : > { %v3301_v17 = vld [vmem:[#allocation3 + $0x290] sm:$0xff]  ;;  %4780 = vst.msk [vmem:[#allocation6 + $0x1c] sm:$0x1] %vm4248_vm6, %v4628_v0  ;;  %4827 = vst.msk [vmem:[#allocation6 + $0x15] sm:$0x1] %vm4248_vm6, %v4795_v55  ;;  %7147 = vmatprep.subr.bf16.mxu0 %v7146_v30 }
 0x445   : > { %3653 = vmatprep.mubr.f32.mxu1 %v3301_v17  ;;  %5043 = vst.msk [vmem:[#allocation6 + $0x16] sm:$0x1] %vm4248_vm6, %v4879_v23  ;;  %v2605_v9 = vpop.permute.xlu1 %2604  ;;  %v3075_v27 = vpop.permute.xlu0 %3074  ;;  %4828 = vst.msk [vmem:[#allocation6 + $0x1d] sm:$0x1] %vm4248_vm6, %v4796_v22  ;;  %v5060_v19 = vcombine.high %v4886_v36, %v4886_v36  ;;  %v5438_v17 = vld [vmem:[%s11458_s6 + $0xd8] sm:$0xff] }
 0x446   : > { %2675 = vst.msk [vmem:[#allocation3 + $0x288] sm:$0xff] %vm2648_vm0, %v2605_v9  ;;  %3136 = vst.msk [vmem:[#allocation3 + $0x2a8] sm:$0xff] %vm2648_vm0, %v3075_v27  ;;  %v7150_v0 = vpack.c.bf16 %v5438_v17, %v5437_v32  ;;  %v5421_v27 = vld [vmem:[%s11458_s6 + $0x50] sm:$0xff] }
 0x447   : > { %5044 = vst.msk [vmem:[#allocation6 + $0x1e] sm:$0x1] %vm4248_vm6, %v4886_v36  ;;  %5091 = vst.msk [vmem:[#allocation6 + $0x17] sm:$0x1] %vm4248_vm6, %v5059_v56  ;;  %v3565_v47 = vpop.f32.mrb[18].mxu1  ;;  %v5425_v32 = vld [vmem:[%s11458_s6 + $0x70] sm:$0xff] }
 0x448   : > { %5092 = vst.msk [vmem:[#allocation6 + $0x1f] sm:$0x1] %vm4248_vm6, %v5060_v19  ;;  %v3566_v16 = vadd.f32 %v10188_v37, %v3565_v47  ;;  %v3567_v2 = vpop.f32.mrb[19].mxu1  ;;  %v5422_v19 = vld [vmem:[%s11458_s6 + $0x58] sm:$0xff] }
 0x449   : > { %v2288_v63 = vpop.permute.xlu1 %2287  ;;  %v2791_v40 = vpop.permute.xlu0 %2790  ;;  %v7152_v13 = vpack.c.bf16 %v5422_v19, %v5421_v27  ;;  %v5439_v2 = vld [vmem:[%s11458_s6 + $0xe0] sm:$0xff] }
 0x44a   : > { %2352 = vst.msk [vmem:[#allocation3 + $0x2a0] sm:$0xff] %vm2325_vm2, %v2288_v63  ;;  %v10511_v28 = vadd.f32 %v9895_v14, %v3566_v16  ;;  %v5420_v14 = vld [vmem:[%s11458_s6 + $0x48] sm:$0xff]  ;;  %v3944_v63 = vmin.f32 %v10472_v25, 0.0 }
 0x44b   : > { %2858 = vst.msk [vmem:[#allocation3 + $0x2c0] sm:$0x7f] %vm2829_vm15, %v2791_v40  ;;  %v7148_v51 = vpack.c.bf16 %v5420_v14, %v5419_v10  ;;  %v5442_v10 = vld [vmem:[%s11458_s6 + $0xf8] sm:$0xff] }
 0x44c   : > { %v7158_v14 = vpack.c.bf16 %v5442_v10, %v5441_v49 }
 0x44d   : > { %v2457_v3 = vpop.permute.xlu1 %2456  ;;  %v3300_v8 = vld [vmem:[#allocation3 + $0x288] sm:$0xff]  ;;  %v2937_v59 = vpop.permute.xlu0 %2936  ;;  %7149 = vmatpush3.bf16.msra.mxu0 %v7148_v51  ;;  %v3912_v51 = vmax.f32 %v10472_v25, 0.0 }
 0x44e   : > { %2522 = vst.msk [vmem:[#allocation3 + $0x2a0] sm:$0xff] %vm2494_vm8, %v2457_v3  ;;  %3654 = vmatmul.mubr.f32.gmra.mrb[54].mxu1 %v3300_v8  ;;  %v3304_v38 = vld [vmem:[#allocation3 + $0x2a8] sm:$0xff]  ;;  %2998 = vst.msk [vmem:[#allocation3 + $0x2c0] sm:$0xff] %vm2494_vm8, %v2937_v59  ;;  %v5106_v55 = vld [vmem:[#allocation6 + $0x10] sm:$0xff]  ;;  %7151 = vmatprep.subr.bf16.mxu0 %v7150_v0 }
 0x44f   : > { %2695 = vst.msk [vmem:[#allocation3 + $0x2a0] sm:$0x1] %vm2680_vm3, %v11666_v5  ;;  %3658 = vmatprep.mubr.f32.mxu1 %v3304_v38  ;;  %v5115_v20 = vld [vmem:[#allocation6 + $0x18] sm:$0xff]  ;;  %v5426_v59 = vld [vmem:[%s11458_s6 + $0x78] sm:$0xff] }
 0x450   : > { %v5123_v22 = vmax.f32 %v5106_v55, %v5115_v20  ;;  %v7160_v38 = vpack.c.bf16 %v5426_v59, %v5425_v32 }
 0x451   : > { %v2607_v23 = vpop.permute.xlu1 %2606  ;;  %v3077_v36 = vpop.permute.xlu0 %3076  ;;  %7153 = vmatpush3.bf16.msra.mxu0 %v7152_v13  ;;  %v10610_v13 = vld [vmem:[%s11457_s5] ss:$0 sm:$0xff] }
 0x452   : > { %2676 = vst.msk [vmem:[#allocation3 + $0x2a0] sm:$0xfe] %vm2646_vm9, %v2607_v23  ;;  %5172 = vrot.lane.b32.xlu0 %v5123_v22, %s7308_s30  ;;  %v10538_v56 = vrot.slane %v5123_v22, 1  ;;  %v5138_v9 = vrot.slane %v5123_v22, 7 }
 0x453   : > { %3137 = vst.msk [vmem:[#allocation3 + $0x2c0] sm:$0xff] %vm2648_vm0, %v3077_v36  ;;  %v3570_v12 = vpop.f32.mrb[20].mxu1 }
 0x454   : > { %5276 = vst.msk [vmem:[#allocation4 + $0x38] sm:$0xff] %vm5160_vm11, %v5123_v22  ;;  %5235 = vrot.lane.b32.xlu1 %v5138_v9, %s7308_s30  ;;  %v3571_v47 = vadd.f32 %v10188_v37, %v3570_v12  ;;  %v3572_v40 = vpop.f32.mrb[21].mxu1  ;;  %v7154_v37 = vpack.c.bf16 %v5440_v11, %v5439_v2 }
 0x455   : > { %5318 = vst.msk [vmem:[#allocation4 + $0x3f] sm:$0x1] %vm5266_vm10, %v11666_v5  ;;  %v2290_v50 = vpop.permute.xlu1 %2289  ;;  %v2793_v16 = vpop.permute.xlu0 %2792 }
 0x456   : > { %5355 = vst.msk [vmem:[#allocation4 + $0x20] sm:$0x7f] %vm5214_vm7, %v10538_v56  ;;  %5216 = vst.msk [vmem:[#allocation4 + $0x58] sm:$0x7f] %vm5214_vm7, %v10538_v56  ;;  %v3796_v26 = vadd.f32 %v9909_v44, %v3571_v47  ;;  %7155 = vmatprep.subr.bf16.mxu0 %v7154_v37  ;;  %v3976_v44 = vmul.f32 %v3944_v63, %v8826_v1  ;;  %v3945_v63 = vmin.f32 %v10511_v28, 0.0 }
 0x457   : > { %5154 = vst.msk [vmem:[#allocation4 + $0x50] sm:$0xfe] %vm5152_vm12, %v5138_v9  ;;  %5326 = vst.msk [vmem:[#allocation4 + $0x18] sm:$0xfe] %vm5152_vm12, %v5138_v9  ;;  %7157 = vmatpush3.bf16.msra.mxu0 %v7156_v60 }
 0x458   : > { %2353 = vst.msk [vmem:[#allocation3 + $0x2b8] sm:$0xff] %vm2325_vm2, %v2290_v50  ;;  %2859 = vst.msk [vmem:[#allocation3 + $0x2d8] sm:$0xff] %vm2325_vm2, %v2793_v16  ;;  %v3946_v3 = vmin.f32 %v3796_v26, 0.0  ;;  %v3914_v17 = vmax.f32 %v3796_v26, 0.0  ;;  %7159 = vmatprep.subr.bf16.mxu0 %v7158_v14  ;;  %v4008_v20 = vadd.f32 %v3976_v44, %v3912_v51 }
 0x459   : > { %5269 = vst.msk [vmem:[#allocation4 + $0x58] sm:$0x1] %vm5266_vm10, %v11666_v5  ;;  %v2459_v53 = vpop.permute.xlu1 %2458  ;;  %v3303_v62 = vld [vmem:[#allocation3 + $0x2a0] sm:$0xff]  ;;  %v2461_v8 = vpop.permute.xlu0 %2460 }
 0x45a   : > { %2543 = vst.msk [vmem:[#allocation3 + $0x2bf] sm:$0x1] %vm2528_vm4, %v11666_v5  ;;  %3659 = vmatmul.mubr.f32.gmra.mrb[56].mxu1 %v3303_v62  ;;  %v3307_v30 = vld [vmem:[#allocation3 + $0x2c0] sm:$0xff]  ;;  %v3978_v0 = vmul.f32 %v3946_v3, %v8826_v1  ;;  %v3977_v62 = vmul.f32 %v3945_v63, %v8826_v1  ;;  %v3913_v3 = vmax.f32 %v10511_v28, 0.0 }
 0x45b   : > { %3000 = vst.msk [vmem:[#allocation3 + $0x2d8] sm:$0xff] %vm2494_vm8, %v11666_v5  ;;  %3663 = vmatprep.mubr.f32.mxu1 %v3307_v30  ;;  %7161 = vmatpush3.bf16.msra.mxu0 %v7160_v38 }
 0x45c   : > { %3017 = vst.msk [vmem:[#allocation3 + $0x2d8] sm:$0x1] %vm2528_vm4, %v11666_v5  ;;  %v4010_v23 = vadd.f32 %v3978_v0, %v3914_v17  ;;  %v4009_v38 = vadd.f32 %v3977_v62, %v3913_v3 }
 0x45d   : > { %3138 = vst.msk [vmem:[#allocation3 + $0x2d8] sm:$0xff] %vm2648_vm0, %v11666_v5  ;;  %v2609_v55 = vpop.permute.xlu1 %2608  ;;  %v2795_v22 = vpop.permute.xlu0 %2794 }
 0x45e   : > { %2523 = vst.msk [vmem:[#allocation3 + $0x2b8] sm:$0x7f] %vm2496_vm13, %v2459_v53  ;;  %v4036_v36 = vmax.f32 %v4008_v20, %v4010_v23 }
 0x45f   : > { %2677 = vst.msk [vmem:[#allocation3 + $0x2b8] sm:$0xff] %vm2648_vm0, %v2609_v55  ;;  %v3575_v9 = vpop.f32.mrb[22].mxu1 }
 0x460   : > { %2860 = vst.msk [vmem:[#allocation3 + $0x2f0] sm:$0x7f] %vm2829_vm15, %v2795_v22  ;;  %v4106_v27 = vrot.slane %v4036_v36, %v10256_v4  ;;  %v4359_v19 = vcombine.high %v4036_v36, %v4036_v36  ;;  %v3576_v50 = vadd.f32 %v10610_v13, %v3575_v9  ;;  %v3577_v12 = vpop.f32.mrb[23].mxu1  ;;  %vm6156_vm15 = vcmask 257024  }
 0x461   : > { %3001 = vst.msk [vmem:[#allocation3 + $0x2f0] sm:$0xff] %vm2494_vm8, %v11666_v5  ;;  %v2292_v25 = vpop.permute.xlu1 %2291  ;;  %v2463_v59 = vpop.permute.xlu0 %2462 }
 0x462   : > { %3139 = vst.msk [vmem:[#allocation3 + $0x2f0] sm:$0xff] %vm2648_vm0, %v11666_v5  ;;  %v4107_v47 = vcombine.high %v4106_v27, %v4106_v27  ;;  %v4114_v16 = vrot.slane %v4106_v27, %v10256_v4  ;;  %v4366_v40 = vrot.slane %v4359_v19, %v10256_v4  ;;  %v3801_v2 = vadd.f32 %v9905_v24, %v3576_v50 }
 0x463   : > { %2354 = vst.msk [vmem:[#allocation3 + $0x2d0] sm:$0xff] %vm2325_vm2, %v2292_v25 }
 0x464   : > { %2524 = vst.msk [vmem:[#allocation3 + $0x2d0] sm:$0xff] %vm2494_vm8, %v2461_v8  ;;  %v3310_v11 = vld [vmem:[#allocation3 + $0x2d8] sm:$0xff]  ;;  %v4121_v15 = vrot.slane %v4107_v47, %v10256_v4  ;;  %v4269_v26 = vcombine.high %v4114_v16, %v4114_v16  ;;  %v4367_v60 = vcombine.high %v4366_v40, %v4366_v40  ;;  %v4374_v53 = vrot.slane %v4366_v40, %v10256_v4 }
 0x465   : > { %2696 = vst.msk [vmem:[#allocation3 + $0x2d0] sm:$0x1] %vm2680_vm3, %v11666_v5  ;;  %v2611_v37 = vpop.permute.xlu1 %2610  ;;  %v3947_v24 = vmin.f32 %v3801_v2, 0.0  ;;  %v3915_v8 = vmax.f32 %v3801_v2, 0.0  ;;  %vm5308_vm8 = vcmask 1047040  }
 0x466   : > { %v3306_v21 = vld [vmem:[#allocation3 + $0x2b8] sm:$0xff]  ;;  %4253 = vst.msk [vmem:[#allocation6 + $0x20] sm:$0x1] %vm4248_vm6, %v4114_v16  ;;  %4254 = vst.msk [vmem:[#allocation6 + $0x28] sm:$0x1] %vm4248_vm6, %v4121_v15  ;;  %v4270_v49 = vcombine.high %v4121_v15, %v4121_v15  ;;  %v4381_v10 = vrot.slane %v4367_v60, %v10256_v4  ;;  %v4533_v44 = vcombine.high %v4374_v53, %v4374_v53 }
 0x467   : > { %2678 = vst.msk [vmem:[#allocation3 + $0x2d0] sm:$0xfe] %vm2646_vm9, %v2611_v37  ;;  %3664 = vmatmul.mubr.f32.gmra.mrb[58].mxu1 %v3306_v21  ;;  %v3979_v30 = vmul.f32 %v3947_v24, %v8826_v1  ;;  %v5375_v37 = vld [vmem:[#allocation4 + $0x20] sm:$0xff]  ;;  %vm6171_vm9 = vcmask 519424  }
 0x468   : > { %3668 = vmatprep.mubr.f32.mxu1 %v3310_v11  ;;  %4301 = vst.msk [vmem:[#allocation6 + $0x21] sm:$0x1] %vm4248_vm6, %v4269_v26  ;;  %4517 = vst.msk [vmem:[#allocation6 + $0x22] sm:$0x1] %vm4248_vm6, %v4374_v53  ;;  %v4534_v32 = vcombine.high %v4381_v10, %v4381_v10 }
 0x469   : > { %v2294_v14 = vpop.permute.xlu1 %2293  ;;  %4302 = vst.msk [vmem:[#allocation6 + $0x29] sm:$0x1] %vm4248_vm6, %v4270_v49  ;;  %4518 = vst.msk [vmem:[#allocation6 + $0x2a] sm:$0x1] %vm4248_vm6, %v4381_v10  ;;  %v4011_v51 = vadd.f32 %v3979_v30, %v3915_v8  ;;  %v3313_v28 = vld [vmem:[#allocation3 + $0x2f0] sm:$0xff] }
 0x46a   : > { %4565 = vst.msk [vmem:[#allocation6 + $0x23] sm:$0x1] %vm4248_vm6, %v4533_v44  ;;  %4566 = vst.msk [vmem:[#allocation6 + $0x2b] sm:$0x1] %vm4248_vm6, %v4534_v32 }
 0x46b   : > { %2355 = vst.msk [vmem:[#allocation3 + $0x2e8] sm:$0xff] %vm2325_vm2, %v2294_v14  ;;  %v4037_v17 = vmax.f32 %v4009_v38, %v4011_v51  ;;  %v3580_v55 = vpop.f32.mrb[24].mxu1  ;;  %vm5257_vm2 = vcmask 1048065  }
 0x46c   : > { %2525 = vst.msk [vmem:[#allocation3 + $0x2e8] sm:$0x7f] %vm2496_vm13, %v2463_v59  ;;  %v3581_v23 = vadd.f32 %v10610_v13, %v3580_v55  ;;  %v3582_v22 = vpop.f32.mrb[25].mxu1 }
 0x46d   : > { %2544 = vst.msk [vmem:[#allocation3 + $0x2ef] sm:$0x1] %vm2528_vm4, %v11666_v5  ;;  %v2613_v0 = vpop.permute.xlu1 %2612  ;;  %v4635_v36 = vrot.slane %v4037_v17, %v10256_v4  ;;  %v4887_v25 = vcombine.high %v4037_v17, %v4037_v17 }
 0x46e   : > { %v3309_v20 = vld [vmem:[#allocation3 + $0x2d0] sm:$0xff]  ;;  %2679 = vst.msk [vmem:[#allocation3 + $0x2e8] sm:$0xff] %vm2648_vm0, %v2613_v0  ;;  %v3806_v9 = vadd.f32 %v9923_v34, %v3581_v23  ;;  %vm11729_vm0 = vmmov %vm11728_vm1 }
 0x46f   : > { %3669 = vmatmul.mubr.f32.gmra.mrb[60].mxu1 %v3309_v20  ;;  %v4636_v27 = vcombine.high %v4635_v36, %v4635_v36  ;;  %v4643_v19 = vrot.slane %v4635_v36, %v10256_v4  ;;  %v4894_v50 = vrot.slane %v4887_v25, %v10256_v4  ;;  %6291 = vst.msk [vmem:[#allocation5 + $0x2c] sm:$0xf] %vm6156_vm15, %v11666_v5  ;;  %6157 = vst.msk [vmem:[#allocation5] sm:$0xf] %vm6156_vm15, %v11666_v5 }
 0x470   : > { %3673 = vmatprep.mubr.f32.mxu1 %v3313_v28  ;;  %v3948_v3 = vmin.f32 %v3806_v9, 0.0  ;;  %v3916_v38 = vmax.f32 %v3806_v9, 0.0  ;;  %6295 = vst.msk [vmem:[#allocation5 + $0x2f] sm:$0x1] %vm11728_vm1, %v11666_v5  ;;  %vm11730_vm13 = vmmov %vm11729_vm0  ;;  %vm6195_vm1 = vcmask 781824  }
 0x471   : > { %v4650_v12 = vrot.slane %v4636_v27, %v10256_v4  ;;  %4781 = vst.msk [vmem:[#allocation6 + $0x24] sm:$0x1] %vm4248_vm6, %v4643_v19  ;;  %v4797_v63 = vcombine.high %v4643_v19, %v4643_v19  ;;  %v4895_v47 = vcombine.high %v4894_v50, %v4894_v50  ;;  %v4902_v16 = vrot.slane %v4894_v50, %v10256_v4 }
 0x472   : > { %v3980_v32 = vmul.f32 %v3948_v3, %v8826_v1  ;;  %6158 = vst.msk [vmem:[#allocation5] sm:$0x1] %vm11729_vm0, %v11666_v5 }
 0x473   : > { %4782 = vst.msk [vmem:[#allocation6 + $0x2c] sm:$0x1] %vm4248_vm6, %v4650_v12  ;;  %v4798_v40 = vcombine.high %v4650_v12, %v4650_v12  ;;  %4829 = vst.msk [vmem:[#allocation6 + $0x25] sm:$0x1] %vm4248_vm6, %v4797_v63  ;;  %v4909_v34 = vrot.slane %v4895_v47, %v10256_v4  ;;  %v5061_v2 = vcombine.high %v4902_v16, %v4902_v16 }
 0x474   : > { %5045 = vst.msk [vmem:[#allocation6 + $0x26] sm:$0x1] %vm4248_vm6, %v4902_v16  ;;  %v4012_v0 = vadd.f32 %v3980_v32, %v3916_v38 }
 0x475   : > { %v3312_v11 = vld [vmem:[#allocation3 + $0x2e8] sm:$0xff]  ;;  %4830 = vst.msk [vmem:[#allocation6 + $0x2d] sm:$0x1] %vm4248_vm6, %v4798_v40  ;;  %5046 = vst.msk [vmem:[#allocation6 + $0x2e] sm:$0x1] %vm4248_vm6, %v4909_v34  ;;  %v5062_v21 = vcombine.high %v4909_v34, %v4909_v34 }
 0x476   : > { %3674 = vmatmul.mubr.f32.gmra.mrb[62].mxu1 %v3312_v11  ;;  %5093 = vst.msk [vmem:[#allocation6 + $0x27] sm:$0x1] %vm4248_vm6, %v5061_v2 }
 0x477   : > { %7045 = vmatprep.mubr.msk.f32.mxu1 %vm5160_vm11, %v5375_v37  ;;  %5094 = vst.msk [vmem:[#allocation6 + $0x2f] sm:$0x1] %vm4248_vm6, %v5062_v21  ;;  %v3585_v15 = vpop.f32.mrb[26].mxu1 }
 0x478   : > { %v3586_v26 = vadd.f32 %v10610_v13, %v3585_v15  ;;  %v3587_v60 = vpop.f32.mrb[27].mxu1  ;;  %6175 = vst.msk [vmem:[#allocation5] sm:$0xf] %vm6171_vm9, %v11666_v5 }
 0x479   : > { %6196 = vst.msk [vmem:[#allocation5] sm:$0xf] %vm6195_vm1, %v11666_v5 }
 0x47a   : > { %v10659_v53 = vadd.f32 %v9919_v41, %v3586_v26  ;;  %6197 = vst.msk [vmem:[#allocation5 + $0x3] sm:$0x1] %vm2528_vm4, %v11666_v5 }
 0x47b   : > { %6220 = vst.msk [vmem:[#allocation5] sm:$0x1] %vm2680_vm3, %v11666_v5 }
 0x47c   : > { %v3949_v27 = vmin.f32 %v10659_v53, 0.0  ;;  %v3917_v15 = vmax.f32 %v10659_v53, 0.0 }
 0x47d   : > { %v5107_v62 = vld [vmem:[#allocation6 + $0x20] sm:$0xff] }
 0x47e   : > { %v5116_v24 = vld [vmem:[#allocation6 + $0x28] sm:$0xff]  ;;  %v3981_v34 = vmul.f32 %v3949_v27, %v8826_v1 }
 0x47f   : > { %v5124_v49 = vmax.f32 %v5107_v62, %v5116_v24 }
 0x480   : > { %v4013_v24 = vadd.f32 %v3981_v34, %v3917_v15 }
 0x481   : > { %v10661_v10 = vrot.slane %v5124_v49, 1  ;;  %5174 = vrot.lane.b32.xlu0 %v5124_v49, %s7308_s30  ;;  %5277 = vst.msk [vmem:[#allocation4 + $0x60] sm:$0xff] %vm5160_vm11, %v5124_v49  ;;  %v5139_v44 = vrot.slane %v5124_v49, 7 }
 0x482   : > { %5319 = vst.msk [vmem:[#allocation4 + $0x67] sm:$0x1] %vm5266_vm10, %v11666_v5 }
 0x483   : > { %5356 = vst.msk [vmem:[#allocation4 + $0x48] sm:$0x7f] %vm5214_vm7, %v10661_v10  ;;  %5217 = vst.msk [vmem:[#allocation4 + $0x80] sm:$0x7f] %vm5214_vm7, %v10661_v10  ;;  %5237 = vrot.lane.b32.xlu1 %v5139_v44, %s7308_s30  ;;  %v3590_v41 = vpop.f32.mrb[28].mxu1 }
 0x484   : > { %5155 = vst.msk [vmem:[#allocation4 + $0x78] sm:$0xfe] %vm5152_vm12, %v5139_v44  ;;  %5327 = vst.msk [vmem:[#allocation4 + $0x40] sm:$0xfe] %vm5152_vm12, %v5139_v44  ;;  %v3591_v8 = vadd.f32 %v10610_v13, %v3590_v41  ;;  %v3592_v30 = vpop.f32.mrb[29].mxu1 }
 0x485   : > { %5270 = vst.msk [vmem:[#allocation4 + $0x80] sm:$0x1] %vm5266_vm10, %v11666_v5  ;;  %v5371_v30 = vld [vmem:[#allocation4] sm:$0xff] }
 0x486   : > { %v3816_v14 = vadd.f32 %v9933_v57, %v3591_v8 }
 0x488   : > { %v3950_v59 = vmin.f32 %v3816_v14, 0.0  ;;  %v3918_v51 = vmax.f32 %v3816_v14, 0.0 }
 0x48a   : > { %v3982_v28 = vmul.f32 %v3950_v59, %v8826_v1  ;;  %v5380_v17 = vld [vmem:[#allocation4 + $0x48] sm:$0xff] }
 0x48b   : > { %7046 = vmatmul.mubr.msk.f32.vlgmr.msra.gmra.mrb[64].mxu1 %vm5160_vm11, %v5380_v17 }
 0x48c   : > { %v4014_v55 = vadd.f32 %v3982_v28, %v3918_v51 }
 0x48e   : > { %v4038_v20 = vmax.f32 %v4012_v0, %v4014_v55 }
 0x48f   : > { %v3595_v23 = vpop.f32.mrb[30].mxu1 }
 0x490   : > { %v4128_v22 = vrot.slane %v4038_v20, %v10256_v4  ;;  %v4382_v36 = vcombine.high %v4038_v20, %v4038_v20  ;;  %v3596_v25 = vadd.f32 %v10610_v13, %v3595_v23  ;;  %v3597_v57 = vpop.f32.mrb[31].mxu1 }
 0x492   : > { %v4129_v19 = vcombine.high %v4128_v22, %v4128_v22  ;;  %v4136_v9 = vrot.slane %v4128_v22, %v10256_v4  ;;  %v4389_v50 = vrot.slane %v4382_v36, %v10256_v4  ;;  %v3821_v12 = vadd.f32 %v9929_v46, %v3596_v25 }
 0x494   : > { %v4143_v63 = vrot.slane %v4129_v19, %v10256_v4  ;;  %4255 = vst.msk [vmem:[#allocation6 + $0x30] sm:$0x1] %vm4248_vm6, %v4136_v9  ;;  %v4271_v47 = vcombine.high %v4136_v9, %v4136_v9  ;;  %v4390_v16 = vcombine.high %v4389_v50, %v4389_v50  ;;  %v4397_v40 = vrot.slane %v4389_v50, %v10256_v4 }
 0x495   : > { %v3951_v2 = vmin.f32 %v3821_v12, 0.0  ;;  %v3919_v26 = vmax.f32 %v3821_v12, 0.0 }
 0x496   : > { %4256 = vst.msk [vmem:[#allocation6 + $0x38] sm:$0x1] %vm4248_vm6, %v4143_v63  ;;  %v4272_v37 = vcombine.high %v4143_v63, %v4143_v63  ;;  %4303 = vst.msk [vmem:[#allocation6 + $0x31] sm:$0x1] %vm4248_vm6, %v4271_v47  ;;  %v4404_v46 = vrot.slane %v4390_v16, %v10256_v4  ;;  %v4535_v21 = vcombine.high %v4397_v40, %v4397_v40 }
 0x497   : > { %4519 = vst.msk [vmem:[#allocation6 + $0x32] sm:$0x1] %vm4248_vm6, %v4397_v40  ;;  %v3983_v60 = vmul.f32 %v3951_v2, %v8826_v1 }
 0x498   : > { %v5234_v11 = vpop.permute.xlu0 %5233  ;;  %4304 = vst.msk [vmem:[#allocation6 + $0x39] sm:$0x1] %vm4248_vm6, %v4272_v37  ;;  %4520 = vst.msk [vmem:[#allocation6 + $0x3a] sm:$0x1] %vm4248_vm6, %v4404_v46  ;;  %v4536_v62 = vcombine.high %v4404_v46, %v4404_v46 }
 0x499   : > { %5258 = vst.msk [vmem:[#allocation4 + $0x8] sm:$0xfe] %vm5257_vm2, %v5234_v11  ;;  %v4015_v49 = vadd.f32 %v3983_v60, %v3919_v26 }
 0x49a   : > { %4567 = vst.msk [vmem:[#allocation6 + $0x33] sm:$0x1] %vm4248_vm6, %v4535_v21  ;;  %4568 = vst.msk [vmem:[#allocation6 + $0x3b] sm:$0x1] %vm4248_vm6, %v4536_v62 }
 0x49b   : > { %v4039_v41 = vmax.f32 %v4013_v24, %v4015_v49  ;;  %v3600_v3 = vpop.f32.mrb[32].mxu1 }
 0x49c   : > { %v5171_v44 = vpop.permute.xlu0 %5170  ;;  %v3601_v53 = vadd.f32 %v10610_v13, %v3600_v3  ;;  %v3602_v8 = vpop.f32.mrb[33].mxu1 }
 0x49d   : > { %5192 = vst.msk [vmem:[#allocation4 + $0x28] sm:$0xff] %vm5191_vm5, %v5171_v44  ;;  %v4657_v14 = vrot.slane %v4039_v41, %v10256_v4  ;;  %v4910_v32 = vcombine.high %v4039_v41, %v4039_v41 }
 0x49e   : > { %v3826_v38 = vadd.f32 %v9999_v52, %v3601_v53 }
 0x49f   : > { %v4658_v51 = vcombine.high %v4657_v14, %v4657_v14  ;;  %v4665_v28 = vrot.slane %v4657_v14, %v10256_v4  ;;  %v4917_v17 = vrot.slane %v4910_v32, %v10256_v4 }
 0x4a0   : > { %v5372_v59 = vld [vmem:[#allocation4 + $0x8] sm:$0xff]  ;;  %v3952_v40 = vmin.f32 %v3826_v38, 0.0  ;;  %v3920_v21 = vmax.f32 %v3826_v38, 0.0 }
 0x4a1   : > { %5578 = vmatprep.mubr.f32.mxu0 %v5372_v59  ;;  %v4672_v0 = vrot.slane %v4658_v51, %v10256_v4  ;;  %4783 = vst.msk [vmem:[#allocation6 + $0x34] sm:$0x1] %vm4248_vm6, %v4665_v28  ;;  %v4799_v55 = vcombine.high %v4665_v28, %v4665_v28  ;;  %v4918_v20 = vcombine.high %v4917_v17, %v4917_v17 }
 0x4a2   : > { %5579 = vmatmul.mubr.f32.vlgmr.msra.gmra.mrb[64].mxu0 %v5371_v30  ;;  %v4925_v23 = vrot.slane %v4917_v17, %v10256_v4  ;;  %v3984_v37 = vmul.f32 %v3952_v40, %v8826_v1 }
 0x4a3   : > { %4784 = vst.msk [vmem:[#allocation6 + $0x3c] sm:$0x1] %vm4248_vm6, %v4672_v0  ;;  %v4800_v22 = vcombine.high %v4672_v0, %v4672_v0  ;;  %4831 = vst.msk [vmem:[#allocation6 + $0x35] sm:$0x1] %vm4248_vm6, %v4799_v55  ;;  %v4932_v52 = vrot.slane %v4918_v20, %v10256_v4 }
 0x4a4   : > { %5047 = vst.msk [vmem:[#allocation6 + $0x36] sm:$0x1] %vm4248_vm6, %v4925_v23  ;;  %v5063_v36 = vcombine.high %v4925_v23, %v4925_v23  ;;  %v4016_v62 = vadd.f32 %v3984_v37, %v3920_v21  ;;  %v5376_v37 = vld [vmem:[#allocation4 + $0x28] sm:$0xff] }
 0x4a5   : > { %4832 = vst.msk [vmem:[#allocation6 + $0x3d] sm:$0x1] %vm4248_vm6, %v4800_v22  ;;  %5048 = vst.msk [vmem:[#allocation6 + $0x3e] sm:$0x1] %vm4248_vm6, %v4932_v52  ;;  %v5064_v25 = vcombine.high %v4932_v52, %v4932_v52 }
 0x4a6   : > { %5095 = vst.msk [vmem:[#allocation6 + $0x37] sm:$0x1] %vm4248_vm6, %v5063_v36 }
 0x4a7   : > { %5096 = vst.msk [vmem:[#allocation6 + $0x3f] sm:$0x1] %vm4248_vm6, %v5064_v25  ;;  %v3605_v57 = vpop.f32.mrb[34].mxu1 }
 0x4a8   : > { %v3606_v27 = vadd.f32 %v10610_v13, %v3605_v57  ;;  %v3607_v19 = vpop.f32.mrb[35].mxu1 }
 0x4aa   : > { %v10721_v9 = vadd.f32 %v9995_v18, %v3606_v27 }
 0x4ac   : > { %v3953_v8 = vmin.f32 %v10721_v9, 0.0  ;;  %v3921_v36 = vmax.f32 %v10721_v9, 0.0 }
 0x4ad   : > { %v5108_v50 = vld [vmem:[#allocation6 + $0x30] sm:$0xff] }
 0x4ae   : > { %v5117_v12 = vld [vmem:[#allocation6 + $0x38] sm:$0xff]  ;;  %v3985_v55 = vmul.f32 %v3953_v8, %v8826_v1 }
 0x4af   : > { %v5125_v63 = vmax.f32 %v5108_v50, %v5117_v12 }
 0x4b0   : > { %v4017_v19 = vadd.f32 %v3985_v55, %v3921_v36 }
 0x4b1   : > { %v10723_v47 = vrot.slane %v5125_v63, 1  ;;  %5176 = vrot.lane.b32.xlu0 %v5125_v63, %s7308_s30  ;;  %5278 = vst.msk [vmem:[#allocation4 + $0x88] sm:$0xff] %vm5160_vm11, %v5125_v63  ;;  %v5140_v16 = vrot.slane %v5125_v63, 7 }
 0x4b2   : > { %5320 = vst.msk [vmem:[#allocation4 + $0x8f] sm:$0x1] %vm5266_vm10, %v11666_v5 }
 0x4b3   : > { %5357 = vst.msk [vmem:[#allocation4 + $0x70] sm:$0x7f] %vm5214_vm7, %v10723_v47  ;;  %5218 = vst.msk [vmem:[#allocation4 + $0xa8] sm:$0x7f] %vm5214_vm7, %v10723_v47  ;;  %5239 = vrot.lane.b32.xlu1 %v5140_v16, %s7308_s30  ;;  %v3610_v18 = vpop.f32.mrb[36].mxu1 }
 0x4b4   : > { %5156 = vst.msk [vmem:[#allocation4 + $0xa0] sm:$0xfe] %vm5152_vm12, %v5140_v16  ;;  %5328 = vst.msk [vmem:[#allocation4 + $0x68] sm:$0xfe] %vm5152_vm12, %v5140_v16  ;;  %v3611_v34 = vadd.f32 %v10610_v13, %v3610_v18  ;;  %v3612_v2 = vpop.f32.mrb[37].mxu1 }
 0x4b5   : > { %5271 = vst.msk [vmem:[#allocation4 + $0xa8] sm:$0x1] %vm5266_vm10, %v11666_v5  ;;  %v10768_v2 = vpop.f32.mrb[62].mxu0 }
 0x4b6   : > { %v3836_v11 = vadd.f32 %v10051_v45, %v3611_v34 }
 0x4b8   : > { %v3954_v46 = vmin.f32 %v3836_v11, 0.0  ;;  %v3922_v15 = vmax.f32 %v3836_v11, 0.0 }
 0x4ba   : > { %v3986_v26 = vmul.f32 %v3954_v46, %v8826_v1  ;;  %v5385_v60 = vld [vmem:[#allocation4 + $0x70] sm:$0xff]  ;;  %v10771_v46 = vpop.f32.mrb[63].mxu0 }
 0x4bb   : > { %7048 = vmatprep.mubr.msk.f32.mxu1 %vm5160_vm11, %v5385_v60 }
 0x4bc   : > { %v4018_v24 = vadd.f32 %v3986_v26, %v3922_v15 }
 0x4be   : > { %v4040_v49 = vmax.f32 %v4016_v62, %v4018_v24 }
 0x4bf   : > { %v3615_v44 = vpop.f32.mrb[38].mxu1 }
 0x4c0   : > { %v4150_v41 = vrot.slane %v4040_v49, %v10256_v4  ;;  %v4405_v3 = vcombine.high %v4040_v49, %v4040_v49  ;;  %v3616_v53 = vadd.f32 %v10610_v13, %v3615_v44  ;;  %v3617_v45 = vpop.f32.mrb[39].mxu1 }
 0x4c2   : > { %v4151_v30 = vcombine.high %v4150_v41, %v4150_v41  ;;  %v4158_v14 = vrot.slane %v4150_v41, %v10256_v4  ;;  %v4412_v32 = vrot.slane %v4405_v3, %v10256_v4  ;;  %v3841_v59 = vadd.f32 %v10049_v39, %v3616_v53 }
 0x4c4   : > { %v5173_v38 = vpop.permute.xlu0 %5172  ;;  %v4165_v51 = vrot.slane %v4151_v30, %v10256_v4  ;;  %4257 = vst.msk [vmem:[#allocation6 + $0x40] sm:$0x1] %vm4248_vm6, %v4158_v14  ;;  %v4273_v28 = vcombine.high %v4158_v14, %v4158_v14  ;;  %v4413_v17 = vcombine.high %v4412_v32, %v4412_v32  ;;  %v4420_v0 = vrot.slane %v4412_v32, %v10256_v4 }
 0x4c5   : > { %5193 = vst.msk [vmem:[#allocation4 + $0x50] sm:$0xff] %vm5191_vm5, %v5173_v38  ;;  %5346 = vst.msk [vmem:[#allocation4 + $0x18] sm:$0xff] %vm5191_vm5, %v5173_v38  ;;  %v3955_v20 = vmin.f32 %v3841_v59, 0.0  ;;  %v3923_v25 = vmax.f32 %v3841_v59, 0.0 }
 0x4c6   : > { %v5236_v23 = vpop.permute.xlu1 %5235  ;;  %4258 = vst.msk [vmem:[#allocation6 + $0x48] sm:$0x1] %vm4248_vm6, %v4165_v51  ;;  %v4274_v39 = vcombine.high %v4165_v51, %v4165_v51  ;;  %4305 = vst.msk [vmem:[#allocation6 + $0x41] sm:$0x1] %vm4248_vm6, %v4273_v28  ;;  %v4427_v22 = vrot.slane %v4413_v17, %v10256_v4  ;;  %v4537_v52 = vcombine.high %v4420_v0, %v4420_v0 }
 0x4c7   : > { %4521 = vst.msk [vmem:[#allocation6 + $0x42] sm:$0x1] %vm4248_vm6, %v4420_v0  ;;  %v3987_v57 = vmul.f32 %v3955_v20, %v8826_v1 }
 0x4c8   : > { %5259 = vst.msk [vmem:[#allocation4 + $0x30] sm:$0xfe] %vm5257_vm2, %v5236_v23  ;;  %v4538_v27 = vcombine.high %v4427_v22, %v4427_v22 }
 0x4c9   : > { %4306 = vst.msk [vmem:[#allocation6 + $0x49] sm:$0x1] %vm4248_vm6, %v4274_v39  ;;  %4522 = vst.msk [vmem:[#allocation6 + $0x4a] sm:$0x1] %vm4248_vm6, %v4427_v22  ;;  %v4019_v50 = vadd.f32 %v3987_v57, %v3923_v25 }
 0x4ca   : > { %4569 = vst.msk [vmem:[#allocation6 + $0x43] sm:$0x1] %vm4248_vm6, %v4537_v52  ;;  %4570 = vst.msk [vmem:[#allocation6 + $0x4b] sm:$0x1] %vm4248_vm6, %v4538_v27 }
 0x4cb   : > { %v4041_v12 = vmax.f32 %v4017_v19, %v4019_v50  ;;  %v3620_v63 = vpop.f32.mrb[40].mxu1 }
 0x4cc   : > { %v3621_v16 = vadd.f32 %v10610_v13, %v3620_v63  ;;  %v3622_v18 = vpop.f32.mrb[41].mxu1 }
 0x4cd   : > { %v4679_v9 = vrot.slane %v4041_v12, %v10256_v4  ;;  %v4933_v40 = vcombine.high %v4041_v12, %v4041_v12 }
 0x4ce   : > { %v3846_v11 = vadd.f32 %v10127_v42, %v3621_v16 }
 0x4cf   : > { %v5377_v34 = vld [vmem:[#allocation4 + $0x30] sm:$0xff]  ;;  %v4680_v21 = vcombine.high %v4679_v9, %v4679_v9  ;;  %v4687_v15 = vrot.slane %v4679_v9, %v10256_v4  ;;  %v4940_v26 = vrot.slane %v4933_v40, %v10256_v4 }
 0x4d0   : > { %5583 = vmatprep.mubr.f32.mxu0 %v5377_v34  ;;  %v3956_v28 = vmin.f32 %v3846_v11, 0.0  ;;  %v3924_v39 = vmax.f32 %v3846_v11, 0.0 }
 0x4d1   : > { %5584 = vmatmul.mubr.f32.gmra.mrb[66].mxu0 %v5376_v37  ;;  %v4694_v60 = vrot.slane %v4680_v21, %v10256_v4  ;;  %4785 = vst.msk [vmem:[#allocation6 + $0x44] sm:$0x1] %vm4248_vm6, %v4687_v15  ;;  %v4801_v62 = vcombine.high %v4687_v15, %v4687_v15  ;;  %v4941_v24 = vcombine.high %v4940_v26, %v4940_v26 }
 0x4d2   : > { %v4948_v49 = vrot.slane %v4940_v26, %v10256_v4  ;;  %v3988_v20 = vmul.f32 %v3956_v28, %v8826_v1 }
 0x4d3   : > { %4786 = vst.msk [vmem:[#allocation6 + $0x4c] sm:$0x1] %vm4248_vm6, %v4694_v60  ;;  %v4802_v42 = vcombine.high %v4694_v60, %v4694_v60  ;;  %4833 = vst.msk [vmem:[#allocation6 + $0x45] sm:$0x1] %vm4248_vm6, %v4801_v62  ;;  %v4955_v44 = vrot.slane %v4941_v24, %v10256_v4 }
 0x4d4   : > { %5049 = vst.msk [vmem:[#allocation6 + $0x46] sm:$0x1] %vm4248_vm6, %v4948_v49  ;;  %v5065_v41 = vcombine.high %v4948_v49, %v4948_v49  ;;  %v4020_v25 = vadd.f32 %v3988_v20, %v3924_v39 }
 0x4d5   : > { %4834 = vst.msk [vmem:[#allocation6 + $0x4d] sm:$0x1] %vm4248_vm6, %v4802_v42  ;;  %5050 = vst.msk [vmem:[#allocation6 + $0x4e] sm:$0x1] %vm4248_vm6, %v4955_v44  ;;  %v5066_v3 = vcombine.high %v4955_v44, %v4955_v44 }
 0x4d6   : > { %5097 = vst.msk [vmem:[#allocation6 + $0x47] sm:$0x1] %vm4248_vm6, %v5065_v41 }
 0x4d7   : > { %5098 = vst.msk [vmem:[#allocation6 + $0x4f] sm:$0x1] %vm4248_vm6, %v5066_v3  ;;  %v3625_v53 = vpop.f32.mrb[42].mxu1 }
 0x4d8   : > { %v3626_v45 = vadd.f32 %v10610_v13, %v3625_v53  ;;  %v3627_v8 = vpop.f32.mrb[43].mxu1 }
 0x4da   : > { %v10788_v30 = vadd.f32 %v10125_v48, %v3626_v45 }
 0x4dc   : > { %v3957_v16 = vmin.f32 %v10788_v30, 0.0  ;;  %v3925_v44 = vmax.f32 %v10788_v30, 0.0 }
 0x4dd   : > { %v5109_v14 = vld [vmem:[#allocation6 + $0x40] sm:$0xff] }
 0x4de   : > { %v5118_v32 = vld [vmem:[#allocation6 + $0x48] sm:$0xff]  ;;  %v3989_v60 = vmul.f32 %v3957_v16, %v8826_v1 }
 0x4df   : > { %v5126_v59 = vmax.f32 %v5109_v14, %v5118_v32 }
 0x4e0   : > { %v4021_v45 = vadd.f32 %v3989_v60, %v3925_v44 }
 0x4e1   : > { %v10790_v38 = vrot.slane %v5126_v59, 1  ;;  %5178 = vrot.lane.b32.xlu0 %v5126_v59, %s7308_s30  ;;  %5279 = vst.msk [vmem:[#allocation4 + $0xb0] sm:$0xff] %vm5160_vm11, %v5126_v59  ;;  %v5141_v51 = vrot.slane %v5126_v59, 7 }
 0x4e2   : > { %5321 = vst.msk [vmem:[#allocation4 + $0xb7] sm:$0x1] %vm5266_vm10, %v11666_v5 }
 0x4e3   : > { %5358 = vst.msk [vmem:[#allocation4 + $0x98] sm:$0x7f] %vm5214_vm7, %v10790_v38  ;;  %5219 = vst.msk [vmem:[#allocation4 + $0xd0] sm:$0x7f] %vm5214_vm7, %v10790_v38  ;;  %5241 = vrot.lane.b32.xlu1 %v5141_v51, %s7308_s30 }
 0x4e4   : > { %5157 = vst.msk [vmem:[#allocation4 + $0xc8] sm:$0xfe] %vm5152_vm12, %v5141_v51  ;;  %5329 = vst.msk [vmem:[#allocation4 + $0x90] sm:$0xfe] %vm5152_vm12, %v5141_v51 }
 0x4e5   : > { %5272 = vst.msk [vmem:[#allocation4 + $0xd0] sm:$0x1] %vm5266_vm10, %v11666_v5 }
 0x4e6   : > { %v3630_v48 = vpop.f32.mrb[44].mxu1 }
 0x4e7   : > { %v3631_v17 = vadd.f32 %v10610_v13, %v3630_v48  ;;  %v3632_v0 = vpop.f32.mrb[45].mxu1 }
 0x4e8   : > { %v5381_v0 = vld [vmem:[#allocation4 + $0x50] sm:$0xff] }
 0x4e9   : > { %v3856_v55 = vadd.f32 %v10206_v6, %v3631_v17 }
 0x4ea   : > { %v5390_v36 = vld [vmem:[#allocation4 + $0x98] sm:$0xff] }
 0x4eb   : > { %v3958_v23 = vmin.f32 %v3856_v55, 0.0  ;;  %v3926_v22 = vmax.f32 %v3856_v55, 0.0  ;;  %7049 = vmatmul.mubr.msk.f32.gmra.mrb[66].mxu1 %vm5160_vm11, %v5390_v36 }
 0x4ed   : > { %v3990_v52 = vmul.f32 %v3958_v23, %v8826_v1 }
 0x4ef   : > { %v4022_v57 = vadd.f32 %v3990_v52, %v3926_v22  ;;  %v3635_v19 = vpop.f32.mrb[46].mxu1 }
 0x4f0   : > { %v3636_v63 = vadd.f32 %v10610_v13, %v3635_v19  ;;  %v3637_v6 = vpop.f32.mrb[47].mxu1 }
 0x4f1   : > { %v4042_v27 = vmax.f32 %v4020_v25, %v4022_v57 }
 0x4f2   : > { %v3861_v34 = vadd.f32 %v10204_v58, %v3636_v63 }
 0x4f3   : > { %v4172_v50 = vrot.slane %v4042_v27, %v10256_v4  ;;  %v4428_v12 = vcombine.high %v4042_v27, %v4042_v27  ;;  %v5175_v11 = vpop.permute.xlu0 %5174 }
 0x4f4   : > { %5194 = vst.msk [vmem:[#allocation4 + $0x78] sm:$0xff] %vm5191_vm5, %v5175_v11  ;;  %5347 = vst.msk [vmem:[#allocation4 + $0x40] sm:$0xff] %vm5191_vm5, %v5175_v11  ;;  %v3959_v62 = vmin.f32 %v3861_v34, 0.0  ;;  %v3927_v41 = vmax.f32 %v3861_v34, 0.0 }
 0x4f5   : > { %v4173_v18 = vcombine.high %v4172_v50, %v4172_v50  ;;  %v4180_v9 = vrot.slane %v4172_v50, %v10256_v4  ;;  %v4435_v40 = vrot.slane %v4428_v12, %v10256_v4  ;;  %v5238_v24 = vpop.permute.xlu1 %5237 }
 0x4f6   : > { %5260 = vst.msk [vmem:[#allocation4 + $0x58] sm:$0xfe] %vm5257_vm2, %v5238_v24  ;;  %v3991_v3 = vmul.f32 %v3959_v62, %v8826_v1 }
 0x4f7   : > { %v4187_v37 = vrot.slane %v4173_v18, %v10256_v4  ;;  %4259 = vst.msk [vmem:[#allocation6 + $0x50] sm:$0x1] %vm4248_vm6, %v4180_v9  ;;  %v4275_v21 = vcombine.high %v4180_v9, %v4180_v9  ;;  %v4436_v15 = vcombine.high %v4435_v40, %v4435_v40  ;;  %v4443_v26 = vrot.slane %v4435_v40, %v10256_v4 }
 0x4f8   : > { %v4023_v8 = vadd.f32 %v3991_v3, %v3927_v41 }
 0x4f9   : > { %4260 = vst.msk [vmem:[#allocation6 + $0x58] sm:$0x1] %vm4248_vm6, %v4187_v37  ;;  %v4276_v58 = vcombine.high %v4187_v37, %v4187_v37  ;;  %4307 = vst.msk [vmem:[#allocation6 + $0x51] sm:$0x1] %vm4248_vm6, %v4275_v21  ;;  %v4450_v49 = vrot.slane %v4436_v15, %v10256_v4  ;;  %v4539_v42 = vcombine.high %v4443_v26, %v4443_v26 }
 0x4fa   : > { %4523 = vst.msk [vmem:[#allocation6 + $0x52] sm:$0x1] %vm4248_vm6, %v4443_v26  ;;  %v4043_v14 = vmax.f32 %v4021_v45, %v4023_v8 }
 0x4fb   : > { %4308 = vst.msk [vmem:[#allocation6 + $0x59] sm:$0x1] %vm4248_vm6, %v4276_v58  ;;  %4524 = vst.msk [vmem:[#allocation6 + $0x5a] sm:$0x1] %vm4248_vm6, %v4450_v49  ;;  %v4540_v53 = vcombine.high %v4450_v49, %v4450_v49  ;;  %v3640_v32 = vpop.f32.mrb[48].mxu1 }
 0x4fc   : > { %4571 = vst.msk [vmem:[#allocation6 + $0x53] sm:$0x1] %vm4248_vm6, %v4539_v42  ;;  %v3641_v59 = vadd.f32 %v10610_v13, %v3640_v32  ;;  %v3642_v51 = vpop.f32.mrb[49].mxu1  ;;  %v4701_v30 = vrot.slane %v4043_v14, %v10256_v4  ;;  %v4956_v48 = vcombine.high %v4043_v14, %v4043_v14 }
 0x4fd   : > { %4572 = vst.msk [vmem:[#allocation6 + $0x5b] sm:$0x1] %vm4248_vm6, %v4540_v53  ;;  %v5382_v28 = vld [vmem:[#allocation4 + $0x58] sm:$0xff] }
 0x4fe   : > { %v3866_v17 = vadd.f32 %v10282_v61, %v3641_v59  ;;  %5588 = vmatprep.mubr.f32.mxu0 %v5382_v28  ;;  %v4702_v55 = vcombine.high %v4701_v30, %v4701_v30  ;;  %v4709_v20 = vrot.slane %v4701_v30, %v10256_v4  ;;  %v4963_v23 = vrot.slane %v4956_v48, %v10256_v4 }
 0x4ff   : > { %5589 = vmatmul.mubr.f32.gmra.mrb[68].mxu0 %v5381_v0 }
 0x500   : > { %v4716_v39 = vrot.slane %v4702_v55, %v10256_v4  ;;  %4787 = vst.msk [vmem:[#allocation6 + $0x54] sm:$0x1] %vm4248_vm6, %v4709_v20  ;;  %v4803_v22 = vcombine.high %v4709_v20, %v4709_v20  ;;  %v4964_v52 = vcombine.high %v4963_v23, %v4963_v23  ;;  %v4971_v36 = vrot.slane %v4963_v23, %v10256_v4 }
 0x501   : > { %v3960_v34 = vmin.f32 %v3866_v17, 0.0  ;;  %v3928_v60 = vmax.f32 %v3866_v17, 0.0 }
 0x502   : > { %4788 = vst.msk [vmem:[#allocation6 + $0x5c] sm:$0x1] %vm4248_vm6, %v4716_v39  ;;  %v4804_v25 = vcombine.high %v4716_v39, %v4716_v39  ;;  %4835 = vst.msk [vmem:[#allocation6 + $0x55] sm:$0x1] %vm4248_vm6, %v4803_v22  ;;  %v4978_v61 = vrot.slane %v4964_v52, %v10256_v4  ;;  %v5067_v57 = vcombine.high %v4971_v36, %v4971_v36 }
 0x503   : > { %5051 = vst.msk [vmem:[#allocation6 + $0x56] sm:$0x1] %vm4248_vm6, %v4971_v36  ;;  %v3992_v15 = vmul.f32 %v3960_v34, %v8826_v1 }
 0x504   : > { %4836 = vst.msk [vmem:[#allocation6 + $0x5d] sm:$0x1] %vm4248_vm6, %v4804_v25  ;;  %5052 = vst.msk [vmem:[#allocation6 + $0x5e] sm:$0x1] %vm4248_vm6, %v4978_v61  ;;  %v5068_v27 = vcombine.high %v4978_v61, %v4978_v61 }
 0x505   : > { %5099 = vst.msk [vmem:[#allocation6 + $0x57] sm:$0x1] %vm4248_vm6, %v5067_v57  ;;  %v4024_v49 = vadd.f32 %v3992_v15, %v3928_v60 }
 0x506   : > { %5100 = vst.msk [vmem:[#allocation6 + $0x5f] sm:$0x1] %vm4248_vm6, %v5068_v27 }
 0x509   : > { %v3645_v19 = vpop.f32.mrb[50].mxu1 }
 0x50a   : > { %v3646_v50 = vadd.f32 %v10610_v13, %v3645_v19  ;;  %v3647_v12 = vpop.f32.mrb[51].mxu1 }
 0x50c   : > { %v10851_v63 = vadd.f32 %v10280_v33, %v3646_v50  ;;  %v5110_v6 = vld [vmem:[#allocation6 + $0x50] sm:$0xff] }
 0x50d   : > { %v5119_v16 = vld [vmem:[#allocation6 + $0x58] sm:$0xff] }
 0x50e   : > { %v5127_v18 = vmax.f32 %v5110_v6, %v5119_v16  ;;  %v3961_v8 = vmin.f32 %v10851_v63, 0.0  ;;  %v3929_v52 = vmax.f32 %v10851_v63, 0.0 }
 0x510   : > { %v10853_v9 = vrot.slane %v5127_v18, 1  ;;  %5180 = vrot.lane.b32.xlu0 %v5127_v18, %s7308_s30  ;;  %5280 = vst.msk [vmem:[#allocation4 + $0xd8] sm:$0xff] %vm5160_vm11, %v5127_v18  ;;  %v5142_v40 = vrot.slane %v5127_v18, 7  ;;  %v3993_v55 = vmul.f32 %v3961_v8, %v8826_v1 }
 0x511   : > { %5322 = vst.msk [vmem:[#allocation4 + $0xdf] sm:$0x1] %vm5266_vm10, %v11666_v5 }
 0x512   : > { %5359 = vst.msk [vmem:[#allocation4 + $0xc0] sm:$0x7f] %vm5214_vm7, %v10853_v9  ;;  %5220 = vst.msk [vmem:[#allocation4 + $0xf8] sm:$0x7f] %vm5214_vm7, %v10853_v9  ;;  %5243 = vrot.lane.b32.xlu1 %v5142_v40, %s7308_s30  ;;  %v4025_v57 = vadd.f32 %v3993_v55, %v3929_v52  ;;  %v5444_v55 = vld [vmem:[%s11458_s6 + $0x108] sm:$0xff] }
 0x513   : > { %5158 = vst.msk [vmem:[#allocation4 + $0xf0] sm:$0xfe] %vm5152_vm12, %v5142_v40  ;;  %5330 = vst.msk [vmem:[#allocation4 + $0xb8] sm:$0xfe] %vm5152_vm12, %v5142_v40  ;;  %v3650_v33 = vpop.f32.mrb[52].mxu1 }
 0x514   : > { %5273 = vst.msk [vmem:[#allocation4 + $0xf8] sm:$0x1] %vm5266_vm10, %v11666_v5  ;;  %v3651_v11 = vadd.f32 %v10610_v13, %v3650_v33  ;;  %v3652_v37 = vpop.f32.mrb[53].mxu1  ;;  %v5386_v33 = vld [vmem:[#allocation4 + $0x78] sm:$0xff] }
 0x516   : > { %v3876_v21 = vadd.f32 %v10380_v54, %v3651_v11 }
 0x518   : > { %v3962_v26 = vmin.f32 %v3876_v21, 0.0  ;;  %v3930_v62 = vmax.f32 %v3876_v21, 0.0 }
 0x519   : > { %v5395_v58 = vld [vmem:[#allocation4 + $0xc0] sm:$0xff] }
 0x51a   : > { %v3994_v24 = vmul.f32 %v3962_v26, %v8826_v1  ;;  %7051 = vmatprep.mubr.msk.f32.mxu1 %vm5160_vm11, %v5395_v58 }
 0x51c   : > { %v4026_v42 = vadd.f32 %v3994_v24, %v3930_v62 }
 0x51e   : > { %v4044_v44 = vmax.f32 %v4024_v49, %v4026_v42 }
 0x520   : > { %v4194_v3 = vrot.slane %v4044_v44, %v10256_v4  ;;  %v4451_v53 = vcombine.high %v4044_v44, %v4044_v44 }
 0x521   : > { %v3655_v41 = vpop.f32.mrb[54].mxu1 }
 0x522   : > { %v3656_v45 = vadd.f32 %v10610_v13, %v3655_v41  ;;  %v3657_v54 = vpop.f32.mrb[55].mxu1  ;;  %v4195_v14 = vcombine.high %v4194_v3, %v4194_v3  ;;  %v4202_v32 = vrot.slane %v4194_v3, %v10256_v4  ;;  %v4458_v59 = vrot.slane %v4451_v53, %v10256_v4 }
 0x523   : > { %v5177_v30 = vpop.permute.xlu0 %5176 }
 0x524   : > { %v3881_v51 = vadd.f32 %v10376_v43, %v3656_v45  ;;  %v4209_v48 = vrot.slane %v4195_v14, %v10256_v4  ;;  %4261 = vst.msk [vmem:[#allocation6 + $0x60] sm:$0x1] %vm4248_vm6, %v4202_v32  ;;  %v4277_v28 = vcombine.high %v4202_v32, %v4202_v32  ;;  %v4459_v17 = vcombine.high %v4458_v59, %v4458_v59 }
 0x525   : > { %v4466_v0 = vrot.slane %v4458_v59, %v10256_v4  ;;  %5195 = vst.msk [vmem:[#allocation4 + $0xa0] sm:$0xff] %vm5191_vm5, %v5177_v30  ;;  %5348 = vst.msk [vmem:[#allocation4 + $0x68] sm:$0xff] %vm5191_vm5, %v5177_v30  ;;  %v5240_v23 = vpop.permute.xlu1 %5239 }
 0x526   : > { %v3963_v20 = vmin.f32 %v3881_v51, 0.0  ;;  %4262 = vst.msk [vmem:[#allocation6 + $0x68] sm:$0x1] %vm4248_vm6, %v4209_v48  ;;  %v4278_v43 = vcombine.high %v4209_v48, %v4209_v48  ;;  %4309 = vst.msk [vmem:[#allocation6 + $0x61] sm:$0x1] %vm4248_vm6, %v4277_v28  ;;  %v4473_v39 = vrot.slane %v4459_v17, %v10256_v4  ;;  %v3931_v36 = vmax.f32 %v3881_v51, 0.0 }
 0x527   : > { %4525 = vst.msk [vmem:[#allocation6 + $0x62] sm:$0x1] %vm4248_vm6, %v4466_v0  ;;  %v4541_v22 = vcombine.high %v4466_v0, %v4466_v0  ;;  %v5460_v48 = vld [vmem:[%s11458_s6 + $0x188] sm:$0xff]  ;;  %v5443_v28 = vld [vmem:[%s11458_s6 + $0x100] sm:$0xff] }
 0x528   : > { %5261 = vst.msk [vmem:[#allocation4 + $0x80] sm:$0xfe] %vm5257_vm2, %v5240_v23  ;;  %v3995_v25 = vmul.f32 %v3963_v20, %v8826_v1  ;;  %v4542_v61 = vcombine.high %v4473_v39, %v4473_v39  ;;  %v5461_v20 = vld [vmem:[%s11458_s6 + $0x190] sm:$0xff]  ;;  %v5462_v23 = vld [vmem:[%s11458_s6 + $0x198] sm:$0xff] }
 0x529   : > { %4310 = vst.msk [vmem:[#allocation6 + $0x69] sm:$0x1] %vm4248_vm6, %v4278_v43  ;;  %4526 = vst.msk [vmem:[#allocation6 + $0x6a] sm:$0x1] %vm4248_vm6, %v4473_v39  ;;  %v7166_v52 = vpack.c.bf16 %v5462_v23, %v5461_v20 }
 0x52a   : > { %4573 = vst.msk [vmem:[#allocation6 + $0x63] sm:$0x1] %vm4248_vm6, %v4541_v22  ;;  %v4027_v27 = vadd.f32 %v3995_v25, %v3931_v36  ;;  %4574 = vst.msk [vmem:[#allocation6 + $0x6b] sm:$0x1] %vm4248_vm6, %v4542_v61  ;;  %v7164_v22 = vpack.c.bf16 %v5444_v55, %v5443_v28  ;;  %v5446_v36 = vld [vmem:[%s11458_s6 + $0x118] sm:$0xff] }
 0x52b   : > { %v5450_v55 = vld [vmem:[%s11458_s6 + $0x138] sm:$0xff] }
 0x52c   : > { %v4045_v19 = vmax.f32 %v4025_v57, %v4027_v27  ;;  %v7285_v27 = vld [vmem:[%s11457_s5] ss:$0 sm:$0xff] }
 0x52d   : > { %v3660_v50 = vpop.f32.mrb[56].mxu1 }
 0x52e   : > { %v3661_v12 = vadd.f32 %v10610_v13, %v3660_v50  ;;  %v3662_v6 = vpop.f32.mrb[57].mxu1  ;;  %v4723_v63 = vrot.slane %v4045_v19, %v10256_v4  ;;  %v4979_v16 = vcombine.high %v4045_v19, %v4045_v19 }
 0x52f   : > { %v5387_v18 = vld [vmem:[#allocation4 + $0x80] sm:$0xff] }
 0x530   : > { %v10899_v40 = vadd.f32 %v10459_v35, %v3661_v12  ;;  %5593 = vmatprep.mubr.f32.mxu0 %v5387_v18  ;;  %v4724_v34 = vcombine.high %v4723_v63, %v4723_v63  ;;  %v4731_v11 = vrot.slane %v4723_v63, %v10256_v4  ;;  %v4986_v37 = vrot.slane %v4979_v16, %v10256_v4 }
 0x531   : > { %5594 = vmatmul.mubr.f32.gmra.mrb[70].mxu0 %v5386_v33 }
 0x532   : > { %v4738_v21 = vrot.slane %v4724_v34, %v10256_v4  ;;  %4789 = vst.msk [vmem:[#allocation6 + $0x64] sm:$0x1] %vm4248_vm6, %v4731_v11  ;;  %v4805_v15 = vcombine.high %v4731_v11, %v4731_v11  ;;  %v4987_v26 = vcombine.high %v4986_v37, %v4986_v37  ;;  %v4994_v60 = vrot.slane %v4986_v37, %v10256_v4 }
 0x533   : > { %v3964_v8 = vmin.f32 %v10899_v40, 0.0  ;;  %v3932_v17 = vmax.f32 %v10899_v40, 0.0 }
 0x534   : > { %4790 = vst.msk [vmem:[#allocation6 + $0x6c] sm:$0x1] %vm4248_vm6, %v4738_v21  ;;  %v4806_v35 = vcombine.high %v4738_v21, %v4738_v21  ;;  %4837 = vst.msk [vmem:[#allocation6 + $0x65] sm:$0x1] %vm4248_vm6, %v4805_v15  ;;  %v5001_v62 = vrot.slane %v4987_v26, %v10256_v4  ;;  %v5069_v24 = vcombine.high %v4994_v60, %v4994_v60 }
 0x535   : > { %5053 = vst.msk [vmem:[#allocation6 + $0x66] sm:$0x1] %vm4248_vm6, %v4994_v60 }
 0x536   : > { %4838 = vst.msk [vmem:[#allocation6 + $0x6d] sm:$0x1] %vm4248_vm6, %v4806_v35  ;;  %5054 = vst.msk [vmem:[#allocation6 + $0x6e] sm:$0x1] %vm4248_vm6, %v5001_v62  ;;  %v5070_v58 = vcombine.high %v5001_v62, %v5001_v62 }
 0x537   : > { %5101 = vst.msk [vmem:[#allocation6 + $0x67] sm:$0x1] %vm4248_vm6, %v5069_v24 }
 0x538   : > { %5102 = vst.msk [vmem:[#allocation6 + $0x6f] sm:$0x1] %vm4248_vm6, %v5070_v58 }
 0x53a   : > { %v3665_v49 = vpop.f32.mrb[58].mxu1 }
 0x53b   : > { %v3666_v42 = vadd.f32 %v10610_v13, %v3665_v49  ;;  %v3667_v44 = vpop.f32.mrb[59].mxu1 }
 0x53d   : > { %v10916_v41 = vadd.f32 %v10457_v29, %v3666_v42  ;;  %v3996_v29 = vmul.f32 %v3964_v8, %v8826_v1 }
 0x53e   : > { %v5111_v3 = vld [vmem:[#allocation6 + $0x60] sm:$0xff] }
 0x53f   : > { %v5120_v53 = vld [vmem:[#allocation6 + $0x68] sm:$0xff]  ;;  %v4028_v61 = vadd.f32 %v3996_v29, %v3932_v17  ;;  %v3965_v6 = vmin.f32 %v10916_v41, 0.0  ;;  %v3933_v15 = vmax.f32 %v10916_v41, 0.0  ;;  %v5463_v41 = vld [vmem:[%s11458_s6 + $0x1a0] sm:$0xff]  ;;  %v5465_v29 = vld [vmem:[%s11458_s6 + $0x1b0] sm:$0xff] }
 0x540   : > { %v5128_v54 = vmax.f32 %v5111_v3, %v5120_v53  ;;  %v5464_v3 = vld [vmem:[%s11458_s6 + $0x1a8] sm:$0xff]  ;;  %v5466_v17 = vld [vmem:[%s11458_s6 + $0x1b8] sm:$0xff] }
 0x541   : > { %v3997_v11 = vmul.f32 %v3965_v6, %v8826_v1  ;;  %v7174_v20 = vpack.c.bf16 %v5466_v17, %v5465_v29 }
 0x542   : > { %v3670_v45 = vpop.f32.mrb[60].mxu1  ;;  %v10920_v59 = vrot.slane %v5128_v54, 1  ;;  %5182 = vrot.lane.b32.xlu0 %v5128_v54, %s7308_s30  ;;  %5281 = vst.msk [vmem:[#allocation4 + $0x100] sm:$0xff] %vm5160_vm11, %v5128_v54  ;;  %v5143_v51 = vrot.slane %v5128_v54, 7  ;;  %v7170_v54 = vpack.c.bf16 %v5464_v3, %v5463_v41  ;;  %v5457_v41 = vld [vmem:[%s11458_s6 + $0x170] sm:$0xff]  ;;  %v5458_v3 = vld [vmem:[%s11458_s6 + $0x178] sm:$0xff] }
 0x543   : > { %v3671_v14 = vadd.f32 %v10610_v13, %v3670_v45  ;;  %v3672_v32 = vpop.f32.mrb[61].mxu1  ;;  %5323 = vst.msk [vmem:[#allocation4 + $0x107] sm:$0x1] %vm5266_vm10, %v11666_v5  ;;  %v4029_v58 = vadd.f32 %v3997_v11, %v3933_v15  ;;  %v5472_v15 = vld [vmem:[%s11458_s6 + $0x1e8] sm:$0xff] }
 0x544   : > { %5360 = vst.msk [vmem:[#allocation4 + $0xe8] sm:$0x7f] %vm5214_vm7, %v10920_v59  ;;  %5221 = vst.msk [vmem:[#allocation4 + $0x120] sm:$0x7f] %vm5214_vm7, %v10920_v59  ;;  %5245 = vrot.lane.b32.xlu1 %v5143_v51, %s7308_s30 }
 0x545   : > { %v3896_v30 = vadd.f32 %v10771_v46, %v3671_v14  ;;  %5159 = vst.msk [vmem:[#allocation4 + $0x118] sm:$0xfe] %vm5152_vm12, %v5143_v51  ;;  %5331 = vst.msk [vmem:[#allocation4 + $0xe0] sm:$0xfe] %vm5152_vm12, %v5143_v51  ;;  %v5459_v46 = vld [vmem:[%s11458_s6 + $0x180] sm:$0xff] }
 0x546   : > { %5274 = vst.msk [vmem:[#allocation4 + $0x120] sm:$0x1] %vm5266_vm10, %v11666_v5  ;;  %5286 = vrot.lane.b32.xlu0 %v10538_v56, %s7308_s30  ;;  %v7162_v0 = vpack.c.bf16 %v5460_v48, %v5459_v46  ;;  %v5445_v56 = vld [vmem:[%s11458_s6 + $0x110] sm:$0xff]  ;;  %v5447_v51 = vld [vmem:[%s11458_s6 + $0x120] sm:$0xff] }
 0x547   : > { %v3966_v13 = vmin.f32 %v3896_v30, 0.0  ;;  %v3934_v43 = vmax.f32 %v3896_v30, 0.0  ;;  %v7168_v12 = vpack.c.bf16 %v5446_v36, %v5445_v56  ;;  %v5448_v30 = vld [vmem:[%s11458_s6 + $0x128] sm:$0xff] }
 0x548   : > { %7163 = vmatprep.subr.bf16.mxu0 %v7162_v0  ;;  %v7172_v28 = vpack.c.bf16 %v5448_v30, %v5447_v51  ;;  %v5449_v0 = vld [vmem:[%s11458_s6 + $0x130] sm:$0xff] }
 0x549   : > { %v3998_v39 = vmul.f32 %v3966_v13, %v8826_v1  ;;  %v3675_v25 = vpop.f32.mrb[62].mxu1  ;;  %7165 = vmatpush3.bf16.msra.mxu0 %v7164_v22  ;;  %v7176_v23 = vpack.c.bf16 %v5450_v55, %v5449_v0 }
 0x54a   : > { %v3676_v19 = vadd.f32 %v7285_v27, %v3675_v25  ;;  %v3677_v50 = vpop.f32.mrb[63].mxu1  ;;  %5290 = vrot.lane.b32.xlu0 %v10723_v47, %s7308_s30  ;;  %7167 = vmatprep.subr.bf16.mxu0 %v7166_v52 }
 0x54b   : > { %v4030_v57 = vadd.f32 %v3998_v39, %v3934_v43  ;;  %v5400_v18 = vld [vmem:[#allocation4 + $0xe8] sm:$0xff]  ;;  %v5467_v43 = vld [vmem:[%s11458_s6 + $0x1c0] sm:$0xff] }
 0x54c   : > { %v3901_v16 = vadd.f32 %v10768_v2, %v3676_v19  ;;  %7052 = vmatmul.mubr.msk.f32.gmra.mrb[68].mxu1 %vm5160_vm11, %v5400_v18  ;;  %v5468_v39 = vld [vmem:[%s11458_s6 + $0x1c8] sm:$0xff] }
 0x54d   : > { %v4046_v63 = vmax.f32 %v4028_v61, %v4030_v57  ;;  %7169 = vmatpush3.bf16.msra.mxu0 %v7168_v12  ;;  %v7178_v25 = vpack.c.bf16 %v5468_v39, %v5467_v43  ;;  %v5451_v61 = vld [vmem:[%s11458_s6 + $0x140] sm:$0xff]  ;;  %v5452_v57 = vld [vmem:[%s11458_s6 + $0x148] sm:$0xff] }
 0x54e   : > { %v3967_v34 = vmin.f32 %v3901_v16, 0.0  ;;  %5294 = vrot.lane.b32.xlu0 %v10853_v9, %s7308_s30  ;;  %v3935_v26 = vmax.f32 %v3901_v16, 0.0  ;;  %7171 = vmatprep.subr.bf16.mxu0 %v7170_v54  ;;  %v7180_v16 = vpack.c.bf16 %v5452_v57, %v5451_v61  ;;  %v7192_v54 = vpack.c.bf16 %v5458_v3, %v5457_v41 }
 0x54f   : > { %v4216_v40 = vrot.slane %v4046_v63, %v10256_v4  ;;  %v4474_v33 = vcombine.high %v4046_v63, %v4046_v63  ;;  %v5391_v63 = vld [vmem:[#allocation4 + $0xa0] sm:$0xff] }
 0x550   : > { %v3999_v2 = vmul.f32 %v3967_v34, %v8826_v1  ;;  %v5453_v34 = vld [vmem:[%s11458_s6 + $0x150] sm:$0xff] }
 0x551   : > { %v4217_v37 = vcombine.high %v4216_v40, %v4216_v40  ;;  %v4224_v47 = vrot.slane %v4216_v40, %v10256_v4  ;;  %v4481_v21 = vrot.slane %v4474_v33, %v10256_v4  ;;  %7173 = vmatpush3.bf16.msra.mxu0 %v7172_v28  ;;  %v5469_v40 = vld [vmem:[%s11458_s6 + $0x1d0] sm:$0xff]  ;;  %v5470_v33 = vld [vmem:[%s11458_s6 + $0x1d8] sm:$0xff] }
 0x552   : > { %v4031_v9 = vadd.f32 %v3999_v2, %v3935_v26  ;;  %5296 = vrot.lane.b32.xlu0 %v10920_v59, %s7308_s30  ;;  %7175 = vmatprep.subr.bf16.mxu0 %v7174_v20  ;;  %v5471_v2 = vld [vmem:[%s11458_s6 + $0x1e0] sm:$0xff] }
 0x553   : > { %v4231_v60 = vrot.slane %v4217_v37, %v10256_v4  ;;  %4263 = vst.msk [vmem:[#allocation6 + $0x70] sm:$0x1] %vm4248_vm6, %v4224_v47  ;;  %v4279_v35 = vcombine.high %v4224_v47, %v4224_v47  ;;  %v4482_v62 = vcombine.high %v4481_v21, %v4481_v21  ;;  %v4489_v24 = vrot.slane %v4481_v21, %v10256_v4  ;;  %v5179_v45 = vpop.permute.xlu0 %5178  ;;  %v5454_v47 = vld [vmem:[%s11458_s6 + $0x158] sm:$0xff]  ;;  %v5455_v26 = vld [vmem:[%s11458_s6 + $0x160] sm:$0xff] }
 0x554   : > { %v4047_v53 = vmax.f32 %v4029_v58, %v4031_v9  ;;  %5196 = vst.msk [vmem:[#allocation4 + $0xc8] sm:$0xff] %vm5191_vm5, %v5179_v45  ;;  %5349 = vst.msk [vmem:[#allocation4 + $0x90] sm:$0xff] %vm5191_vm5, %v5179_v45  ;;  %v7182_v37 = vpack.c.bf16 %v5470_v33, %v5469_v40  ;;  %v7184_v21 = vpack.c.bf16 %v5454_v47, %v5453_v34  ;;  %v5473_v9 = vld [vmem:[%s11458_s6 + $0x1f0] sm:$0xff]  ;;  %v5384_v40 = vld [vmem:[#allocation4 + $0x68] sm:$0xff] }
 0x555   : > { %4264 = vst.msk [vmem:[#allocation6 + $0x78] sm:$0x1] %vm4248_vm6, %v4231_v60  ;;  %v4280_v49 = vcombine.high %v4231_v60, %v4231_v60  ;;  %4311 = vst.msk [vmem:[#allocation6 + $0x71] sm:$0x1] %vm4248_vm6, %v4279_v35  ;;  %v4496_v42 = vrot.slane %v4482_v62, %v10256_v4  ;;  %v4543_v44 = vcombine.high %v4489_v24, %v4489_v24  ;;  %v5242_v59 = vpop.permute.xlu1 %5241  ;;  %7177 = vmatpush3.bf16.msra.mxu0 %v7176_v23  ;;  %v5456_v35 = vld [vmem:[%s11458_s6 + $0x168] sm:$0xff] }
 0x556   : > { %4527 = vst.msk [vmem:[#allocation6 + $0x72] sm:$0x1] %vm4248_vm6, %v4489_v24  ;;  %v4745_v14 = vrot.slane %v4047_v53, %v10256_v4  ;;  %v5002_v32 = vcombine.high %v4047_v53, %v4047_v53  ;;  %7179 = vmatprep.subr.bf16.mxu0 %v7178_v25  ;;  %v7186_v60 = vpack.c.bf16 %v5472_v15, %v5471_v2 }
 0x557   : > { %4312 = vst.msk [vmem:[#allocation6 + $0x79] sm:$0x1] %vm4248_vm6, %v4280_v49  ;;  %4528 = vst.msk [vmem:[#allocation6 + $0x7a] sm:$0x1] %vm4248_vm6, %v4496_v42  ;;  %v4544_v8 = vcombine.high %v4496_v42, %v4496_v42  ;;  %v7188_v24 = vpack.c.bf16 %v5456_v35, %v5455_v26  ;;  %v5474_v49 = vld [vmem:[%s11458_s6 + $0x1f8] sm:$0xff]  ;;  %v5409_v35 = vld [vmem:[#allocation4 + $0x130] sm:$0xff] }
 0x558   : > { %4575 = vst.msk [vmem:[#allocation6 + $0x73] sm:$0x1] %vm4248_vm6, %v4543_v44  ;;  %v4746_v13 = vcombine.high %v4745_v14, %v4745_v14  ;;  %v4753_v46 = vrot.slane %v4745_v14, %v10256_v4  ;;  %v5009_v48 = vrot.slane %v5002_v32, %v10256_v4  ;;  %v7190_v44 = vpack.c.bf16 %v5474_v49, %v5473_v9 }
 0x559   : > { %4576 = vst.msk [vmem:[#allocation6 + $0x7b] sm:$0x1] %vm4248_vm6, %v4544_v8  ;;  %7181 = vmatpush3.bf16.msra.mxu0 %v7180_v16 }
 0x55a   : > { %5262 = vst.msk [vmem:[#allocation4 + $0xa8] sm:$0xfe] %vm5257_vm2, %v5242_v59  ;;  %v4760_v22 = vrot.slane %v4746_v13, %v10256_v4  ;;  %v4807_v52 = vcombine.high %v4753_v46, %v4753_v46  ;;  %v5010_v56 = vcombine.high %v5009_v48, %v5009_v48  ;;  %v5017_v36 = vrot.slane %v5009_v48, %v10256_v4 }
 0x55b   : > { %4791 = vst.msk [vmem:[#allocation6 + $0x74] sm:$0x1] %vm4248_vm6, %v4753_v46  ;;  %7183 = vmatprep.subr.bf16.mxu0 %v7182_v37  ;;  %v5396_v30 = vld [vmem:[#allocation4 + $0xc8] sm:$0xff]  ;;  %v5389_v37 = vld [vmem:[#allocation4 + $0x90] sm:$0xff] }
 0x55c   : > { %4792 = vst.msk [vmem:[#allocation6 + $0x7c] sm:$0x1] %vm4248_vm6, %v4760_v22  ;;  %v4808_v27 = vcombine.high %v4760_v22, %v4760_v22  ;;  %4839 = vst.msk [vmem:[#allocation6 + $0x75] sm:$0x1] %vm4248_vm6, %v4807_v52  ;;  %v5024_v19 = vrot.slane %v5010_v56, %v10256_v4  ;;  %v5071_v50 = vcombine.high %v5017_v36, %v5017_v36 }
 0x55d   : > { %5055 = vst.msk [vmem:[#allocation6 + $0x76] sm:$0x1] %vm4248_vm6, %v5017_v36  ;;  %7185 = vmatpush3.bf16.msra.mxu0 %v7184_v21 }
 0x55e   : > { %4840 = vst.msk [vmem:[#allocation6 + $0x7d] sm:$0x1] %vm4248_vm6, %v4808_v27  ;;  %5056 = vst.msk [vmem:[#allocation6 + $0x7e] sm:$0x1] %vm4248_vm6, %v5024_v19  ;;  %v5072_v12 = vcombine.high %v5024_v19, %v5024_v19  ;;  %v11046_v18 = vpop.f32.mrb[64].mxu1  ;;  %7187 = vmatprep.subr.bf16.mxu0 %v7186_v60  ;;  %v5374_v19 = vld [vmem:[#allocation4 + $0x18] sm:$0xff] }
 0x55f   : > { %5103 = vst.msk [vmem:[#allocation6 + $0x77] sm:$0x1] %vm4248_vm6, %v5071_v50  ;;  %v11058_v11 = vpop.f32.mrb[65].mxu1 }
 0x560   : > { %5104 = vst.msk [vmem:[#allocation6 + $0x7f] sm:$0x1] %vm4248_vm6, %v5072_v12  ;;  %vm11731_vm6 = vmmov %vm11729_vm0 }
 0x561   : > { %v5392_v6 = vld [vmem:[#allocation4 + $0xa8] sm:$0xff]  ;;  %7189 = vmatpush3.bf16.msra.mxu0 %v7188_v24 }
 0x562   : > { %5598 = vmatprep.mubr.f32.mxu0 %v5392_v6  ;;  %7191 = vmatprep.subr.bf16.mxu0 %v7190_v44  ;;  %v5379_v6 = vld [vmem:[#allocation4 + $0x40] sm:$0xff] }
 0x563   : > { %5599 = vmatmul.mubr.f32.gmra.mrb[72].mxu0 %v5391_v63 }
 0x565   : > { %7193 = vmatpush3.bf16.msra.mxu0 %v7192_v54 }
 0x566   : > { %v5112_v62 = vld [vmem:[#allocation6 + $0x70] sm:$0xff] }
 0x567   : > { %v5121_v58 = vld [vmem:[#allocation6 + $0x78] sm:$0xff] }
 0x568   : > { %v5129_v42 = vmax.f32 %v5112_v62, %v5121_v58 }
 0x56a   : > { %v5232_v53 = vrot.slane %v5129_v42, 7  ;;  %v5283_v45 = vrot.slane %v5129_v42, 1  ;;  %5282 = vst.msk [vmem:[#allocation4 + $0x128] sm:$0xff] %vm5160_vm11, %v5129_v42 }
 0x56b   : > { %5324 = vst.msk [vmem:[#allocation4 + $0x12f] sm:$0x1] %vm5266_vm10, %v11666_v5  ;;  %vm11735_vm10 = vmmov %vm11729_vm0 }
 0x56c   : > { %5361 = vst.msk [vmem:[#allocation4 + $0x110] sm:$0x7f] %vm5214_vm7, %v5283_v45  ;;  %5247 = vrot.lane.b32.xlu1 %v5232_v53, %s7308_s30  ;;  %vm11733_vm7 = vmmov %vm11729_vm0 }
 0x56d   : > { %5332 = vst.msk [vmem:[#allocation4 + $0x108] sm:$0xfe] %vm5152_vm12, %v5232_v53  ;;  %vm11734_vm12 = vmmov %vm11729_vm0 }
 0x570   : > { %5284 = vrot.lane.b32.xlu1 %v5200_v7, %s7308_s30  ;;  %v5410_v7 = vld [vmem:[#allocation4 + $0x138] sm:$0xff] }
 0x573   : > { %v5405_v8 = vld [vmem:[#allocation4 + $0x110] sm:$0xff] }
 0x574   : > { %7054 = vmatprep.mubr.msk.f32.mxu1 %vm5160_vm11, %v5405_v8  ;;  %5288 = vrot.lane.b32.xlu1 %v10661_v10, %s7308_s30 }
 0x575   : > { %v6781_v14 = vpop.f32.mrb[64].mxu0  ;;  %7055 = vmatmul.mubr.msk.f32.gmra.mrb[70].mxu1 %vm5160_vm11, %v5410_v7  ;;  %vm11732_vm11 = vmmov %vm11729_vm0 }
 0x576   : > { %v6782_v32 = vpop.f32.mrb[65].mxu0 }
 0x577   : > { %v11099_v59 = vadd.f32 %v6782_v32, %v6781_v14 }
 0x578   : > { %5292 = vrot.lane.b32.xlu1 %v10790_v38, %s7308_s30 }
 0x57c   : > { %5343 = vrot.lane.b32.xlu1 %v5129_v42, %s7308_s30 }
 0x580   : > { %5298 = vrot.lane.b32.xlu1 %v5283_v45, %s7308_s30 }
 0x582   : > { %v5181_v51 = vpop.permute.xlu0 %5180 }
 0x583   : > { %5197 = vst.msk [vmem:[#allocation4 + $0xf0] sm:$0xff] %vm5191_vm5, %v5181_v51  ;;  %5350 = vst.msk [vmem:[#allocation4 + $0xb8] sm:$0xff] %vm5191_vm5, %v5181_v51 }
 0x584   : > { %v5244_v31 = vpop.permute.xlu1 %5243 }
 0x585   : > { %5263 = vst.msk [vmem:[#allocation4 + $0xd0] sm:$0xfe] %vm5257_vm2, %v5244_v31 }
 0x58a   : > { %v5401_v20 = vld [vmem:[#allocation4 + $0xf0] sm:$0xff]  ;;  %v5394_v21 = vld [vmem:[#allocation4 + $0xb8] sm:$0xff] }
 0x58c   : > { %v5397_v10 = vld [vmem:[#allocation4 + $0xd0] sm:$0xff] }
 0x58d   : > { %5603 = vmatprep.mubr.f32.mxu0 %v5397_v10 }
 0x58e   : > { %5604 = vmatmul.mubr.f32.gmra.mrb[74].mxu0 %v5396_v30 }
 0x5a4   : > { %v6784_v38 = vpop.f32.mrb[66].mxu0 }
 0x5a5   : > { %v6785_v29 = vpop.f32.mrb[67].mxu0 }
 0x5a6   : > { %v11109_v13 = vadd.f32 %v6785_v29, %v6784_v38 }
 0x5b4   : > { %v5183_v46 = vpop.permute.xlu0 %5182 }
 0x5b5   : > { %5198 = vst.msk [vmem:[#allocation4 + $0x118] sm:$0xff] %vm5191_vm5, %v5183_v46  ;;  %5351 = vst.msk [vmem:[#allocation4 + $0xe0] sm:$0xff] %vm5191_vm5, %v5183_v46  ;;  %v11153_v46 = vld [vmem:[%s11459_s7] ss:$0 sm:$0xff] }
 0x5b6   : > { %v5246_v48 = vpop.permute.xlu1 %5245 }
 0x5b7   : > { %5264 = vst.msk [vmem:[#allocation4 + $0xf8] sm:$0xfe] %vm5257_vm2, %v5246_v48 }
 0x5b8   : > { %v5287_v28 = vpop.permute.xlu0 %5286 }
 0x5b9   : > { %5310 = vst.msk [vmem:[#allocation4 + $0x38] sm:$0x7f] %vm5308_vm8, %v5287_v28  ;;  %v5581_v28 = vadd.f32 %v11099_v59, %v11153_v46 }
 0x5bc   : > { %v5291_v17 = vpop.permute.xlu0 %5290  ;;  %v5406_v27 = vld [vmem:[#allocation4 + $0x118] sm:$0xff]  ;;  %v5399_v15 = vld [vmem:[#allocation4 + $0xe0] sm:$0xff] }
 0x5bd   : > { %5312 = vst.msk [vmem:[#allocation4 + $0x88] sm:$0x7f] %vm5308_vm8, %v5291_v17 }
 0x5be   : > { %v5402_v0 = vld [vmem:[#allocation4 + $0xf8] sm:$0xff]  ;;  %v11116_v55 = vpop.f32.mrb[66].mxu1 }
 0x5bf   : > { %5608 = vmatprep.mubr.f32.mxu0 %v5402_v0  ;;  %v11118_v43 = vpop.f32.mrb[67].mxu1 }
 0x5c0   : > { %v5295_v23 = vpop.permute.xlu0 %5294  ;;  %5609 = vmatmul.mubr.f32.gmra.mrb[76].mxu0 %v5401_v20  ;;  %v5378_v16 = vld [vmem:[#allocation4 + $0x38] sm:$0xff] }
 0x5c1   : > { %5314 = vst.msk [vmem:[#allocation4 + $0xd8] sm:$0x7f] %vm5308_vm8, %v5295_v23 }
 0x5c4   : > { %v5297_v39 = vpop.permute.xlu0 %5296  ;;  %v5388_v47 = vld [vmem:[#allocation4 + $0x88] sm:$0xff] }
 0x5c5   : > { %5315 = vst.msk [vmem:[#allocation4 + $0x100] sm:$0x7f] %vm5308_vm8, %v5297_v39  ;;  %v5586_v39 = vadd.f32 %v11109_v13, %v11153_v46 }
 0x5c8   : > { %v5398_v26 = vld [vmem:[#allocation4 + $0xd8] sm:$0xff] }
 0x5cc   : > { %v5403_v24 = vld [vmem:[#allocation4 + $0x100] sm:$0xff] }
 0x5d2   : > { %v6787_v22 = vpop.f32.mrb[68].mxu0 }
 0x5d3   : > { %v6788_v52 = vpop.f32.mrb[69].mxu0 }
 0x5d4   : > { %v11122_v56 = vadd.f32 %v6788_v52, %v6787_v22 }
 0x5de   : > { %v5248_v36 = vpop.permute.xlu1 %5247 }
 0x5df   : > { %5265 = vst.msk [vmem:[#allocation4 + $0x120] sm:$0xfe] %vm5257_vm2, %v5248_v36  ;;  %vm11737_vm2 = vmmov %vm11729_vm0 }
 0x5e2   : > { %v5285_v25 = vpop.permute.xlu1 %5284 }
 0x5e3   : > { %5309 = vst.msk [vmem:[#allocation4 + $0x10] sm:$0x7f] %vm5308_vm8, %v5285_v25 }
 0x5e6   : > { %v5289_v61 = vpop.permute.xlu1 %5288  ;;  %v5407_v57 = vld [vmem:[#allocation4 + $0x120] sm:$0xff] }
 0x5e7   : > { %5311 = vst.msk [vmem:[#allocation4 + $0x60] sm:$0x7f] %vm5308_vm8, %v5289_v61  ;;  %5613 = vmatprep.mubr.f32.mxu0 %v5407_v57 }
 0x5e8   : > { %5614 = vmatmul.mubr.f32.gmra.mrb[78].mxu0 %v5406_v27  ;;  %v5591_v27 = vadd.f32 %v11122_v56, %v11153_v46 }
 0x5e9   : > { %5683 = vmatprep.mubr.f32.mxu0 %v5374_v19 }
 0x5ea   : > { %v5293_v50 = vpop.permute.xlu1 %5292  ;;  %v5373_v12 = vld [vmem:[#allocation4 + $0x10] sm:$0xff] }
 0x5eb   : > { %5313 = vst.msk [vmem:[#allocation4 + $0xb0] sm:$0x7f] %vm5308_vm8, %v5293_v50 }
 0x5ec   : > { %5684 = vmatmul.mubr.f32.vlgmr.msra.gmra.mrb[80].mxu0 %v5373_v12 }
 0x5ed   : > { %5688 = vmatprep.mubr.f32.mxu0 %v5379_v6 }
 0x5ee   : > { %v5344_v63 = vpop.permute.xlu1 %5343  ;;  %v5383_v34 = vld [vmem:[#allocation4 + $0x60] sm:$0xff] }
 0x5ef   : > { %5352 = vst.msk [vmem:[#allocation4 + $0x108] sm:$0xff] %vm5191_vm5, %v5344_v63  ;;  %vm11736_vm5 = vmmov %vm11729_vm0 }
 0x5f0   : > { %5689 = vmatmul.mubr.f32.gmra.mrb[82].mxu0 %v5378_v16 }
 0x5f1   : > { %5693 = vmatprep.mubr.f32.mxu0 %v5384_v40 }
 0x5f2   : > { %v5299_v33 = vpop.permute.xlu1 %5298  ;;  %v5393_v2 = vld [vmem:[#allocation4 + $0xb0] sm:$0xff] }
 0x5f3   : > { %5316 = vst.msk [vmem:[#allocation4 + $0x128] sm:$0x7f] %vm5308_vm8, %v5299_v33  ;;  %vm11738_vm8 = vmmov %vm11729_vm0 }
 0x5f4   : > { %5694 = vmatmul.mubr.f32.gmra.mrb[84].mxu0 %v5383_v34 }
 0x5f5   : > { %5698 = vmatprep.mubr.f32.mxu0 %v5389_v37 }
 0x5f6   : > { %v5404_v60 = vld [vmem:[#allocation4 + $0x108] sm:$0xff] }
 0x5f8   : > { %5699 = vmatmul.mubr.f32.gmra.mrb[86].mxu0 %v5388_v47 }
 0x5f9   : > { %5703 = vmatprep.mubr.f32.mxu0 %v5394_v21 }
 0x5fa   : > { %v5408_v49 = vld [vmem:[#allocation4 + $0x128] sm:$0xff] }
 0x5fc   : > { %5704 = vmatmul.mubr.f32.gmra.mrb[88].mxu0 %v5393_v2 }
 0x5fd   : > { %5708 = vmatprep.mubr.f32.mxu0 %v5399_v15 }
 0x600   : > { %5709 = vmatmul.mubr.f32.gmra.mrb[90].mxu0 %v5398_v26 }
 0x601   : > { %5713 = vmatprep.mubr.f32.mxu0 %v5404_v60 }
 0x604   : > { %v6790_v62 = vpop.f32.mrb[70].mxu0  ;;  %5714 = vmatmul.mubr.f32.gmra.mrb[92].mxu0 %v5403_v24 }
 0x605   : > { %v6791_v58 = vpop.f32.mrb[71].mxu0  ;;  %5718 = vmatprep.mubr.f32.mxu0 %v5409_v35 }
 0x606   : > { %v6792_v9 = vadd.f32 %v6791_v58, %v6790_v62 }
 0x608   : > { %5719 = vmatmul.mubr.f32.gmra.mrb[94].mxu0 %v5408_v49  ;;  %v5596_v13 = vadd.f32 %v6792_v9, %v11153_v46 }
 0x61f   : > { %v11130_v42 = vpop.f32.mrb[68].mxu1 }
 0x620   : > { %v11132_v44 = vpop.f32.mrb[69].mxu1 }
 0x636   : > { %v6793_v41 = vpop.f32.mrb[72].mxu0 }
 0x637   : > { %v6794_v3 = vpop.f32.mrb[73].mxu0 }
 0x638   : > { %v6795_v53 = vadd.f32 %v6794_v3, %v6793_v41 }
 0x63a   : > { %v5601_v62 = vadd.f32 %v6795_v53, %v11153_v46 }
 0x648   : > { %v11134_v14 = vpop.f32.mrb[70].mxu1 }
 0x649   : > { %v11136_v32 = vpop.f32.mrb[71].mxu1 }
 0x661   : > { %v6796_v45 = vpop.f32.mrb[74].mxu0 }
 0x662   : > { %v6797_v54 = vpop.f32.mrb[75].mxu0 }
 0x663   : > { %v6798_v8 = vadd.f32 %v6797_v54, %v6796_v45 }
 0x665   : > { %v5606_v24 = vadd.f32 %v6798_v8, %v11153_v46 }
 0x693   : > { %v6799_v51 = vpop.f32.mrb[76].mxu0 }
 0x694   : > { %v6800_v31 = vpop.f32.mrb[77].mxu0 }
 0x695   : > { %v6801_v7 = vadd.f32 %v6800_v31, %v6799_v51 }
 0x6bb   : > { %v6802_v10 = vpop.f32.mrb[78].mxu0 }
 0x6bc   : > { %v6803_v30 = vpop.f32.mrb[79].mxu0 }
 0x6bd   : > { %v11148_v38 = vadd.f32 %v6803_v30, %v6802_v10 }
 0x6bf   : > { %v6837_v29 = vpop.f32.mrb[80].mxu0 }
 0x6c0   : > { %v6838_v48 = vpop.f32.mrb[81].mxu0 }
 0x6c1   : > { %v6839_v17 = vadd.f32 %v6838_v48, %v6837_v29 }
 0x6c3   : > { %v5686_v0 = vadd.f32 %v6839_v17, %v5581_v28  ;;  %v6840_v20 = vpop.f32.mrb[82].mxu0 }
 0x6c4   : > { %v6841_v23 = vpop.f32.mrb[83].mxu0 }
 0x6c5   : > { %v5791_v22 = vadd.f32 %v11058_v11, %v5686_v0  ;;  %v6842_v52 = vadd.f32 %v6841_v23, %v6840_v20 }
 0x6c7   : > { %v5837_v36 = vmin.f32 %v5791_v22, 0.0  ;;  %v5691_v25 = vadd.f32 %v6842_v52, %v5586_v39  ;;  %v6843_v61 = vpop.f32.mrb[84].mxu0  ;;  %v5829_v16 = vmax.f32 %v5791_v22, 0.0 }
 0x6c8   : > { %v6844_v57 = vpop.f32.mrb[85].mxu0 }
 0x6c9   : > { %v5796_v19 = vadd.f32 %v11046_v18, %v5691_v25  ;;  %v6845_v59 = vadd.f32 %v6844_v57, %v6843_v61  ;;  %v5845_v50 = vmul.f32 %v5837_v36, %v8826_v1 }
 0x6cb   : > { %v5838_v12 = vmin.f32 %v5796_v19, 0.0  ;;  %v5696_v6 = vadd.f32 %v6845_v59, %v5591_v27  ;;  %v6846_v63 = vpop.f32.mrb[86].mxu0  ;;  %v5830_v40 = vmax.f32 %v5796_v19, 0.0  ;;  %v5853_v47 = vadd.f32 %v5845_v50, %v5829_v16 }
 0x6cc   : > { %v6847_v11 = vpop.f32.mrb[87].mxu0 }
 0x6cd   : > { %v5846_v33 = vmul.f32 %v5838_v12, %v8826_v1  ;;  %v5801_v34 = vadd.f32 %v11118_v43, %v5696_v6  ;;  %v6848_v37 = vadd.f32 %v6847_v11, %v6846_v63  ;;  %v5611_v43 = vadd.f32 %v6801_v7, %v11153_v46 }
 0x6ce   : > { %v5616_v12 = vadd.f32 %v11148_v38, %v11153_v46 }
 0x6cf   : > { %v5854_v56 = vadd.f32 %v5846_v33, %v5830_v40  ;;  %v5701_v21 = vadd.f32 %v6848_v37, %v5596_v13  ;;  %v6849_v18 = vpop.f32.mrb[88].mxu0  ;;  %v5839_v2 = vmin.f32 %v5801_v34, 0.0  ;;  %v5831_v53 = vmax.f32 %v5801_v34, 0.0 }
 0x6d0   : > { %v6850_v15 = vpop.f32.mrb[89].mxu0 }
 0x6d1   : > { %v5861_v26 = vmax.f32 %v5853_v47, %v5854_v56  ;;  %v5806_v60 = vadd.f32 %v11116_v55, %v5701_v21  ;;  %v6851_v35 = vadd.f32 %v6850_v15, %v6849_v18  ;;  %v5847_v41 = vmul.f32 %v5839_v2, %v8826_v1 }
 0x6d3   : > { %v5875_v58 = vrot.slane %v5861_v26, %v10256_v4  ;;  %v5997_v9 = vcombine.high %v5861_v26, %v5861_v26  ;;  %v6852_v49 = vpop.f32.mrb[90].mxu0  ;;  %v5840_v3 = vmin.f32 %v5806_v60, 0.0  ;;  %v5706_v45 = vadd.f32 %v6851_v35, %v5601_v62  ;;  %v6320_v26 = vld [vmem:[%s11460_s8 + $0x80] sm:$0xff] }
 0x6d4   : > { %v6853_v54 = vpop.f32.mrb[91].mxu0  ;;  %v5832_v30 = vmax.f32 %v5806_v60, 0.0  ;;  %v5855_v20 = vadd.f32 %v5847_v41, %v5831_v53 }
 0x6d5   : > { %v5876_v51 = vcombine.high %v5875_v58, %v5875_v58  ;;  %v5883_v31 = vrot.slane %v5875_v58, %v10256_v4  ;;  %v6004_v55 = vrot.slane %v5997_v9, %v10256_v4  ;;  %v6854_v10 = vadd.f32 %v6853_v54, %v6852_v49  ;;  %v6304_v58 = vld [vmem:[%s11460_s8] sm:$0xff]  ;;  %v6305_v9 = vld [vmem:[%s11460_s8 + $0x8] sm:$0xff] }
 0x6d6   : > { %v5848_v8 = vmul.f32 %v5840_v3, %v8826_v1  ;;  %v5811_v29 = vadd.f32 %v11132_v44, %v5706_v45  ;;  %v7212_v53 = vpack.c.bf16 %v6305_v9, %v6304_v58 }
 0x6d7   : > { %v5890_v48 = vrot.slane %v5876_v51, %v10256_v4  ;;  %5965 = vst.msk [vmem:[#allocation7] sm:$0x1] %vm11730_vm13, %v5883_v31  ;;  %v5973_v7 = vcombine.high %v5883_v31, %v5883_v31  ;;  %v6005_v28 = vcombine.high %v6004_v55, %v6004_v55  ;;  %v6012_v17 = vrot.slane %v6004_v55, %v10256_v4  ;;  %v6855_v0 = vpop.f32.mrb[92].mxu0  ;;  %vm11739_vm13 = vmmov %vm11729_vm0 }
 0x6d8   : > { %v5856_v23 = vadd.f32 %v5848_v8, %v5832_v30  ;;  %v5841_v39 = vmin.f32 %v5811_v29, 0.0  ;;  %v5711_v22 = vadd.f32 %v6854_v10, %v5606_v24  ;;  %v6856_v52 = vpop.f32.mrb[93].mxu0  ;;  %v5833_v47 = vmax.f32 %v5811_v29, 0.0  ;;  %v6321_v24 = vld [vmem:[%s11460_s8 + $0x88] sm:$0xff]  ;;  %v6322_v30 = vld [vmem:[%s11460_s8 + $0x90] sm:$0xff]  ;;  %v6323_v8 = vld [vmem:[%s11460_s8 + $0x98] sm:$0xff] }
 0x6d9   : > { %5966 = vst.msk [vmem:[#allocation7 + $0x4] sm:$0x1] %vm11731_vm6, %v5890_v48  ;;  %v5974_v36 = vcombine.high %v5890_v48, %v5890_v48  ;;  %v6019_v44 = vrot.slane %v6005_v28, %v10256_v4  ;;  %v6105_v25 = vcombine.high %v6012_v17, %v6012_v17  ;;  %v6857_v61 = vadd.f32 %v6856_v52, %v6855_v0  ;;  %vm11740_vm6 = vmmov %vm11729_vm0  ;;  %v6307_v0 = vld [vmem:[%s11460_s8 + $0x18] sm:$0xff] }
 0x6da   : > { %5989 = vst.msk [vmem:[#allocation7 + $0x1] sm:$0x1] %vm11732_vm11, %v5973_v7  ;;  %v5862_v57 = vmax.f32 %v5855_v20, %v5856_v23  ;;  %v5816_v27 = vadd.f32 %v11130_v42, %v5711_v22  ;;  %v5849_v42 = vmul.f32 %v5841_v39, %v8826_v1  ;;  %vm11741_vm11 = vmmov %vm11729_vm0  ;;  %v7210_v10 = vpack.c.bf16 %v6321_v24, %v6320_v26 }
 0x6db   : > { %6097 = vst.msk [vmem:[#allocation7 + $0x2] sm:$0x1] %vm11733_vm7, %v6012_v17  ;;  %v6106_v19 = vcombine.high %v6019_v44, %v6019_v44  ;;  %v6858_v59 = vpop.f32.mrb[94].mxu0  ;;  %v5716_v50 = vadd.f32 %v6857_v61, %v5611_v43  ;;  %vm11742_vm7 = vmmov %vm11729_vm0  ;;  %v6306_v17 = vld [vmem:[%s11460_s8 + $0x10] sm:$0xff]  ;;  %v7214_v23 = vpack.c.bf16 %v6323_v8, %v6322_v30 }
 0x6dc   : > { %5990 = vst.msk [vmem:[#allocation7 + $0x5] sm:$0x1] %vm11734_vm12, %v5974_v36  ;;  %v5897_v6 = vrot.slane %v5862_v57, %v10256_v4  ;;  %v6020_v63 = vcombine.high %v5862_v57, %v5862_v57  ;;  %v6859_v13 = vpop.f32.mrb[95].mxu0  ;;  %v5842_v16 = vmin.f32 %v5816_v27, 0.0  ;;  %v5834_v38 = vmax.f32 %v5816_v27, 0.0  ;;  %vm11743_vm12 = vmmov %vm11729_vm0  ;;  %7211 = vmatprep.subr.bf16.mxu0 %v7210_v10  ;;  %v6312_v10 = vld [vmem:[%s11460_s8 + $0x40] sm:$0xff] }
 0x6dd   : > { %6098 = vst.msk [vmem:[#allocation7 + $0x6] sm:$0x1] %vm11735_vm10, %v6019_v44  ;;  %v6860_v11 = vadd.f32 %v6859_v13, %v6858_v59  ;;  %v11194_v40 = vadd.f32 %v11136_v32, %v5716_v50  ;;  %v5857_v60 = vadd.f32 %v5849_v42, %v5833_v47  ;;  %vm11744_vm10 = vmmov %vm11729_vm0  ;;  %7213 = vmatpush3.bf16.msra.mxu0 %v7212_v53  ;;  %v6324_v50 = vld [vmem:[%s11460_s8 + $0xa0] sm:$0xff]  ;;  %v6313_v53 = vld [vmem:[%s11460_s8 + $0x48] sm:$0xff] }
 0x6de   : > { %6121 = vst.msk [vmem:[#allocation7 + $0x3] sm:$0x1] %vm11736_vm5, %v6105_v25  ;;  %v5898_v33 = vcombine.high %v5897_v6, %v5897_v6  ;;  %v5905_v34 = vrot.slane %v5897_v6, %v10256_v4  ;;  %v6027_v37 = vrot.slane %v6020_v63, %v10256_v4  ;;  %v5850_v46 = vmul.f32 %v5842_v16, %v8826_v1  ;;  %v6308_v42 = vld [vmem:[%s11460_s8 + $0x20] sm:$0xff]  ;;  %v6309_v16 = vld [vmem:[%s11460_s8 + $0x28] sm:$0xff] }
 0x6df   : > { %6122 = vst.msk [vmem:[#allocation7 + $0x7] sm:$0x1] %vm11737_vm2, %v6106_v19  ;;  %v5721_v56 = vadd.f32 %v6860_v11, %v5616_v12  ;;  %v5843_v21 = vmin.f32 %v11194_v40, 0.0  ;;  %v5835_v20 = vmax.f32 %v11194_v40, 0.0  ;;  %vm6152_vm5 = vcmask 257025   ;;  %vm11745_vm2 = vmmov %vm11729_vm0  ;;  %7215 = vmatprep.subr.bf16.mxu0 %v7214_v23  ;;  %v6325_v12 = vld [vmem:[%s11460_s8 + $0xa8] sm:$0xff] }
 0x6e0   : > { %v5912_v18 = vrot.slane %v5898_v33, %v10256_v4  ;;  %5967 = vst.msk [vmem:[#allocation7 + $0x8] sm:$0x1] %vm11738_vm8, %v5905_v34  ;;  %v5975_v2 = vcombine.high %v5905_v34, %v5905_v34  ;;  %v6028_v15 = vcombine.high %v6027_v37, %v6027_v37  ;;  %v6035_v32 = vrot.slane %v6027_v37, %v10256_v4  ;;  %vm11746_vm8 = vmmov %vm11729_vm0 }
 0x6e1   : > { %v5858_v35 = vadd.f32 %v5850_v46, %v5834_v38  ;;  %v5826_v62 = vadd.f32 %v11134_v14, %v5721_v56  ;;  %v5851_v45 = vmul.f32 %v5843_v21, %v8826_v1  ;;  %v7216_v61 = vpack.c.bf16 %v6307_v0, %v6306_v17  ;;  %v6326_v21 = vld [vmem:[%s11460_s8 + $0xb0] sm:$0xff] }
 0x6e2   : > { %5968 = vst.msk [vmem:[#allocation7 + $0xc] sm:$0x1] %vm11729_vm0, %v5912_v18  ;;  %v5976_v49 = vcombine.high %v5912_v18, %v5912_v18  ;;  %v6042_v14 = vrot.slane %v6028_v15, %v10256_v4  ;;  %v6107_v43 = vcombine.high %v6035_v32, %v6035_v32  ;;  %v7218_v13 = vpack.c.bf16 %v6325_v12, %v6324_v50  ;;  %v6327_v18 = vld [vmem:[%s11460_s8 + $0xb8] sm:$0xff]  ;;  %v6314_v0 = vld [vmem:[%s11460_s8 + $0x50] sm:$0xff] }
 0x6e3   : > { %5991 = vst.msk [vmem:[#allocation7 + $0x9] sm:$0x1] %vm11739_vm13, %v5975_v2  ;;  %v5863_v41 = vmax.f32 %v5857_v60, %v5858_v35  ;;  %v5844_v3 = vmin.f32 %v5826_v62, 0.0  ;;  %v5836_v31 = vmax.f32 %v5826_v62, 0.0  ;;  %v5859_v36 = vadd.f32 %v5851_v45, %v5835_v20  ;;  %vm11747_vm13 = vmmov %vm11729_vm0  ;;  %7217 = vmatpush3.bf16.msra.mxu0 %v7216_v61  ;;  %v6310_v60 = vld [vmem:[%s11460_s8 + $0x30] sm:$0xff]  ;;  %v6311_v35 = vld [vmem:[%s11460_s8 + $0x38] sm:$0xff] }
 0x6e4   : > { %6099 = vst.msk [vmem:[#allocation7 + $0xa] sm:$0x1] %vm11740_vm6, %v6035_v32  ;;  %v6108_v51 = vcombine.high %v6042_v14, %v6042_v14  ;;  %vm11748_vm6 = vmmov %vm11729_vm0  ;;  %7219 = vmatprep.subr.bf16.mxu0 %v7218_v13  ;;  %v7220_v56 = vpack.c.bf16 %v6309_v16, %v6308_v42  ;;  %v7222_v62 = vpack.c.bf16 %v6327_v18, %v6326_v21  ;;  %v6329_v45 = vld [vmem:[%s11460_s8 + $0xc8] sm:$0xff]  ;;  %v6315_v20 = vld [vmem:[%s11460_s8 + $0x58] sm:$0xff] }
 0x6e5   : > { %v6129_v54 = vld [vmem:[#allocation7] sm:$0xf]  ;;  %5992 = vst.msk [vmem:[#allocation7 + $0xd] sm:$0x1] %vm11741_vm11, %v5976_v49  ;;  %v5919_v29 = vrot.slane %v5863_v41, %v10256_v4  ;;  %v6043_v48 = vcombine.high %v5863_v41, %v5863_v41  ;;  %v5852_v7 = vmul.f32 %v5844_v3, %v8826_v1  ;;  %vm11749_vm11 = vmmov %vm11729_vm0  ;;  %v7224_v41 = vpack.c.bf16 %v6311_v35, %v6310_v60  ;;  %v6328_v3 = vld [vmem:[%s11460_s8 + $0xc0] sm:$0xff] }
 0x6e6   : > { %6100 = vst.msk [vmem:[#allocation7 + $0xe] sm:$0x1] %vm11742_vm7, %v6042_v14  ;;  %v6134_v55 = vld [vmem:[#allocation7 + $0x4] sm:$0xf]  ;;  %vm11750_vm7 = vmmov %vm11729_vm0  ;;  %v6317_v61 = vld [vmem:[%s11460_s8 + $0x68] sm:$0xff] }
 0x6e7   : > { %6123 = vst.msk [vmem:[#allocation7 + $0xb] sm:$0x1] %vm11743_vm12, %v6107_v43  ;;  %v6138_v28 = vmax.f32 %v6129_v54, %v6134_v55  ;;  %v5920_v39 = vcombine.high %v5919_v29, %v5919_v29  ;;  %v5927_v22 = vrot.slane %v5919_v29, %v10256_v4  ;;  %v6050_v1 = vrot.slane %v6043_v48, %v10256_v4  ;;  %vm11751_vm12 = vmmov %vm11729_vm0  ;;  %v6330_v48 = vld [vmem:[%s11460_s8 + $0xd0] sm:$0xff]  ;;  %v6319_v16 = vld [vmem:[%s11460_s8 + $0x78] sm:$0xff] }
 0x6e8   : > { %6124 = vst.msk [vmem:[#allocation7 + $0xf] sm:$0x1] %vm11744_vm10, %v6108_v51  ;;  %v5860_v52 = vadd.f32 %v5852_v7, %v5836_v31  ;;  %vm11752_vm10 = vmmov %vm11729_vm0  ;;  %7221 = vmatpush3.bf16.msra.mxu0 %v7220_v56  ;;  %v7226_v55 = vpack.c.bf16 %v6329_v45, %v6328_v3  ;;  %v7228_v29 = vpack.c.bf16 %v6313_v53, %v6312_v10  ;;  %v6331_v7 = vld [vmem:[%s11460_s8 + $0xd8] sm:$0xff]  ;;  %v6334_v12 = vld [vmem:[%s11460_s8 + $0xf0] sm:$0xff] }
 0x6e9   : > { %6162 = vrot.lane.b32.xlu0 %v6138_v28, %s7307_s29  ;;  %6224 = vst.msk [vmem:[#allocation5 + $0x4] sm:$0xf] %vm6156_vm15, %v6138_v28  ;;  %v6176_v44 = vrot.slane %v6138_v28, 5  ;;  %v6145_v25 = vrot.slane %v6138_v28, 7  ;;  %v5934_v57 = vrot.slane %v5920_v39, %v10256_v4  ;;  %v5977_v27 = vcombine.high %v5927_v22, %v5927_v22  ;;  %7223 = vmatprep.subr.bf16.mxu0 %v7222_v62  ;;  %v6332_v39 = vld [vmem:[%s11460_s8 + $0xe0] sm:$0xff] }
 0x6ea   : > { %6247 = vst.msk [vmem:[#allocation5 + $0x7] sm:$0x1] %vm2861_vm14, %v11666_v5  ;;  %v6051_v19 = vcombine.high %v6050_v1, %v6050_v1  ;;  %v6058_v59 = vrot.slane %v6050_v1, %v10256_v4  ;;  %v5864_v6 = vmax.f32 %v5859_v36, %v5860_v52  ;;  %v7230_v17 = vpack.c.bf16 %v6331_v7, %v6330_v48  ;;  %v6672_v48 = vld [vmem:[#allocation9] ss:$0 sm:$0xff] }
 0x6eb   : > { %5969 = vst.msk [vmem:[#allocation7 + $0x10] sm:$0x1] %vm11745_vm2, %v5927_v22  ;;  %v6177_v63 = vrot.slane %v6176_v44, 4  ;;  %v5978_v11 = vcombine.high %v5934_v57, %v5934_v57  ;;  %vm6287_vm2 = vcmask 256000   ;;  %v6333_v22 = vld [vmem:[%s11460_s8 + $0xe8] sm:$0xff]  ;;  %v7232_v36 = vpack.c.bf16 %v6315_v20, %v6314_v0 }
 0x6ec   : > { %6153 = vst.msk [vmem:[#allocation5 + $0xc] sm:$0xe] %vm6152_vm5, %v6145_v25  ;;  %v6065_v40 = vrot.slane %v6051_v19, %v10256_v4  ;;  %v6109_v33 = vcombine.high %v6058_v59, %v6058_v59  ;;  %v5941_v34 = vrot.slane %v5864_v6, %v10256_v4  ;;  %v6066_v37 = vcombine.high %v5864_v6, %v5864_v6  ;;  %v6335_v6 = vld [vmem:[%s11460_s8 + $0xf8] sm:$0xff] }
 0x6ed   : > { %5970 = vst.msk [vmem:[#allocation7 + $0x14] sm:$0x1] %vm11746_vm8, %v5934_v57  ;;  %6203 = vrot.lane.b32.xlu0 %v6145_v25, %s7306_s28  ;;  %6230 = vrot.lane.b32.xlu1 %v6177_v63, %s7307_s29  ;;  %vm11753_vm8 = vmmov %vm11729_vm0  ;;  %v7234_v44 = vpack.c.bf16 %v6333_v22, %v6332_v39  ;;  %v6316_v25 = vld [vmem:[%s11460_s8 + $0x60] sm:$0xff]  ;;  %v7238_v42 = vpack.c.bf16 %v6335_v6, %v6334_v12 }
 0x6ee   : > { %5993 = vst.msk [vmem:[#allocation7 + $0x11] sm:$0x1] %vm11729_vm0, %v5977_v27  ;;  %v6130_v47 = vld [vmem:[#allocation7 + $0x8] sm:$0xf]  ;;  %v6110_v38 = vcombine.high %v6065_v40, %v6065_v40  ;;  %v5942_v2 = vcombine.high %v5941_v34, %v5941_v34  ;;  %v5949_v15 = vrot.slane %v5941_v34, %v10256_v4  ;;  %v6073_v32 = vrot.slane %v6066_v37, %v10256_v4  ;;  %v6336_v34 = vld [vmem:[%s11460_s8 + $0x100] sm:$0xff]  ;;  %v6337_v37 = vld [vmem:[%s11460_s8 + $0x108] sm:$0xff] }
 0x6ef   : > { %6101 = vst.msk [vmem:[#allocation7 + $0x12] sm:$0x1] %vm11747_vm13, %v6058_v59  ;;  %v6135_v46 = vld [vmem:[#allocation7 + $0xc] sm:$0xf]  ;;  %vm11754_vm13 = vmmov %vm11729_vm0  ;;  %7225 = vmatpush3.bf16.msra.mxu0 %v7224_v41  ;;  %v7236_v59 = vpack.c.bf16 %v6317_v61, %v6316_v25 }
 0x6f0   : > { %5994 = vst.msk [vmem:[#allocation7 + $0x15] sm:$0x1] %vm11748_vm6, %v5978_v11  ;;  %v6139_v26 = vmax.f32 %v6130_v47, %v6135_v46  ;;  %v5956_v24 = vrot.slane %v5942_v2, %v10256_v4  ;;  %v5979_v58 = vcombine.high %v5949_v15, %v5949_v15  ;;  %v6074_v9 = vcombine.high %v6073_v32, %v6073_v32  ;;  %vm11755_vm6 = vmmov %vm11729_vm0 }
 0x6f1   : > { %6102 = vst.msk [vmem:[#allocation7 + $0x16] sm:$0x1] %vm11749_vm11, %v6065_v40  ;;  %v6081_v49 = vrot.slane %v6073_v32, %v10256_v4  ;;  %6182 = vrot.lane.b32.xlu1 %v6177_v63, %s7308_s30  ;;  %vm11756_vm11 = vmmov %vm11729_vm0  ;;  %7227 = vmatprep.subr.bf16.mxu0 %v7226_v55  ;;  %v6318_v63 = vld [vmem:[%s11460_s8 + $0x70] sm:$0xff]  ;;  %v11383_v47 = vpack.c.bf16 %v6337_v37, %v6336_v34 }
 0x6f2   : > { %6125 = vst.msk [vmem:[#allocation7 + $0x13] sm:$0x1] %vm11750_vm7, %v6109_v33  ;;  %6270 = vrot.lane.b32.xlu0 %v6139_v26, %s7306_s28  ;;  %v6146_v14 = vrot.slane %v6139_v26, 7  ;;  %v6178_v43 = vrot.slane %v6139_v26, 5  ;;  %v5980_v54 = vcombine.high %v5956_v24, %v5956_v24  ;;  %v6088_v51 = vrot.slane %v6074_v9, %v10256_v4  ;;  %vm11757_vm7 = vmmov %vm11729_vm0 }
 0x6f3   : > { %6126 = vst.msk [vmem:[#allocation7 + $0x17] sm:$0x1] %vm11751_vm12, %v6110_v38  ;;  %v6111_v31 = vcombine.high %v6081_v49, %v6081_v49  ;;  %vm11758_vm12 = vmmov %vm11729_vm0  ;;  %7229 = vmatpush3.bf16.msra.mxu0 %v7228_v29  ;;  %v7240_v11 = vpack.c.bf16 %v6319_v16, %v6318_v63 }
 0x6f4   : > { %5971 = vst.msk [vmem:[#allocation7 + $0x18] sm:$0x1] %vm11752_vm10, %v5949_v15  ;;  %v6179_v30 = vrot.slane %v6178_v43, 4  ;;  %v6112_v4 = vcombine.high %v6088_v51, %v6088_v51  ;;  %7231 = vmatprep.subr.bf16.mxu0 %v7230_v17  ;;  %vm6260_vm10 = vcmask 781825  }
 0x6f5   : > { %6225 = vst.msk [vmem:[#allocation5 + $0x10] sm:$0xf] %vm6156_vm15, %v6139_v26  ;;  %6164 = vrot.lane.b32.xlu1 %v6139_v26, %s7307_s29 }
 0x6f6   : > { %6248 = vst.msk [vmem:[#allocation5 + $0x13] sm:$0x1] %vm2861_vm14, %v11666_v5  ;;  %6251 = vrot.lane.b32.xlu0 %v6146_v14, %s7308_s30 }
 0x6f7   : > { %5972 = vst.msk [vmem:[#allocation7 + $0x1c] sm:$0x1] %vm11753_vm8, %v5956_v24  ;;  %7233 = vmatpush3.bf16.msra.mxu0 %v7232_v36 }
 0x6f8   : > { %5995 = vst.msk [vmem:[#allocation7 + $0x19] sm:$0x1] %vm11729_vm0, %v5979_v58  ;;  %7235 = vmatprep.subr.bf16.mxu0 %v7234_v44 }
 0x6f9   : > { %6103 = vst.msk [vmem:[#allocation7 + $0x1a] sm:$0x1] %vm11754_vm13, %v6081_v49  ;;  %v6131_v8 = vld [vmem:[#allocation7 + $0x10] sm:$0xf]  ;;  %6205 = vrot.lane.b32.xlu1 %v6146_v14, %s7306_s28  ;;  %v6338_v49 = vld [vmem:[%s11460_s8 + $0x110] sm:$0xff] }
 0x6fa   : > { %6154 = vst.msk [vmem:[#allocation5 + $0x18] sm:$0xe] %vm6152_vm5, %v6146_v14  ;;  %v6136_v28 = vld [vmem:[#allocation7 + $0x14] sm:$0xf]  ;;  %6232 = vrot.lane.b32.xlu0 %v6179_v30, %s7307_s29  ;;  %v6339_v14 = vld [vmem:[%s11460_s8 + $0x118] sm:$0xff] }
 0x6fb   : > { %5996 = vst.msk [vmem:[#allocation7 + $0x1d] sm:$0x1] %vm11755_vm6, %v5980_v54  ;;  %v6140_v23 = vmax.f32 %v6131_v8, %v6136_v28  ;;  %7237 = vmatpush3.bf16.msra.mxu0 %v7236_v59  ;;  %v7246_v54 = vpack.c.bf16 %v6339_v14, %v6338_v49  ;;  %v6364_v28 = vcombine.low %v6672_v48, %v6672_v48 }
 0x6fc   : > { %6104 = vst.msk [vmem:[#allocation7 + $0x1e] sm:$0x1] %vm11756_vm11, %v6088_v51  ;;  %7239 = vmatprep.subr.bf16.mxu0 %v7238_v42 }
 0x6fd   : > { %6127 = vst.msk [vmem:[#allocation7 + $0x1b] sm:$0x1] %vm11757_vm7, %v6111_v31  ;;  %v6147_v1 = vrot.slane %v6140_v23, 7  ;;  %v6180_v52 = vrot.slane %v6140_v23, 5  ;;  %6272 = vrot.lane.b32.xlu1 %v6140_v23, %s7306_s28 }
 0x6fe   : > { %6288 = vst.msk [vmem:[#allocation5 + $0x8] sm:$0x7] %vm6287_vm2, %v6179_v30  ;;  %6184 = vrot.lane.b32.xlu0 %v6179_v30, %s7308_s30 }
 0x6ff   : > { %6128 = vst.msk [vmem:[#allocation7 + $0x1f] sm:$0x1] %vm11758_vm12, %v6112_v4  ;;  %v6181_v57 = vrot.slane %v6180_v52, 4  ;;  %7241 = vmatpush3.bf16.msra.mxu0 %v7240_v11 }
 0x700   : > { %6226 = vst.msk [vmem:[#allocation5 + $0x1c] sm:$0xf] %vm6156_vm15, %v6140_v23  ;;  %7243 = vmatprep.subr.bf16.mxu0 %v11383_v47 }
 0x701   : > { %6249 = vst.msk [vmem:[#allocation5 + $0x1f] sm:$0x1] %vm2861_vm14, %v11666_v5  ;;  %6253 = vrot.lane.b32.xlu1 %v6147_v1, %s7308_s30 }
 0x702   : > { %6155 = vst.msk [vmem:[#allocation5 + $0x24] sm:$0xe] %vm6152_vm5, %v6147_v1  ;;  %6166 = vrot.lane.b32.xlu0 %v6140_v23, %s7307_s29  ;;  %vm6191_vm5 = vcmask 780800  }
 0x703   : > { %6289 = vst.msk [vmem:[#allocation5 + $0x14] sm:$0x7] %vm6287_vm2, %v6181_v57 }
 0x704   : > { %v6132_v27 = vld [vmem:[#allocation7 + $0x18] sm:$0xf] }
 0x705   : > { %6207 = vrot.lane.b32.xlu1 %v6147_v1, %s7306_s28 }
 0x706   : > { %v6137_v19 = vld [vmem:[#allocation7 + $0x1c] sm:$0xf] }
 0x707   : > { %v6141_v50 = vmax.f32 %v6132_v27, %v6137_v19 }
 0x709   : > { %v6228_v13 = vrot.slane %v6141_v50, 5  ;;  %6227 = vst.msk [vmem:[#allocation5 + $0x28] sm:$0xf] %vm6156_vm15, %v6141_v50  ;;  %v6202_v33 = vrot.slane %v6141_v50, 7  ;;  %6234 = vrot.lane.b32.xlu1 %v6181_v57, %s7307_s29  ;;  %vm6242_vm15 = vcmask 518400  }
 0x70a   : > { %6250 = vst.msk [vmem:[#allocation5 + $0x2b] sm:$0x1] %vm2861_vm14, %v11666_v5  ;;  %vm6215_vm14 = vcmask 1044225   ;;  %v7281_v30 = vld [vmem:[#allocation5 + $0x8] ss:$12 sps:$4 sm:$0xff]  }
 0x70b   : > { %v6229_v40 = vrot.slane %v6228_v13, 4  ;;  %6255 = vrot.lane.b32.xlu0 %v6202_v33, %s7308_s30 }
 0x70d   : > { %6290 = vst.msk [vmem:[#allocation5 + $0x20] sm:$0x7] %vm6287_vm2, %v6229_v40  ;;  %6186 = vrot.lane.b32.xlu1 %v6181_v57, %s7308_s30  ;;  %vm6279_vm2 = vcmask 1044224  }
 0x70f   : > { %6236 = vrot.lane.b32.xlu0 %v6229_v40, %s7307_s29 }
 0x711   : > { %6274 = vrot.lane.b32.xlu1 %v6141_v50, %s7306_s28 }
 0x713   : > { %6209 = vrot.lane.b32.xlu0 %v6202_v33, %s7306_s28 }
 0x714   : > { %v7282_v4 = vld [vmem:[#allocation5 + $0x20] ss:$12 sps:$4 sm:$0xff]  }
 0x75b   : > { %v6163_v38 = vpop.permute.xlu0 %6162 }
 0x75c   : > { %6172 = vst.msk [vmem:[#allocation5 + $0xc] sm:$0xf] %vm6171_vm9, %v6163_v38 }
 0x75d   : > { %6198 = vst.msk [vmem:[#allocation5 + $0xf] sm:$0x1] %vm2528_vm4, %v11666_v5 }
 0x75f   : > { %v6204_v46 = vpop.permute.xlu0 %6203  ;;  %v6231_v56 = vpop.permute.xlu1 %6230 }
 0x760   : > { %6216 = vst.msk [vmem:[#allocation5] sm:$0xe] %vm6215_vm14, %v6204_v46 }
 0x761   : > { %6243 = vst.msk [vmem:[#allocation5 + $0x4] sm:$0x7] %vm6242_vm15, %v6231_v56 }
 0x762   : > { %6266 = vst.msk [vmem:[#allocation5 + $0x4] sm:$0x1] %vm2528_vm4, %v11666_v5 }
 0x763   : > { %v6183_v21 = vpop.permute.xlu1 %6182 }
 0x764   : > { %6192 = vst.msk [vmem:[#allocation5 + $0xc] sm:$0x7] %vm6191_vm5, %v6183_v21  ;;  %v6271_v18 = vpop.permute.xlu0 %6270 }
 0x765   : > { %6221 = vst.msk [vmem:[#allocation5 + $0xc] sm:$0x1] %vm2680_vm3, %v11666_v5 }
 0x767   : > { %v6165_v2 = vpop.permute.xlu1 %6164 }
 0x768   : > { %6173 = vst.msk [vmem:[#allocation5 + $0x18] sm:$0xf] %vm6171_vm9, %v6165_v2  ;;  %v6252_v15 = vpop.permute.xlu0 %6251 }
 0x769   : > { %6199 = vst.msk [vmem:[#allocation5 + $0x1b] sm:$0x1] %vm2528_vm4, %v11666_v5 }
 0x76a   : > { %6261 = vst.msk [vmem:[#allocation5 + $0x4] sm:$0xe] %vm6260_vm10, %v6252_v15 }
 0x76b   : > { %6280 = vst.msk [vmem:[#allocation5 + $0x4] sm:$0xf] %vm6279_vm2, %v6271_v18  ;;  %v6206_v32 = vpop.permute.xlu1 %6205 }
 0x76c   : > { %6217 = vst.msk [vmem:[#allocation5 + $0xc] sm:$0xe] %vm6215_vm14, %v6206_v32  ;;  %v6233_v26 = vpop.permute.xlu0 %6232 }
 0x76d   : > { %6244 = vst.msk [vmem:[#allocation5 + $0x10] sm:$0x7] %vm6242_vm15, %v6233_v26 }
 0x76e   : > { %6267 = vst.msk [vmem:[#allocation5 + $0x10] sm:$0x1] %vm2528_vm4, %v11666_v5 }
 0x76f   : > { %v6273_v60 = vpop.permute.xlu1 %6272 }
 0x770   : > { %v6185_v35 = vpop.permute.xlu0 %6184 }
 0x771   : > { %6193 = vst.msk [vmem:[#allocation5 + $0x18] sm:$0x7] %vm6191_vm5, %v6185_v35 }
 0x772   : > { %6222 = vst.msk [vmem:[#allocation5 + $0x18] sm:$0x1] %vm2680_vm3, %v11666_v5 }
 0x773   : > { %v6254_v62 = vpop.permute.xlu1 %6253  ;;  %v7275_v3 = vld [vmem:[#allocation5] ss:$12 sps:$4 sm:$0xff]  }
 0x774   : > { %6262 = vst.msk [vmem:[#allocation5 + $0x10] sm:$0xe] %vm6260_vm10, %v6254_v62  ;;  %v6167_v24 = vpop.permute.xlu0 %6166 }
 0x775   : > { %6281 = vst.msk [vmem:[#allocation5 + $0x10] sm:$0xf] %vm6279_vm2, %v6273_v60 }
 0x776   : > { %6174 = vst.msk [vmem:[#allocation5 + $0x24] sm:$0xf] %vm6171_vm9, %v6167_v24 }
 0x777   : > { %6200 = vst.msk [vmem:[#allocation5 + $0x27] sm:$0x1] %vm2528_vm4, %v11666_v5  ;;  %v6208_v58 = vpop.permute.xlu1 %6207 }
 0x778   : > { %6218 = vst.msk [vmem:[#allocation5 + $0x18] sm:$0xe] %vm6215_vm14, %v6208_v58 }
 0x77b   : > { %v6235_v43 = vpop.permute.xlu1 %6234 }
 0x77c   : > { %6245 = vst.msk [vmem:[#allocation5 + $0x1c] sm:$0x7] %vm6242_vm15, %v6235_v43  ;;  %v7277_v45 = vld [vmem:[#allocation5 + $0x4] ss:$12 sps:$4 sm:$0xff]  }
 0x77d   : > { %v6256_v9 = vpop.permute.xlu0 %6255  ;;  %6268 = vst.msk [vmem:[#allocation5 + $0x1c] sm:$0x1] %vm2528_vm4, %v11666_v5  ;;  %6434 = vmatprep.mubr.f32.mxu0 %v7277_v45 }
 0x77e   : > { %6263 = vst.msk [vmem:[#allocation5 + $0x1c] sm:$0xe] %vm6260_vm10, %v6256_v9  ;;  %6435 = vmatmul.mubr.f32.vlgmr.msra.gmra.mrb[96].mxu0 %v7275_v3 }
 0x77f   : > { %v6187_v51 = vpop.permute.xlu1 %6186  ;;  %7245 = vmatpush3.bf16.msra.mxu0 %v11383_v47 }
 0x780   : > { %6194 = vst.msk [vmem:[#allocation5 + $0x24] sm:$0x7] %vm6191_vm5, %v6187_v51  ;;  %7247 = vmatprep.subr.bf16.mxu0 %v7246_v54 }
 0x781   : > { %v6237_v41 = vpop.permute.xlu0 %6236  ;;  %6223 = vst.msk [vmem:[#allocation5 + $0x24] sm:$0x1] %vm2680_vm3, %v11666_v5  ;;  %vm6526_vm3 = vcmask 3072  }
 0x782   : > { %6246 = vst.msk [vmem:[#allocation5 + $0x28] sm:$0x7] %vm6242_vm15, %v6237_v41 }
 0x783   : > { %6265 = vst.msk [vmem:[#allocation5 + $0x28] sm:$0xf] %vm6195_vm1, %v11666_v5  ;;  %v6275_v55 = vpop.permute.xlu1 %6274  ;;  %7249 = vmatpush3.bf16.msra.mxu0 %v7246_v54 }
 0x784   : > { %6269 = vst.msk [vmem:[#allocation5 + $0x28] sm:$0x1] %vm2528_vm4, %v11666_v5  ;;  %vm11759_vm4 = vcmask 261120  }
 0x785   : > { %6283 = vst.msk [vmem:[#allocation5 + $0x28] sm:$0xf] %vm6279_vm2, %v11666_v5  ;;  %v6210_v31 = vpop.permute.xlu0 %6209  ;;  %6282 = vst.msk [vmem:[#allocation5 + $0x1c] sm:$0xf] %vm6279_vm2, %v6275_v55 }
 0x786   : > { %6219 = vst.msk [vmem:[#allocation5 + $0x24] sm:$0xe] %vm6215_vm14, %v6210_v31  ;;  %vm11760_vm9 = vmmov %vm11759_vm4 }
 0x78c   : > { %v7278_v10 = vld [vmem:[#allocation5 + $0x1c] ss:$12 sps:$4 sm:$0xff]  }
 0x78d   : > { %v7280_v53 = vld [vmem:[#allocation5 + $0x18] ss:$12 sps:$4 sm:$0xff]   ;;  %6439 = vmatprep.mubr.f32.mxu0 %v7278_v10 }
 0x78e   : > { %6440 = vmatmul.mubr.f32.gmra.mrb[98].mxu0 %v7280_v53 }
 0x78f   : > { %7065 = vmatprep.mubr.msk.f32.mxu0 %vm11759_vm4, %v7281_v30 }
 0x792   : > { %7066 = vmatmul.mubr.msk.f32.vlgmr.msra.gmra.mrb[100].mxu0 %vm11760_vm9, %v7282_v4 }
 0x851   : > { %v6909_v8 = vpop.f32.mrb[96].mxu0 }
 0x852   : > { %v6910_v5 = vpop.f32.mrb[97].mxu0 }
 0x853   : > { %v6911_v29 = vadd.f32 %v6910_v5, %v6909_v8 }
 0x855   : > { %v6437_v39 = vadd.f32 %v6911_v29, %v6364_v28 }
 0x861   : > { %v6912_v7 = vpop.f32.mrb[98].mxu0 }
 0x862   : > { %v6913_v17 = vpop.f32.mrb[99].mxu0 }
 0x863   : > { %v6914_v0 = vadd.f32 %v6913_v17, %v6912_v7 }
 0x865   : > { %v6442_v20 = vadd.f32 %v6914_v0, %v6364_v28  ;;  %v7067_v23 = vpop.f32.mrb[100].mxu0 }
 0x866   : > { %v6511_v22 = vpop.f32.mrb[101].mxu0 }
 0x867   : > { %v6517_v1 = vadd.f32 %v7067_v23, %v6442_v20  ;;  %v6512_v52 = vadd.f32 %v6511_v22, %v6437_v39 }
 0x869   : > { %v6523_v36 = vcombine.high %v6517_v1, %v6517_v1  ;;  %6529 = vst.msk [vmem:[%s363_s19 + $0x8] sm:$0xf] %vm6526_vm3, %v6517_v1  ;;  %v6522_v44 = vcombine.high %v6512_v52, %v6512_v52  ;;  %6527 = vst.msk [vmem:[%s363_s19] sm:$0xf] %vm6526_vm3, %v6512_v52 }
 0x86b   : > { %6530 = vst.msk [vmem:[%s363_s19 + $0xc] sm:$0xf] %vm6526_vm3, %v6523_v36  ;;  %6528 = vst.msk [vmem:[%s363_s19 + $0x4] sm:$0xf] %vm6526_vm3, %v6522_v44 }
 0x86c PF: > { %s24_s17 = sadd.s32 1, %s7292_s17  }
 0x86d   : > { %p21_p4 = scmp.ge.s32.totalorder %s24_s17, 4  }
 0x86f   :  { %23 = sbr.rel (!%p21_p4) target bundleno = 3 (0x3), region = 100 }

</bundles_post_ra>
